<compile_context>
chip_gen: v7x
topology: tpu7x:2x2x1
jax: 0.10.0
libtpu: 0.0.40
codegen_flags: <defaults>
</compile_context>

<pallas_src>
import jax
import jax.numpy as jnp
import numpy as np
from jax.experimental import pallas as pl
from jax.experimental.pallas import tpu as pltpu


def _relu(x):
    return jnp.maximum(x, 0.0)


def mask_kernel(x_ref,
                w1_ref, b1_ref,
                w2_ref, b2_ref,
                w3_ref, b3_ref,
                wag_ref, wap_ref, ba_ref,
                wc_ref, bc_ref,
                wd_ref, bd_ref,
                out_ref):
    """MASK forward for one (Bt, dim, N) block, batch packed along lanes."""
    bt, dim, n = x_ref.shape
    cdt = w2_ref.dtype                     # bf16 compute dtype for big matmuls

    # Hoisted weight / bias loads: one VMEM load (+ broadcast) each.
    w1, b1 = w1_ref[...], b1_ref[...]
    w2, b2 = w2_ref[...], b2_ref[...]
    w3, b3 = w3_ref[...], b3_ref[...]
    wag, wap, ba = wag_ref[...], wap_ref[...], ba_ref[...]
    wc, bc = wc_ref[...], bc_ref[...]
    wd, bd = wd_ref[...], bd_ref[...]

    # Pack the batch into the lane axis: (Bt, dim, N) -> (dim, Bt*N).
    xp = jnp.concatenate([x_ref[b] for b in range(bt)], axis=1)

    # conv1 + bn1 + relu: K = dim = 3 is far too shallow for the MXU ->
    # three f32 VPU FMAs (VALU slot is otherwise idle here).
    acc = b1                                                  # (64, 1) f32
    for k in range(dim):
        acc = acc + w1[:, k:k + 1] * xp[k:k + 1, :]
    h1 = _relu(acc)                                           # (64, Bt*N) f32
    h1c = h1.astype(cdt)

    # conv2 + bn2 + relu ; conv3 + bn3 + relu   (bf16 MXU, f32 accumulation)
    h2 = _relu(jnp.dot(w2, h1c, preferred_element_type=jnp.float32) + b2)
    h3 = _relu(jnp.dot(w3, h2.astype(cdt),
                       preferred_element_type=jnp.float32) + b3)  # (512, Bt*N)

    # MaxPool1d(num_points): per-batch global max over static, 128-aligned
    # lane slices (N is a multiple of 128).
    g = jnp.concatenate(
        [jnp.max(h3[:, b * n:(b + 1) * n], axis=1, keepdims=True)
         for b in range(bt)],
        axis=1)                                               # (512, Bt) f32

    # conva on cat([global repeated, pointfeat]) splits into
    #   wa_g @ global  +  wa_p @ pointfeat.
    # Global part: ONE (256,512)@(512,Bt) matmul for the whole block, with the
    # bias folded in so a single broadcast-add per batch element remains.
    gb = jnp.dot(wag, g.astype(cdt),
                 preferred_element_type=jnp.float32) + ba     # (256, Bt)
    pre = jnp.dot(wap, h1c, preferred_element_type=jnp.float32)  # (256, Bt*N)
    ha = jnp.concatenate(
        [_relu(pre[:, b * n:(b + 1) * n] + gb[:, b:b + 1]) for b in range(bt)],
        axis=1)                                               # (256, Bt*N)

    # convc + bnc + relu
    hc = _relu(jnp.dot(wc, ha.astype(cdt),
                       preferred_element_type=jnp.float32) + bc)  # (64, Bt*N)

    # convd (1x64) + relu as a VPU weighted channel-sum (skips an M=1 MXU pass).
    hd = _relu(jnp.sum(wd * hc, axis=0, keepdims=True) + bd)  # (1, Bt*N)

    # Lane-dense stores back into the (Bt, 1, N) output block.
    for b in range(bt):
        out_ref[b] = hd[:, b * n:(b + 1) * n].astype(out_ref.dtype)


def _fold_bn(w, b, gamma, beta, mean, var, eps=1e-5):
    """Fold eval-mode BatchNorm1d into the preceding 1x1 conv.

    w: (Cout, Cin), b: (Cout,). Returns folded (w, b) with b shaped (Cout, 1).
    """
    scale = gamma / jnp.sqrt(var + eps)
    w_f = w * scale[:, None]
    b_f = scale * (b - mean) + beta
    return w_f, b_f.reshape(-1, 1)


def make_mask_params(key, dim=3, matmul_dtype=jnp.bfloat16):
    """Deterministic synthetic parameters matching the MASK module shapes."""
    ks = jax.random.split(key, 16)

    def conv_w(k, cout, cin, scale=0.1):
        return scale * jax.random.normal(k, (cout, cin), dtype=jnp.float32)

    def conv_b(k, cout, scale=0.05):
        return scale * jax.random.normal(k, (cout,), dtype=jnp.float32)

    def bn(k, c):
        k1, k2, k3, k4 = jax.random.split(k, 4)
        gamma = 1.0 + 0.1 * jax.random.normal(k1, (c,), dtype=jnp.float32)
        beta = 0.1 * jax.random.normal(k2, (c,), dtype=jnp.float32)
        mean = 0.1 * jax.random.normal(k3, (c,), dtype=jnp.float32)
        var = 1.0 + 0.1 * jnp.abs(jax.random.normal(k4, (c,), dtype=jnp.float32))
        return gamma, beta, mean, var

    # PyTorch Conv1d weight layout (Cout, Cin) with kernel_size=1 squeezed.
    w1, b1 = conv_w(ks[0], 64, dim), conv_b(ks[1], 64)
    w2, b2 = conv_w(ks[2], 128, 64), conv_b(ks[3], 128)
    w3, b3 = conv_w(ks[4], 512, 128), conv_b(ks[5], 512)
    wa, ba = conv_w(ks[6], 256, 576), conv_b(ks[7], 256)
    wc, bc = conv_w(ks[8], 64, 256), conv_b(ks[9], 64)
    wd, bd = conv_w(ks[10], 1, 64), conv_b(ks[11], 1)

    bn1 = bn(ks[12], 64)
    bn2 = bn(ks[13], 128)
    bn3 = bn(ks[14], 512)
    bna = bn(jax.random.fold_in(ks[15], 0), 256)
    bnc = bn(jax.random.fold_in(ks[15], 1), 64)

    # Fold eval-mode BN into the conv weights/biases.
    w1f, b1f = _fold_bn(w1, b1, *bn1)
    w2f, b2f = _fold_bn(w2, b2, *bn2)
    w3f, b3f = _fold_bn(w3, b3, *bn3)
    waf, baf = _fold_bn(wa, ba, *bna)
    wcf, bcf = _fold_bn(wc, bc, *bnc)

    # torch.cat([global_feat_repeated, pointfeat], dim=1): global channels
    # (512) come FIRST, pointfeat (64) last -> split conva's input channels.
    wa_g = waf[:, :512]
    wa_p = waf[:, 512:]

    # bf16 for the big matmuls (f32 accumulation on the MXU); the tiny K=3
    # first layer, the 1x64 last layer (VPU paths) and all biases stay f32.
    mm = lambda w: w.astype(matmul_dtype)
    return dict(w1=w1f, b1=b1f,
                w2=mm(w2f), b2=b2f,
                w3=mm(w3f), b3=b3f,
                wa_g=mm(wa_g), wa_p=mm(wa_p), ba=baf,
                wc=mm(wcf), bc=bcf,
                wd=wd.T, bd=bd.reshape(-1, 1))   # wd as (64, 1) f32, bd (1, 1)


def _num_parallel_tensorcores():
    """Best-effort count of TensorCores a 'parallel' grid axis can shard over."""
    try:
        kind = jax.devices()[0].device_kind.lower()
    except Exception:
        return 1
    # v7x has 2 TCs/chip; v4/v5p expose a 2-core megacore. v5e/v6e: 1 TC.
    return 2 if any(tag in kind for tag in ("v7", "v4", "v5p")) else 1


def mask_forward(x_ncw, params, block_batch=None):
    """x_ncw: (B, dim, N) float32 in PyTorch NCW layout.  Returns (B, 1, N)."""
    B, dim, N = x_ncw.shape
    assert N % 128 == 0, "num_points must be a multiple of 128 (lane tiling)"
    if block_batch is None:
        # One grid step per available TensorCore: 1 on v5e/v6e, 2 on v7x.
        # Extra steps only add ~0.35us/step of serial overhead at these shapes.
        steps = max(1, min(B, _num_parallel_tensorcores()))
        while B % steps:
            steps -= 1
        block_batch = B // steps
    assert B % block_batch == 0, (B, block_batch)

    p = params
    weights = (p["w1"], p["b1"], p["w2"], p["b2"], p["w3"], p["b3"],
               p["wa_g"], p["wa_p"], p["ba"],
               p["wc"], p["bc"], p["wd"], p["bd"])

    # Constant-index full-array blocks for weights/biases (< 1 MiB total, so
    # the default double-buffering is immaterial; no Buffered(1) needed).
    weight_specs = [pl.BlockSpec(a.shape, lambda i, nd=a.ndim: (0,) * nd)
                    for a in weights]
    in_specs = [pl.BlockSpec((block_batch, dim, N), lambda i: (i, 0, 0))]
    in_specs += weight_specs

    return pl.pallas_call(
        mask_kernel,
        out_shape=jax.ShapeDtypeStruct((B, 1, N), jnp.float32),
        grid_spec=pltpu.PrefetchScalarGridSpec(
            num_scalar_prefetch=0,
            grid=(B // block_batch,),
            in_specs=in_specs,
            out_specs=pl.BlockSpec((block_batch, 1, N), lambda i: (i, 0, 0)),
        ),
        compiler_params=pltpu.CompilerParams(
            dimension_semantics=("parallel",)),
    )(x_ncw.astype(jnp.float32), *weights)


def mask_reference(x_ncw, params):
    """Pure-JAX reference with the same eval-mode BN fold and bf16 matmul casts."""
    p = params
    x = x_ncw.astype(jnp.float32)

    def conv(w, b, h):
        y = jnp.einsum("oc,bcn->bon", w, h.astype(w.dtype),
                       preferred_element_type=jnp.float32)
        return _relu(y + b[None])

    h1 = conv(p["w1"], p["b1"], x)                                   # (B, 64, N)
    h2 = conv(p["w2"], p["b2"], h1)                                  # (B,128, N)
    h3 = conv(p["w3"], p["b3"], h2)                                  # (B,512, N)
    g = jnp.max(h3, axis=2, keepdims=True)                           # (B,512, 1)
    gc = jnp.einsum("oc,bcn->bon", p["wa_g"], g.astype(p["wa_g"].dtype),
                    preferred_element_type=jnp.float32)              # (B,256, 1)
    hp = jnp.einsum("oc,bcn->bon", p["wa_p"], h1.astype(p["wa_p"].dtype),
                    preferred_element_type=jnp.float32)              # (B,256, N)
    ha = _relu(gc + hp + p["ba"][None])
    hc = conv(p["wc"], p["bc"], ha)                                  # (B, 64, N)
    hd = _relu(jnp.einsum("ck,bcn->bkn", p["wd"], hc) + p["bd"][None])
    return hd                                                        # (B,  1, N)


if __name__ == "__main__":
    B, DIM, NUM_POINTS = 4, 3, 256
    key = jax.random.PRNGKey(0)
    kx, kp = jax.random.split(key)

    x = jax.random.normal(kx, (B, DIM, NUM_POINTS), dtype=jnp.float32)
    params = make_mask_params(kp, dim=DIM)

    out = mask_forward(x, params)
    out = jax.block_until_ready(out)

    ref = mask_reference(x, params)
    assert out.shape == (B, 1, NUM_POINTS), out.shape
    np.testing.assert_allclose(np.asarray(out), np.asarray(ref),
                               rtol=5e-3, atol=5e-3)
    print("KERNEL_OK")
</pallas_src>

<mosaic_0001>
module attributes {stable_mosaic.version = 11 : i64} {
  func.func @mask_kernel(%arg0: i32, %arg1: memref<4x3x256xf32, #tpu.memory_space<vmem>>, %arg2: memref<64x3xf32, #tpu.memory_space<vmem>>, %arg3: memref<64x1xf32, #tpu.memory_space<vmem>>, %arg4: memref<128x64xbf16, #tpu.memory_space<vmem>>, %arg5: memref<128x1xf32, #tpu.memory_space<vmem>>, %arg6: memref<512x128xbf16, #tpu.memory_space<vmem>>, %arg7: memref<512x1xf32, #tpu.memory_space<vmem>>, %arg8: memref<256x512xbf16, #tpu.memory_space<vmem>>, %arg9: memref<256x64xbf16, #tpu.memory_space<vmem>>, %arg10: memref<256x1xf32, #tpu.memory_space<vmem>>, %arg11: memref<64x256xbf16, #tpu.memory_space<vmem>>, %arg12: memref<64x1xf32, #tpu.memory_space<vmem>>, %arg13: memref<64x1xf32, #tpu.memory_space<vmem>>, %arg14: memref<1x1xf32, #tpu.memory_space<vmem>>, %arg15: memref<4x1x256xf32, #tpu.memory_space<vmem>>) attributes {dimension_semantics = [#tpu.dimension_semantics<parallel>], iteration_bounds = array<i64: 1>, scalar_prefetch = 0 : i64, scratch_operands = 0 : i64, tpu.core_type = #tpu.core_type<tc>, window_params = [{transform_indices = @transform_0, window_bounds = array<i64: 4, 3, 256>}, {pipeline_mode = #tpu.pipeline_mode<synchronous>, transform_indices = @transform_1, window_bounds = array<i64: 64, 3>}, {pipeline_mode = #tpu.pipeline_mode<synchronous>, transform_indices = @transform_2, window_bounds = array<i64: 64, 1>}, {pipeline_mode = #tpu.pipeline_mode<synchronous>, transform_indices = @transform_3, window_bounds = array<i64: 128, 64>}, {pipeline_mode = #tpu.pipeline_mode<synchronous>, transform_indices = @transform_4, window_bounds = array<i64: 128, 1>}, {pipeline_mode = #tpu.pipeline_mode<synchronous>, transform_indices = @transform_5, window_bounds = array<i64: 512, 128>}, {pipeline_mode = #tpu.pipeline_mode<synchronous>, transform_indices = @transform_6, window_bounds = array<i64: 512, 1>}, {pipeline_mode = #tpu.pipeline_mode<synchronous>, transform_indices = @transform_7, window_bounds = array<i64: 256, 512>}, {pipeline_mode = #tpu.pipeline_mode<synchronous>, transform_indices = @transform_8, window_bounds = array<i64: 256, 64>}, {pipeline_mode = #tpu.pipeline_mode<synchronous>, transform_indices = @transform_9, window_bounds = array<i64: 256, 1>}, {pipeline_mode = #tpu.pipeline_mode<synchronous>, transform_indices = @transform_10, window_bounds = array<i64: 64, 256>}, {pipeline_mode = #tpu.pipeline_mode<synchronous>, transform_indices = @transform_11, window_bounds = array<i64: 64, 1>}, {pipeline_mode = #tpu.pipeline_mode<synchronous>, transform_indices = @transform_12, window_bounds = array<i64: 64, 1>}, {pipeline_mode = #tpu.pipeline_mode<synchronous>, transform_indices = @transform_13, window_bounds = array<i64: 1, 1>}, {transform_indices = @transform_14, window_bounds = array<i64: 4, 1, 256>}]} {
    %c0 = arith.constant 0 : index
    %c0_0 = arith.constant 0 : index
    %0 = vector.load %arg2[%c0, %c0_0] : memref<64x3xf32, #tpu.memory_space<vmem>>, vector<64x3xf32>
    %c0_1 = arith.constant 0 : index
    %c0_2 = arith.constant 0 : index
    %1 = vector.load %arg3[%c0_1, %c0_2] : memref<64x1xf32, #tpu.memory_space<vmem>>, vector<64x1xf32>
    %c0_3 = arith.constant 0 : index
    %c0_4 = arith.constant 0 : index
    %2 = vector.load %arg4[%c0_3, %c0_4] : memref<128x64xbf16, #tpu.memory_space<vmem>>, vector<128x64xbf16>
    %c0_5 = arith.constant 0 : index
    %c0_6 = arith.constant 0 : index
    %3 = vector.load %arg5[%c0_5, %c0_6] : memref<128x1xf32, #tpu.memory_space<vmem>>, vector<128x1xf32>
    %c0_7 = arith.constant 0 : index
    %c0_8 = arith.constant 0 : index
    %4 = vector.load %arg6[%c0_7, %c0_8] : memref<512x128xbf16, #tpu.memory_space<vmem>>, vector<512x128xbf16>
    %c0_9 = arith.constant 0 : index
    %c0_10 = arith.constant 0 : index
    %5 = vector.load %arg7[%c0_9, %c0_10] : memref<512x1xf32, #tpu.memory_space<vmem>>, vector<512x1xf32>
    %c0_11 = arith.constant 0 : index
    %c0_12 = arith.constant 0 : index
    %6 = vector.load %arg8[%c0_11, %c0_12] : memref<256x512xbf16, #tpu.memory_space<vmem>>, vector<256x512xbf16>
    %c0_13 = arith.constant 0 : index
    %c0_14 = arith.constant 0 : index
    %7 = vector.load %arg9[%c0_13, %c0_14] : memref<256x64xbf16, #tpu.memory_space<vmem>>, vector<256x64xbf16>
    %c0_15 = arith.constant 0 : index
    %c0_16 = arith.constant 0 : index
    %8 = vector.load %arg10[%c0_15, %c0_16] : memref<256x1xf32, #tpu.memory_space<vmem>>, vector<256x1xf32>
    %c0_17 = arith.constant 0 : index
    %c0_18 = arith.constant 0 : index
    %9 = vector.load %arg11[%c0_17, %c0_18] : memref<64x256xbf16, #tpu.memory_space<vmem>>, vector<64x256xbf16>
    %c0_19 = arith.constant 0 : index
    %c0_20 = arith.constant 0 : index
    %10 = vector.load %arg12[%c0_19, %c0_20] : memref<64x1xf32, #tpu.memory_space<vmem>>, vector<64x1xf32>
    %c0_21 = arith.constant 0 : index
    %c0_22 = arith.constant 0 : index
    %11 = vector.load %arg13[%c0_21, %c0_22] : memref<64x1xf32, #tpu.memory_space<vmem>>, vector<64x1xf32>
    %c0_23 = arith.constant 0 : index
    %c0_24 = arith.constant 0 : index
    %12 = vector.load %arg14[%c0_23, %c0_24] : memref<1x1xf32, #tpu.memory_space<vmem>>, vector<1x1xf32>
    %c0_25 = arith.constant 0 : index
    %c0_26 = arith.constant 0 : index
    %c0_27 = arith.constant 0 : index
    %13 = vector.load %arg1[%c0_25, %c0_26, %c0_27] : memref<4x3x256xf32, #tpu.memory_space<vmem>>, vector<1x3x256xf32>
    %14 = vector.shape_cast %13 : vector<1x3x256xf32> to vector<3x256xf32>
    %c1 = arith.constant 1 : index
    %c0_28 = arith.constant 0 : index
    %c0_29 = arith.constant 0 : index
    %15 = vector.load %arg1[%c1, %c0_28, %c0_29] : memref<4x3x256xf32, #tpu.memory_space<vmem>>, vector<1x3x256xf32>
    %16 = vector.shape_cast %15 : vector<1x3x256xf32> to vector<3x256xf32>
    %c2 = arith.constant 2 : index
    %c0_30 = arith.constant 0 : index
    %c0_31 = arith.constant 0 : index
    %17 = vector.load %arg1[%c2, %c0_30, %c0_31] : memref<4x3x256xf32, #tpu.memory_space<vmem>>, vector<1x3x256xf32>
    %18 = vector.shape_cast %17 : vector<1x3x256xf32> to vector<3x256xf32>
    %c3 = arith.constant 3 : index
    %c0_32 = arith.constant 0 : index
    %c0_33 = arith.constant 0 : index
    %19 = vector.load %arg1[%c3, %c0_32, %c0_33] : memref<4x3x256xf32, #tpu.memory_space<vmem>>, vector<1x3x256xf32>
    %20 = vector.shape_cast %19 : vector<1x3x256xf32> to vector<3x256xf32>
    %21 = tpu.concatenate %14, %16, %18, %20 in 1 : vector<3x256xf32>, vector<3x256xf32>, vector<3x256xf32>, vector<3x256xf32> -> vector<3x1024xf32>
    %22 = vector.extract_strided_slice %0 {offsets = [0, 0], sizes = [64, 1], strides = [1, 1]} : vector<64x3xf32> to vector<64x1xf32>
    %23 = vector.extract_strided_slice %21 {offsets = [0, 0], sizes = [1, 1024], strides = [1, 1]} : vector<3x1024xf32> to vector<1x1024xf32>
    %24 = vector.broadcast %22 : vector<64x1xf32> to vector<64x1024xf32>
    %25 = vector.broadcast %23 : vector<1x1024xf32> to vector<64x1024xf32>
    %26 = arith.mulf %24, %25 : vector<64x1024xf32>
    %27 = vector.broadcast %1 : vector<64x1xf32> to vector<64x1024xf32>
    %28 = arith.addf %27, %26 : vector<64x1024xf32>
    %29 = vector.extract_strided_slice %0 {offsets = [0, 1], sizes = [64, 1], strides = [1, 1]} : vector<64x3xf32> to vector<64x1xf32>
    %30 = vector.extract_strided_slice %21 {offsets = [1, 0], sizes = [1, 1024], strides = [1, 1]} : vector<3x1024xf32> to vector<1x1024xf32>
    %31 = vector.broadcast %29 : vector<64x1xf32> to vector<64x1024xf32>
    %32 = vector.broadcast %30 : vector<1x1024xf32> to vector<64x1024xf32>
    %33 = arith.mulf %31, %32 : vector<64x1024xf32>
    %34 = arith.addf %28, %33 : vector<64x1024xf32>
    %35 = vector.extract_strided_slice %0 {offsets = [0, 2], sizes = [64, 1], strides = [1, 1]} : vector<64x3xf32> to vector<64x1xf32>
    %36 = vector.extract_strided_slice %21 {offsets = [2, 0], sizes = [1, 1024], strides = [1, 1]} : vector<3x1024xf32> to vector<1x1024xf32>
    %37 = vector.broadcast %35 : vector<64x1xf32> to vector<64x1024xf32>
    %38 = vector.broadcast %36 : vector<1x1024xf32> to vector<64x1024xf32>
    %39 = arith.mulf %37, %38 : vector<64x1024xf32>
    %40 = arith.addf %34, %39 : vector<64x1024xf32>
    %cst = arith.constant 0.000000e+00 : f32
    %41 = vector.broadcast %cst : f32 to vector<64x1024xf32>
    %42 = arith.maximumf %40, %41 : vector<64x1024xf32>
    %43 = arith.truncf %42 : vector<64x1024xf32> to vector<64x1024xbf16>
    %cst_34 = arith.constant dense<0.000000e+00> : vector<128x1024xf32>
    %44 = tpu.matmul %2, %43, %cst_34 {dimension_numbers = #tpu.dot_dimension_numbers<[1], [0], [0], [1], [0, 0, 1, 1], [], []>} : vector<128x64xbf16>, vector<64x1024xbf16>, vector<128x1024xf32> -> vector<128x1024xf32>
    %45 = vector.broadcast %3 : vector<128x1xf32> to vector<128x1024xf32>
    %46 = arith.addf %44, %45 : vector<128x1024xf32>
    %cst_35 = arith.constant 0.000000e+00 : f32
    %47 = vector.broadcast %cst_35 : f32 to vector<128x1024xf32>
    %48 = arith.maximumf %46, %47 : vector<128x1024xf32>
    %49 = arith.truncf %48 : vector<128x1024xf32> to vector<128x1024xbf16>
    %cst_36 = arith.constant dense<0.000000e+00> : vector<512x1024xf32>
    %50 = tpu.matmul %4, %49, %cst_36 {dimension_numbers = #tpu.dot_dimension_numbers<[1], [0], [0], [1], [0, 0, 1, 1], [], []>} : vector<512x128xbf16>, vector<128x1024xbf16>, vector<512x1024xf32> -> vector<512x1024xf32>
    %51 = vector.broadcast %5 : vector<512x1xf32> to vector<512x1024xf32>
    %52 = arith.addf %50, %51 : vector<512x1024xf32>
    %cst_37 = arith.constant 0.000000e+00 : f32
    %53 = vector.broadcast %cst_37 : f32 to vector<512x1024xf32>
    %54 = arith.maximumf %52, %53 : vector<512x1024xf32>
    %55 = vector.extract_strided_slice %54 {offsets = [0, 0], sizes = [512, 256], strides = [1, 1]} : vector<512x1024xf32> to vector<512x256xf32>
    %cst_38 = arith.constant dense<0xFF800000> : vector<512xf32>
    %56 = vector.multi_reduction <maximumf>, %55, %cst_38 [1] : vector<512x256xf32> to vector<512xf32>
    %57 = vector.shape_cast %56 : vector<512xf32> to vector<512x1xf32>
    %58 = vector.extract_strided_slice %54 {offsets = [0, 256], sizes = [512, 256], strides = [1, 1]} : vector<512x1024xf32> to vector<512x256xf32>
    %cst_39 = arith.constant dense<0xFF800000> : vector<512xf32>
    %59 = vector.multi_reduction <maximumf>, %58, %cst_39 [1] : vector<512x256xf32> to vector<512xf32>
    %60 = vector.shape_cast %59 : vector<512xf32> to vector<512x1xf32>
    %61 = vector.extract_strided_slice %54 {offsets = [0, 512], sizes = [512, 256], strides = [1, 1]} : vector<512x1024xf32> to vector<512x256xf32>
    %cst_40 = arith.constant dense<0xFF800000> : vector<512xf32>
    %62 = vector.multi_reduction <maximumf>, %61, %cst_40 [1] : vector<512x256xf32> to vector<512xf32>
    %63 = vector.shape_cast %62 : vector<512xf32> to vector<512x1xf32>
    %64 = vector.extract_strided_slice %54 {offsets = [0, 768], sizes = [512, 256], strides = [1, 1]} : vector<512x1024xf32> to vector<512x256xf32>
    %cst_41 = arith.constant dense<0xFF800000> : vector<512xf32>
    %65 = vector.multi_reduction <maximumf>, %64, %cst_41 [1] : vector<512x256xf32> to vector<512xf32>
    %66 = vector.shape_cast %65 : vector<512xf32> to vector<512x1xf32>
    %67 = tpu.concatenate %57, %60, %63, %66 in 1 : vector<512x1xf32>, vector<512x1xf32>, vector<512x1xf32>, vector<512x1xf32> -> vector<512x4xf32>
    %68 = arith.truncf %67 : vector<512x4xf32> to vector<512x4xbf16>
    %cst_42 = arith.constant dense<0.000000e+00> : vector<256x4xf32>
    %69 = tpu.matmul %6, %68, %cst_42 {dimension_numbers = #tpu.dot_dimension_numbers<[1], [0], [0], [1], [0, 0, 1, 1], [], []>} : vector<256x512xbf16>, vector<512x4xbf16>, vector<256x4xf32> -> vector<256x4xf32>
    %70 = vector.broadcast %8 : vector<256x1xf32> to vector<256x4xf32>
    %71 = arith.addf %69, %70 : vector<256x4xf32>
    %cst_43 = arith.constant dense<0.000000e+00> : vector<256x1024xf32>
    %72 = tpu.matmul %7, %43, %cst_43 {dimension_numbers = #tpu.dot_dimension_numbers<[1], [0], [0], [1], [0, 0, 1, 1], [], []>} : vector<256x64xbf16>, vector<64x1024xbf16>, vector<256x1024xf32> -> vector<256x1024xf32>
    %73 = vector.extract_strided_slice %72 {offsets = [0, 0], sizes = [256, 256], strides = [1, 1]} : vector<256x1024xf32> to vector<256x256xf32>
    %74 = vector.extract_strided_slice %71 {offsets = [0, 0], sizes = [256, 1], strides = [1, 1]} : vector<256x4xf32> to vector<256x1xf32>
    %75 = vector.broadcast %74 : vector<256x1xf32> to vector<256x256xf32>
    %76 = arith.addf %73, %75 : vector<256x256xf32>
    %cst_44 = arith.constant 0.000000e+00 : f32
    %77 = vector.broadcast %cst_44 : f32 to vector<256x256xf32>
    %78 = arith.maximumf %76, %77 : vector<256x256xf32>
    %79 = vector.extract_strided_slice %72 {offsets = [0, 256], sizes = [256, 256], strides = [1, 1]} : vector<256x1024xf32> to vector<256x256xf32>
    %80 = vector.extract_strided_slice %71 {offsets = [0, 1], sizes = [256, 1], strides = [1, 1]} : vector<256x4xf32> to vector<256x1xf32>
    %81 = vector.broadcast %80 : vector<256x1xf32> to vector<256x256xf32>
    %82 = arith.addf %79, %81 : vector<256x256xf32>
    %cst_45 = arith.constant 0.000000e+00 : f32
    %83 = vector.broadcast %cst_45 : f32 to vector<256x256xf32>
    %84 = arith.maximumf %82, %83 : vector<256x256xf32>
    %85 = vector.extract_strided_slice %72 {offsets = [0, 512], sizes = [256, 256], strides = [1, 1]} : vector<256x1024xf32> to vector<256x256xf32>
    %86 = vector.extract_strided_slice %71 {offsets = [0, 2], sizes = [256, 1], strides = [1, 1]} : vector<256x4xf32> to vector<256x1xf32>
    %87 = vector.broadcast %86 : vector<256x1xf32> to vector<256x256xf32>
    %88 = arith.addf %85, %87 : vector<256x256xf32>
    %cst_46 = arith.constant 0.000000e+00 : f32
    %89 = vector.broadcast %cst_46 : f32 to vector<256x256xf32>
    %90 = arith.maximumf %88, %89 : vector<256x256xf32>
    %91 = vector.extract_strided_slice %72 {offsets = [0, 768], sizes = [256, 256], strides = [1, 1]} : vector<256x1024xf32> to vector<256x256xf32>
    %92 = vector.extract_strided_slice %71 {offsets = [0, 3], sizes = [256, 1], strides = [1, 1]} : vector<256x4xf32> to vector<256x1xf32>
    %93 = vector.broadcast %92 : vector<256x1xf32> to vector<256x256xf32>
    %94 = arith.addf %91, %93 : vector<256x256xf32>
    %cst_47 = arith.constant 0.000000e+00 : f32
    %95 = vector.broadcast %cst_47 : f32 to vector<256x256xf32>
    %96 = arith.maximumf %94, %95 : vector<256x256xf32>
    %97 = tpu.concatenate %78, %84, %90, %96 in 1 : vector<256x256xf32>, vector<256x256xf32>, vector<256x256xf32>, vector<256x256xf32> -> vector<256x1024xf32>
    %98 = arith.truncf %97 : vector<256x1024xf32> to vector<256x1024xbf16>
    %cst_48 = arith.constant dense<0.000000e+00> : vector<64x1024xf32>
    %99 = tpu.matmul %9, %98, %cst_48 {dimension_numbers = #tpu.dot_dimension_numbers<[1], [0], [0], [1], [0, 0, 1, 1], [], []>} : vector<64x256xbf16>, vector<256x1024xbf16>, vector<64x1024xf32> -> vector<64x1024xf32>
    %100 = vector.broadcast %10 : vector<64x1xf32> to vector<64x1024xf32>
    %101 = arith.addf %99, %100 : vector<64x1024xf32>
    %cst_49 = arith.constant 0.000000e+00 : f32
    %102 = vector.broadcast %cst_49 : f32 to vector<64x1024xf32>
    %103 = arith.maximumf %101, %102 : vector<64x1024xf32>
    %104 = vector.broadcast %11 : vector<64x1xf32> to vector<64x1024xf32>
    %105 = arith.mulf %104, %103 : vector<64x1024xf32>
    %cst_50 = arith.constant dense<0.000000e+00> : vector<1024xf32>
    %106 = vector.multi_reduction <add>, %105, %cst_50 [0] : vector<64x1024xf32> to vector<1024xf32>
    %107 = vector.shape_cast %106 : vector<1024xf32> to vector<1x1024xf32>
    %108 = vector.broadcast %12 : vector<1x1xf32> to vector<1x1024xf32>
    %109 = arith.addf %107, %108 : vector<1x1024xf32>
    %cst_51 = arith.constant 0.000000e+00 : f32
    %110 = vector.broadcast %cst_51 : f32 to vector<1x1024xf32>
    %111 = arith.maximumf %109, %110 : vector<1x1024xf32>
    %112 = vector.extract_strided_slice %111 {offsets = [0, 0], sizes = [1, 256], strides = [1, 1]} : vector<1x1024xf32> to vector<1x256xf32>
    %c0_52 = arith.constant 0 : index
    %c0_53 = arith.constant 0 : index
    %c0_54 = arith.constant 0 : index
    %113 = vector.load %arg15[%c0_52, %c0_53, %c0_54] : memref<4x1x256xf32, #tpu.memory_space<vmem>>, vector<1x1x256xf32>
    %114 = vector.shape_cast %113 : vector<1x1x256xf32> to vector<1x256xf32>
    %115 = vector.shape_cast %112 : vector<1x256xf32> to vector<1x1x256xf32>
    tpu.vector_store %arg15[%c0_52, %c0_53, %c0_54], %115 {strides = array<i32>} : memref<4x1x256xf32, #tpu.memory_space<vmem>>, vector<1x1x256xf32>,
    %116 = vector.extract_strided_slice %111 {offsets = [0, 256], sizes = [1, 256], strides = [1, 1]} : vector<1x1024xf32> to vector<1x256xf32>
    %c1_55 = arith.constant 1 : index
    %c0_56 = arith.constant 0 : index
    %c0_57 = arith.constant 0 : index
    %117 = vector.load %arg15[%c1_55, %c0_56, %c0_57] : memref<4x1x256xf32, #tpu.memory_space<vmem>>, vector<1x1x256xf32>
    %118 = vector.shape_cast %117 : vector<1x1x256xf32> to vector<1x256xf32>
    %119 = vector.shape_cast %116 : vector<1x256xf32> to vector<1x1x256xf32>
    tpu.vector_store %arg15[%c1_55, %c0_56, %c0_57], %119 {strides = array<i32>} : memref<4x1x256xf32, #tpu.memory_space<vmem>>, vector<1x1x256xf32>,
    %120 = vector.extract_strided_slice %111 {offsets = [0, 512], sizes = [1, 256], strides = [1, 1]} : vector<1x1024xf32> to vector<1x256xf32>
    %c2_58 = arith.constant 2 : index
    %c0_59 = arith.constant 0 : index
    %c0_60 = arith.constant 0 : index
    %121 = vector.load %arg15[%c2_58, %c0_59, %c0_60] : memref<4x1x256xf32, #tpu.memory_space<vmem>>, vector<1x1x256xf32>
    %122 = vector.shape_cast %121 : vector<1x1x256xf32> to vector<1x256xf32>
    %123 = vector.shape_cast %120 : vector<1x256xf32> to vector<1x1x256xf32>
    tpu.vector_store %arg15[%c2_58, %c0_59, %c0_60], %123 {strides = array<i32>} : memref<4x1x256xf32, #tpu.memory_space<vmem>>, vector<1x1x256xf32>,
    %124 = vector.extract_strided_slice %111 {offsets = [0, 768], sizes = [1, 256], strides = [1, 1]} : vector<1x1024xf32> to vector<1x256xf32>
    %c3_61 = arith.constant 3 : index
    %c0_62 = arith.constant 0 : index
    %c0_63 = arith.constant 0 : index
    %125 = vector.load %arg15[%c3_61, %c0_62, %c0_63] : memref<4x1x256xf32, #tpu.memory_space<vmem>>, vector<1x1x256xf32>
    %126 = vector.shape_cast %125 : vector<1x1x256xf32> to vector<1x256xf32>
    %127 = vector.shape_cast %124 : vector<1x256xf32> to vector<1x1x256xf32>
    tpu.vector_store %arg15[%c3_61, %c0_62, %c0_63], %127 {strides = array<i32>} : memref<4x1x256xf32, #tpu.memory_space<vmem>>, vector<1x1x256xf32>,
    return
  }
  func.func @transform_0(%arg0: i32) -> (i32, i32, i32) {
    %c0_i32 = arith.constant 0 : i32
    %c0_i32_0 = arith.constant 0 : i32
    %c0_i32_1 = arith.constant 0 : i32
    return %arg0, %c0_i32, %c0_i32_0 : i32, i32, i32
  }
  func.func @transform_1(%arg0: i32) -> (i32, i32) {
    %c0_i32 = arith.constant 0 : i32
    %c0_i32_0 = arith.constant 0 : i32
    %c0_i32_1 = arith.constant 0 : i32
    return %c0_i32, %c0_i32_0 : i32, i32
  }
  func.func @transform_2(%arg0: i32) -> (i32, i32) {
    %c0_i32 = arith.constant 0 : i32
    %c0_i32_0 = arith.constant 0 : i32
    %c0_i32_1 = arith.constant 0 : i32
    return %c0_i32, %c0_i32_0 : i32, i32
  }
  func.func @transform_3(%arg0: i32) -> (i32, i32) {
    %c0_i32 = arith.constant 0 : i32
    %c0_i32_0 = arith.constant 0 : i32
    %c0_i32_1 = arith.constant 0 : i32
    return %c0_i32, %c0_i32_0 : i32, i32
  }
  func.func @transform_4(%arg0: i32) -> (i32, i32) {
    %c0_i32 = arith.constant 0 : i32
    %c0_i32_0 = arith.constant 0 : i32
    %c0_i32_1 = arith.constant 0 : i32
    return %c0_i32, %c0_i32_0 : i32, i32
  }
  func.func @transform_5(%arg0: i32) -> (i32, i32) {
    %c0_i32 = arith.constant 0 : i32
    %c0_i32_0 = arith.constant 0 : i32
    %c0_i32_1 = arith.constant 0 : i32
    return %c0_i32, %c0_i32_0 : i32, i32
  }
  func.func @transform_6(%arg0: i32) -> (i32, i32) {
    %c0_i32 = arith.constant 0 : i32
    %c0_i32_0 = arith.constant 0 : i32
    %c0_i32_1 = arith.constant 0 : i32
    return %c0_i32, %c0_i32_0 : i32, i32
  }
  func.func @transform_7(%arg0: i32) -> (i32, i32) {
    %c0_i32 = arith.constant 0 : i32
    %c0_i32_0 = arith.constant 0 : i32
    %c0_i32_1 = arith.constant 0 : i32
    return %c0_i32, %c0_i32_0 : i32, i32
  }
  func.func @transform_8(%arg0: i32) -> (i32, i32) {
    %c0_i32 = arith.constant 0 : i32
    %c0_i32_0 = arith.constant 0 : i32
    %c0_i32_1 = arith.constant 0 : i32
    return %c0_i32, %c0_i32_0 : i32, i32
  }
  func.func @transform_9(%arg0: i32) -> (i32, i32) {
    %c0_i32 = arith.constant 0 : i32
    %c0_i32_0 = arith.constant 0 : i32
    %c0_i32_1 = arith.constant 0 : i32
    return %c0_i32, %c0_i32_0 : i32, i32
  }
  func.func @transform_10(%arg0: i32) -> (i32, i32) {
    %c0_i32 = arith.constant 0 : i32
    %c0_i32_0 = arith.constant 0 : i32
    %c0_i32_1 = arith.constant 0 : i32
    return %c0_i32, %c0_i32_0 : i32, i32
  }
  func.func @transform_11(%arg0: i32) -> (i32, i32) {
    %c0_i32 = arith.constant 0 : i32
    %c0_i32_0 = arith.constant 0 : i32
    %c0_i32_1 = arith.constant 0 : i32
    return %c0_i32, %c0_i32_0 : i32, i32
  }
  func.func @transform_12(%arg0: i32) -> (i32, i32) {
    %c0_i32 = arith.constant 0 : i32
    %c0_i32_0 = arith.constant 0 : i32
    %c0_i32_1 = arith.constant 0 : i32
    return %c0_i32, %c0_i32_0 : i32, i32
  }
  func.func @transform_13(%arg0: i32) -> (i32, i32) {
    %c0_i32 = arith.constant 0 : i32
    %c0_i32_0 = arith.constant 0 : i32
    %c0_i32_1 = arith.constant 0 : i32
    return %c0_i32, %c0_i32_0 : i32, i32
  }
  func.func @transform_14(%arg0: i32) -> (i32, i32, i32) {
    %c0_i32 = arith.constant 0 : i32
    %c0_i32_0 = arith.constant 0 : i32
    %c0_i32_1 = arith.constant 0 : i32
    return %arg0, %c0_i32, %c0_i32_0 : i32, i32, i32
  }
}

</mosaic_0001>

<bundles_post_ra>
// kernel: tpu_custom_call.1
= control target key start
LH: loop header
LB: loop body
LE: loop exit
PB: predicated region body
PF: predicated region fallthrough
CT: control target
= control target key end

     0   :  { %s15192_s0 = inlined_call_operand.vmem [shape: f32[4,3,256], index: 0, kind: input, shape index: {}]   ;;  %s15193_s1 = inlined_call_operand.vmem [shape: f32[64,3], index: 1, kind: input, shape index: {}]   ;;  %s15194_s2 = inlined_call_operand.vmem [shape: f32[64,1], index: 2, kind: input, shape index: {}]   ;;  %s15195_s3 = inlined_call_operand.vmem [shape: bf16[128,64], index: 3, kind: input, shape index: {}]   ;;  %s15196_s4 = inlined_call_operand.vmem [shape: f32[128,1], index: 4, kind: input, shape index: {}]   ;;  %s15197_s5 = inlined_call_operand.vmem [shape: bf16[512,128], index: 5, kind: input, shape index: {}]   ;;  %s15198_s6 = inlined_call_operand.vmem [shape: f32[512,1], index: 6, kind: input, shape index: {}]   ;;  %s15199_s7 = inlined_call_operand.vmem [shape: bf16[256,512], index: 7, kind: input, shape index: {}]   ;;  %s15200_s8 = inlined_call_operand.vmem [shape: bf16[256,64], index: 8, kind: input, shape index: {}]   ;;  %s15201_s9 = inlined_call_operand.vmem [shape: f32[256,1], index: 9, kind: input, shape index: {}]   ;;  %s15202_s10 = inlined_call_operand.vmem [shape: bf16[64,256], index: 10, kind: input, shape index: {}]   ;;  %s15203_s11 = inlined_call_operand.vmem [shape: f32[64,1], index: 11, kind: input, shape index: {}]   ;;  %s15204_s12 = inlined_call_operand.vmem [shape: f32[64,1], index: 12, kind: input, shape index: {}]   ;;  %s15205_s13 = inlined_call_operand.<no memory space> [shape: f32[1,1], index: 13, kind: input, shape index: {}]   ;;  %s15206_s14 = inlined_call_operand.hbm [shape: f32[4,1,256], index: 14, kind: output, shape index: {}]  }
   0x1   :  { %v19_v0 = vstv %s15205_s13 }
   0x2   :  { %20 = vst [vmem:[#allocation2] sm:$0x1] %v19_v0 }
   0x3   :  { %v59_v1 = vld [vmem:[%s15194_s2] sm:$0xff]  ;;  %v15212_v3 = vmov 0   ;;  %v60_v4 = vld [vmem:[%s15194_s2 + $0x8] sm:$0xff]  ;;  %v54_v6 = vld [vmem:[%s15193_s1 + $0x18] sm:$0xff]  ;;  %v15208_v8 = vmov 1   ;;  %v15210_v12 = vmov 2  }
   0x4   :  { %v51_v2 = vld [vmem:[%s15193_s1] sm:$0xff]  ;;  %9453 = vset.pattern.permute.xlu1 %v15212_v3  ;;  %9452 = vset.pattern.permute.xlu0 %v15212_v3  ;;  %v52_v5 = vld [vmem:[%s15193_s1 + $0x8] sm:$0xff]  ;;  %v61_v7 = vld [vmem:[%s15194_s2 + $0x10] sm:$0xff] }
   0x5   :  { %537 = vperm.xlu1 %9453, %v59_v1   ;;  %401 = vperm.xlu0 %9452, %v51_v2   ;;  %v53_v9 = vld [vmem:[%s15193_s1 + $0x10] sm:$0xff]  ;;  %v56_v10 = vld [vmem:[%s15193_s1 + $0x28] sm:$0xff]  ;;  %v63_v11 = vld [vmem:[%s15194_s2 + $0x20] sm:$0xff] }
   0x6   :  { %1296 = vmatprep.mubr.bf16.mxu0 %v15212_v3  ;;  %1409 = vmatprep.mubr.bf16.mxu1 %v15212_v3  ;;  %v58_v13 = vld [vmem:[%s15193_s1 + $0x38] sm:$0xff]  ;;  %v65_v15 = vld [vmem:[%s15194_s2 + $0x30] sm:$0xff]  ;;  %v55_v16 = vld [vmem:[%s15193_s1 + $0x20] sm:$0xff] }
   0x7   :  { %v62_v14 = vld [vmem:[%s15194_s2 + $0x18] sm:$0xff]  ;;  %v57_v17 = vld [vmem:[%s15193_s1 + $0x30] sm:$0xff]  ;;  %v64_v18 = vld [vmem:[%s15194_s2 + $0x28] sm:$0xff] }
   0x8   :  { %v85_v19 = vld [vmem:[%s15196_s4 + $0x10] sm:$0xff]  ;;  %v88_v20 = vld [vmem:[%s15196_s4 + $0x28] sm:$0xff] }
   0x9   :  { %542 = vperm.xlu1 %9453, %v60_v4   ;;  %406 = vperm.xlu0 %9452, %v52_v5  }
   0xd   :  { %9454 = vset.pattern.permute.xlu1 %v15208_v8  ;;  %416 = vperm.xlu0 %9452, %v54_v6  }
   0xe   :  { %644 = vperm.xlu1 %9454, %v52_v5  }
  0x11   :  { %547 = vperm.xlu0 %9452, %v61_v7  }
  0x12   :  { %9455 = vset.pattern.permute.xlu1 %v15212_v3 }
  0x13   :  { %411 = vperm.xlu1 %9455, %v53_v9  }
  0x15   :  { %426 = vperm.xlu0 %9452, %v56_v10  }
  0x17   :  { %9456 = vset.pattern.permute.xlu1 %v15210_v12 }
  0x18   :  { %832 = vperm.xlu1 %9456, %v51_v2  }
  0x19   :  { %557 = vperm.xlu0 %9452, %v63_v11  }
  0x1c   :  { %836 = vperm.xlu1 %9456, %v52_v5  }
  0x1d   :  { %436 = vperm.xlu0 %9452, %v58_v13  }
  0x20   :  { %9457 = vset.pattern.permute.xlu1 %v15212_v3 }
  0x21   :  { %552 = vperm.xlu1 %9457, %v62_v14   ;;  %567 = vperm.xlu0 %9452, %v65_v15  }
  0x25   :  { %9458 = vset.pattern.permute.xlu1 %v15208_v8  ;;  %9465 = vset.pattern.permute.xlu0 %v15208_v8 }
  0x26   :  { %652 = vperm.xlu1 %9458, %v54_v6   ;;  %640 = vperm.xlu0 %9465, %v51_v2  }
  0x2a   :  { %9459 = vset.pattern.permute.xlu1 %v15212_v3  ;;  %648 = vperm.xlu0 %9465, %v53_v9  }
  0x2b   :  { %421 = vperm.xlu1 %9459, %v55_v16  }
  0x2e   :  { %656 = vperm.xlu0 %9465, %v55_v16  }
  0x2f   :  { %9460 = vset.pattern.permute.xlu1 %v15210_v12 }
  0x30   :  { %840 = vperm.xlu1 %9460, %v53_v9  }
  0x32   :  { %664 = vperm.xlu0 %9465, %v57_v17  }
  0x34   :  { %844 = vperm.xlu1 %9460, %v54_v6  }
  0x36   :  { %9469 = vset.pattern.permute.xlu0 %v15210_v12 }
  0x37   :  { %860 = vperm.xlu0 %9469, %v58_v13  }
  0x38   :  { %9461 = vset.pattern.permute.xlu1 %v15212_v3 }
  0x39   :  { %562 = vperm.xlu1 %9461, %v64_v18  }
  0x3b   :  { %9471 = vset.pattern.permute.xlu0 %v15212_v3 }
  0x3c   :  { %1131 = vperm.xlu0 %9471, %v85_v19  }
  0x3d   :  { %9462 = vset.pattern.permute.xlu1 %v15208_v8 }
  0x3e   :  { %660 = vperm.xlu1 %9462, %v56_v10  }
  0x40   :  { %1146 = vperm.xlu0 %9471, %v88_v20  }
  0x42   :  { %9463 = vset.pattern.permute.xlu1 %v15212_v3 }
  0x43   :  { %431 = vperm.xlu1 %9463, %v57_v17  }
  0x47   :  { %9464 = vset.pattern.permute.xlu1 %v15210_v12 }
  0x48   :  { %848 = vperm.xlu1 %9464, %v55_v16  }
  0x49   :  { %21 = vsyncpa [#allocation4], 0  ;;  %v90_v21 = vld [vmem:[%s15196_s4 + $0x38] sm:$0xff]  ;;  %v92_v23 = vld [vmem:[%s15196_s4 + $0x48] sm:$0xff]  ;;  %v15207_v37 = vlaneseq  ;;  %vm1239_vm0 = vcmask 523264   ;;  %vm5112_vm1 = vcmask 7168  }
  0x4a   :  { %1156 = vperm.xlu0 %9471, %v90_v21   ;;  %v66_v22 = vld [vmem:[%s15194_s2 + $0x38] sm:$0xff]  ;;  %v96_v25 = vld [vmem:[%s15196_s4 + $0x68] sm:$0xff]  ;;  %v83_v27 = vld [vmem:[%s15196_s4] sm:$0xff]  ;;  %vm5177_vm2 = vcmask 15360   ;;  %vm5242_vm3 = vcmask 23552  }
  0x4b   :  { %v94_v24 = vld [vmem:[%s15196_s4 + $0x58] sm:$0xff]  ;;  %v164_v28 = vld [vmem:[%s15198_s6 + $0x8] sm:$0xff]  ;;  %v87_v32 = vld [vmem:[%s15196_s4 + $0x20] sm:$0xff]  ;;  %v10021_v39 = vshrl.u32 %v15207_v37, 7 }
  0x4c   :  { %852 = vperm.xlu1 %9464, %v56_v10   ;;  %v98_v26 = vld [vmem:[%s15196_s4 + $0x78] sm:$0xff]  ;;  %v84_v29 = vld [vmem:[%s15196_s4 + $0x8] sm:$0xff]  ;;  %v89_v34 = vld [vmem:[%s15196_s4 + $0x30] sm:$0xff] }
  0x4d   :  { %v86_v30 = vld [vmem:[%s15196_s4 + $0x18] sm:$0xff]  ;;  %v168_v33 = vld [vmem:[%s15198_s6 + $0x28] sm:$0xff]  ;;  %v91_v35 = vld [vmem:[%s15196_s4 + $0x40] sm:$0xff]  ;;  %15418 = vst [vmem:[#allocation6_spill] sm:$0xff] %v10021_v39  ;;  %v10036_v45 = vsub.s32 0, %v10021_v39  ;;  %v673_v49 = vsub.s32 1, %v10021_v39 }
  0x4e   :  { %1166 = vperm.xlu0 %9471, %v92_v23   ;;  %v166_v31 = vld [vmem:[%s15198_s6 + $0x18] sm:$0xff]  ;;  %v93_v38 = vld [vmem:[%s15196_s4 + $0x50] sm:$0xff]  ;;  %v95_v40 = vld [vmem:[%s15196_s4 + $0x60] sm:$0xff]  ;;  %v865_v50 = vsub.s32 2, %v10021_v39 }
  0x4f   :  { %v170_v36 = vld [vmem:[%s15198_s6 + $0x38] sm:$0xff]  ;;  %v380_v41 = vld [vmem:[%s15192_s0] sm:$0x77]  ;;  %v8993_v42 = vld [vmem:[%s15192_s0 + $0x8] sm:$0x77]  ;;  %15419 = vst [vmem:[#allocation7_spill] sm:$0xff] %v10036_v45 }
  0x50   :  { %9466 = vset.pattern.permute.xlu1 %v15212_v3  ;;  %v8994_v43 = vld [vmem:[%s15192_s0 + $0x10] sm:$0x77]  ;;  %v388_v44 = vcombine.high %v380_v41, %v380_v41  ;;  %v391_v46 = vcombine.high %v8993_v42, %v8993_v42  ;;  %v8995_v48 = vld [vmem:[%s15192_s0 + $0x18] sm:$0x77]  ;;  %v172_v53 = vld [vmem:[%s15198_s6 + $0x48] sm:$0xff]  ;;  %v10056_v56 = vrot.slane %v380_v41, %v10036_v45  ;;  %v10059_v57 = vrot.slane %v8993_v42, %v10036_v45 }
  0x51   :  { %572 = vperm.xlu1 %9466, %v66_v22   ;;  %v97_v47 = vld [vmem:[%s15196_s4 + $0x70] sm:$0xff]  ;;  %v394_v51 = vcombine.high %v8994_v43, %v8994_v43  ;;  %v397_v52 = vcombine.high %v8995_v48, %v8995_v48  ;;  %v163_v58 = vld [vmem:[%s15198_s6] sm:$0xff]  ;;  %v10068_v61 = vrot.slane %v380_v41, %v673_v49  ;;  %v10070_v62 = vrot.slane %v8993_v42, %v673_v49 }
  0x52   :  { %1176 = vperm.xlu0 %9471, %v94_v24   ;;  %v10050_v54 = vrot.slane %v388_v44, %v10036_v45  ;;  %v10053_v55 = vrot.slane %v391_v46, %v10036_v45  ;;  %v10064_v59 = vrot.slane %v388_v44, %v673_v49  ;;  %v10066_v60 = vrot.slane %v391_v46, %v673_v49  ;;  %v165_v11 = vld [vmem:[%s15198_s6 + $0x10] sm:$0xff] }
  0x53   :  { %v10072_v63 = vrot.slane %v388_v44, %v865_v50  ;;  %v10074_v0 = vrot.slane %v391_v46, %v865_v50  ;;  %v10076_v1 = vrot.slane %v380_v41, %v865_v50  ;;  %v10079_v2 = vrot.slane %v394_v51, %v10036_v45 }
  0x54   :  { %v10081_v6 = vrot.slane %v8993_v42, %v865_v50  ;;  %v10084_v7 = vrot.slane %v397_v52, %v10036_v45  ;;  %v10087_v9 = vrot.slane %v8994_v43, %v10036_v45  ;;  %v10090_v10 = vrot.slane %v8995_v48, %v10036_v45 }
  0x55   :  { %9467 = vset.pattern.permute.xlu1 %v15208_v8  ;;  %15420 = vst [vmem:[#allocation8_spill] sm:$0xff] %v10079_v2  ;;  %v10097_v14 = vrot.slane %v397_v52, %v673_v49  ;;  %v10099_v15 = vrot.slane %v8994_v43, %v673_v49  ;;  %v10101_v16 = vrot.slane %v8995_v48, %v673_v49 }
  0x56   :  { %668 = vperm.xlu1 %9467, %v58_v13   ;;  %1186 = vperm.xlu0 %9471, %v96_v25   ;;  %15421 = vst [vmem:[#allocation9_spill] sm:$0xff] %v10084_v7  ;;  %15422 = vst [vmem:[#allocation10_spill] sm:$0xff] %v10087_v9  ;;  %v10095_v13 = vrot.slane %v394_v51, %v673_v49  ;;  %v10107_v21 = vrot.slane %v394_v51, %v865_v50  ;;  %v174_v25 = vld [vmem:[%s15198_s6 + $0x58] sm:$0xff] }
  0x57   :  { %15423 = vst [vmem:[#allocation11_spill] sm:$0xff] %v10090_v10  ;;  %15425 = vst [vmem:[#allocation13_spill] sm:$0xff] %v10097_v14  ;;  %v10109_v22 = vrot.slane %v397_v52, %v865_v50  ;;  %v10111_v23 = vrot.slane %v8994_v43, %v865_v50  ;;  %v10113_v24 = vrot.slane %v8995_v48, %v865_v50  ;;  %v176_v43 = vld [vmem:[%s15198_s6 + $0x68] sm:$0xff] }
  0x58   :  { %15424 = vst [vmem:[#allocation12_spill] sm:$0xff] %v10095_v13  ;;  %15426 = vst [vmem:[#allocation14_spill] sm:$0xff] %v10099_v15 }
  0x59   :  { %15427 = vst [vmem:[#allocation15_spill] sm:$0xff] %v10101_v16  ;;  %15428 = vst [vmem:[#allocation16_spill] sm:$0xff] %v10107_v21 }
  0x5a   :  { %9468 = vset.pattern.permute.xlu1 %v15210_v12  ;;  %1196 = vperm.xlu0 %9471, %v98_v26   ;;  %15429 = vst [vmem:[#allocation17_spill] sm:$0xff] %v10109_v22  ;;  %15430 = vst [vmem:[#allocation18_spill] sm:$0xff] %v10111_v23 }
  0x5b   :  { %856 = vperm.xlu1 %9468, %v57_v17   ;;  %15431 = vst [vmem:[#allocation19_spill] sm:$0xff] %v10113_v24 }
  0x5e   :  { %1915 = vperm.xlu0 %9471, %v164_v28  }
  0x5f   :  { %9470 = vset.pattern.permute.xlu1 %v15212_v3  ;;  %v180_v3 = vld [vmem:[%s15198_s6 + $0x88] sm:$0xff] }
  0x60   :  { %1121 = vperm.xlu1 %9470, %v83_v27  }
  0x62   :  { %1925 = vperm.xlu0 %9471, %v166_v31  }
  0x64   :  { %1126 = vperm.xlu1 %9470, %v84_v29  }
  0x66   :  { %1935 = vperm.xlu0 %9471, %v168_v33  }
  0x68   :  { %1136 = vperm.xlu1 %9470, %v86_v30  }
  0x6a   :  { %1945 = vperm.xlu0 %9471, %v170_v36   ;;  %v167_v36 = vld [vmem:[%s15198_s6 + $0x20] sm:$0xff] }
  0x6c   :  { %1141 = vperm.xlu1 %9470, %v87_v32  }
  0x6e   :  { %1955 = vperm.xlu0 %9471, %v172_v53  }
  0x70   :  { %1151 = vperm.xlu1 %9470, %v89_v34  }
  0x72   :  { %1965 = vperm.xlu0 %9471, %v174_v25  }
  0x74   :  { %1161 = vperm.xlu1 %9470, %v91_v35  }
  0x76   :  { %1975 = vperm.xlu0 %9471, %v176_v43  }
  0x78   :  { %1171 = vperm.xlu1 %9470, %v93_v38  }
  0x7c   :  { %1181 = vperm.xlu1 %9470, %v95_v40  }
  0x80   :  { %1191 = vperm.xlu1 %9470, %v97_v47  }
  0x84   :  { %v538_v4 = vpop.permute.xlu1 %537  ;;  %v402_v5 = vpop.permute.xlu0 %401  ;;  %1910 = vperm.xlu1 %9470, %v163_v58  }
  0x85   :  { %v472_v17 = vmul.f32 %v10050_v54, %v402_v5  ;;  %v474_v18 = vmul.f32 %v10053_v55, %v402_v5  ;;  %v471_v19 = vmul.f32 %v10056_v56, %v402_v5  ;;  %v473_v20 = vmul.f32 %v10059_v57, %v402_v5 }
  0x86   :  { %v476_v28 = vmul.f32 %v10079_v2, %v402_v5  ;;  %v478_v29 = vmul.f32 %v10084_v7, %v402_v5  ;;  %v475_v30 = vmul.f32 %v10087_v9, %v402_v5  ;;  %v477_v31 = vmul.f32 %v10090_v10, %v402_v5 }
  0x87   :  { %v10129_v38 = vadd.f32 %v538_v4, %v472_v17  ;;  %v10131_v40 = vadd.f32 %v538_v4, %v474_v18  ;;  %v10133_v41 = vadd.f32 %v538_v4, %v471_v19  ;;  %v10135_v42 = vadd.f32 %v538_v4, %v473_v20  ;;  %v169_v19 = vld [vmem:[%s15198_s6 + $0x30] sm:$0xff] }
  0x88   :  { %v543_v26 = vpop.permute.xlu1 %542  ;;  %v407_v27 = vpop.permute.xlu0 %406  ;;  %1920 = vperm.xlu1 %9470, %v165_v11   ;;  %v10144_v50 = vadd.f32 %v538_v4, %v476_v28  ;;  %v10146_v51 = vadd.f32 %v538_v4, %v478_v29  ;;  %v10148_v52 = vadd.f32 %v538_v4, %v475_v30  ;;  %v10150_v53 = vadd.f32 %v538_v4, %v477_v31  ;;  %v178_v4 = vld [vmem:[%s15198_s6 + $0x78] sm:$0xff] }
  0x89   :  { %v480_v32 = vmul.f32 %v10050_v54, %v407_v27  ;;  %v482_v33 = vmul.f32 %v10053_v55, %v407_v27  ;;  %v479_v34 = vmul.f32 %v10056_v56, %v407_v27  ;;  %v481_v35 = vmul.f32 %v10059_v57, %v407_v27  ;;  %1985 = vperm.xlu0 %9471, %v178_v4  }
  0x8a   :  { %v484_v44 = vmul.f32 %v10079_v2, %v407_v27  ;;  %v486_v46 = vmul.f32 %v10084_v7, %v407_v27  ;;  %v483_v47 = vmul.f32 %v10087_v9, %v407_v27  ;;  %v485_v48 = vmul.f32 %v10090_v10, %v407_v27  ;;  %15432 = vst [vmem:[#allocation20_spill] sm:$0xff] %v10144_v50 }
  0x8b   :  { %15433 = vst [vmem:[#allocation21_spill] sm:$0xff] %v10146_v51  ;;  %15434 = vst [vmem:[#allocation22_spill] sm:$0xff] %v10148_v52  ;;  %v584_v5 = vadd.f32 %v543_v26, %v480_v32  ;;  %v586_v11 = vadd.f32 %v543_v26, %v482_v33  ;;  %v583_v17 = vadd.f32 %v543_v26, %v479_v34 }
  0x8c   :  { %v417_v49 = vpop.permute.xlu0 %416  ;;  %1930 = vperm.xlu1 %9470, %v167_v36   ;;  %15435 = vst [vmem:[#allocation23_spill] sm:$0xff] %v10150_v53  ;;  %v585_v18 = vadd.f32 %v543_v26, %v481_v35  ;;  %v588_v29 = vadd.f32 %v543_v26, %v484_v44  ;;  %v590_v30 = vadd.f32 %v543_v26, %v486_v46  ;;  %v171_v46 = vld [vmem:[%s15198_s6 + $0x40] sm:$0xff] }
  0x8d   :  { %v645_v58 = vpop.permute.xlu1 %644  ;;  %v587_v31 = vadd.f32 %v543_v26, %v483_v47  ;;  %v589_v32 = vadd.f32 %v543_v26, %v485_v48  ;;  %v10167_v37 = vmul.f32 %v10050_v54, %v417_v49  ;;  %v10170_v8 = vmul.f32 %v10053_v55, %v417_v49  ;;  %1995 = vperm.xlu0 %9471, %v180_v3  }
  0x8e   :  { %v712_v20 = vmul.f32 %v10064_v59, %v645_v58  ;;  %v714_v25 = vmul.f32 %v10066_v60, %v645_v58  ;;  %v711_v27 = vmul.f32 %v10068_v61, %v645_v58  ;;  %v713_v28 = vmul.f32 %v10070_v62, %v645_v58 }
  0x8f   :  { %v716_v34 = vmul.f32 %v10095_v13, %v645_v58  ;;  %v718_v35 = vmul.f32 %v10097_v14, %v645_v58  ;;  %v715_v36 = vmul.f32 %v10099_v15, %v645_v58  ;;  %v717_v43 = vmul.f32 %v10101_v16, %v645_v58  ;;  %v175_v14 = vld [vmem:[%s15198_s6 + $0x60] sm:$0xff] }
  0x90   :  { %v548_v33 = vpop.permute.xlu0 %547  ;;  %1940 = vperm.xlu1 %9470, %v169_v19   ;;  %v10173_v44 = vmul.f32 %v10056_v56, %v417_v49  ;;  %v10176_v26 = vmul.f32 %v10059_v57, %v417_v49  ;;  %v10181_v48 = vadd.f32 %v712_v20, %v584_v5  ;;  %v10183_v58 = vadd.f32 %v714_v25, %v586_v11 }
  0x91   :  { %v10185_v19 = vadd.f32 %v711_v27, %v583_v17  ;;  %v10187_v12 = vadd.f32 %v713_v28, %v585_v18  ;;  %v10196_v20 = vadd.f32 %v716_v34, %v588_v29  ;;  %v10198_v11 = vadd.f32 %v718_v35, %v590_v30  ;;  %v173_v29 = vld [vmem:[%s15198_s6 + $0x50] sm:$0xff]  ;;  %v182_v35 = vld [vmem:[%s15198_s6 + $0x98] sm:$0xff] }
  0x92   :  { %v412_v47 = vpop.permute.xlu1 %411  ;;  %v10200_v17 = vadd.f32 %v715_v36, %v587_v31  ;;  %v10202_v18 = vadd.f32 %v717_v43, %v589_v32  ;;  %v10212_v30 = vmul.f32 %v10079_v2, %v417_v49  ;;  %v10215_v31 = vmul.f32 %v10084_v7, %v417_v49  ;;  %2005 = vperm.xlu0 %9471, %v182_v35  }
  0x93   :  { %v488_v39 = vmul.f32 %v10050_v54, %v412_v47  ;;  %v490_v45 = vmul.f32 %v10053_v55, %v412_v47  ;;  %v487_v53 = vmul.f32 %v10056_v56, %v412_v47  ;;  %v489_v4 = vmul.f32 %v10059_v57, %v412_v47 }
  0x94   :  { %v427_v5 = vpop.permute.xlu0 %426  ;;  %1950 = vperm.xlu1 %9470, %v171_v46   ;;  %v492_v25 = vmul.f32 %v10079_v2, %v412_v47  ;;  %v494_v27 = vmul.f32 %v10084_v7, %v412_v47  ;;  %v491_v28 = vmul.f32 %v10087_v9, %v412_v47  ;;  %v493_v52 = vmul.f32 %v10090_v10, %v412_v47 }
  0x95   :  { %v10218_v32 = vmul.f32 %v10087_v9, %v417_v49  ;;  %v10221_v34 = vmul.f32 %v10090_v10, %v417_v49  ;;  %v10226_v43 = vadd.f32 %v548_v33, %v488_v39  ;;  %v10228_v3 = vadd.f32 %v548_v33, %v490_v45 }
  0x96   :  { %v10230_v46 = vadd.f32 %v548_v33, %v487_v53  ;;  %v10232_v47 = vadd.f32 %v548_v33, %v489_v4  ;;  %v10237_v50 = vmul.f32 %v10050_v54, %v427_v5  ;;  %v10240_v49 = vmul.f32 %v10053_v55, %v427_v5 }
  0x97   :  { %v833_v36 = vpop.permute.xlu1 %832  ;;  %v10243_v16 = vmul.f32 %v10056_v56, %v427_v5  ;;  %v10246_v39 = vmul.f32 %v10059_v57, %v427_v5  ;;  %v10248_v45 = vadd.f32 %v548_v33, %v492_v25  ;;  %v10250_v53 = vadd.f32 %v548_v33, %v494_v27 }
  0x98   :  { %v10234_v51 = vpop.permute.xlu0 %557  ;;  %15437 = vst [vmem:[#allocation25_spill] sm:$0xff] %v10237_v50  ;;  %15438 = vst [vmem:[#allocation26_spill] sm:$0xff] %v10240_v49  ;;  %1960 = vperm.xlu1 %9470, %v173_v29   ;;  %v10252_v4 = vadd.f32 %v548_v33, %v491_v28  ;;  %v10254_v15 = vadd.f32 %v548_v33, %v493_v52  ;;  %v10260_v13 = vmul.f32 %v10072_v63, %v833_v36  ;;  %v184_v52 = vld [vmem:[%s15198_s6 + $0xa8] sm:$0xff] }
  0x99   :  { %15436 = vst [vmem:[#allocation24_spill] sm:$0xff] %v10234_v51  ;;  %15439 = vst [vmem:[#allocation27_spill] sm:$0xff] %v10243_v16  ;;  %v10263_v16 = vmul.f32 %v10074_v0, %v833_v36  ;;  %v10266_v25 = vmul.f32 %v10076_v1, %v833_v36  ;;  %v10269_v27 = vmul.f32 %v10081_v6, %v833_v36  ;;  %2015 = vperm.xlu0 %9471, %v184_v52  }
  0x9a   :  { %15440 = vst [vmem:[#allocation28_spill] sm:$0xff] %v10246_v39  ;;  %15441 = vst [vmem:[#allocation29_spill] sm:$0xff] %v10248_v45  ;;  %v10275_v28 = vmul.f32 %v10107_v21, %v833_v36  ;;  %v10278_v29 = vmul.f32 %v10109_v22, %v833_v36  ;;  %v10281_v35 = vmul.f32 %v10111_v23, %v833_v36 }
  0x9b   :  { %15442 = vst [vmem:[#allocation30_spill] sm:$0xff] %v10250_v53  ;;  %15443 = vst [vmem:[#allocation31_spill] sm:$0xff] %v10252_v4  ;;  %v837_v33 = vpop.permute.xlu1 %836 }
  0x9c   :  { %15444 = vst [vmem:[#allocation32_spill] sm:$0xff] %v10254_v15  ;;  %15445 = vst [vmem:[#allocation33_spill] sm:$0xff] %v10275_v28  ;;  %v10284_v15 = vmul.f32 %v10113_v24, %v833_v36  ;;  %v437_v4 = vpop.permute.xlu0 %436  ;;  %v904_v53 = vmul.f32 %v10072_v63, %v837_v33  ;;  %v906_v45 = vmul.f32 %v10074_v0, %v837_v33  ;;  %1970 = vperm.xlu1 %9470, %v175_v14  }
  0x9d   :  { %15446 = vst [vmem:[#allocation34_spill] sm:$0xff] %v10278_v29  ;;  %15447 = vst [vmem:[#allocation35_spill] sm:$0xff] %v10281_v35  ;;  %v903_v39 = vmul.f32 %v10076_v1, %v837_v33  ;;  %v905_v49 = vmul.f32 %v10081_v6, %v837_v33  ;;  %v10291_v28 = vmul.f32 %v10079_v2, %v427_v5 }
  0x9e   :  { %15448 = vst [vmem:[#allocation36_spill] sm:$0xff] %v10284_v15  ;;  %v10294_v29 = vmul.f32 %v10084_v7, %v427_v5  ;;  %v10297_v35 = vmul.f32 %v10087_v9, %v427_v5  ;;  %v10300_v36 = vmul.f32 %v10090_v10, %v427_v5  ;;  %v177_v15 = vld [vmem:[%s15198_s6 + $0x70] sm:$0xff]  ;;  %v10306_v50 = vadd.f32 %v904_v53, %v10181_v48  ;;  %v186_v5 = vld [vmem:[%s15198_s6 + $0xb8] sm:$0xff] }
  0x9f   :  { %15449 = vst [vmem:[#allocation37_spill] sm:$0xff] %v10291_v28  ;;  %v10309_v14 = vadd.f32 %v906_v45, %v10183_v58  ;;  %v10312_v28 = vadd.f32 %v903_v39, %v10185_v19  ;;  %v910_v52 = vmul.f32 %v10109_v22, %v837_v33  ;;  %v907_v48 = vmul.f32 %v10111_v23, %v837_v33  ;;  %v179_v22 = vld [vmem:[%s15198_s6 + $0x80] sm:$0xff] }
  0xa0   :  { %15450 = vst [vmem:[#allocation38_spill] sm:$0xff] %v10294_v29  ;;  %15451 = vst [vmem:[#allocation39_spill] sm:$0xff] %v10297_v35  ;;  %v10315_v29 = vadd.f32 %v905_v49, %v10187_v12  ;;  %v909_v53 = vmul.f32 %v10113_v24, %v837_v33  ;;  %v553_v58 = vpop.permute.xlu1 %552  ;;  %v10324_v45 = vpop.permute.xlu0 %567  ;;  %v10327_v19 = vmul.f32 %v10050_v54, %v437_v4  ;;  %1980 = vperm.xlu1 %9470, %v177_v15  }
  0xa1   :  { %15452 = vst [vmem:[#allocation40_spill] sm:$0xff] %v10300_v36  ;;  %v908_v36 = vmul.f32 %v10107_v21, %v837_v33  ;;  %v10330_v12 = vmul.f32 %v10053_v55, %v437_v4  ;;  %v10333_v49 = vmul.f32 %v10056_v56, %v437_v4  ;;  %v10336_v39 = vmul.f32 %v10059_v57, %v437_v4  ;;  %v188_v33 = vld [vmem:[%s15198_s6 + $0xc8] sm:$0xff] }
  0xa2   :  { %2025 = vperm.xlu0 %9471, %v186_v5   ;;  %v601_v15 = vadd.f32 %v553_v58, %v10176_v26  ;;  %v10356_v23 = vadd.f32 %v910_v52, %v10198_v11  ;;  %v10359_v5 = vadd.f32 %v907_v48, %v10200_v17  ;;  %v10371_v26 = vadd.f32 %v553_v58, %v10218_v32 }
  0xa3   :  { %15453 = vst [vmem:[#allocation41_spill] sm:$0xff] %v10330_v12  ;;  %15454 = vst [vmem:[#allocation42_spill] sm:$0xff] %v10333_v49  ;;  %v600_v12 = vadd.f32 %v553_v58, %v10167_v37  ;;  %v602_v49 = vadd.f32 %v553_v58, %v10170_v8  ;;  %v10353_v24 = vadd.f32 %v908_v36, %v10196_v20 }
  0xa4   :  { %15455 = vst [vmem:[#allocation43_spill] sm:$0xff] %v10336_v39  ;;  %v599_v39 = vadd.f32 %v553_v58, %v10173_v44  ;;  %v10362_v37 = vadd.f32 %v909_v53, %v10202_v18  ;;  %v10365_v8 = vadd.f32 %v553_v58, %v10212_v30  ;;  %v10368_v44 = vadd.f32 %v553_v58, %v10215_v31 }
  0xa5   :  { %v10374_v20 = vadd.f32 %v553_v58, %v10221_v34  ;;  %1990 = vperm.xlu1 %9470, %v179_v22   ;;  %v10376_v11 = vpop.permute.xlu1 %652  ;;  %v10378_v17 = vpop.permute.xlu0 %640  ;;  %v10381_v18 = vmul.f32 %v10079_v2, %v437_v4  ;;  %v10384_v30 = vmul.f32 %v10084_v7, %v437_v4  ;;  %v10387_v31 = vmul.f32 %v10087_v9, %v437_v4  ;;  %v181_v22 = vld [vmem:[%s15198_s6 + $0x90] sm:$0xff] }
  0xa6   :  { %v10390_v32 = vmul.f32 %v10090_v10, %v437_v4  ;;  %2035 = vperm.xlu0 %9471, %v188_v33   ;;  %v704_v34 = vmul.f32 %v10064_v59, %v10378_v17  ;;  %v706_v36 = vmul.f32 %v10066_v60, %v10378_v17  ;;  %v703_v52 = vmul.f32 %v10068_v61, %v10378_v17  ;;  %v190_v4 = vld [vmem:[%s15198_s6 + $0xd8] sm:$0xff] }
  0xa7   :  { %15456 = vst [vmem:[#allocation44_spill] sm:$0xff] %v10374_v20  ;;  %15457 = vst [vmem:[#allocation45_spill] sm:$0xff] %v10381_v18  ;;  %v705_v48 = vmul.f32 %v10070_v62, %v10378_v17  ;;  %v728_v53 = vmul.f32 %v10064_v59, %v10376_v11  ;;  %v730_v58 = vmul.f32 %v10066_v60, %v10376_v11 }
  0xa8   :  { %15458 = vst [vmem:[#allocation46_spill] sm:$0xff] %v10384_v30  ;;  %15459 = vst [vmem:[#allocation47_spill] sm:$0xff] %v10387_v31  ;;  %v727_v33 = vmul.f32 %v10068_v61, %v10376_v11  ;;  %v729_v35 = vmul.f32 %v10070_v62, %v10376_v11  ;;  %v770_v31 = vadd.f32 %v706_v36, %v10131_v40 }
  0xa9   :  { %15460 = vst [vmem:[#allocation48_spill] sm:$0xff] %v10390_v32  ;;  %v768_v32 = vadd.f32 %v704_v34, %v10129_v38  ;;  %v767_v30 = vadd.f32 %v703_v52, %v10133_v41  ;;  %v769_v18 = vadd.f32 %v705_v48, %v10135_v42  ;;  %2000 = vperm.xlu1 %9470, %v181_v22   ;;  %v10418_v10 = vpop.permute.xlu0 %648  ;;  %v183_v38 = vld [vmem:[%s15198_s6 + $0xa0] sm:$0xff]  ;;  %v15463_v52 = vmax.f32 %v10306_v50, 0.0 }
  0xaa   :  { %v10420_v9 = vadd.f32 %v728_v53, %v600_v12  ;;  %v10422_v7 = vadd.f32 %v730_v58, %v602_v49  ;;  %v10424_v2 = vadd.f32 %v727_v33, %v599_v39  ;;  %v10426_v20 = vadd.f32 %v729_v35, %v601_v15  ;;  %2045 = vperm.xlu0 %9471, %v190_v4   ;;  %v10431_v40 = vpop.permute.xlu1 %421  ;;  %v192_v35 = vld [vmem:[%s15198_s6 + $0xe8] sm:$0xff] }
  0xab   :  { %15461 = vst [vmem:[#allocation49_spill] sm:$0xff] %v10431_v40  ;;  %v960_v41 = vadd.f32 %v10260_v13, %v768_v32  ;;  %v962_v42 = vadd.f32 %v10263_v16, %v770_v31  ;;  %v959_v12 = vadd.f32 %v10266_v25, %v767_v30  ;;  %v961_v49 = vadd.f32 %v10269_v27, %v769_v18 }
  0xac   :  { %v720_v39 = vmul.f32 %v10064_v59, %v10418_v10  ;;  %v722_v15 = vmul.f32 %v10066_v60, %v10418_v10  ;;  %v719_v22 = vmul.f32 %v10068_v61, %v10418_v10  ;;  %v721_v13 = vmul.f32 %v10070_v62, %v10418_v10 }
  0xad   :  { %v1024_v16 = vmax.f32 %v960_v41, 0.0  ;;  %v1026_v25 = vmax.f32 %v962_v42, 0.0  ;;  %v1023_v30 = vmax.f32 %v959_v12, 0.0  ;;  %v1025_v27 = vmax.f32 %v961_v49, 0.0  ;;  %2010 = vperm.xlu1 %9470, %v183_v38   ;;  %v10448_v18 = vpop.permute.xlu0 %656  ;;  %v194_v49 = vld [vmem:[%s15198_s6 + $0xf8] sm:$0xff] }
  0xae   :  { %15462 = vst [vmem:[#allocation50_spill] sm:$0xff] %v10448_v18  ;;  %v784_v31 = vadd.f32 %v720_v39, %v10226_v43  ;;  %v786_v32 = vadd.f32 %v722_v15, %v10228_v3  ;;  %v783_v34 = vadd.f32 %v719_v22, %v10230_v46  ;;  %v785_v36 = vadd.f32 %v721_v13, %v10232_v47 }
  0xaf   :  { %2055 = vperm.xlu0 %9471, %v192_v35   ;;  %v10456_v48 = vpack.c.bf16 %v15463_v52, %v1024_v16  ;;  %v15465_v4 = vmax.f32 %v10309_v14, 0.0  ;;  %v15467_v58 = vmax.f32 %v10312_v28, 0.0  ;;  %v15469_v43 = vmax.f32 %v10315_v29, 0.0  ;;  %v10470_v46 = vpop.permute.xlu1 %840  ;;  %v185_v29 = vld [vmem:[%s15198_s6 + $0xb0] sm:$0xff] }
  0xb0   :  { %v504_v47 = vmul.f32 %v10050_v54, %v10431_v40  ;;  %v736_v50 = vmul.f32 %v10064_v59, %v10448_v18  ;;  %v506_v14 = vmul.f32 %v10053_v55, %v10431_v40  ;;  %v738_v28 = vmul.f32 %v10066_v60, %v10448_v18 }
  0xb1   :  { %15464 = vst [vmem:[#allocation51_spill] sm:$0xff] %v10456_v48  ;;  %v10460_v53 = vpack.c.bf16 %v15465_v4, %v1026_v25  ;;  %v10464_v33 = vpack.c.bf16 %v15467_v58, %v1023_v30  ;;  %v10468_v3 = vpack.c.bf16 %v15469_v43, %v1025_v27  ;;  %1264 = vmatprep.subr.bf16.mxu0 %v10456_v48 }
  0xb2   :  { %v912_v38 = vmul.f32 %v10072_v63, %v10470_v46  ;;  %v914_v41 = vmul.f32 %v10074_v0, %v10470_v46  ;;  %v911_v42 = vmul.f32 %v10076_v1, %v10470_v46  ;;  %v913_v35 = vmul.f32 %v10081_v6, %v10470_v46  ;;  %2020 = vperm.xlu1 %9470, %v185_v29  }
  0xb3   :  { %15466 = vst [vmem:[#allocation52_spill] sm:$0xff] %v10460_v53  ;;  %15468 = vst [vmem:[#allocation53_spill] sm:$0xff] %v10464_v33  ;;  %1377 = vmatprep.subr.bf16.mxu1 %v10460_v53  ;;  %1265 = vmatpush1.bf16.msra.mxu0 %v10464_v33  ;;  %v608_v39 = vadd.f32 %v10234_v51, %v504_v47  ;;  %v610_v15 = vadd.f32 %v10234_v51, %v506_v14  ;;  %v10504_v27 = vpop.permute.xlu1 %844  ;;  %v196_v14 = vld [vmem:[%s15198_s6 + $0x108] sm:$0xff]  ;;  %v15490_v33 = vld [vmem:[#allocation15_spill] sm:$0xff] }
  0xb4   :  { %15470 = vst [vmem:[#allocation54_spill] sm:$0xff] %v10468_v3  ;;  %1378 = vmatpush1.bf16.msra.mxu1 %v10468_v3  ;;  %v976_v13 = vadd.f32 %v912_v38, %v784_v31  ;;  %v978_v16 = vadd.f32 %v914_v41, %v786_v32  ;;  %v975_v25 = vadd.f32 %v911_v42, %v783_v34  ;;  %v187_v31 = vld [vmem:[%s15198_s6 + $0xc0] sm:$0xff] }
  0xb5   :  { %v503_v30 = vmul.f32 %v10056_v56, %v10431_v40  ;;  %v977_v52 = vadd.f32 %v913_v35, %v785_v36  ;;  %v10506_v4 = vadd.f32 %v736_v50, %v608_v39  ;;  %v10508_v58 = vadd.f32 %v738_v28, %v610_v15  ;;  %2065 = vperm.xlu0 %9471, %v194_v49   ;;  %v10519_v50 = vpop.permute.xlu0 %664 }
  0xb6   :  { %v735_v43 = vmul.f32 %v10068_v61, %v10448_v18  ;;  %v920_v32 = vmul.f32 %v10072_v63, %v10504_v27  ;;  %v1040_v34 = vmax.f32 %v976_v13, 0.0  ;;  %v922_v47 = vmul.f32 %v10074_v0, %v10504_v27  ;;  %15471 = vst [vmem:[#allocation55_spill] sm:$0xff] %v10519_v50  ;;  %2030 = vperm.xlu1 %9470, %v187_v31  }
  0xb7   :  { %v1042_v36 = vmax.f32 %v978_v16, 0.0  ;;  %v919_v28 = vmul.f32 %v10076_v1, %v10504_v27  ;;  %v1039_v29 = vmax.f32 %v975_v25, 0.0  ;;  %v921_v38 = vmul.f32 %v10081_v6, %v10504_v27 }
  0xb8   :  { %v1041_v41 = vmax.f32 %v977_v52, 0.0  ;;  %v984_v42 = vadd.f32 %v920_v32, %v10420_v9  ;;  %v986_v49 = vadd.f32 %v922_v47, %v10422_v7  ;;  %v607_v35 = vadd.f32 %v10234_v51, %v503_v30  ;;  %v189_v7 = vld [vmem:[%s15198_s6 + $0xd0] sm:$0xff]  ;;  %v10544_v9 = vpop.permute.xlu1 %562  ;;  %v198_v32 = vld [vmem:[%s15198_s6 + $0x118] sm:$0xff] }
  0xb9   :  { %v505_v39 = vmul.f32 %v10059_v57, %v10431_v40  ;;  %v983_v15 = vadd.f32 %v919_v28, %v10424_v2  ;;  %v985_v13 = vadd.f32 %v921_v38, %v10426_v20  ;;  %v737_v16 = vmul.f32 %v10070_v62, %v10448_v18  ;;  %2075 = vperm.xlu0 %9471, %v196_v14   ;;  %v10549_v20 = vpop.permute.xlu0 %860  ;;  %v15474_v38 = vld [vmem:[#allocation25_spill] sm:$0xff]  ;;  %v15475_v14 = vld [vmem:[#allocation26_spill] sm:$0xff]  ;;  %v202_v18 = vld [vmem:[%s15198_s6 + $0x138] sm:$0xff] }
  0xba   :  { %v10539_v25 = vmul.f32 %v10064_v59, %v10519_v50  ;;  %15472 = vst [vmem:[#allocation56_spill] sm:$0xff] %v10544_v9  ;;  %v1048_v30 = vmax.f32 %v984_v42, 0.0  ;;  %v1050_v52 = vmax.f32 %v986_v49, 0.0  ;;  %v10546_v31 = vadd.f32 %v735_v43, %v607_v35  ;;  %15473 = vst [vmem:[#allocation57_spill] sm:$0xff] %v10549_v20  ;;  %v15478_v49 = vld [vmem:[#allocation27_spill] sm:$0xff]  ;;  %2040 = vperm.xlu1 %9470, %v189_v7   ;;  %v200_v7 = vld [vmem:[%s15198_s6 + $0x128] sm:$0xff] }
  0xbb   :  { %v609_v2 = vadd.f32 %v10234_v51, %v505_v39  ;;  %v1047_v47 = vmax.f32 %v983_v15, 0.0  ;;  %v1049_v28 = vmax.f32 %v985_v13, 0.0  ;;  %v616_v22 = vadd.f32 %v10544_v9, %v15474_v38  ;;  %v15479_v39 = vld [vmem:[#allocation28_spill] sm:$0xff] }
  0xbc   :  { %v618_v12 = vadd.f32 %v10544_v9, %v15475_v14  ;;  %v10558_v42 = vpack.c.bf16 %v1048_v30, %v1040_v34  ;;  %v10560_v43 = vpack.c.bf16 %v1050_v52, %v1042_v36  ;;  %v615_v35 = vadd.f32 %v10544_v9, %v15478_v49  ;;  %v191_v34 = vld [vmem:[%s15198_s6 + $0xe0] sm:$0xff] }
  0xbd   :  { %v617_v3 = vadd.f32 %v10544_v9, %v15479_v39  ;;  %v10566_v53 = vpack.c.bf16 %v1047_v47, %v1039_v29  ;;  %v10568_v15 = vpack.c.bf16 %v1049_v28, %v1041_v41  ;;  %v10570_v13 = vadd.f32 %v737_v16, %v609_v2  ;;  %2085 = vperm.xlu0 %9471, %v198_v32   ;;  %v10593_v30 = vpop.permute.xlu1 %660  ;;  %v15487_v16 = vld [vmem:[#allocation12_spill] sm:$0xff] }
  0xbe   :  { %15476 = vst [vmem:[#allocation25_spill] sm:$0xff] %v10558_v42  ;;  %15477 = vst [vmem:[#allocation26_spill] sm:$0xff] %v10560_v43  ;;  %v10574_v38 = vmul.f32 %v10072_v63, %v10549_v20  ;;  %1266 = vmatprep.subr.bf16.mxu0 %v10558_v42  ;;  %1379 = vmatprep.subr.bf16.mxu1 %v10560_v43  ;;  %v754_v36 = vmul.f32 %v10066_v60, %v10519_v50  ;;  %v1037_v47 = vmax.f32 %v10362_v37, 0.0  ;;  %v15488_v43 = vld [vmem:[#allocation13_spill] sm:$0xff]  ;;  %v15489_v37 = vld [vmem:[#allocation14_spill] sm:$0xff] }
  0xbf   :  { %15480 = vst [vmem:[#allocation27_spill] sm:$0xff] %v10566_v53  ;;  %15481 = vst [vmem:[#allocation28_spill] sm:$0xff] %v10568_v15  ;;  %v10585_v29 = vmul.f32 %v10074_v0, %v10549_v20  ;;  %v751_v41 = vmul.f32 %v10068_v61, %v10519_v50  ;;  %1267 = vmatpush1.bf16.msra.mxu0 %v10566_v53  ;;  %1380 = vmatpush1.bf16.msra.mxu1 %v10568_v15  ;;  %v15491_v9 = vld [vmem:[#allocation20_spill] sm:$0xff] }
  0xc0   :  { %15482 = vst [vmem:[#allocation58_spill] sm:$0xff] %v10574_v38  ;;  %15484 = vst [vmem:[#allocation60_spill] sm:$0xff] %v10593_v30  ;;  %v10599_v52 = vmul.f32 %v10076_v1, %v10549_v20  ;;  %v753_v2 = vmul.f32 %v10070_v62, %v10519_v50  ;;  %v10605_v32 = vmul.f32 %v10081_v6, %v10549_v20  ;;  %2050 = vperm.xlu1 %9470, %v191_v34   ;;  %v193_v20 = vld [vmem:[%s15198_s6 + $0xf0] sm:$0xff] }
  0xc1   :  { %15483 = vst [vmem:[#allocation59_spill] sm:$0xff] %v10585_v29  ;;  %v744_v28 = vmul.f32 %v10064_v59, %v10593_v30  ;;  %v746_v14 = vmul.f32 %v10066_v60, %v10593_v30  ;;  %v743_v49 = vmul.f32 %v10068_v61, %v10593_v30  ;;  %v745_v39 = vmul.f32 %v10070_v62, %v10593_v30  ;;  %v15494_v38 = vld [vmem:[#allocation23_spill] sm:$0xff] }
  0xc2   :  { %15485 = vst [vmem:[#allocation61_spill] sm:$0xff] %v10599_v52  ;;  %15486 = vst [vmem:[#allocation62_spill] sm:$0xff] %v10605_v32  ;;  %v708_v15 = vmul.f32 %v15487_v16, %v10378_v17  ;;  %v710_v53 = vmul.f32 %v15488_v43, %v10378_v17  ;;  %v707_v42 = vmul.f32 %v15489_v37, %v10378_v17  ;;  %2095 = vperm.xlu0 %9471, %v200_v7   ;;  %v15493_v52 = vld [vmem:[#allocation22_spill] sm:$0xff] }
  0xc3   :  { %v709_v48 = vmul.f32 %v15490_v33, %v10378_v17  ;;  %v10627_v50 = vadd.f32 %v744_v28, %v616_v22  ;;  %v10629_v34 = vadd.f32 %v746_v14, %v618_v12  ;;  %v10631_v51 = vadd.f32 %v743_v49, %v615_v35  ;;  %v15492_v17 = vld [vmem:[#allocation21_spill] sm:$0xff]  ;;  %v10642_v22 = vpop.permute.xlu1 %431  ;;  %v15498_v49 = vld [vmem:[#allocation35_spill] sm:$0xff] }
  0xc4   :  { %v10633_v30 = vadd.f32 %v745_v39, %v617_v3  ;;  %v772_v40 = vadd.f32 %v708_v15, %v15491_v9  ;;  %v774_v32 = vadd.f32 %v710_v53, %v15492_v17  ;;  %v771_v29 = vadd.f32 %v707_v42, %v15493_v52  ;;  %15495 = vst [vmem:[#allocation12_spill] sm:$0xff] %v10642_v22  ;;  %v15496_v52 = vld [vmem:[#allocation33_spill] sm:$0xff]  ;;  %v15499_v39 = vld [vmem:[#allocation36_spill] sm:$0xff] }
  0xc5   :  { %v773_v7 = vadd.f32 %v709_v48, %v15494_v38  ;;  %v724_v12 = vmul.f32 %v15487_v16, %v10418_v10  ;;  %v732_v3 = vmul.f32 %v15487_v16, %v10376_v11  ;;  %v916_v35 = vmul.f32 %v10107_v21, %v10470_v46  ;;  %2060 = vperm.xlu1 %9470, %v193_v20   ;;  %v195_v38 = vld [vmem:[%s15198_s6 + $0x100] sm:$0xff]  ;;  %v15497_v20 = vld [vmem:[#allocation34_spill] sm:$0xff] }
  0xc6   :  { %v924_v9 = vmul.f32 %v10107_v21, %v10504_v27  ;;  %v520_v53 = vmul.f32 %v10050_v54, %v10642_v22  ;;  %v522_v48 = vmul.f32 %v10053_v55, %v10642_v22  ;;  %v519_v42 = vmul.f32 %v10056_v56, %v10642_v22  ;;  %2105 = vperm.xlu0 %9471, %v202_v18   ;;  %v204_v55 = vld [vmem:[%s15198_s6 + $0x148] sm:$0xff] }
  0xc7   :  { %v521_v15 = vmul.f32 %v10059_v57, %v10642_v22  ;;  %v964_v28 = vadd.f32 %v15496_v52, %v772_v40  ;;  %v966_v14 = vadd.f32 %v15497_v20, %v774_v32  ;;  %v963_v54 = vadd.f32 %v15498_v49, %v771_v29  ;;  %v10674_v29 = vpop.permute.xlu1 %848 }
  0xc8   :  { %v965_v17 = vadd.f32 %v15499_v39, %v773_v7  ;;  %v624_v56 = vadd.f32 %v10324_v45, %v520_v53  ;;  %v626_v57 = vadd.f32 %v10324_v45, %v522_v48  ;;  %v623_v22 = vadd.f32 %v10324_v45, %v519_v42  ;;  %v197_v48 = vld [vmem:[%s15198_s6 + $0x110] sm:$0xff] }
  0xc9   :  { %v625_v18 = vadd.f32 %v10324_v45, %v521_v15  ;;  %v1028_v21 = vmax.f32 %v964_v28, 0.0  ;;  %v1030_v40 = vmax.f32 %v966_v14, 0.0  ;;  %v1027_v52 = vmax.f32 %v963_v54, 0.0  ;;  %2070 = vperm.xlu1 %9470, %v195_v38  }
  0xca   :  { %v1029_v32 = vmax.f32 %v965_v17, 0.0  ;;  %v10677_v7 = vadd.f32 %v10539_v25, %v624_v56  ;;  %v10679_v20 = vadd.f32 %v754_v36, %v626_v57  ;;  %v10681_v49 = vadd.f32 %v751_v41, %v623_v22  ;;  %2115 = vperm.xlu0 %9471, %v204_v55   ;;  %v206_v41 = vld [vmem:[%s15198_s6 + $0x158] sm:$0xff] }
  0xcb   :  { %v10683_v53 = vadd.f32 %v753_v2, %v625_v18  ;;  %v928_v42 = vmul.f32 %v10072_v63, %v10674_v29  ;;  %v930_v15 = vmul.f32 %v10074_v0, %v10674_v29  ;;  %v927_v25 = vmul.f32 %v10076_v1, %v10674_v29 }
  0xcc   :  { %v929_v36 = vmul.f32 %v10081_v6, %v10674_v29  ;;  %v15500_v2 = vmax.f32 %v10353_v24, 0.0  ;;  %v15502_v38 = vmax.f32 %v10356_v23, 0.0  ;;  %v15504_v14 = vmax.f32 %v10359_v5, 0.0  ;;  %v15507_v23 = vld [vmem:[#allocation29_spill] sm:$0xff] }
  0xcd   :  { %v10711_v39 = vpack.c.bf16 %v1037_v47, %v1029_v32  ;;  %v992_v17 = vadd.f32 %v928_v42, %v10506_v4  ;;  %v994_v55 = vadd.f32 %v930_v15, %v10508_v58  ;;  %v991_v56 = vadd.f32 %v927_v25, %v10546_v31  ;;  %2080 = vperm.xlu1 %9470, %v197_v48   ;;  %v199_v4 = vld [vmem:[%s15198_s6 + $0x120] sm:$0xff] }
  0xce   :  { %v10701_v22 = vpack.c.bf16 %v15500_v2, %v1028_v21  ;;  %v10705_v28 = vpack.c.bf16 %v15502_v38, %v1030_v40  ;;  %v10709_v54 = vpack.c.bf16 %v15504_v14, %v1027_v52  ;;  %v993_v24 = vadd.f32 %v929_v36, %v10570_v13  ;;  %v10717_v21 = vpop.permute.xlu1 %852  ;;  %2125 = vperm.xlu0 %9471, %v206_v41   ;;  %v15508_v2 = vld [vmem:[#allocation30_spill] sm:$0xff] }
  0xcf   :  { %15506 = vst [vmem:[#allocation20_spill] sm:$0xff] %v10711_v39  ;;  %v788_v57 = vadd.f32 %v724_v12, %v15507_v23  ;;  %v796_v18 = vadd.f32 %v732_v3, %v10365_v8  ;;  %v726_v5 = vmul.f32 %v15488_v43, %v10418_v10  ;;  %v734_v47 = vmul.f32 %v15488_v43, %v10376_v11  ;;  %v208_v8 = vld [vmem:[%s15198_s6 + $0x168] sm:$0xff] }
  0xd0   :  { %15501 = vst [vmem:[#allocation13_spill] sm:$0xff] %v10701_v22  ;;  %15503 = vst [vmem:[#allocation14_spill] sm:$0xff] %v10705_v28  ;;  %v936_v58 = vmul.f32 %v10072_v63, %v10717_v21  ;;  %v1056_v31 = vmax.f32 %v992_v17, 0.0  ;;  %v938_v13 = vmul.f32 %v10074_v0, %v10717_v21  ;;  %v1058_v12 = vmax.f32 %v994_v55, 0.0  ;;  %v201_v17 = vld [vmem:[%s15198_s6 + $0x130] sm:$0xff] }
  0xd1   :  { %15505 = vst [vmem:[#allocation15_spill] sm:$0xff] %v10709_v54  ;;  %v935_v3 = vmul.f32 %v10076_v1, %v10717_v21  ;;  %v1055_v40 = vmax.f32 %v991_v56, 0.0  ;;  %v937_v52 = vmul.f32 %v10081_v6, %v10717_v21  ;;  %v1057_v32 = vmax.f32 %v993_v24, 0.0  ;;  %2090 = vperm.xlu1 %9470, %v199_v4   ;;  %v15509_v24 = vld [vmem:[#allocation41_spill] sm:$0xff]  ;;  %v15513_v4 = vld [vmem:[#allocation43_spill] sm:$0xff] }
  0xd2   :  { %v1000_v48 = vadd.f32 %v936_v58, %v10627_v50  ;;  %v1002_v42 = vadd.f32 %v938_v13, %v10629_v34  ;;  %v980_v15 = vadd.f32 %v916_v35, %v788_v57  ;;  %v988_v25 = vadd.f32 %v924_v9, %v796_v18  ;;  %2135 = vperm.xlu0 %9471, %v208_v8   ;;  %v10748_v55 = vpop.permute.xlu1 %572 }
  0xd3   :  { %v999_v36 = vadd.f32 %v935_v3, %v10631_v51  ;;  %v1001_v41 = vadd.f32 %v937_v52, %v10633_v30  ;;  %v790_v38 = vadd.f32 %v726_v5, %v15508_v2  ;;  %v798_v14 = vadd.f32 %v734_v47, %v10368_v44  ;;  %v210_v51 = vld [vmem:[%s15198_s6 + $0x178] sm:$0xff]  ;;  %v15512_v5 = vld [vmem:[#allocation42_spill] sm:$0xff] }
  0xd4   :  { %v1064_v50 = vmax.f32 %v1000_v48, 0.0  ;;  %v1066_v34 = vmax.f32 %v1002_v42, 0.0  ;;  %v1044_v35 = vmax.f32 %v980_v15, 0.0  ;;  %v1052_v9 = vmax.f32 %v988_v25, 0.0  ;;  %v212_v48 = vld [vmem:[%s15198_s6 + $0x188] sm:$0xff] }
  0xd5   :  { %v1063_v30 = vmax.f32 %v999_v36, 0.0  ;;  %v1065_v56 = vmax.f32 %v1001_v41, 0.0  ;;  %v632_v44 = vadd.f32 %v10748_v55, %v10327_v19  ;;  %v634_v23 = vadd.f32 %v10748_v55, %v15509_v24  ;;  %2100 = vperm.xlu1 %9470, %v201_v17   ;;  %v15517_v19 = vld [vmem:[#allocation17_spill] sm:$0xff]  ;;  %v15518_v25 = vld [vmem:[#allocation18_spill] sm:$0xff] }
  0xd6   :  { %v10757_v57 = vpack.c.bf16 %v1064_v50, %v1056_v31  ;;  %v10759_v18 = vpack.c.bf16 %v1066_v34, %v1058_v12  ;;  %v631_v47 = vadd.f32 %v10748_v55, %v15512_v5  ;;  %v633_v58 = vadd.f32 %v10748_v55, %v15513_v4  ;;  %v203_v31 = vld [vmem:[%s15198_s6 + $0x140] sm:$0xff]  ;;  %2145 = vperm.xlu0 %9471, %v210_v51   ;;  %v10787_v42 = vpop.permute.xlu1 %668 }
  0xd7   :  { %v10765_v13 = vpack.c.bf16 %v1063_v30, %v1055_v40  ;;  %v10767_v8 = vpack.c.bf16 %v1065_v56, %v1057_v32  ;;  %v10769_v3 = vpack.c.bf16 %v1052_v9, %v1044_v35  ;;  %v918_v52 = vmul.f32 %v15517_v19, %v10470_v46  ;;  %v15519_v9 = vld [vmem:[#allocation31_spill] sm:$0xff] }
  0xd8   :  { %15510 = vst [vmem:[#allocation21_spill] sm:$0xff] %v10757_v57  ;;  %15511 = vst [vmem:[#allocation22_spill] sm:$0xff] %v10759_v18  ;;  %1268 = vmatprep.subr.bf16.mxu0 %v10757_v57  ;;  %1381 = vmatprep.subr.bf16.mxu1 %v10759_v18  ;;  %v926_v12 = vmul.f32 %v15517_v19, %v10504_v27  ;;  %v723_v40 = vmul.f32 %v15489_v37, %v10418_v10 }
  0xd9   :  { %15514 = vst [vmem:[#allocation23_spill] sm:$0xff] %v10765_v13  ;;  %15515 = vst [vmem:[#allocation33_spill] sm:$0xff] %v10767_v8  ;;  %v731_v32 = vmul.f32 %v15489_v37, %v10376_v11  ;;  %1269 = vmatpush1.bf16.msra.mxu0 %v10765_v13  ;;  %1382 = vmatpush1.bf16.msra.mxu1 %v10767_v8  ;;  %v982_v15 = vadd.f32 %v918_v52, %v790_v38 }
  0xda   :  { %15516 = vst [vmem:[#allocation34_spill] sm:$0xff] %v10769_v3  ;;  %v915_v36 = vmul.f32 %v15518_v25, %v10470_v46  ;;  %v923_v41 = vmul.f32 %v15518_v25, %v10504_v27  ;;  %v760_v2 = vmul.f32 %v10064_v59, %v10787_v42  ;;  %v762_v17 = vmul.f32 %v10066_v60, %v10787_v42  ;;  %v205_v59 = vld [vmem:[%s15198_s6 + $0x150] sm:$0xff] }
  0xdb   :  { %v759_v50 = vmul.f32 %v10068_v61, %v10787_v42  ;;  %v761_v34 = vmul.f32 %v10070_v62, %v10787_v42  ;;  %2110 = vperm.xlu1 %9470, %v203_v31   ;;  %v990_v38 = vadd.f32 %v926_v12, %v798_v14  ;;  %v1046_v35 = vmax.f32 %v982_v15, 0.0  ;;  %2155 = vperm.xlu0 %9471, %v212_v48   ;;  %v214_v61 = vld [vmem:[%s15198_s6 + $0x198] sm:$0xff]  ;;  %v15520_v31 = vld [vmem:[#allocation58_spill] sm:$0xff] }
  0xdc   :  { %v787_v51 = vadd.f32 %v723_v40, %v15519_v9  ;;  %v795_v30 = vadd.f32 %v731_v32, %v10371_v26  ;;  %v824_v56 = vadd.f32 %v760_v2, %v632_v44  ;;  %v826_v60 = vadd.f32 %v762_v17, %v634_v23  ;;  %v10813_v26 = vpop.permute.xlu1 %856  ;;  %v15521_v40 = vld [vmem:[#allocation59_spill] sm:$0xff]  ;;  %v15522_v44 = vld [vmem:[#allocation61_spill] sm:$0xff] }
  0xdd   :  { %v823_v24 = vadd.f32 %v759_v50, %v631_v47  ;;  %v825_v5 = vadd.f32 %v761_v34, %v633_v58  ;;  %v1054_v62 = vmax.f32 %v990_v38, 0.0  ;;  %v725_v52 = vmul.f32 %v15490_v33, %v10418_v10  ;;  %v15523_v47 = vld [vmem:[#allocation62_spill] sm:$0xff] }
  0xde   :  { %v979_v14 = vadd.f32 %v915_v36, %v787_v51  ;;  %v987_v4 = vadd.f32 %v923_v41, %v795_v30  ;;  %v1016_v12 = vadd.f32 %v15520_v31, %v824_v56  ;;  %v1018_v32 = vadd.f32 %v15521_v40, %v826_v60  ;;  %v207_v41 = vld [vmem:[%s15198_s6 + $0x160] sm:$0xff] }
  0xdf   :  { %v1015_v23 = vadd.f32 %v15522_v44, %v823_v24  ;;  %v1017_v58 = vadd.f32 %v15523_v47, %v825_v5  ;;  %2120 = vperm.xlu1 %9470, %v205_v59   ;;  %v944_v48 = vmul.f32 %v10072_v63, %v10813_v26  ;;  %v946_v15 = vmul.f32 %v10074_v0, %v10813_v26  ;;  %v216_v63 = vld [vmem:[%s15198_s6 + $0x1a8] sm:$0xff] }
  0xe0   :  { %v943_v10 = vmul.f32 %v10076_v1, %v10813_v26  ;;  %v945_v36 = vmul.f32 %v10081_v6, %v10813_v26  ;;  %2165 = vperm.xlu0 %9471, %v214_v61   ;;  %v1080_v2 = vmax.f32 %v1016_v12, 0.0  ;;  %v1082_v17 = vmax.f32 %v1018_v32, 0.0  ;;  %v15533_v44 = vld [vmem:[#allocation49_spill] sm:$0xff] }
  0xe1   :  { %v1079_v50 = vmax.f32 %v1015_v23, 0.0  ;;  %v1081_v34 = vmax.f32 %v1017_v58, 0.0  ;;  %v1008_v0 = vadd.f32 %v944_v48, %v10677_v7  ;;  %v1010_v1 = vadd.f32 %v946_v15, %v10679_v20  ;;  %v209_v7 = vld [vmem:[%s15198_s6 + $0x170] sm:$0xff]  ;;  %v15534_v23 = vld [vmem:[#allocation8_spill] sm:$0xff]  ;;  %v15535_v47 = vld [vmem:[#allocation37_spill] sm:$0xff] }
  0xe2   :  { %v1007_v38 = vadd.f32 %v943_v10, %v10681_v49  ;;  %v1009_v6 = vadd.f32 %v945_v36, %v10683_v53  ;;  %v10837_v9 = vpack.c.bf16 %v1054_v62, %v1046_v35  ;;  %v1043_v51 = vmax.f32 %v979_v14, 0.0  ;;  %v15526_v49 = vld [vmem:[#allocation32_spill] sm:$0xff]  ;;  %v15528_v62 = vld [vmem:[#allocation19_spill] sm:$0xff]  ;;  %v15537_v15 = vld [vmem:[#allocation50_spill] sm:$0xff] }
  0xe3   :  { %v1051_v30 = vmax.f32 %v987_v4, 0.0  ;;  %v733_v59 = vmul.f32 %v15490_v33, %v10376_v11  ;;  %2130 = vperm.xlu1 %9470, %v207_v41   ;;  %v1072_v56 = vmax.f32 %v1008_v0, 0.0  ;;  %v1074_v60 = vmax.f32 %v1010_v1, 0.0  ;;  %v15527_v35 = vld [vmem:[#allocation44_spill] sm:$0xff] }
  0xe4   :  { %15524 = vst [vmem:[#allocation35_spill] sm:$0xff] %v10837_v9  ;;  %v1071_v24 = vmax.f32 %v1007_v38, 0.0  ;;  %v1073_v5 = vmax.f32 %v1009_v6, 0.0  ;;  %2175 = vperm.xlu0 %9471, %v216_v63   ;;  %v789_v53 = vadd.f32 %v725_v52, %v15526_v49  ;;  %v917_v14 = vmul.f32 %v15528_v62, %v10470_v46  ;;  %v15536_v58 = vld [vmem:[#allocation56_spill] sm:$0xff] }
  0xe5   :  { %v10844_v20 = vpack.c.bf16 %v1051_v30, %v1043_v51  ;;  %v797_v61 = vadd.f32 %v733_v59, %v15527_v35  ;;  %v10850_v11 = vpack.c.bf16 %v1080_v2, %v1072_v56  ;;  %v10852_v4 = vpack.c.bf16 %v1082_v17, %v1074_v60  ;;  %v10869_v46 = vld [vmem:[%s15195_s3] sm:$0xff]   ;;  %v15542_v59 = vld [vmem:[#allocation38_spill] sm:$0xff] }
  0xe6   :  { %v10854_v31 = vpack.c.bf16 %v1079_v50, %v1071_v24  ;;  %v10856_v12 = vpack.c.bf16 %v1081_v34, %v1073_v5  ;;  %v925_v40 = vmul.f32 %v15528_v62, %v10504_v27  ;;  %v981_v32 = vadd.f32 %v917_v14, %v789_v53  ;;  %v15538_v10 = vld [vmem:[#allocation60_spill] sm:$0xff]  ;;  %v15541_v51 = vld [vmem:[#allocation9_spill] sm:$0xff] }
  0xe7   :  { %15525 = vst [vmem:[#allocation36_spill] sm:$0xff] %v10844_v20  ;;  %15529 = vst [vmem:[#allocation29_spill] sm:$0xff] %v10850_v11  ;;  %v508_v52 = vmul.f32 %v15534_v23, %v15533_v44  ;;  %v620_v48 = vadd.f32 %v15536_v58, %v15535_v47  ;;  %2140 = vperm.xlu1 %9470, %v209_v7   ;;  %1270 = vmatprep.subr.bf16.mxu0 %v10850_v11  ;;  %v15539_v41 = vld [vmem:[#allocation16_spill] sm:$0xff] }
  0xe8   :  { %15530 = vst [vmem:[#allocation30_spill] sm:$0xff] %v10852_v4  ;;  %15531 = vst [vmem:[#allocation41_spill] sm:$0xff] %v10854_v31  ;;  %1383 = vmatprep.subr.bf16.mxu1 %v10852_v4  ;;  %v740_v27 = vmul.f32 %v15487_v16, %v15537_v15  ;;  %v748_v36 = vmul.f32 %v15487_v16, %v15538_v10  ;;  %v932_v2 = vmul.f32 %v15539_v41, %v10674_v29  ;;  %v211_v17 = vld [vmem:[%s15198_s6 + $0x180] sm:$0xff]  ;;  %v218_v50 = vld [vmem:[%s15198_s6 + $0x1b8] sm:$0xff] }
  0xe9   :  { %15532 = vst [vmem:[#allocation42_spill] sm:$0xff] %v10856_v12  ;;  %1271 = vmatpush1.bf16.msra.mxu0 %v10854_v31  ;;  %1384 = vmatpush1.bf16.msra.mxu1 %v10856_v12  ;;  %v989_v34 = vadd.f32 %v925_v40, %v797_v61  ;;  %v15540_v63 = vld [vmem:[#allocation24_spill] sm:$0xff]  ;;  %v940_v1 = vmul.f32 %v15539_v41, %v10717_v21  ;;  %v1045_v38 = vmax.f32 %v981_v32, 0.0  ;;  %v213_v32 = vld [vmem:[%s15198_s6 + $0x190] sm:$0xff] }
  0xea   :  { %v612_v0 = vadd.f32 %v15540_v63, %v508_v52  ;;  %1490 = vmatprep.subr.bf16.mxu0 %v10701_v22  ;;  %1603 = vmatprep.subr.bf16.mxu1 %v10705_v28  ;;  %v812_v6 = vadd.f32 %v748_v36, %v620_v48  ;;  %v510_v30 = vmul.f32 %v15541_v51, %v15533_v44 }
  0xeb   :  { %v622_v56 = vadd.f32 %v15536_v58, %v15542_v59  ;;  %v1053_v60 = vmax.f32 %v989_v34, 0.0  ;;  %v742_v5 = vmul.f32 %v15488_v43, %v15537_v15  ;;  %v750_v7 = vmul.f32 %v15488_v43, %v15538_v10  ;;  %2150 = vperm.xlu1 %9470, %v211_v17   ;;  %2185 = vperm.xlu0 %9471, %v218_v50   ;;  %v10932_v59 = vld [vmem:[%s15195_s3 + $0x8] sm:$0xff]  }
  0xec   :  { %v804_v24 = vadd.f32 %v740_v27, %v612_v0  ;;  %9004 = vmatmul.mubr.msk.bf16.vlgmr.msra.gmra.mrb[0].mxu0 %vm1239_vm0, %v10869_v46  ;;  %9012 = vmatmul.mubr.msk.bf16.vlgmr.msra.gmra.mrb[0].mxu1 %vm1239_vm0, %v10869_v46  ;;  %v1004_v49 = vadd.f32 %v940_v1, %v812_v6  ;;  %v614_v53 = vadd.f32 %v15540_v63, %v510_v30  ;;  %v15544_v27 = vld [vmem:[#allocation10_spill] sm:$0xff]  ;;  %v15545_v50 = vmov 0  }
  0xed   :  { %v934_v35 = vmul.f32 %v15517_v19, %v10674_v29  ;;  %1491 = vmatpush1.bf16.msra.mxu0 %v10709_v54  ;;  %1604 = vmatpush1.bf16.msra.mxu1 %v10711_v39  ;;  %v10907_v61 = vpack.c.bf16 %v1053_v60, %v1045_v38  ;;  %v814_v40 = vadd.f32 %v750_v7, %v622_v56  ;;  %v220_v38 = vld [vmem:[%s15198_s6 + $0x1c8] sm:$0xff] }
  0xee   :  { %v996_v14 = vadd.f32 %v932_v2, %v804_v24  ;;  %1492 = vmatprep.subr.bf16.mxu0 %v10769_v3  ;;  %1605 = vmatprep.subr.bf16.mxu1 %v10837_v9  ;;  %v1068_v52 = vmax.f32 %v1004_v49, 0.0  ;;  %v806_v47 = vadd.f32 %v742_v5, %v614_v53  ;;  %v942_v48 = vmul.f32 %v15517_v19, %v10717_v21  ;;  %v15546_v2 = vld [vmem:[#allocation39_spill] sm:$0xff] }
  0xef   :  { %15543 = vst [vmem:[#allocation43_spill] sm:$0xff] %v10907_v61  ;;  %v507_v36 = vmul.f32 %v15544_v27, %v15533_v44  ;;  %1306 = vmatprep.mubr.bf16.mxu0 %v15545_v50  ;;  %1419 = vmatprep.mubr.bf16.mxu1 %v15545_v50  ;;  %v619_v34 = vadd.f32 %v15536_v58, %v15546_v2 }
  0xf0   :  { %v1060_v17 = vmax.f32 %v996_v14, 0.0  ;;  %v739_v0 = vmul.f32 %v15489_v37, %v15537_v15  ;;  %v747_v1 = vmul.f32 %v15489_v37, %v15538_v10  ;;  %v998_v6 = vadd.f32 %v934_v35, %v806_v47  ;;  %2160 = vperm.xlu1 %9470, %v213_v32   ;;  %v15548_v14 = vld [vmem:[#allocation11_spill] sm:$0xff]  ;;  %2195 = vperm.xlu0 %9471, %v220_v38   ;;  %v15549_v47 = vld [vmem:[#allocation40_spill] sm:$0xff] }
  0xf1   :  { %v1006_v30 = vadd.f32 %v942_v48, %v814_v40  ;;  %v611_v56 = vadd.f32 %v15540_v63, %v507_v36  ;;  %v931_v60 = vmul.f32 %v15518_v25, %v10674_v29  ;;  %1493 = vmatpush1.bf16.msra.mxu0 %v10844_v20  ;;  %1606 = vmatpush1.bf16.msra.mxu1 %v10907_v61 }
  0xf2   :  { %v10939_v24 = vpack.c.bf16 %v1068_v52, %v1060_v17  ;;  %v811_v5 = vadd.f32 %v747_v1, %v619_v34  ;;  %v939_v7 = vmul.f32 %v15518_v25, %v10717_v21  ;;  %v1062_v49 = vmax.f32 %v998_v6, 0.0  ;;  %v215_v17 = vld [vmem:[%s15198_s6 + $0x1a0] sm:$0xff] }
  0xf3   :  { %v1070_v53 = vmax.f32 %v1006_v30, 0.0  ;;  %v803_v35 = vadd.f32 %v739_v0, %v611_v56  ;;  %v509_v40 = vmul.f32 %v15548_v14, %v15533_v44  ;;  %v621_v48 = vadd.f32 %v15536_v58, %v15549_v47  ;;  %v15551_v6 = vld [vmem:[#allocation12_spill] sm:$0xff]  ;;  %v15552_v56 = vld [vmem:[#allocation45_spill] sm:$0xff] }
  0xf4   :  { %15547 = vst [vmem:[#allocation17_spill] sm:$0xff] %v10939_v24  ;;  %1494 = vmatprep.subr.bf16.mxu0 %v10939_v24  ;;  %v1003_v32 = vadd.f32 %v939_v7, %v811_v5  ;;  %v741_v52 = vmul.f32 %v15490_v33, %v15537_v15  ;;  %v749_v36 = vmul.f32 %v15490_v33, %v15538_v10  ;;  %v222_v15 = vld [vmem:[%s15198_s6 + $0x1d8] sm:$0xff] }
  0xf5   :  { %v10955_v2 = vpack.c.bf16 %v1070_v53, %v1062_v49  ;;  %9005 = vmatmul.mubr.msk.bf16.gmra.mrb[4].mxu0 %vm1239_vm0, %v10932_v59  ;;  %9013 = vmatmul.mubr.msk.bf16.gmra.mrb[4].mxu1 %vm1239_vm0, %v10932_v59  ;;  %v995_v44 = vadd.f32 %v931_v60, %v803_v35  ;;  %v613_v58 = vadd.f32 %v15540_v63, %v509_v40  ;;  %v217_v53 = vld [vmem:[%s15198_s6 + $0x1b0] sm:$0xff] }
  0xf6   :  { %v1067_v10 = vmax.f32 %v1003_v32, 0.0  ;;  %v813_v34 = vadd.f32 %v749_v36, %v621_v48  ;;  %v933_v0 = vmul.f32 %v15528_v62, %v10674_v29  ;;  %v941_v1 = vmul.f32 %v15528_v62, %v10717_v21  ;;  %1316 = vmatprep.mubr.bf16.mxu0 %v15545_v50  ;;  %1429 = vmatprep.mubr.bf16.mxu1 %v15545_v50  ;;  %v15553_v29 = vld [vmem:[#allocation55_spill] sm:$0xff]  ;;  %v15555_v32 = vld [vmem:[#allocation57_spill] sm:$0xff] }
  0xf7   :  { %15550 = vst [vmem:[#allocation18_spill] sm:$0xff] %v10955_v2  ;;  %1607 = vmatprep.subr.bf16.mxu1 %v10955_v2  ;;  %v1059_v38 = vmax.f32 %v995_v44, 0.0  ;;  %v805_v63 = vadd.f32 %v741_v52, %v613_v58  ;;  %v524_v30 = vmul.f32 %v15534_v23, %v15551_v6  ;;  %v636_v60 = vadd.f32 %v10748_v55, %v15552_v56  ;;  %v224_v48 = vld [vmem:[%s15198_s6 + $0x1e8] sm:$0xff] }
  0xf8   :  { %2170 = vperm.xlu1 %9470, %v215_v17   ;;  %v1005_v5 = vadd.f32 %v941_v1, %v813_v34  ;;  %v756_v7 = vmul.f32 %v15487_v16, %v15553_v29  ;;  %v764_v21 = vmul.f32 %v15487_v16, %v10787_v42  ;;  %v948_v49 = vmul.f32 %v15539_v41, %v10813_v26  ;;  %v10993_v16 = vld [vmem:[%s15195_s3 + $0x10] sm:$0xff]  }
  0xf9   :  { %2205 = vperm.xlu0 %9471, %v222_v15   ;;  %v10985_v23 = vpack.c.bf16 %v1067_v10, %v1059_v38  ;;  %v997_v35 = vadd.f32 %v933_v0, %v805_v63  ;;  %v628_v40 = vadd.f32 %v10324_v45, %v524_v30  ;;  %v956_v47 = vmul.f32 %v15539_v41, %v15555_v32  ;;  %v15556_v44 = vld [vmem:[#allocation46_spill] sm:$0xff] }
  0xfa   :  { %v1069_v52 = vmax.f32 %v1005_v5, 0.0  ;;  %v828_v36 = vadd.f32 %v764_v21, %v636_v60  ;;  %v526_v17 = vmul.f32 %v15541_v51, %v15551_v6  ;;  %v638_v58 = vadd.f32 %v10748_v55, %v15556_v44  ;;  %v15558_v21 = vld [vmem:[#allocation47_spill] sm:$0xff] }
  0xfb   :  { %15554 = vst [vmem:[#allocation31_spill] sm:$0xff] %v10985_v23  ;;  %1495 = vmatpush1.bf16.msra.mxu0 %v10985_v23  ;;  %v1061_v41 = vmax.f32 %v997_v35, 0.0  ;;  %v820_v15 = vadd.f32 %v756_v7, %v628_v40  ;;  %v758_v10 = vmul.f32 %v15488_v43, %v15553_v29  ;;  %v766_v34 = vmul.f32 %v15488_v43, %v10787_v42  ;;  %v219_v43 = vld [vmem:[%s15198_s6 + $0x1c0] sm:$0xff] }
  0xfc   :  { %2180 = vperm.xlu1 %9470, %v217_v53   ;;  %v1020_v0 = vadd.f32 %v956_v47, %v828_v36  ;;  %v630_v1 = vadd.f32 %v10324_v45, %v526_v17  ;;  %v950_v51 = vmul.f32 %v15517_v19, %v10813_v26  ;;  %v958_v38 = vmul.f32 %v15517_v19, %v15555_v32 }
  0xfd   :  { %2215 = vperm.xlu0 %9471, %v224_v48   ;;  %v11012_v63 = vpack.c.bf16 %v1069_v52, %v1061_v41  ;;  %v1012_v30 = vadd.f32 %v948_v49, %v820_v15  ;;  %v830_v56 = vadd.f32 %v766_v34, %v638_v58  ;;  %v523_v60 = vmul.f32 %v15544_v27, %v15551_v6  ;;  %v226_v27 = vld [vmem:[%s15198_s6 + $0x1f8] sm:$0xff] }
  0xfe   :  { %9006 = vmatmul.mubr.msk.bf16.gmra.mrb[8].mxu0 %vm1239_vm0, %v10993_v16  ;;  %v1084_v5 = vmax.f32 %v1020_v0, 0.0  ;;  %v822_v7 = vadd.f32 %v758_v10, %v630_v1  ;;  %v635_v19 = vadd.f32 %v10748_v55, %v15558_v21  ;;  %v755_v53 = vmul.f32 %v15489_v37, %v15553_v29  ;;  %9014 = vmatmul.mubr.msk.bf16.gmra.mrb[8].mxu1 %vm1239_vm0, %v10993_v16  ;;  %v221_v10 = vld [vmem:[%s15198_s6 + $0x1d0] sm:$0xff] }
  0xff   :  { %15557 = vst [vmem:[#allocation58_spill] sm:$0xff] %v11012_v63  ;;  %1326 = vmatprep.mubr.bf16.mxu0 %v15545_v50  ;;  %1608 = vmatpush1.bf16.msra.mxu1 %v11012_v63  ;;  %v1076_v49 = vmax.f32 %v1012_v30, 0.0  ;;  %v1022_v35 = vadd.f32 %v958_v38, %v830_v56  ;;  %v627_v40 = vadd.f32 %v10324_v45, %v523_v60  ;;  %v225_v21 = vld [vmem:[%s15198_s6 + $0x1f0] sm:$0xff] }
 0x100   :  { %v763_v47 = vmul.f32 %v15489_v37, %v10787_v42  ;;  %1439 = vmatprep.mubr.bf16.mxu1 %v15545_v50  ;;  %v1014_v48 = vadd.f32 %v950_v51, %v822_v7  ;;  %v947_v52 = vmul.f32 %v15518_v25, %v10813_v26  ;;  %v955_v36 = vmul.f32 %v15518_v25, %v15555_v32  ;;  %v11047_v37 = vld [vmem:[%s15195_s3 + $0x18] sm:$0xff]   ;;  %v9584_v7 = vld [vmem:[%s15195_s3 + $0x20] sm:$0xff]  }
 0x101   :  { %v525_v17 = vmul.f32 %v15548_v14, %v15551_v6  ;;  %2190 = vperm.xlu1 %9470, %v219_v43   ;;  %v11042_v44 = vpack.c.bf16 %v1084_v5, %v1076_v49  ;;  %v1086_v58 = vmax.f32 %v1022_v35, 0.0  ;;  %v819_v41 = vadd.f32 %v755_v53, %v627_v40  ;;  %2225 = vperm.xlu0 %9471, %v226_v27   ;;  %v15560_v14 = vld [vmem:[#allocation48_spill] sm:$0xff]  ;;  %v9585_v53 = vld [vmem:[%s15195_s3 + $0x28] sm:$0xff]   ;;  %v9586_v27 = vld [vmem:[%s15195_s3 + $0x30] sm:$0xff]  }
 0x102   :  { %v827_v15 = vadd.f32 %v763_v47, %v635_v19  ;;  %v1078_v25 = vmax.f32 %v1014_v48, 0.0  ;;  %v637_v6 = vadd.f32 %v10748_v55, %v15560_v14  ;;  %v757_v0 = vmul.f32 %v15490_v33, %v15553_v29  ;;  %v9587_v49 = vld [vmem:[%s15195_s3 + $0x38] sm:$0xff]  }
 0x103   :  { %15559 = vst [vmem:[#allocation59_spill] sm:$0xff] %v11042_v44  ;;  %v629_v34 = vadd.f32 %v10324_v45, %v525_v17  ;;  %1496 = vmatprep.subr.bf16.mxu0 %v11042_v44  ;;  %v1011_v1 = vadd.f32 %v947_v52, %v819_v41  ;;  %v765_v38 = vmul.f32 %v15490_v33, %v10787_v42  ;;  %v223_v33 = vld [vmem:[%s15198_s6 + $0x1e0] sm:$0xff] }
 0x104   :  { %v1019_v51 = vadd.f32 %v955_v36, %v827_v15  ;;  %v949_v30 = vmul.f32 %v15528_v62, %v10813_v26  ;;  %v11062_v56 = vpack.c.bf16 %v1086_v58, %v1078_v25  ;;  %v957_v45 = vmul.f32 %v15528_v62, %v15555_v32 }
 0x105   :  { %v821_v60 = vadd.f32 %v757_v0, %v629_v34  ;;  %2200 = vperm.xlu1 %9470, %v221_v10   ;;  %v1075_v55 = vmax.f32 %v1011_v1, 0.0  ;;  %v829_v29 = vadd.f32 %v765_v38, %v637_v6 }
 0x106   :  { %15561 = vst [vmem:[#allocation61_spill] sm:$0xff] %v11062_v56  ;;  %v1083_v43 = vmax.f32 %v1019_v51, 0.0  ;;  %9007 = vmatmul.mubr.msk.bf16.gmra.mrb[12].mxu0 %vm1239_vm0, %v11047_v37  ;;  %1609 = vmatprep.subr.bf16.mxu1 %v11062_v56 }
 0x107   :  { %v1013_v42 = vadd.f32 %v949_v30, %v821_v60  ;;  %9015 = vmatmul.mubr.msk.bf16.gmra.mrb[12].mxu1 %vm1239_vm0, %v11047_v37  ;;  %v1021_v62 = vadd.f32 %v957_v45, %v829_v29  ;;  %1336 = vmatprep.mubr.bf16.mxu0 %v15545_v50 }
 0x108   :  { %v11074_v26 = vpack.c.bf16 %v1083_v43, %v1075_v55  ;;  %1449 = vmatprep.mubr.bf16.mxu1 %v15545_v50  ;;  %v11167_v43 = vpop.permute.xlu0 %1131 }
 0x109   :  { %v1077_v32 = vmax.f32 %v1013_v42, 0.0  ;;  %2210 = vperm.xlu1 %9470, %v223_v33   ;;  %v1085_v5 = vmax.f32 %v1021_v62, 0.0 }
 0x10a   :  { %15562 = vst [vmem:[#allocation62_spill] sm:$0xff] %v11074_v26  ;;  %1497 = vmatpush1.bf16.msra.mxu0 %v11074_v26 }
 0x10b   :  { %v11085_v19 = vpack.c.bf16 %v1085_v5, %v1077_v32 }
 0x10d   :  { %15563 = vst [vmem:[#allocation32_spill] sm:$0xff] %v11085_v19  ;;  %2220 = vperm.xlu1 %9470, %v225_v21   ;;  %1610 = vmatpush1.bf16.msra.mxu1 %v11085_v19 }
 0x10e   :  { %9008 = vmatmul.mubr.msk.bf16.gmra.mrb[16].mxu0 %vm1239_vm0, %v9584_v7 }
 0x10f   :  { %9016 = vmatmul.mubr.msk.bf16.gmra.mrb[16].mxu1 %vm1239_vm0, %v9584_v7  ;;  %1346 = vmatprep.mubr.bf16.mxu0 %v15545_v50 }
 0x110   :  { %1459 = vmatprep.mubr.bf16.mxu1 %v15545_v50 }
 0x116   :  { %9009 = vmatmul.mubr.msk.bf16.gmra.mrb[20].mxu0 %vm1239_vm0, %v9585_v53 }
 0x117   :  { %9017 = vmatmul.mubr.msk.bf16.gmra.mrb[20].mxu1 %vm1239_vm0, %v9585_v53  ;;  %1356 = vmatprep.mubr.bf16.mxu0 %v15545_v50 }
 0x118   :  { %1469 = vmatprep.mubr.bf16.mxu1 %v15545_v50 }
 0x11e   :  { %9010 = vmatmul.mubr.msk.bf16.gmra.mrb[24].mxu0 %vm1239_vm0, %v9586_v27 }
 0x11f   :  { %9018 = vmatmul.mubr.msk.bf16.gmra.mrb[24].mxu1 %vm1239_vm0, %v9586_v27  ;;  %1366 = vmatprep.mubr.bf16.mxu0 %v15545_v50 }
 0x120   :  { %1479 = vmatprep.mubr.bf16.mxu1 %v15545_v50 }
 0x126   :  { %9011 = vmatmul.mubr.msk.bf16.gmra.mrb[28].mxu0 %vm1239_vm0, %v9587_v49 }
 0x127   :  { %9019 = vmatmul.mubr.msk.bf16.gmra.mrb[28].mxu1 %vm1239_vm0, %v9587_v49  ;;  %1522 = vmatprep.mubr.bf16.mxu0 %v15545_v50 }
 0x128   :  { %1635 = vmatprep.mubr.bf16.mxu1 %v15545_v50 }
 0x12e   :  { %9020 = vmatmul.mubr.msk.bf16.vlgmr.msra.gmra.mrb[32].mxu0 %vm1239_vm0, %v10869_v46 }
 0x12f   :  { %9028 = vmatmul.mubr.msk.bf16.vlgmr.msra.gmra.mrb[32].mxu1 %vm1239_vm0, %v10869_v46  ;;  %1532 = vmatprep.mubr.bf16.mxu0 %v15545_v50  ;;  %v11153_v46 = vpop.permute.xlu1 %1121 }
 0x130   :  { %1645 = vmatprep.mubr.bf16.mxu1 %v15545_v50 }
 0x136   :  { %9021 = vmatmul.mubr.msk.bf16.gmra.mrb[36].mxu0 %vm1239_vm0, %v10932_v59 }
 0x137   :  { %9029 = vmatmul.mubr.msk.bf16.gmra.mrb[36].mxu1 %vm1239_vm0, %v10932_v59  ;;  %1542 = vmatprep.mubr.bf16.mxu0 %v15545_v50  ;;  %v11155_v59 = vpop.permute.xlu1 %1126 }
 0x138   :  { %1655 = vmatprep.mubr.bf16.mxu1 %v15545_v50 }
 0x13b   :  { %v11165_v55 = vpop.permute.xlu1 %1136 }
 0x13e   :  { %9022 = vmatmul.mubr.msk.bf16.gmra.mrb[40].mxu0 %vm1239_vm0, %v10993_v16 }
 0x13f   :  { %9030 = vmatmul.mubr.msk.bf16.gmra.mrb[40].mxu1 %vm1239_vm0, %v10993_v16  ;;  %1552 = vmatprep.mubr.bf16.mxu0 %v15545_v50 }
 0x140   :  { %1665 = vmatprep.mubr.bf16.mxu1 %v15545_v50 }
 0x146   :  { %9023 = vmatmul.mubr.msk.bf16.gmra.mrb[44].mxu0 %vm1239_vm0, %v11047_v37 }
 0x147   :  { %9031 = vmatmul.mubr.msk.bf16.gmra.mrb[44].mxu1 %vm1239_vm0, %v11047_v37  ;;  %1562 = vmatprep.mubr.bf16.mxu0 %v15545_v50 }
 0x148   :  { %1675 = vmatprep.mubr.bf16.mxu1 %v15545_v50 }
 0x14e   :  { %9024 = vmatmul.mubr.msk.bf16.gmra.mrb[48].mxu0 %vm1239_vm0, %v9584_v7 }
 0x14f   :  { %9032 = vmatmul.mubr.msk.bf16.gmra.mrb[48].mxu1 %vm1239_vm0, %v9584_v7  ;;  %1572 = vmatprep.mubr.bf16.mxu0 %v15545_v50 }
 0x150   :  { %1685 = vmatprep.mubr.bf16.mxu1 %v15545_v50 }
 0x156   :  { %9025 = vmatmul.mubr.msk.bf16.gmra.mrb[52].mxu0 %vm1239_vm0, %v9585_v53 }
 0x157   :  { %9033 = vmatmul.mubr.msk.bf16.gmra.mrb[52].mxu1 %vm1239_vm0, %v9585_v53  ;;  %1582 = vmatprep.mubr.bf16.mxu0 %v15545_v50 }
 0x158   :  { %1695 = vmatprep.mubr.bf16.mxu1 %v15545_v50 }
 0x15e   :  { %9026 = vmatmul.mubr.msk.bf16.gmra.mrb[56].mxu0 %vm1239_vm0, %v9586_v27 }
 0x15f   :  { %9034 = vmatmul.mubr.msk.bf16.gmra.mrb[56].mxu1 %vm1239_vm0, %v9586_v27  ;;  %1592 = vmatprep.mubr.bf16.mxu0 %v15545_v50 }
 0x160   :  { %1705 = vmatprep.mubr.bf16.mxu1 %v15545_v50 }
 0x166   :  { %9027 = vmatmul.mubr.msk.bf16.gmra.mrb[60].mxu0 %vm1239_vm0, %v9587_v49 }
 0x167   :  { %9035 = vmatmul.mubr.msk.bf16.gmra.mrb[60].mxu1 %vm1239_vm0, %v9587_v49  ;;  %2452 = vmatprep.mubr.bf16.mxu0 %v15545_v50 }
 0x168   :  { %2805 = vmatprep.mubr.bf16.mxu1 %v15545_v50 }
 0x1bf   :  { %v1298_v16 = vpop.f32.mrb[0].mxu0  ;;  %v1411_v35 = vpop.f32.mrb[0].mxu1 }
 0x1c0   :  { %v1299_v40 = vadd.f32 %v1298_v16, %v11153_v46  ;;  %v1412_v47 = vadd.f32 %v1411_v35, %v11153_v46  ;;  %v1300_v48 = vpop.f32.mrb[1].mxu0  ;;  %v1413_v52 = vpop.f32.mrb[1].mxu1 }
 0x1c1   :  { %v1301_v36 = vadd.f32 %v1300_v48, %v11153_v46  ;;  %v1414_v17 = vadd.f32 %v1413_v52, %v11153_v46  ;;  %v1302_v58 = vpop.f32.mrb[2].mxu0  ;;  %v1415_v41 = vpop.f32.mrb[2].mxu1 }
 0x1c2   :  { %v1718_v15 = vmax.f32 %v1412_v47, 0.0  ;;  %v1303_v37 = vadd.f32 %v1302_v58, %v11155_v59  ;;  %v1416_v10 = vadd.f32 %v1415_v41, %v11155_v59  ;;  %v1304_v25 = vpop.f32.mrb[3].mxu0  ;;  %v1417_v34 = vpop.f32.mrb[3].mxu1  ;;  %v1716_v1 = vmax.f32 %v1299_v40, 0.0 }
 0x1c3   :  { %v1719_v14 = vmax.f32 %v1414_v17, 0.0  ;;  %v1305_v6 = vadd.f32 %v1304_v25, %v11155_v59  ;;  %v1418_v0 = vadd.f32 %v1417_v34, %v11155_v59  ;;  %v1717_v30 = vmax.f32 %v1301_v36, 0.0 }
 0x1c4   :  { %v1724_v51 = vmax.f32 %v1303_v37, 0.0  ;;  %v1726_v38 = vmax.f32 %v1416_v10, 0.0 }
 0x1c5   :  { %v1725_v60 = vmax.f32 %v1305_v6, 0.0  ;;  %v1727_v45 = vmax.f32 %v1418_v0, 0.0  ;;  %v11177_v0 = vpop.permute.xlu0 %1146 }
 0x1c6   :  { %v1844_v29 = vpack.c.bf16 %v1724_v51, %v1716_v1  ;;  %v1846_v33 = vpack.c.bf16 %v1726_v38, %v1718_v15  ;;  %v11179_v38 = vpop.permute.xlu1 %1141 }
 0x1c7   :  { %v1845_v32 = vpack.c.bf16 %v1725_v60, %v1717_v30  ;;  %v1847_v5 = vpack.c.bf16 %v1727_v45, %v1719_v14 }
 0x1c8   :  { %v1308_v42 = vpop.f32.mrb[4].mxu0  ;;  %v1421_v62 = vpop.f32.mrb[4].mxu1 }
 0x1c9   :  { %v1309_v7 = vadd.f32 %v1308_v42, %v11167_v43  ;;  %v1422_v21 = vadd.f32 %v1421_v62, %v11167_v43  ;;  %v1310_v53 = vpop.f32.mrb[5].mxu0  ;;  %v1423_v27 = vpop.f32.mrb[5].mxu1  ;;  %2420 = vmatprep.subr.bf16.mxu0 %v1845_v32  ;;  %2773 = vmatprep.subr.bf16.mxu1 %v1847_v5 }
 0x1ca   :  { %v1311_v49 = vadd.f32 %v1310_v53, %v11167_v43  ;;  %v1424_v16 = vadd.f32 %v1423_v27, %v11167_v43  ;;  %v1312_v35 = vpop.f32.mrb[6].mxu0  ;;  %v1425_v40 = vpop.f32.mrb[6].mxu1  ;;  %2421 = vmatpush1.bf16.msra.mxu0 %v1844_v29  ;;  %2774 = vmatpush1.bf16.msra.mxu1 %v1846_v33 }
 0x1cb   :  { %v1734_v47 = vmax.f32 %v1422_v21, 0.0  ;;  %v1313_v48 = vadd.f32 %v1312_v35, %v11165_v55  ;;  %v1426_v52 = vadd.f32 %v1425_v40, %v11165_v55  ;;  %v1314_v36 = vpop.f32.mrb[7].mxu0  ;;  %v1427_v17 = vpop.f32.mrb[7].mxu1  ;;  %v1732_v37 = vmax.f32 %v1309_v7, 0.0 }
 0x1cc   :  { %v1735_v58 = vmax.f32 %v1424_v16, 0.0  ;;  %v1315_v41 = vadd.f32 %v1314_v36, %v11165_v55  ;;  %v1428_v15 = vadd.f32 %v1427_v17, %v11165_v55  ;;  %v1733_v34 = vmax.f32 %v1311_v49, 0.0 }
 0x1cd   :  { %v1740_v10 = vmax.f32 %v1313_v48, 0.0  ;;  %v1742_v25 = vmax.f32 %v1426_v52, 0.0 }
 0x1ce   :  { %v1741_v14 = vmax.f32 %v1315_v41, 0.0  ;;  %v1743_v6 = vmax.f32 %v1428_v15, 0.0 }
 0x1cf   :  { %v1852_v1 = vpack.c.bf16 %v1740_v10, %v1732_v37  ;;  %v1854_v51 = vpack.c.bf16 %v1742_v25, %v1734_v47  ;;  %v11189_v37 = vpop.permute.xlu0 %1156 }
 0x1d0   :  { %v1853_v60 = vpack.c.bf16 %v1741_v14, %v1733_v34  ;;  %v1855_v45 = vpack.c.bf16 %v1743_v6, %v1735_v58  ;;  %v11191_v34 = vpop.permute.xlu1 %1151 }
 0x1d1   :  { %v1318_v30 = vpop.f32.mrb[8].mxu0  ;;  %v1431_v33 = vpop.f32.mrb[8].mxu1 }
 0x1d2   :  { %v1319_v29 = vadd.f32 %v1318_v30, %v11179_v38  ;;  %v1320_v42 = vpop.f32.mrb[9].mxu0  ;;  %v1432_v62 = vadd.f32 %v1431_v33, %v11179_v38  ;;  %v1433_v5 = vpop.f32.mrb[9].mxu1  ;;  %2422 = vmatprep.subr.bf16.mxu0 %v1853_v60  ;;  %2775 = vmatprep.subr.bf16.mxu1 %v1855_v45 }
 0x1d3   :  { %v1321_v32 = vadd.f32 %v1320_v42, %v11179_v38  ;;  %v1322_v7 = vpop.f32.mrb[10].mxu0  ;;  %v1434_v21 = vadd.f32 %v1433_v5, %v11179_v38  ;;  %v1435_v27 = vpop.f32.mrb[10].mxu1  ;;  %2423 = vmatpush1.bf16.msra.mxu0 %v1852_v1  ;;  %2776 = vmatpush1.bf16.msra.mxu1 %v1854_v51 }
 0x1d4   :  { %v1323_v53 = vadd.f32 %v1322_v7, %v11177_v0  ;;  %v1324_v49 = vpop.f32.mrb[11].mxu0  ;;  %v1750_v16 = vmax.f32 %v1432_v62, 0.0  ;;  %v1436_v35 = vadd.f32 %v1435_v27, %v11177_v0  ;;  %v1437_v47 = vpop.f32.mrb[11].mxu1  ;;  %v1748_v48 = vmax.f32 %v1319_v29, 0.0 }
 0x1d5   :  { %v1325_v40 = vadd.f32 %v1324_v49, %v11177_v0  ;;  %v1751_v52 = vmax.f32 %v1434_v21, 0.0  ;;  %v1438_v17 = vadd.f32 %v1437_v47, %v11177_v0  ;;  %v1749_v58 = vmax.f32 %v1321_v32, 0.0 }
 0x1d6   :  { %v1756_v36 = vmax.f32 %v1323_v53, 0.0  ;;  %v1758_v41 = vmax.f32 %v1436_v35, 0.0 }
 0x1d7   :  { %v1757_v15 = vmax.f32 %v1325_v40, 0.0  ;;  %v1759_v25 = vmax.f32 %v1438_v17, 0.0 }
 0x1d8   :  { %v1860_v10 = vpack.c.bf16 %v1756_v36, %v1748_v48  ;;  %v1862_v14 = vpack.c.bf16 %v1758_v41, %v1750_v16 }
 0x1d9   :  { %v1328_v6 = vpop.f32.mrb[12].mxu0  ;;  %v1861_v1 = vpack.c.bf16 %v1757_v15, %v1749_v58  ;;  %v1863_v45 = vpack.c.bf16 %v1759_v25, %v1751_v52  ;;  %v11201_v58 = vpop.permute.xlu0 %1166 }
 0x1da   :  { %v1329_v51 = vadd.f32 %v1328_v6, %v11191_v34  ;;  %v1441_v30 = vpop.f32.mrb[12].mxu1  ;;  %v1330_v60 = vpop.f32.mrb[13].mxu0 }
 0x1db   :  { %v1442_v29 = vadd.f32 %v1441_v30, %v11191_v34  ;;  %v1331_v33 = vadd.f32 %v1330_v60, %v11191_v34  ;;  %v1443_v42 = vpop.f32.mrb[13].mxu1  ;;  %v1332_v62 = vpop.f32.mrb[14].mxu0  ;;  %2424 = vmatprep.subr.bf16.mxu0 %v1861_v1  ;;  %2777 = vmatprep.subr.bf16.mxu1 %v1863_v45 }
 0x1dc   :  { %v1444_v32 = vadd.f32 %v1443_v42, %v11191_v34  ;;  %v1333_v5 = vadd.f32 %v1332_v62, %v11189_v37  ;;  %v1445_v7 = vpop.f32.mrb[14].mxu1  ;;  %v1334_v21 = vpop.f32.mrb[15].mxu0  ;;  %2425 = vmatpush1.bf16.msra.mxu0 %v1860_v10  ;;  %2778 = vmatpush1.bf16.msra.mxu1 %v1862_v14  ;;  %v1764_v35 = vmax.f32 %v1329_v51, 0.0 }
 0x1dd   :  { %v1766_v53 = vmax.f32 %v1442_v29, 0.0  ;;  %v1446_v27 = vadd.f32 %v1445_v7, %v11189_v37  ;;  %v1335_v49 = vadd.f32 %v1334_v21, %v11189_v37  ;;  %v1447_v16 = vpop.f32.mrb[15].mxu1  ;;  %v1765_v52 = vmax.f32 %v1331_v33, 0.0  ;;  %v11203_v10 = vpop.permute.xlu1 %1161 }
 0x1de   :  { %v1767_v40 = vmax.f32 %v1444_v32, 0.0  ;;  %v1772_v47 = vmax.f32 %v1333_v5, 0.0  ;;  %v1448_v48 = vadd.f32 %v1447_v16, %v11189_v37 }
 0x1df   :  { %v1774_v36 = vmax.f32 %v1446_v27, 0.0  ;;  %v1773_v17 = vmax.f32 %v1335_v49, 0.0 }
 0x1e0   :  { %v1868_v41 = vpack.c.bf16 %v1772_v47, %v1764_v35  ;;  %v1775_v15 = vmax.f32 %v1448_v48, 0.0 }
 0x1e1   :  { %v1870_v25 = vpack.c.bf16 %v1774_v36, %v1766_v53  ;;  %v1338_v6 = vpop.f32.mrb[16].mxu0  ;;  %v1869_v1 = vpack.c.bf16 %v1773_v17, %v1765_v52  ;;  %v11213_v36 = vpop.permute.xlu0 %1176 }
 0x1e2   :  { %v1339_v30 = vadd.f32 %v1338_v6, %v11203_v10  ;;  %v1451_v14 = vpop.f32.mrb[16].mxu1  ;;  %v1340_v51 = vpop.f32.mrb[17].mxu0  ;;  %v1871_v60 = vpack.c.bf16 %v1775_v15, %v1767_v40 }
 0x1e3   :  { %v1452_v45 = vadd.f32 %v1451_v14, %v11203_v10  ;;  %v1341_v29 = vadd.f32 %v1340_v51, %v11203_v10  ;;  %v1453_v33 = vpop.f32.mrb[17].mxu1  ;;  %v1342_v42 = vpop.f32.mrb[18].mxu0  ;;  %2426 = vmatprep.subr.bf16.mxu0 %v1869_v1 }
 0x1e4   :  { %v1454_v62 = vadd.f32 %v1453_v33, %v11203_v10  ;;  %v1343_v32 = vadd.f32 %v1342_v42, %v11201_v58  ;;  %v1455_v5 = vpop.f32.mrb[18].mxu1  ;;  %2779 = vmatprep.subr.bf16.mxu1 %v1871_v60  ;;  %v1344_v7 = vpop.f32.mrb[19].mxu0  ;;  %2427 = vmatpush1.bf16.msra.mxu0 %v1868_v41  ;;  %v1780_v49 = vmax.f32 %v1339_v30, 0.0 }
 0x1e5   :  { %v1456_v21 = vadd.f32 %v1455_v5, %v11201_v58  ;;  %v1345_v53 = vadd.f32 %v1344_v7, %v11201_v58  ;;  %v1457_v27 = vpop.f32.mrb[19].mxu1  ;;  %2780 = vmatpush1.bf16.msra.mxu1 %v1870_v25  ;;  %v1782_v40 = vmax.f32 %v1452_v45, 0.0  ;;  %v1781_v47 = vmax.f32 %v1341_v29, 0.0  ;;  %v11215_v41 = vpop.permute.xlu1 %1171 }
 0x1e6   :  { %v1788_v16 = vmax.f32 %v1343_v32, 0.0  ;;  %v1458_v35 = vadd.f32 %v1457_v27, %v11201_v58  ;;  %v1783_v17 = vmax.f32 %v1454_v62, 0.0 }
 0x1e7   :  { %v1790_v48 = vmax.f32 %v1456_v21, 0.0  ;;  %v1789_v52 = vmax.f32 %v1345_v53, 0.0 }
 0x1e8   :  { %v1876_v15 = vpack.c.bf16 %v1788_v16, %v1780_v49  ;;  %v1791_v6 = vmax.f32 %v1458_v35, 0.0 }
 0x1e9   :  { %v1878_v1 = vpack.c.bf16 %v1790_v48, %v1782_v40  ;;  %v1348_v14 = vpop.f32.mrb[20].mxu0  ;;  %v1877_v51 = vpack.c.bf16 %v1789_v52, %v1781_v47 }
 0x1ea   :  { %v1349_v25 = vadd.f32 %v1348_v14, %v11215_v41  ;;  %v1461_v30 = vpop.f32.mrb[20].mxu1  ;;  %v1350_v60 = vpop.f32.mrb[21].mxu0  ;;  %v1879_v33 = vpack.c.bf16 %v1791_v6, %v1783_v17 }
 0x1eb   :  { %v1462_v45 = vadd.f32 %v1461_v30, %v11215_v41  ;;  %v1351_v29 = vadd.f32 %v1350_v60, %v11215_v41  ;;  %v1463_v42 = vpop.f32.mrb[21].mxu1  ;;  %v1352_v32 = vpop.f32.mrb[22].mxu0  ;;  %2428 = vmatprep.subr.bf16.mxu0 %v1877_v51 }
 0x1ec   :  { %v1464_v62 = vadd.f32 %v1463_v42, %v11215_v41  ;;  %v1353_v5 = vadd.f32 %v1352_v32, %v11213_v36  ;;  %v1465_v7 = vpop.f32.mrb[22].mxu1  ;;  %2781 = vmatprep.subr.bf16.mxu1 %v1879_v33  ;;  %v1354_v21 = vpop.f32.mrb[23].mxu0  ;;  %2429 = vmatpush1.bf16.msra.mxu0 %v1876_v15  ;;  %v1796_v16 = vmax.f32 %v1349_v25, 0.0 }
 0x1ed   :  { %v1466_v53 = vadd.f32 %v1465_v7, %v11213_v36  ;;  %v1355_v27 = vadd.f32 %v1354_v21, %v11213_v36  ;;  %v1467_v49 = vpop.f32.mrb[23].mxu1  ;;  %2782 = vmatpush1.bf16.msra.mxu1 %v1878_v1  ;;  %v1798_v47 = vmax.f32 %v1462_v45, 0.0  ;;  %v1797_v48 = vmax.f32 %v1351_v29, 0.0  ;;  %v11225_v6 = vpop.permute.xlu0 %1186 }
 0x1ee   :  { %v1804_v35 = vmax.f32 %v1353_v5, 0.0  ;;  %v1468_v40 = vadd.f32 %v1467_v49, %v11213_v36  ;;  %v1799_v14 = vmax.f32 %v1464_v62, 0.0  ;;  %v11227_v15 = vpop.permute.xlu1 %1181 }
 0x1ef   :  { %v1806_v52 = vmax.f32 %v1466_v53, 0.0  ;;  %v1805_v17 = vmax.f32 %v1355_v27, 0.0 }
 0x1f0   :  { %v1884_v51 = vpack.c.bf16 %v1804_v35, %v1796_v16  ;;  %v1807_v30 = vmax.f32 %v1468_v40, 0.0 }
 0x1f1   :  { %v1886_v60 = vpack.c.bf16 %v1806_v52, %v1798_v47  ;;  %v1358_v33 = vpop.f32.mrb[24].mxu0  ;;  %v1885_v42 = vpack.c.bf16 %v1805_v17, %v1797_v48 }
 0x1f2   :  { %v1359_v1 = vadd.f32 %v1358_v33, %v11227_v15  ;;  %v1471_v25 = vpop.f32.mrb[24].mxu1  ;;  %v1360_v32 = vpop.f32.mrb[25].mxu0  ;;  %v1887_v5 = vpack.c.bf16 %v1807_v30, %v1799_v14 }
 0x1f3   :  { %v1472_v45 = vadd.f32 %v1471_v25, %v11227_v15  ;;  %v1361_v29 = vadd.f32 %v1360_v32, %v11227_v15  ;;  %v1473_v7 = vpop.f32.mrb[25].mxu1  ;;  %v1362_v21 = vpop.f32.mrb[26].mxu0  ;;  %2430 = vmatprep.subr.bf16.mxu0 %v1885_v42 }
 0x1f4   :  { %v1474_v62 = vadd.f32 %v1473_v7, %v11227_v15  ;;  %v1363_v53 = vadd.f32 %v1362_v21, %v11225_v6  ;;  %v1475_v27 = vpop.f32.mrb[26].mxu1  ;;  %2783 = vmatprep.subr.bf16.mxu1 %v1887_v5  ;;  %v1364_v49 = vpop.f32.mrb[27].mxu0  ;;  %2431 = vmatpush1.bf16.msra.mxu0 %v1884_v51  ;;  %v1812_v47 = vmax.f32 %v1359_v1, 0.0 }
 0x1f5   :  { %v1476_v16 = vadd.f32 %v1475_v27, %v11225_v6  ;;  %v1365_v35 = vadd.f32 %v1364_v49, %v11225_v6  ;;  %v1477_v40 = vpop.f32.mrb[27].mxu1  ;;  %2784 = vmatpush1.bf16.msra.mxu1 %v1886_v60  ;;  %v1814_v17 = vmax.f32 %v1472_v45, 0.0  ;;  %v1813_v14 = vmax.f32 %v1361_v29, 0.0  ;;  %v11237_v42 = vpop.permute.xlu0 %1196 }
 0x1f6   :  { %v1820_v48 = vmax.f32 %v1363_v53, 0.0  ;;  %v1478_v52 = vadd.f32 %v1477_v40, %v11225_v6  ;;  %v1815_v25 = vmax.f32 %v1474_v62, 0.0  ;;  %v11239_v51 = vpop.permute.xlu1 %1191 }
 0x1f7   :  { %v1822_v30 = vmax.f32 %v1476_v16, 0.0  ;;  %v1821_v33 = vmax.f32 %v1365_v35, 0.0 }
 0x1f8   :  { %v1892_v32 = vpack.c.bf16 %v1820_v48, %v1812_v47  ;;  %v1823_v5 = vmax.f32 %v1478_v52, 0.0 }
 0x1f9   :  { %v1894_v7 = vpack.c.bf16 %v1822_v30, %v1814_v17  ;;  %v1368_v21 = vpop.f32.mrb[28].mxu0  ;;  %v1893_v27 = vpack.c.bf16 %v1821_v33, %v1813_v14 }
 0x1fa   :  { %v1369_v60 = vadd.f32 %v1368_v21, %v11239_v51  ;;  %v1481_v1 = vpop.f32.mrb[28].mxu1  ;;  %v1370_v53 = vpop.f32.mrb[29].mxu0  ;;  %v1895_v49 = vpack.c.bf16 %v1823_v5, %v1815_v25 }
 0x1fb   :  { %v1482_v45 = vadd.f32 %v1481_v1, %v11239_v51  ;;  %v1371_v29 = vadd.f32 %v1370_v53, %v11239_v51  ;;  %v1483_v16 = vpop.f32.mrb[29].mxu1  ;;  %v1372_v35 = vpop.f32.mrb[30].mxu0  ;;  %2432 = vmatprep.subr.bf16.mxu0 %v1893_v27 }
 0x1fc   :  { %v1484_v62 = vadd.f32 %v1483_v16, %v11239_v51  ;;  %v1373_v40 = vadd.f32 %v1372_v35, %v11237_v42  ;;  %v1485_v47 = vpop.f32.mrb[30].mxu1  ;;  %2785 = vmatprep.subr.bf16.mxu1 %v1895_v49  ;;  %v1374_v48 = vpop.f32.mrb[31].mxu0  ;;  %2433 = vmatpush1.bf16.msra.mxu0 %v1892_v32  ;;  %v1828_v30 = vmax.f32 %v1369_v60, 0.0 }
 0x1fd   :  { %v1486_v52 = vadd.f32 %v1485_v47, %v11237_v42  ;;  %v1375_v17 = vadd.f32 %v1374_v48, %v11237_v42  ;;  %v1487_v14 = vpop.f32.mrb[31].mxu1  ;;  %2786 = vmatpush1.bf16.msra.mxu1 %v1894_v7  ;;  %v1830_v5 = vmax.f32 %v1482_v45, 0.0  ;;  %v1829_v21 = vmax.f32 %v1371_v29, 0.0  ;;  %v9588_v29 = vld [vmem:[%s15197_s5] sm:$0xff]  }
 0x1fe   :  { %v1836_v33 = vmax.f32 %v1373_v40, 0.0  ;;  %v1488_v25 = vadd.f32 %v1487_v14, %v11237_v42  ;;  %v1831_v53 = vmax.f32 %v1484_v62, 0.0 }
 0x1ff   :  { %v1838_v27 = vmax.f32 %v1486_v52, 0.0  ;;  %v1837_v1 = vmax.f32 %v1375_v17, 0.0 }
 0x200   :  { %v1900_v16 = vpack.c.bf16 %v1836_v33, %v1828_v30  ;;  %v1839_v35 = vmax.f32 %v1488_v25, 0.0 }
 0x201   :  { %v1902_v49 = vpack.c.bf16 %v1838_v27, %v1830_v5  ;;  %v1524_v19 = vpop.f32.mrb[32].mxu0  ;;  %v1901_v32 = vpack.c.bf16 %v1837_v1, %v1829_v21 }
 0x202   :  { %v1525_v47 = vadd.f32 %v1524_v19, %v11153_v46  ;;  %v1637_v56 = vpop.f32.mrb[32].mxu1  ;;  %v1526_v48 = vpop.f32.mrb[33].mxu0  ;;  %v1903_v63 = vpack.c.bf16 %v1839_v35, %v1831_v53 }
 0x203   :  { %v1638_v7 = vadd.f32 %v1637_v56, %v11153_v46  ;;  %v1527_v60 = vadd.f32 %v1526_v48, %v11153_v46  ;;  %v1639_v40 = vpop.f32.mrb[33].mxu1  ;;  %v1528_v45 = vpop.f32.mrb[34].mxu0  ;;  %2434 = vmatprep.subr.bf16.mxu0 %v1901_v32 }
 0x204   :  { %v1640_v62 = vadd.f32 %v1639_v40, %v11153_v46  ;;  %v1529_v52 = vadd.f32 %v1528_v45, %v11155_v59  ;;  %v1641_v17 = vpop.f32.mrb[34].mxu1  ;;  %2787 = vmatprep.subr.bf16.mxu1 %v1903_v63  ;;  %v1530_v19 = vpop.f32.mrb[35].mxu0  ;;  %2435 = vmatpush1.bf16.msra.mxu0 %v1900_v16  ;;  %v1720_v33 = vmax.f32 %v1525_v47, 0.0 }
 0x205   :  { %v1642_v14 = vadd.f32 %v1641_v17, %v11155_v59  ;;  %v1531_v56 = vadd.f32 %v1530_v19, %v11155_v59  ;;  %v1643_v30 = vpop.f32.mrb[35].mxu1  ;;  %2788 = vmatpush1.bf16.msra.mxu1 %v1902_v49  ;;  %v1722_v21 = vmax.f32 %v1638_v7, 0.0  ;;  %v1721_v27 = vmax.f32 %v1527_v60, 0.0 }
 0x206   :  { %v1728_v25 = vmax.f32 %v1529_v52, 0.0  ;;  %v1644_v5 = vadd.f32 %v1643_v30, %v11155_v59  ;;  %v1723_v53 = vmax.f32 %v1640_v62, 0.0 }
 0x207   :  { %v1730_v1 = vmax.f32 %v1642_v14, 0.0  ;;  %v1729_v46 = vmax.f32 %v1531_v56, 0.0  ;;  %2453 = vmatmul.mubr.bf16.vlgmr.msra.gmra.mrb[64].mxu0 %v9588_v29 }
 0x208   :  { %v1848_v35 = vpack.c.bf16 %v1728_v25, %v1720_v33  ;;  %v1731_v63 = vmax.f32 %v1644_v5, 0.0  ;;  %2806 = vmatmul.mubr.bf16.vlgmr.msra.gmra.mrb[64].mxu1 %v9588_v29  ;;  %2462 = vmatprep.mubr.bf16.mxu0 %v15545_v50  ;;  %v9589_v29 = vld [vmem:[%s15197_s5 + $0x8] sm:$0xff]  }
 0x209   :  { %v1850_v16 = vpack.c.bf16 %v1730_v1, %v1722_v21  ;;  %v1534_v32 = vpop.f32.mrb[36].mxu0  ;;  %v1849_v48 = vpack.c.bf16 %v1729_v46, %v1721_v27  ;;  %2815 = vmatprep.mubr.bf16.mxu1 %v15545_v50 }
 0x20a   :  { %v1535_v49 = vadd.f32 %v1534_v32, %v11167_v43  ;;  %v1647_v47 = vpop.f32.mrb[36].mxu1  ;;  %v1536_v59 = vpop.f32.mrb[37].mxu0  ;;  %v1851_v7 = vpack.c.bf16 %v1731_v63, %v1723_v53 }
 0x20b   :  { %v1648_v60 = vadd.f32 %v1647_v47, %v11167_v43  ;;  %v1537_v40 = vadd.f32 %v1536_v59, %v11167_v43  ;;  %v1649_v45 = vpop.f32.mrb[37].mxu1  ;;  %v1538_v62 = vpop.f32.mrb[38].mxu0  ;;  %3126 = vmatprep.subr.bf16.mxu0 %v1849_v48 }
 0x20c   :  { %v1650_v52 = vadd.f32 %v1649_v45, %v11167_v43  ;;  %v1539_v17 = vadd.f32 %v1538_v62, %v11165_v55  ;;  %v1651_v19 = vpop.f32.mrb[38].mxu1  ;;  %3479 = vmatprep.subr.bf16.mxu1 %v1851_v7  ;;  %v1540_v14 = vpop.f32.mrb[39].mxu0  ;;  %3127 = vmatpush1.bf16.msra.mxu0 %v1848_v35  ;;  %v1736_v25 = vmax.f32 %v1535_v49, 0.0  ;;  %v9590_v62 = vld [vmem:[%s15197_s5 + $0x10] sm:$0xff]  }
 0x20d   :  { %v1652_v56 = vadd.f32 %v1651_v19, %v11165_v55  ;;  %v1541_v30 = vadd.f32 %v1540_v14, %v11165_v55  ;;  %v1653_v33 = vpop.f32.mrb[39].mxu1  ;;  %3480 = vmatpush1.bf16.msra.mxu1 %v1850_v16  ;;  %v1738_v27 = vmax.f32 %v1648_v60, 0.0  ;;  %v1737_v1 = vmax.f32 %v1537_v40, 0.0 }
 0x20e   :  { %v1744_v5 = vmax.f32 %v1539_v17, 0.0  ;;  %v1654_v21 = vadd.f32 %v1653_v33, %v11165_v55  ;;  %v1739_v53 = vmax.f32 %v1650_v52, 0.0 }
 0x20f   :  { %v1746_v46 = vmax.f32 %v1652_v56, 0.0  ;;  %v1745_v43 = vmax.f32 %v1541_v30, 0.0  ;;  %2463 = vmatmul.mubr.bf16.gmra.mrb[68].mxu0 %v9589_v29 }
 0x210   :  { %v1856_v63 = vpack.c.bf16 %v1744_v5, %v1736_v25  ;;  %v1747_v32 = vmax.f32 %v1654_v21, 0.0  ;;  %2816 = vmatmul.mubr.bf16.gmra.mrb[68].mxu1 %v9589_v29  ;;  %2472 = vmatprep.mubr.bf16.mxu0 %v15545_v50 }
 0x211   :  { %v1858_v35 = vpack.c.bf16 %v1746_v46, %v1738_v27  ;;  %v1544_v48 = vpop.f32.mrb[40].mxu0  ;;  %v1857_v47 = vpack.c.bf16 %v1745_v43, %v1737_v1  ;;  %2825 = vmatprep.mubr.bf16.mxu1 %v15545_v50 }
 0x212   :  { %v1545_v16 = vadd.f32 %v1544_v48, %v11179_v38  ;;  %v1657_v49 = vpop.f32.mrb[40].mxu1  ;;  %v1546_v55 = vpop.f32.mrb[41].mxu0  ;;  %v1859_v59 = vpack.c.bf16 %v1747_v32, %v1739_v53 }
 0x213   :  { %v1658_v7 = vadd.f32 %v1657_v49, %v11179_v38  ;;  %v1547_v60 = vadd.f32 %v1546_v55, %v11179_v38  ;;  %v1659_v40 = vpop.f32.mrb[41].mxu1  ;;  %v1548_v45 = vpop.f32.mrb[42].mxu0  ;;  %3128 = vmatprep.subr.bf16.mxu0 %v1857_v47 }
 0x214   :  { %v1660_v29 = vadd.f32 %v1659_v40, %v11179_v38  ;;  %v1549_v52 = vadd.f32 %v1548_v45, %v11177_v0  ;;  %v1661_v17 = vpop.f32.mrb[42].mxu1  ;;  %3481 = vmatprep.subr.bf16.mxu1 %v1859_v59  ;;  %v1550_v19 = vpop.f32.mrb[43].mxu0  ;;  %3129 = vmatpush1.bf16.msra.mxu0 %v1856_v63  ;;  %v1752_v33 = vmax.f32 %v1545_v16, 0.0 }
 0x215   :  { %v1662_v14 = vadd.f32 %v1661_v17, %v11177_v0  ;;  %v1551_v56 = vadd.f32 %v1550_v19, %v11177_v0  ;;  %v1663_v30 = vpop.f32.mrb[43].mxu1  ;;  %3482 = vmatpush1.bf16.msra.mxu1 %v1858_v35  ;;  %v1754_v21 = vmax.f32 %v1658_v7, 0.0  ;;  %v1753_v27 = vmax.f32 %v1547_v60, 0.0  ;;  %v9591_v60 = vld [vmem:[%s15197_s5 + $0x18] sm:$0xff]  }
 0x216   :  { %v1760_v25 = vmax.f32 %v1549_v52, 0.0  ;;  %v1664_v5 = vadd.f32 %v1663_v30, %v11177_v0  ;;  %v1755_v46 = vmax.f32 %v1660_v29, 0.0 }
 0x217   :  { %v1762_v1 = vmax.f32 %v1662_v14, 0.0  ;;  %v1761_v38 = vmax.f32 %v1551_v56, 0.0  ;;  %2473 = vmatmul.mubr.bf16.gmra.mrb[72].mxu0 %v9590_v62 }
 0x218   :  { %v1864_v43 = vpack.c.bf16 %v1760_v25, %v1752_v33  ;;  %v1763_v53 = vmax.f32 %v1664_v5, 0.0  ;;  %2826 = vmatmul.mubr.bf16.gmra.mrb[72].mxu1 %v9590_v62  ;;  %2482 = vmatprep.mubr.bf16.mxu0 %v15545_v50 }
 0x219   :  { %v1866_v63 = vpack.c.bf16 %v1762_v1, %v1754_v21  ;;  %v1554_v32 = vpop.f32.mrb[44].mxu0  ;;  %v1865_v48 = vpack.c.bf16 %v1761_v38, %v1753_v27  ;;  %2835 = vmatprep.mubr.bf16.mxu1 %v15545_v50 }
 0x21a   :  { %v1555_v35 = vadd.f32 %v1554_v32, %v11191_v34  ;;  %v1667_v47 = vpop.f32.mrb[44].mxu1  ;;  %v1556_v0 = vpop.f32.mrb[45].mxu0  ;;  %v1867_v16 = vpack.c.bf16 %v1763_v53, %v1755_v46 }
 0x21b   :  { %v1668_v49 = vadd.f32 %v1667_v47, %v11191_v34  ;;  %v1557_v55 = vadd.f32 %v1556_v0, %v11191_v34  ;;  %v1669_v59 = vpop.f32.mrb[45].mxu1  ;;  %v1558_v7 = vpop.f32.mrb[46].mxu0  ;;  %3130 = vmatprep.subr.bf16.mxu0 %v1865_v48 }
 0x21c   :  { %v1670_v40 = vadd.f32 %v1669_v59, %v11191_v34  ;;  %v1559_v45 = vadd.f32 %v1558_v7, %v11189_v37  ;;  %v1671_v62 = vpop.f32.mrb[46].mxu1  ;;  %3483 = vmatprep.subr.bf16.mxu1 %v1867_v16  ;;  %v1560_v29 = vpop.f32.mrb[47].mxu0  ;;  %3131 = vmatpush1.bf16.msra.mxu0 %v1864_v43  ;;  %v1768_v14 = vmax.f32 %v1555_v35, 0.0  ;;  %v9592_v16 = vld [vmem:[%s15197_s5 + $0x20] sm:$0xff]  }
 0x21d   :  { %v1672_v52 = vadd.f32 %v1671_v62, %v11189_v37  ;;  %v1561_v17 = vadd.f32 %v1560_v29, %v11189_v37  ;;  %v1673_v19 = vpop.f32.mrb[47].mxu1  ;;  %3484 = vmatpush1.bf16.msra.mxu1 %v1866_v63  ;;  %v1770_v33 = vmax.f32 %v1668_v49, 0.0  ;;  %v1769_v25 = vmax.f32 %v1557_v55, 0.0 }
 0x21e   :  { %v1776_v56 = vmax.f32 %v1559_v45, 0.0  ;;  %v1674_v30 = vadd.f32 %v1673_v19, %v11189_v37  ;;  %v1771_v21 = vmax.f32 %v1670_v40, 0.0 }
 0x21f   :  { %v1778_v5 = vmax.f32 %v1672_v52, 0.0  ;;  %v1777_v34 = vmax.f32 %v1561_v17, 0.0  ;;  %2483 = vmatmul.mubr.bf16.gmra.mrb[76].mxu0 %v9591_v60 }
 0x220   :  { %v1872_v27 = vpack.c.bf16 %v1776_v56, %v1768_v14  ;;  %v1779_v1 = vmax.f32 %v1674_v30, 0.0  ;;  %2836 = vmatmul.mubr.bf16.gmra.mrb[76].mxu1 %v9591_v60  ;;  %2492 = vmatprep.mubr.bf16.mxu0 %v15545_v50 }
 0x221   :  { %v1874_v38 = vpack.c.bf16 %v1778_v5, %v1770_v33  ;;  %v1564_v46 = vpop.f32.mrb[48].mxu0  ;;  %v1873_v43 = vpack.c.bf16 %v1777_v34, %v1769_v25  ;;  %2845 = vmatprep.mubr.bf16.mxu1 %v15545_v50 }
 0x222   :  { %v1565_v53 = vadd.f32 %v1564_v46, %v11203_v10  ;;  %v1677_v63 = vpop.f32.mrb[48].mxu1  ;;  %v1566_v37 = vpop.f32.mrb[49].mxu0  ;;  %v1875_v32 = vpack.c.bf16 %v1779_v1, %v1771_v21 }
 0x223   :  { %v1678_v48 = vadd.f32 %v1677_v63, %v11203_v10  ;;  %v1567_v35 = vadd.f32 %v1566_v37, %v11203_v10  ;;  %v1679_v47 = vpop.f32.mrb[49].mxu1  ;;  %v1568_v0 = vpop.f32.mrb[50].mxu0  ;;  %3132 = vmatprep.subr.bf16.mxu0 %v1873_v43  ;;  %v9593_v63 = vld [vmem:[%s15197_s5 + $0x28] sm:$0xff]  }
 0x224   :  { %v1680_v49 = vadd.f32 %v1679_v47, %v11203_v10  ;;  %v1569_v55 = vadd.f32 %v1568_v0, %v11201_v58  ;;  %v1681_v59 = vpop.f32.mrb[50].mxu1  ;;  %3485 = vmatprep.subr.bf16.mxu1 %v1875_v32  ;;  %v1570_v7 = vpop.f32.mrb[51].mxu0  ;;  %3133 = vmatpush1.bf16.msra.mxu0 %v1872_v27  ;;  %v1784_v62 = vmax.f32 %v1565_v53, 0.0 }
 0x225   :  { %v1682_v60 = vadd.f32 %v1681_v59, %v11201_v58  ;;  %v1571_v40 = vadd.f32 %v1570_v7, %v11201_v58  ;;  %v1683_v45 = vpop.f32.mrb[51].mxu1  ;;  %3486 = vmatpush1.bf16.msra.mxu1 %v1874_v38  ;;  %v1786_v17 = vmax.f32 %v1678_v48, 0.0  ;;  %v1785_v19 = vmax.f32 %v1567_v35, 0.0 }
 0x226   :  { %v1792_v29 = vmax.f32 %v1569_v55, 0.0  ;;  %v1684_v52 = vadd.f32 %v1683_v45, %v11201_v58  ;;  %v1787_v56 = vmax.f32 %v1680_v49, 0.0 }
 0x227   :  { %v1794_v14 = vmax.f32 %v1682_v60, 0.0  ;;  %v1793_v10 = vmax.f32 %v1571_v40, 0.0  ;;  %2493 = vmatmul.mubr.bf16.gmra.mrb[80].mxu0 %v9592_v16 }
 0x228   :  { %v1880_v30 = vpack.c.bf16 %v1792_v29, %v1784_v62  ;;  %v1795_v33 = vmax.f32 %v1684_v52, 0.0  ;;  %2846 = vmatmul.mubr.bf16.gmra.mrb[80].mxu1 %v9592_v16  ;;  %2502 = vmatprep.mubr.bf16.mxu0 %v15545_v50 }
 0x229   :  { %v1882_v25 = vpack.c.bf16 %v1794_v14, %v1786_v17  ;;  %v1574_v5 = vpop.f32.mrb[52].mxu0  ;;  %v1881_v34 = vpack.c.bf16 %v1793_v10, %v1785_v19  ;;  %2855 = vmatprep.mubr.bf16.mxu1 %v15545_v50 }
 0x22a   :  { %v1575_v21 = vadd.f32 %v1574_v5, %v11215_v41  ;;  %v1687_v27 = vpop.f32.mrb[52].mxu1  ;;  %v1576_v58 = vpop.f32.mrb[53].mxu0  ;;  %v1883_v1 = vpack.c.bf16 %v1795_v33, %v1787_v56 }
 0x22b   :  { %v1688_v38 = vadd.f32 %v1687_v27, %v11215_v41  ;;  %v1577_v46 = vadd.f32 %v1576_v58, %v11215_v41  ;;  %v1689_v43 = vpop.f32.mrb[53].mxu1  ;;  %v1578_v53 = vpop.f32.mrb[54].mxu0  ;;  %3134 = vmatprep.subr.bf16.mxu0 %v1881_v34  ;;  %v9594_v34 = vld [vmem:[%s15197_s5 + $0x30] sm:$0xff]  }
 0x22c   :  { %v1690_v37 = vadd.f32 %v1689_v43, %v11215_v41  ;;  %v1579_v32 = vadd.f32 %v1578_v53, %v11213_v36  ;;  %v1691_v48 = vpop.f32.mrb[54].mxu1  ;;  %3487 = vmatprep.subr.bf16.mxu1 %v1883_v1  ;;  %v1580_v35 = vpop.f32.mrb[55].mxu0  ;;  %3135 = vmatpush1.bf16.msra.mxu0 %v1880_v30  ;;  %v1800_v49 = vmax.f32 %v1575_v21, 0.0 }
 0x22d   :  { %v1692_v47 = vadd.f32 %v1691_v48, %v11213_v36  ;;  %v1581_v0 = vadd.f32 %v1580_v35, %v11213_v36  ;;  %v1693_v16 = vpop.f32.mrb[55].mxu1  ;;  %3488 = vmatpush1.bf16.msra.mxu1 %v1882_v25  ;;  %v1802_v7 = vmax.f32 %v1688_v38, 0.0  ;;  %v1801_v60 = vmax.f32 %v1577_v46, 0.0 }
 0x22e   :  { %v1808_v55 = vmax.f32 %v1579_v32, 0.0  ;;  %v1694_v59 = vadd.f32 %v1693_v16, %v11213_v36  ;;  %v1803_v45 = vmax.f32 %v1690_v37, 0.0 }
 0x22f   :  { %v1810_v40 = vmax.f32 %v1692_v47, 0.0  ;;  %v1809_v41 = vmax.f32 %v1581_v0, 0.0  ;;  %2503 = vmatmul.mubr.bf16.gmra.mrb[84].mxu0 %v9593_v63 }
 0x230   :  { %v1888_v62 = vpack.c.bf16 %v1808_v55, %v1800_v49  ;;  %v1811_v29 = vmax.f32 %v1694_v59, 0.0  ;;  %2856 = vmatmul.mubr.bf16.gmra.mrb[84].mxu1 %v9593_v63  ;;  %2512 = vmatprep.mubr.bf16.mxu0 %v15545_v50 }
 0x231   :  { %v1890_v52 = vpack.c.bf16 %v1810_v40, %v1802_v7  ;;  %v1584_v17 = vpop.f32.mrb[56].mxu0  ;;  %v1889_v19 = vpack.c.bf16 %v1809_v41, %v1801_v60  ;;  %2865 = vmatprep.mubr.bf16.mxu1 %v15545_v50 }
 0x232   :  { %v1585_v14 = vadd.f32 %v1584_v17, %v11227_v15  ;;  %v1697_v10 = vpop.f32.mrb[56].mxu1  ;;  %v1586_v36 = vpop.f32.mrb[57].mxu0  ;;  %v1891_v56 = vpack.c.bf16 %v1811_v29, %v1803_v45 }
 0x233   :  { %v1698_v30 = vadd.f32 %v1697_v10, %v11227_v15  ;;  %v1587_v33 = vadd.f32 %v1586_v36, %v11227_v15  ;;  %v1699_v25 = vpop.f32.mrb[57].mxu1  ;;  %v1588_v5 = vpop.f32.mrb[58].mxu0  ;;  %3136 = vmatprep.subr.bf16.mxu0 %v1889_v19 }
 0x234   :  { %v1700_v21 = vadd.f32 %v1699_v25, %v11227_v15  ;;  %v1589_v27 = vadd.f32 %v1588_v5, %v11225_v6  ;;  %v1701_v58 = vpop.f32.mrb[58].mxu1  ;;  %3489 = vmatprep.subr.bf16.mxu1 %v1891_v56  ;;  %v1590_v1 = vpop.f32.mrb[59].mxu0  ;;  %3137 = vmatpush1.bf16.msra.mxu0 %v1888_v62  ;;  %v1816_v53 = vmax.f32 %v1585_v14, 0.0 }
 0x235   :  { %v1702_v38 = vadd.f32 %v1701_v58, %v11225_v6  ;;  %v1591_v46 = vadd.f32 %v1590_v1, %v11225_v6  ;;  %v1703_v43 = vpop.f32.mrb[59].mxu1  ;;  %3490 = vmatpush1.bf16.msra.mxu1 %v1890_v52  ;;  %v1818_v32 = vmax.f32 %v1698_v30, 0.0  ;;  %v1817_v48 = vmax.f32 %v1587_v33, 0.0  ;;  %v9595_v52 = vld [vmem:[%s15197_s5 + $0x38] sm:$0xff]  }
 0x236   :  { %v1824_v63 = vmax.f32 %v1589_v27, 0.0  ;;  %v1704_v37 = vadd.f32 %v1703_v43, %v11225_v6  ;;  %v1819_v47 = vmax.f32 %v1700_v21, 0.0 }
 0x237   :  { %v1826_v35 = vmax.f32 %v1702_v38, 0.0  ;;  %v1825_v15 = vmax.f32 %v1591_v46, 0.0  ;;  %2513 = vmatmul.mubr.bf16.gmra.mrb[88].mxu0 %v9594_v34 }
 0x238   :  { %v1896_v0 = vpack.c.bf16 %v1824_v63, %v1816_v53  ;;  %v1827_v16 = vmax.f32 %v1704_v37, 0.0  ;;  %2866 = vmatmul.mubr.bf16.gmra.mrb[88].mxu1 %v9594_v34  ;;  %2522 = vmatprep.mubr.bf16.mxu0 %v15545_v50  ;;  %v9597_v63 = vld [vmem:[%s15197_s5 + $0x48] sm:$0xff]   ;;  %v9598_v37 = vld [vmem:[%s15197_s5 + $0x50] sm:$0xff]  }
 0x239   :  { %v1898_v49 = vpack.c.bf16 %v1826_v35, %v1818_v32  ;;  %v1594_v55 = vpop.f32.mrb[60].mxu0  ;;  %v1897_v59 = vpack.c.bf16 %v1825_v15, %v1817_v48  ;;  %2875 = vmatprep.mubr.bf16.mxu1 %v15545_v50  ;;  %v9599_v32 = vld [vmem:[%s15197_s5 + $0x58] sm:$0xff]   ;;  %v9600_v48 = vld [vmem:[%s15197_s5 + $0x60] sm:$0xff]   ;;  %v9601_v35 = vld [vmem:[%s15197_s5 + $0x68] sm:$0xff]  }
 0x23a   :  { %v1595_v7 = vadd.f32 %v1594_v55, %v11239_v51  ;;  %v1707_v60 = vpop.f32.mrb[60].mxu1  ;;  %v1596_v6 = vpop.f32.mrb[61].mxu0  ;;  %v1899_v40 = vpack.c.bf16 %v1827_v16, %v1819_v47  ;;  %v9602_v15 = vld [vmem:[%s15197_s5 + $0x70] sm:$0xff]   ;;  %v9603_v47 = vld [vmem:[%s15197_s5 + $0x78] sm:$0xff]  }
 0x23b   :  { %v1708_v41 = vadd.f32 %v1707_v60, %v11239_v51  ;;  %v1597_v45 = vadd.f32 %v1596_v6, %v11239_v51  ;;  %v1709_v62 = vpop.f32.mrb[61].mxu1  ;;  %v1598_v29 = vpop.f32.mrb[62].mxu0  ;;  %3138 = vmatprep.subr.bf16.mxu0 %v1897_v59  ;;  %v9606_v60 = vld [vmem:[%s15197_s5 + $0x90] sm:$0xff]  }
 0x23c   :  { %v1710_v17 = vadd.f32 %v1709_v62, %v11239_v51  ;;  %v1599_v19 = vadd.f32 %v1598_v29, %v11237_v42  ;;  %v1711_v14 = vpop.f32.mrb[62].mxu1  ;;  %3491 = vmatprep.subr.bf16.mxu1 %v1899_v40  ;;  %v1600_v10 = vpop.f32.mrb[63].mxu0  ;;  %3139 = vmatpush1.bf16.msra.mxu0 %v1896_v0  ;;  %v1832_v33 = vmax.f32 %v1595_v7, 0.0  ;;  %v9604_v0 = vld [vmem:[%s15197_s5 + $0x80] sm:$0xff]  }
 0x23d   :  { %v1712_v36 = vadd.f32 %v1711_v14, %v11237_v42  ;;  %v1601_v56 = vadd.f32 %v1600_v10, %v11237_v42  ;;  %v1713_v30 = vpop.f32.mrb[63].mxu1  ;;  %3492 = vmatpush1.bf16.msra.mxu1 %v1898_v49  ;;  %v1834_v34 = vmax.f32 %v1708_v41, 0.0  ;;  %v1833_v21 = vmax.f32 %v1597_v45, 0.0  ;;  %v11398_v16 = vpop.permute.xlu0 %1915  ;;  %v9605_v49 = vld [vmem:[%s15197_s5 + $0x88] sm:$0xff]   ;;  %v9607_v41 = vld [vmem:[%s15197_s5 + $0x98] sm:$0xff]  }
 0x23e   :  { %v1840_v25 = vmax.f32 %v1599_v19, 0.0  ;;  %v1714_v5 = vadd.f32 %v1713_v30, %v11237_v42  ;;  %v1835_v58 = vmax.f32 %v1710_v17, 0.0  ;;  %v9596_v42 = vld [vmem:[%s15197_s5 + $0x40] sm:$0xff]   ;;  %v11403_v55 = vpop.permute.xlu1 %1910  ;;  %v9609_v10 = vld [vmem:[%s15197_s5 + $0xa8] sm:$0xff]   ;;  %v9610_v30 = vld [vmem:[%s15197_s5 + $0xb0] sm:$0xff]  }
 0x23f   :  { %v1842_v27 = vmax.f32 %v1712_v36, 0.0  ;;  %v1841_v51 = vmax.f32 %v1601_v56, 0.0  ;;  %2523 = vmatmul.mubr.bf16.gmra.mrb[92].mxu0 %v9595_v52 }
 0x240   :  { %v1904_v1 = vpack.c.bf16 %v1840_v25, %v1832_v33  ;;  %v1843_v38 = vmax.f32 %v1714_v5, 0.0  ;;  %2876 = vmatmul.mubr.bf16.gmra.mrb[92].mxu1 %v9595_v52  ;;  %2532 = vmatprep.mubr.bf16.mxu0 %v15545_v50  ;;  %v9608_v52 = vld [vmem:[%s15197_s5 + $0xa0] sm:$0xff]  }
 0x241   :  { %v1906_v46 = vpack.c.bf16 %v1842_v27, %v1834_v34  ;;  %v1905_v43 = vpack.c.bf16 %v1841_v51, %v1833_v21  ;;  %2885 = vmatprep.mubr.bf16.mxu1 %v15545_v50  ;;  %v11406_v59 = vpop.permute.xlu0 %1925  ;;  %v9611_v34 = vld [vmem:[%s15197_s5 + $0xb8] sm:$0xff]  }
 0x242   :  { %v1907_v53 = vpack.c.bf16 %v1843_v38, %v1835_v58  ;;  %v11409_v7 = vpop.permute.xlu1 %1920  ;;  %v9612_v58 = vld [vmem:[%s15197_s5 + $0xc0] sm:$0xff]  }
 0x243   :  { %3140 = vmatprep.subr.bf16.mxu0 %v1905_v43 }
 0x244   :  { %3493 = vmatprep.subr.bf16.mxu1 %v1907_v53  ;;  %3141 = vmatpush1.bf16.msra.mxu0 %v1904_v1 }
 0x245   :  { %3494 = vmatpush1.bf16.msra.mxu1 %v1906_v46  ;;  %v11414_v6 = vpop.permute.xlu0 %1935  ;;  %v9613_v46 = vld [vmem:[%s15197_s5 + $0xc8] sm:$0xff]  }
 0x246   :  { %v11416_v40 = vpop.permute.xlu1 %1930 }
 0x247   :  { %2533 = vmatmul.mubr.bf16.gmra.mrb[96].mxu0 %v9596_v42 }
 0x248   :  { %2886 = vmatmul.mubr.bf16.gmra.mrb[96].mxu1 %v9596_v42  ;;  %2542 = vmatprep.mubr.bf16.mxu0 %v15545_v50 }
 0x249   :  { %2895 = vmatprep.mubr.bf16.mxu1 %v15545_v50  ;;  %v11423_v45 = vpop.permute.xlu0 %1945 }
 0x24a   :  { %v11425_v62 = vpop.permute.xlu1 %1940 }
 0x24d   :  { %v11429_v29 = vpop.permute.xlu0 %1955 }
 0x24e   :  { %v11434_v17 = vpop.permute.xlu1 %1950 }
 0x24f   :  { %2543 = vmatmul.mubr.bf16.gmra.mrb[100].mxu0 %v9597_v63 }
 0x250   :  { %2896 = vmatmul.mubr.bf16.gmra.mrb[100].mxu1 %v9597_v63  ;;  %2552 = vmatprep.mubr.bf16.mxu0 %v15545_v50  ;;  %v9614_v63 = vld [vmem:[%s15197_s5 + $0xd0] sm:$0xff]  }
 0x251   :  { %2905 = vmatprep.mubr.bf16.mxu1 %v15545_v50  ;;  %v11437_v19 = vpop.permute.xlu0 %1965 }
 0x252   :  { %v11440_v14 = vpop.permute.xlu1 %1960 }
 0x255   :  { %v11445_v36 = vpop.permute.xlu0 %1975 }
 0x256   :  { %v11447_v56 = vpop.permute.xlu1 %1970 }
 0x257   :  { %2553 = vmatmul.mubr.bf16.gmra.mrb[104].mxu0 %v9598_v37 }
 0x258   :  { %2906 = vmatmul.mubr.bf16.gmra.mrb[104].mxu1 %v9598_v37  ;;  %2562 = vmatprep.mubr.bf16.mxu0 %v15545_v50 }
 0x259   :  { %2915 = vmatprep.mubr.bf16.mxu1 %v15545_v50  ;;  %v11454_v33 = vpop.permute.xlu0 %1985 }
 0x25a   :  { %15564 = vst [vmem:[#allocation44_spill] sm:$0xff] %v11454_v33  ;;  %v11456_v25 = vpop.permute.xlu1 %1980 }
 0x25b   :  { %15565 = vst [vmem:[#allocation19_spill] sm:$0xff] %v11456_v25 }
 0x25d   :  { %v11460_v5 = vpop.permute.xlu0 %1995 }
 0x25e   :  { %15566 = vst [vmem:[#allocation49_spill] sm:$0xff] %v11460_v5  ;;  %v11465_v21 = vpop.permute.xlu1 %1990 }
 0x25f   :  { %2563 = vmatmul.mubr.bf16.gmra.mrb[108].mxu0 %v9599_v32  ;;  %15567 = vst [vmem:[#allocation8_spill] sm:$0xff] %v11465_v21 }
 0x260   :  { %2916 = vmatmul.mubr.bf16.gmra.mrb[108].mxu1 %v9599_v32  ;;  %2572 = vmatprep.mubr.bf16.mxu0 %v15545_v50 }
 0x261   :  { %2925 = vmatprep.mubr.bf16.mxu1 %v15545_v50  ;;  %v11468_v27 = vpop.permute.xlu0 %2005 }
 0x262   :  { %15568 = vst [vmem:[#allocation37_spill] sm:$0xff] %v11468_v27  ;;  %v11471_v51 = vpop.permute.xlu1 %2000 }
 0x263   :  { %15569 = vst [vmem:[#allocation56_spill] sm:$0xff] %v11471_v51 }
 0x265   :  { %v11476_v1 = vpop.permute.xlu0 %2015 }
 0x266   :  { %15570 = vst [vmem:[#allocation50_spill] sm:$0xff] %v11476_v1  ;;  %v11478_v38 = vpop.permute.xlu1 %2010 }
 0x267   :  { %2573 = vmatmul.mubr.bf16.gmra.mrb[112].mxu0 %v9600_v48  ;;  %15571 = vst [vmem:[#allocation60_spill] sm:$0xff] %v11478_v38 }
 0x268   :  { %2926 = vmatmul.mubr.bf16.gmra.mrb[112].mxu1 %v9600_v48  ;;  %2582 = vmatprep.mubr.bf16.mxu0 %v15545_v50 }
 0x269   :  { %2935 = vmatprep.mubr.bf16.mxu1 %v15545_v50  ;;  %v11485_v43 = vpop.permute.xlu0 %2025 }
 0x26a   :  { %15572 = vst [vmem:[#allocation16_spill] sm:$0xff] %v11485_v43  ;;  %v11487_v53 = vpop.permute.xlu1 %2020 }
 0x26b   :  { %15573 = vst [vmem:[#allocation24_spill] sm:$0xff] %v11487_v53 }
 0x26d   :  { %v11491_v42 = vpop.permute.xlu0 %2035 }
 0x26e   :  { %15574 = vst [vmem:[#allocation9_spill] sm:$0xff] %v11491_v42  ;;  %v11496_v37 = vpop.permute.xlu1 %2030 }
 0x26f   :  { %2583 = vmatmul.mubr.bf16.gmra.mrb[116].mxu0 %v9601_v35  ;;  %15575 = vst [vmem:[#allocation38_spill] sm:$0xff] %v11496_v37 }
 0x270   :  { %2936 = vmatmul.mubr.bf16.gmra.mrb[116].mxu1 %v9601_v35  ;;  %2592 = vmatprep.mubr.bf16.mxu0 %v15545_v50 }
 0x271   :  { %2945 = vmatprep.mubr.bf16.mxu1 %v15545_v50  ;;  %v11499_v32 = vpop.permute.xlu0 %2045 }
 0x272   :  { %15576 = vst [vmem:[#allocation10_spill] sm:$0xff] %v11499_v32  ;;  %v11502_v48 = vpop.permute.xlu1 %2040 }
 0x273   :  { %15577 = vst [vmem:[#allocation39_spill] sm:$0xff] %v11502_v48 }
 0x277   :  { %2593 = vmatmul.mubr.bf16.gmra.mrb[120].mxu0 %v9602_v15 }
 0x278   :  { %2946 = vmatmul.mubr.bf16.gmra.mrb[120].mxu1 %v9602_v15  ;;  %2602 = vmatprep.mubr.bf16.mxu0 %v15545_v50 }
 0x279   :  { %2955 = vmatprep.mubr.bf16.mxu1 %v15545_v50 }
 0x27f   :  { %2603 = vmatmul.mubr.bf16.gmra.mrb[124].mxu0 %v9603_v47 }
 0x280   :  { %2956 = vmatmul.mubr.bf16.gmra.mrb[124].mxu1 %v9603_v47  ;;  %2612 = vmatprep.mubr.bf16.mxu0 %v15545_v50 }
 0x281   :  { %2965 = vmatprep.mubr.bf16.mxu1 %v15545_v50 }
 0x287   :  { %2613 = vmatmul.mubr.bf16.gmra.mrb[128].mxu0 %v9604_v0 }
 0x288   :  { %2966 = vmatmul.mubr.bf16.gmra.mrb[128].mxu1 %v9604_v0  ;;  %2622 = vmatprep.mubr.bf16.mxu0 %v15545_v50 }
 0x289   :  { %2975 = vmatprep.mubr.bf16.mxu1 %v15545_v50 }
 0x28f   :  { %2623 = vmatmul.mubr.bf16.gmra.mrb[132].mxu0 %v9605_v49 }
 0x290   :  { %2976 = vmatmul.mubr.bf16.gmra.mrb[132].mxu1 %v9605_v49  ;;  %2632 = vmatprep.mubr.bf16.mxu0 %v15545_v50  ;;  %v9615_v49 = vld [vmem:[%s15197_s5 + $0xd8] sm:$0xff]  }
 0x291   :  { %2985 = vmatprep.mubr.bf16.mxu1 %v15545_v50 }
 0x297   :  { %2633 = vmatmul.mubr.bf16.gmra.mrb[136].mxu0 %v9606_v60 }
 0x298   :  { %2986 = vmatmul.mubr.bf16.gmra.mrb[136].mxu1 %v9606_v60  ;;  %2642 = vmatprep.mubr.bf16.mxu0 %v15545_v50 }
 0x299   :  { %2995 = vmatprep.mubr.bf16.mxu1 %v15545_v50 }
 0x29f   :  { %2643 = vmatmul.mubr.bf16.gmra.mrb[140].mxu0 %v9607_v41 }
 0x2a0   :  { %2996 = vmatmul.mubr.bf16.gmra.mrb[140].mxu1 %v9607_v41  ;;  %2652 = vmatprep.mubr.bf16.mxu0 %v15545_v50 }
 0x2a1   :  { %3005 = vmatprep.mubr.bf16.mxu1 %v15545_v50 }
 0x2a7   :  { %2653 = vmatmul.mubr.bf16.gmra.mrb[144].mxu0 %v9608_v52 }
 0x2a8   :  { %3006 = vmatmul.mubr.bf16.gmra.mrb[144].mxu1 %v9608_v52  ;;  %2662 = vmatprep.mubr.bf16.mxu0 %v15545_v50 }
 0x2a9   :  { %3015 = vmatprep.mubr.bf16.mxu1 %v15545_v50 }
 0x2af   :  { %2663 = vmatmul.mubr.bf16.gmra.mrb[148].mxu0 %v9609_v10 }
 0x2b0   :  { %3016 = vmatmul.mubr.bf16.gmra.mrb[148].mxu1 %v9609_v10  ;;  %2672 = vmatprep.mubr.bf16.mxu0 %v15545_v50 }
 0x2b1   :  { %3025 = vmatprep.mubr.bf16.mxu1 %v15545_v50 }
 0x2b7   :  { %2673 = vmatmul.mubr.bf16.gmra.mrb[152].mxu0 %v9610_v30 }
 0x2b8   :  { %3026 = vmatmul.mubr.bf16.gmra.mrb[152].mxu1 %v9610_v30  ;;  %2682 = vmatprep.mubr.bf16.mxu0 %v15545_v50 }
 0x2b9   :  { %3035 = vmatprep.mubr.bf16.mxu1 %v15545_v50 }
 0x2bf   :  { %2683 = vmatmul.mubr.bf16.gmra.mrb[156].mxu0 %v9611_v34 }
 0x2c0   :  { %3036 = vmatmul.mubr.bf16.gmra.mrb[156].mxu1 %v9611_v34  ;;  %2692 = vmatprep.mubr.bf16.mxu0 %v15545_v50 }
 0x2c1   :  { %3045 = vmatprep.mubr.bf16.mxu1 %v15545_v50 }
 0x2c7   :  { %2693 = vmatmul.mubr.bf16.gmra.mrb[160].mxu0 %v9612_v58 }
 0x2c8   :  { %3046 = vmatmul.mubr.bf16.gmra.mrb[160].mxu1 %v9612_v58  ;;  %2702 = vmatprep.mubr.bf16.mxu0 %v15545_v50 }
 0x2c9   :  { %3055 = vmatprep.mubr.bf16.mxu1 %v15545_v50 }
 0x2cf   :  { %2703 = vmatmul.mubr.bf16.gmra.mrb[164].mxu0 %v9613_v46 }
 0x2d0   :  { %3056 = vmatmul.mubr.bf16.gmra.mrb[164].mxu1 %v9613_v46  ;;  %2712 = vmatprep.mubr.bf16.mxu0 %v15545_v50 }
 0x2d1   :  { %3065 = vmatprep.mubr.bf16.mxu1 %v15545_v50 }
 0x2d7   :  { %2713 = vmatmul.mubr.bf16.gmra.mrb[168].mxu0 %v9614_v63 }
 0x2d8   :  { %3066 = vmatmul.mubr.bf16.gmra.mrb[168].mxu1 %v9614_v63  ;;  %2722 = vmatprep.mubr.bf16.mxu0 %v15545_v50 }
 0x2d9   :  { %3075 = vmatprep.mubr.bf16.mxu1 %v15545_v50 }
 0x2da   :  { %v2454_v35 = vpop.f32.mrb[64].mxu0 }
 0x2db   :  { %v2455_v15 = vadd.f32 %v2454_v35, %v11403_v55  ;;  %v2807_v47 = vpop.f32.mrb[64].mxu1  ;;  %v2456_v0 = vpop.f32.mrb[65].mxu0 }
 0x2dc   :  { %v2808_v60 = vadd.f32 %v2807_v47, %v11403_v55  ;;  %v2457_v41 = vadd.f32 %v2456_v0, %v11403_v55  ;;  %v2809_v52 = vpop.f32.mrb[65].mxu1  ;;  %v2458_v10 = vpop.f32.mrb[66].mxu0 }
 0x2dd   :  { %v3832_v30 = vmax.f32 %v2455_v15, 0.0  ;;  %v2810_v34 = vadd.f32 %v2809_v52, %v11403_v55  ;;  %v2459_v58 = vadd.f32 %v2458_v10, %v11398_v16  ;;  %v2811_v46 = vpop.f32.mrb[66].mxu1  ;;  %v2460_v63 = vpop.f32.mrb[67].mxu0 }
 0x2de   :  { %v3834_v35 = vmax.f32 %v2808_v60, 0.0  ;;  %v3833_v2 = vmax.f32 %v2457_v41, 0.0  ;;  %v2812_v61 = vadd.f32 %v2811_v46, %v11398_v16  ;;  %v2461_v9 = vadd.f32 %v2460_v63, %v11398_v16  ;;  %v2813_v39 = vpop.f32.mrb[67].mxu1  ;;  %v11516_v10 = vpop.permute.xlu0 %2055 }
 0x2df   :  { %v3835_v28 = vmax.f32 %v2810_v34, 0.0  ;;  %v3840_v47 = vmax.f32 %v2459_v58, 0.0  ;;  %v2814_v0 = vadd.f32 %v2813_v39, %v11398_v16  ;;  %2723 = vmatmul.mubr.bf16.gmra.mrb[172].mxu0 %v9615_v49  ;;  %15578 = vst [vmem:[#allocation11_spill] sm:$0xff] %v11516_v10  ;;  %v11519_v46 = vpop.permute.xlu1 %2050 }
 0x2e0   :  { %v3842_v12 = vmax.f32 %v2812_v61, 0.0  ;;  %v3841_v15 = vmax.f32 %v2461_v9, 0.0  ;;  %3076 = vmatmul.mubr.bf16.gmra.mrb[172].mxu1 %v9615_v49  ;;  %v4344_v52 = vmax.f32 %v3832_v30, %v3833_v2  ;;  %2732 = vmatprep.mubr.bf16.mxu0 %v15545_v50  ;;  %15579 = vst [vmem:[#allocation40_spill] sm:$0xff] %v11519_v46  ;;  %v9616_v2 = vld [vmem:[%s15197_s5 + $0xe0] sm:$0xff]  }
 0x2e1   :  { %v3843_v60 = vmax.f32 %v2814_v0, 0.0  ;;  %v4536_v41 = vmax.f32 %v3834_v35, %v3835_v28  ;;  %3085 = vmatprep.mubr.bf16.mxu1 %v15545_v50 }
 0x2e2   :  { %v2464_v63 = vpop.f32.mrb[68].mxu0  ;;  %4345 = vmax.xlane.f32.xlu1 %v4344_v52  ;;  %v4347_v34 = vmax.f32 %v3840_v47, %v3841_v15 }
 0x2e3   :  { %v2817_v58 = vpop.f32.mrb[68].mxu1  ;;  %4537 = vmax.xlane.f32.xlu0 %v4536_v41  ;;  %v2465_v39 = vadd.f32 %v2464_v63, %v11409_v7  ;;  %v2466_v9 = vpop.f32.mrb[69].mxu0  ;;  %v4539_v61 = vmax.f32 %v3842_v12, %v3843_v60 }
 0x2e4   :  { %v2818_v49 = vadd.f32 %v2817_v58, %v11409_v7  ;;  %v2467_v28 = vadd.f32 %v2466_v9, %v11409_v7  ;;  %v2819_v30 = vpop.f32.mrb[69].mxu1  ;;  %v2468_v35 = vpop.f32.mrb[70].mxu0 }
 0x2e5   :  { %v3848_v0 = vmax.f32 %v2465_v39, 0.0  ;;  %v2820_v52 = vadd.f32 %v2819_v30, %v11409_v7  ;;  %v2469_v47 = vadd.f32 %v2468_v35, %v11406_v59  ;;  %v2821_v15 = vpop.f32.mrb[70].mxu1  ;;  %v2470_v41 = vpop.f32.mrb[71].mxu0 }
 0x2e6   :  { %v3850_v63 = vmax.f32 %v2818_v49, 0.0  ;;  %v3849_v26 = vmax.f32 %v2467_v28, 0.0  ;;  %v2822_v12 = vadd.f32 %v2821_v15, %v11406_v59  ;;  %v2471_v60 = vadd.f32 %v2470_v41, %v11406_v59  ;;  %v2823_v4 = vpop.f32.mrb[71].mxu1  ;;  %4540 = vmax.xlane.f32.xlu1 %v4539_v61  ;;  %v11533_v49 = vpop.permute.xlu0 %2065 }
 0x2e7   :  { %v3851_v58 = vmax.f32 %v2820_v52, 0.0  ;;  %v3856_v8 = vmax.f32 %v2469_v47, 0.0  ;;  %v2824_v9 = vadd.f32 %v2823_v4, %v11406_v59  ;;  %4348 = vmax.xlane.f32.xlu0 %v4347_v34  ;;  %2733 = vmatmul.mubr.bf16.gmra.mrb[176].mxu0 %v9616_v2  ;;  %15580 = vst [vmem:[#allocation12_spill] sm:$0xff] %v11533_v49  ;;  %v11536_v41 = vpop.permute.xlu1 %2060 }
 0x2e8   :  { %v3858_v39 = vmax.f32 %v2822_v12, 0.0  ;;  %v3857_v30 = vmax.f32 %v2471_v60, 0.0  ;;  %3086 = vmatmul.mubr.bf16.gmra.mrb[176].mxu1 %v9616_v2  ;;  %v4350_v35 = vmax.f32 %v3848_v0, %v3849_v26  ;;  %2742 = vmatprep.mubr.bf16.mxu0 %v15545_v50  ;;  %15581 = vst [vmem:[#allocation45_spill] sm:$0xff] %v11536_v41  ;;  %v9617_v26 = vld [vmem:[%s15197_s5 + $0xe8] sm:$0xff]  }
 0x2e9   :  { %v3859_v28 = vmax.f32 %v2824_v9, 0.0  ;;  %3095 = vmatprep.mubr.bf16.mxu1 %v15545_v50  ;;  %v4542_v15 = vmax.f32 %v3850_v63, %v3851_v58 }
 0x2ea   :  { %v2474_v61 = vpop.f32.mrb[72].mxu0  ;;  %v4353_v52 = vmax.f32 %v3856_v8, %v3857_v30 }
 0x2eb   :  { %v2475_v4 = vadd.f32 %v2474_v61, %v11416_v40  ;;  %v2827_v34 = vpop.f32.mrb[72].mxu1  ;;  %4351 = vmax.xlane.f32.xlu0 %v4350_v35  ;;  %v2476_v47 = vpop.f32.mrb[73].mxu0  ;;  %v4545_v2 = vmax.f32 %v3858_v39, %v3859_v28 }
 0x2ec   :  { %v2828_v0 = vadd.f32 %v2827_v34, %v11416_v40  ;;  %v2477_v12 = vadd.f32 %v2476_v47, %v11416_v40  ;;  %v2829_v60 = vpop.f32.mrb[73].mxu1  ;;  %v2478_v63 = vpop.f32.mrb[74].mxu0  ;;  %4354 = vmax.xlane.f32.xlu1 %v4353_v52 }
 0x2ed   :  { %v3864_v58 = vmax.f32 %v2475_v4, 0.0  ;;  %v2830_v8 = vadd.f32 %v2829_v60, %v11416_v40  ;;  %v2479_v9 = vadd.f32 %v2478_v63, %v11414_v6  ;;  %v2831_v30 = vpop.f32.mrb[74].mxu1  ;;  %v2480_v35 = vpop.f32.mrb[75].mxu0 }
 0x2ee   :  { %v3866_v61 = vmax.f32 %v2828_v0, 0.0  ;;  %v3865_v44 = vmax.f32 %v2477_v12, 0.0  ;;  %v2832_v23 = vadd.f32 %v2831_v30, %v11414_v6  ;;  %v2481_v39 = vadd.f32 %v2480_v35, %v11414_v6  ;;  %v2833_v28 = vpop.f32.mrb[75].mxu1  ;;  %v11549_v63 = vpop.permute.xlu0 %2075 }
 0x2ef   :  { %v3867_v34 = vmax.f32 %v2830_v8, 0.0  ;;  %v3872_v18 = vmax.f32 %v2479_v9, 0.0  ;;  %v2834_v47 = vadd.f32 %v2833_v28, %v11414_v6  ;;  %4543 = vmax.xlane.f32.xlu0 %v4542_v15  ;;  %2743 = vmatmul.mubr.bf16.gmra.mrb[180].mxu0 %v9617_v26  ;;  %15582 = vst [vmem:[#allocation55_spill] sm:$0xff] %v11549_v63  ;;  %v11553_v30 = vpop.permute.xlu1 %2070 }
 0x2f0   :  { %v3874_v52 = vmax.f32 %v2832_v23, 0.0  ;;  %v3873_v4 = vmax.f32 %v2481_v39, 0.0  ;;  %3096 = vmatmul.mubr.bf16.gmra.mrb[180].mxu1 %v9617_v26  ;;  %4546 = vmax.xlane.f32.xlu1 %v4545_v2  ;;  %v4356_v60 = vmax.f32 %v3864_v58, %v3865_v44  ;;  %15583 = vst [vmem:[#allocation57_spill] sm:$0xff] %v11553_v30  ;;  %v9618_v44 = vld [vmem:[%s15197_s5 + $0xf0] sm:$0xff]  }
 0x2f1   :  { %v3875_v0 = vmax.f32 %v2834_v47, 0.0  ;;  %2752 = vmatprep.mubr.bf16.mxu0 %v15545_v50  ;;  %3105 = vmatprep.mubr.bf16.mxu1 %v15545_v50  ;;  %v4548_v12 = vmax.f32 %v3866_v61, %v3867_v34 }
 0x2f2   :  { %v2484_v8 = vpop.f32.mrb[76].mxu0  ;;  %v4359_v9 = vmax.f32 %v3872_v18, %v3873_v4 }
 0x2f3   :  { %v2485_v15 = vadd.f32 %v2484_v8, %v11425_v62  ;;  %v2837_v35 = vpop.f32.mrb[76].mxu1  ;;  %4357 = vmax.xlane.f32.xlu0 %v4356_v60  ;;  %v2486_v23 = vpop.f32.mrb[77].mxu0  ;;  %v4551_v26 = vmax.f32 %v3874_v52, %v3875_v0 }
 0x2f4   :  { %v2838_v2 = vadd.f32 %v2837_v35, %v11425_v62  ;;  %v2487_v58 = vadd.f32 %v2486_v23, %v11425_v62  ;;  %v2839_v39 = vpop.f32.mrb[77].mxu1  ;;  %v2488_v61 = vpop.f32.mrb[78].mxu0  ;;  %4360 = vmax.xlane.f32.xlu1 %v4359_v9 }
 0x2f5   :  { %v3880_v28 = vmax.f32 %v2485_v15, 0.0  ;;  %v2840_v18 = vadd.f32 %v2839_v39, %v11425_v62  ;;  %v2489_v34 = vadd.f32 %v2488_v61, %v11423_v45  ;;  %v2841_v47 = vpop.f32.mrb[78].mxu1  ;;  %v2490_v4 = vpop.f32.mrb[79].mxu0 }
 0x2f6   :  { %v3882_v60 = vmax.f32 %v2838_v2, 0.0  ;;  %v3881_v8 = vmax.f32 %v2487_v58, 0.0  ;;  %v2842_v24 = vadd.f32 %v2841_v47, %v11423_v45  ;;  %v2491_v52 = vadd.f32 %v2490_v4, %v11423_v45  ;;  %v2843_v0 = vpop.f32.mrb[79].mxu1  ;;  %v11566_v61 = vpop.permute.xlu0 %2085 }
 0x2f7   :  { %v3883_v35 = vmax.f32 %v2840_v18, 0.0  ;;  %v3888_v20 = vmax.f32 %v2489_v34, 0.0  ;;  %v2844_v23 = vadd.f32 %v2843_v0, %v11423_v45  ;;  %4549 = vmax.xlane.f32.xlu0 %v4548_v12  ;;  %2753 = vmatmul.mubr.bf16.gmra.mrb[184].mxu0 %v9618_v44  ;;  %15584 = vst [vmem:[#allocation46_spill] sm:$0xff] %v11566_v61  ;;  %v11570_v47 = vpop.permute.xlu1 %2080 }
 0x2f8   :  { %v3890_v9 = vmax.f32 %v2842_v24, 0.0  ;;  %v3889_v15 = vmax.f32 %v2491_v52, 0.0  ;;  %3106 = vmatmul.mubr.bf16.gmra.mrb[184].mxu1 %v9618_v44  ;;  %4552 = vmax.xlane.f32.xlu1 %v4551_v26  ;;  %v4362_v39 = vmax.f32 %v3880_v28, %v3881_v8  ;;  %15585 = vst [vmem:[#allocation47_spill] sm:$0xff] %v11570_v47  ;;  %v9619_v44 = vld [vmem:[%s15197_s5 + $0xf8] sm:$0xff]  }
 0x2f9   :  { %v3891_v2 = vmax.f32 %v2844_v23, 0.0  ;;  %2762 = vmatprep.mubr.bf16.mxu0 %v15545_v50  ;;  %3115 = vmatprep.mubr.bf16.mxu1 %v15545_v50  ;;  %v4554_v58 = vmax.f32 %v3882_v60, %v3883_v35 }
 0x2fa   :  { %v2494_v18 = vpop.f32.mrb[80].mxu0  ;;  %v4365_v34 = vmax.f32 %v3888_v20, %v3889_v15 }
 0x2fb   :  { %v2495_v12 = vadd.f32 %v2494_v18, %v11434_v17  ;;  %v2847_v4 = vpop.f32.mrb[80].mxu1  ;;  %4363 = vmax.xlane.f32.xlu0 %v4362_v39  ;;  %v2496_v24 = vpop.f32.mrb[81].mxu0  ;;  %v4557_v26 = vmax.f32 %v3890_v9, %v3891_v2 }
 0x2fc   :  { %v2848_v28 = vadd.f32 %v2847_v4, %v11434_v17  ;;  %v2497_v8 = vadd.f32 %v2496_v24, %v11434_v17  ;;  %v2849_v52 = vpop.f32.mrb[81].mxu1  ;;  %v2498_v60 = vpop.f32.mrb[82].mxu0  ;;  %4366 = vmax.xlane.f32.xlu1 %v4365_v34 }
 0x2fd   :  { %v3896_v0 = vmax.f32 %v2495_v12, 0.0  ;;  %v2850_v20 = vadd.f32 %v2849_v52, %v11434_v17  ;;  %v2499_v35 = vadd.f32 %v2498_v60, %v11429_v29  ;;  %v2851_v23 = vpop.f32.mrb[82].mxu1  ;;  %v2500_v15 = vpop.f32.mrb[83].mxu0 }
 0x2fe   :  { %v3898_v39 = vmax.f32 %v2848_v28, 0.0  ;;  %v3897_v18 = vmax.f32 %v2497_v8, 0.0  ;;  %v2852_v3 = vadd.f32 %v2851_v23, %v11429_v29  ;;  %v2501_v9 = vadd.f32 %v2500_v15, %v11429_v29  ;;  %v2853_v2 = vpop.f32.mrb[83].mxu1  ;;  %v11583_v60 = vpop.permute.xlu0 %2095 }
 0x2ff   :  { %v3899_v4 = vmax.f32 %v2850_v20, 0.0  ;;  %v3904_v54 = vmax.f32 %v2499_v35, 0.0  ;;  %v2854_v24 = vadd.f32 %v2853_v2, %v11429_v29  ;;  %4555 = vmax.xlane.f32.xlu0 %v4554_v58  ;;  %2763 = vmatmul.mubr.bf16.gmra.mrb[188].mxu0 %v9619_v44  ;;  %15586 = vst [vmem:[#allocation48_spill] sm:$0xff] %v11583_v60  ;;  %v11587_v23 = vpop.permute.xlu1 %2090 }
 0x300   :  { %v3906_v34 = vmax.f32 %v2852_v3, 0.0  ;;  %v3905_v12 = vmax.f32 %v2501_v9, 0.0  ;;  %3116 = vmatmul.mubr.bf16.gmra.mrb[188].mxu1 %v9619_v44  ;;  %4558 = vmax.xlane.f32.xlu1 %v4557_v26  ;;  %v4368_v52 = vmax.f32 %v3896_v0, %v3897_v18  ;;  %15587 = vst [vmem:[#allocation63_spill] sm:$0xff] %v11587_v23 }
 0x301   :  { %v3907_v28 = vmax.f32 %v2854_v24, 0.0  ;;  %3158 = vmatprep.mubr.bf16.mxu0 %v15545_v50  ;;  %3511 = vmatprep.mubr.bf16.mxu1 %v15545_v50  ;;  %v4560_v8 = vmax.f32 %v3898_v39, %v3899_v4 }
 0x302   :  { %v2504_v20 = vpop.f32.mrb[84].mxu0  ;;  %v4371_v35 = vmax.f32 %v3904_v54, %v3905_v12 }
 0x303   :  { %v2505_v58 = vadd.f32 %v2504_v20, %v11440_v14  ;;  %v2857_v15 = vpop.f32.mrb[84].mxu1  ;;  %4369 = vmax.xlane.f32.xlu0 %v4368_v52  ;;  %v2506_v3 = vpop.f32.mrb[85].mxu0  ;;  %v4563_v44 = vmax.f32 %v3906_v34, %v3907_v28 }
 0x304   :  { %v2858_v26 = vadd.f32 %v2857_v15, %v11440_v14  ;;  %v2507_v0 = vadd.f32 %v2506_v3, %v11440_v14  ;;  %v2859_v18 = vpop.f32.mrb[85].mxu1  ;;  %v2508_v9 = vpop.f32.mrb[86].mxu0  ;;  %4372 = vmax.xlane.f32.xlu1 %v4371_v35  ;;  %v9744_v35 = vld [vmem:[%s15197_s5] sm:$0xff]  }
 0x305   :  { %v3912_v2 = vmax.f32 %v2505_v58, 0.0  ;;  %v2860_v39 = vadd.f32 %v2859_v18, %v11440_v14  ;;  %v2509_v4 = vadd.f32 %v2508_v9, %v11437_v19  ;;  %v2861_v24 = vpop.f32.mrb[86].mxu1  ;;  %v2510_v54 = vpop.f32.mrb[87].mxu0 }
 0x306   :  { %v3914_v12 = vmax.f32 %v2858_v26, 0.0  ;;  %v3913_v20 = vmax.f32 %v2507_v0, 0.0  ;;  %v2862_v52 = vadd.f32 %v2861_v24, %v11437_v19  ;;  %v2511_v34 = vadd.f32 %v2510_v54, %v11437_v19  ;;  %v2863_v28 = vpop.f32.mrb[87].mxu1  ;;  %v11600_v0 = vpop.permute.xlu0 %2105 }
 0x307   :  { %v3915_v15 = vmax.f32 %v2860_v39, 0.0  ;;  %v3920_v22 = vmax.f32 %v2509_v4, 0.0  ;;  %v2864_v3 = vadd.f32 %v2863_v28, %v11437_v19  ;;  %4561 = vmax.xlane.f32.xlu0 %v4560_v8  ;;  %3159 = vmatmul.mubr.bf16.vlgmr.msra.gmra.mrb[192].mxu0 %v9744_v35  ;;  %15588 = vst [vmem:[#allocation64_spill] sm:$0xff] %v11600_v0  ;;  %v11604_v4 = vpop.permute.xlu1 %2100 }
 0x308   :  { %v3922_v58 = vmax.f32 %v2862_v52, 0.0  ;;  %v3921_v18 = vmax.f32 %v2511_v34, 0.0  ;;  %3512 = vmatmul.mubr.bf16.vlgmr.msra.gmra.mrb[192].mxu1 %v9744_v35  ;;  %4564 = vmax.xlane.f32.xlu1 %v4563_v44  ;;  %v4374_v26 = vmax.f32 %v3912_v2, %v3913_v20  ;;  %15589 = vst [vmem:[#allocation65_spill] sm:$0xff] %v11604_v4 }
 0x309   :  { %v3923_v9 = vmax.f32 %v2864_v3, 0.0  ;;  %3168 = vmatprep.mubr.bf16.mxu0 %v15545_v50  ;;  %3521 = vmatprep.mubr.bf16.mxu1 %v15545_v50  ;;  %v4566_v39 = vmax.f32 %v3914_v12, %v3915_v15 }
 0x30a   :  { %v2514_v8 = vpop.f32.mrb[88].mxu0  ;;  %v4377_v24 = vmax.f32 %v3920_v22, %v3921_v18 }
 0x30b   :  { %v2515_v54 = vadd.f32 %v2514_v8, %v11447_v56  ;;  %v2867_v28 = vpop.f32.mrb[88].mxu1  ;;  %4375 = vmax.xlane.f32.xlu0 %v4374_v26  ;;  %v2516_v52 = vpop.f32.mrb[89].mxu0  ;;  %v4569_v34 = vmax.f32 %v3922_v58, %v3923_v9 }
 0x30c   :  { %v2868_v44 = vadd.f32 %v2867_v28, %v11447_v56  ;;  %v2517_v2 = vadd.f32 %v2516_v52, %v11447_v56  ;;  %v2869_v20 = vpop.f32.mrb[89].mxu1  ;;  %v2518_v3 = vpop.f32.mrb[90].mxu0  ;;  %4378 = vmax.xlane.f32.xlu1 %v4377_v24  ;;  %v9745_v24 = vld [vmem:[%s15197_s5 + $0x8] sm:$0xff]  }
 0x30d   :  { %v3928_v35 = vmax.f32 %v2515_v54, 0.0  ;;  %v2870_v12 = vadd.f32 %v2869_v20, %v11447_v56  ;;  %v2519_v15 = vadd.f32 %v2518_v3, %v11445_v36  ;;  %v2871_v31 = vpop.f32.mrb[90].mxu1  ;;  %v2520_v22 = vpop.f32.mrb[91].mxu0 }
 0x30e   :  { %v3930_v18 = vmax.f32 %v2868_v44, 0.0  ;;  %v3929_v8 = vmax.f32 %v2517_v2, 0.0  ;;  %v2872_v26 = vadd.f32 %v2871_v31, %v11445_v36  ;;  %v2521_v58 = vadd.f32 %v2520_v22, %v11445_v36  ;;  %v2873_v9 = vpop.f32.mrb[91].mxu1  ;;  %v11617_v2 = vpop.permute.xlu0 %2115 }
 0x30f   :  { %v3931_v28 = vmax.f32 %v2870_v12, 0.0  ;;  %v3936_v11 = vmax.f32 %v2519_v15, 0.0  ;;  %v2874_v52 = vadd.f32 %v2873_v9, %v11445_v36  ;;  %4567 = vmax.xlane.f32.xlu0 %v4566_v39  ;;  %3169 = vmatmul.mubr.bf16.gmra.mrb[196].mxu0 %v9745_v24  ;;  %v11621_v12 = vpop.permute.xlu1 %2110 }
 0x310   :  { %v3938_v54 = vmax.f32 %v2872_v26, 0.0  ;;  %v3937_v20 = vmax.f32 %v2521_v58, 0.0  ;;  %3522 = vmatmul.mubr.bf16.gmra.mrb[196].mxu1 %v9745_v24  ;;  %4570 = vmax.xlane.f32.xlu1 %v4569_v34  ;;  %v4380_v44 = vmax.f32 %v3928_v35, %v3929_v8 }
 0x311   :  { %v3939_v31 = vmax.f32 %v2874_v52, 0.0  ;;  %3178 = vmatprep.mubr.bf16.mxu0 %v15545_v50  ;;  %3531 = vmatprep.mubr.bf16.mxu1 %v15545_v50  ;;  %v4572_v3 = vmax.f32 %v3930_v18, %v3931_v28 }
 0x312   :  { %v2524_v39 = vpop.f32.mrb[92].mxu0  ;;  %v4383_v15 = vmax.f32 %v3936_v11, %v3937_v20 }
 0x313   :  { %v2525_v22 = vadd.f32 %v2524_v39, %v11456_v25  ;;  %v2877_v9 = vpop.f32.mrb[92].mxu1  ;;  %4381 = vmax.xlane.f32.xlu0 %v4380_v44  ;;  %v2526_v26 = vpop.f32.mrb[93].mxu0  ;;  %v4575_v58 = vmax.f32 %v3938_v54, %v3939_v31 }
 0x314   :  { %v2878_v34 = vadd.f32 %v2877_v9, %v11456_v25  ;;  %v2527_v35 = vadd.f32 %v2526_v26, %v11456_v25  ;;  %v2879_v8 = vpop.f32.mrb[93].mxu1  ;;  %v2528_v52 = vpop.f32.mrb[94].mxu0  ;;  %4384 = vmax.xlane.f32.xlu1 %v4383_v15  ;;  %v9746_v15 = vld [vmem:[%s15197_s5 + $0x10] sm:$0xff]  }
 0x315   :  { %v3944_v24 = vmax.f32 %v2525_v22, 0.0  ;;  %v2880_v18 = vadd.f32 %v2879_v8, %v11456_v25  ;;  %v2529_v28 = vadd.f32 %v2528_v52, %v11454_v33  ;;  %v2881_v13 = vpop.f32.mrb[94].mxu1  ;;  %v2530_v11 = vpop.f32.mrb[95].mxu0 }
 0x316   :  { %v3946_v20 = vmax.f32 %v2878_v34, 0.0  ;;  %v3945_v39 = vmax.f32 %v2527_v35, 0.0  ;;  %v2882_v44 = vadd.f32 %v2881_v13, %v11454_v33  ;;  %v2531_v54 = vadd.f32 %v2530_v11, %v11454_v33  ;;  %v2883_v31 = vpop.f32.mrb[95].mxu1  ;;  %v11634_v35 = vpop.permute.xlu0 %2125 }
 0x317   :  { %v3947_v9 = vmax.f32 %v2880_v18, 0.0  ;;  %v3952_v57 = vmax.f32 %v2529_v28, 0.0  ;;  %v2884_v26 = vadd.f32 %v2883_v31, %v11454_v33  ;;  %4573 = vmax.xlane.f32.xlu0 %v4572_v3  ;;  %3179 = vmatmul.mubr.bf16.gmra.mrb[200].mxu0 %v9746_v15  ;;  %15590 = vst [vmem:[#allocation66_spill] sm:$0xff] %v11634_v35  ;;  %v11638_v18 = vpop.permute.xlu1 %2120 }
 0x318   :  { %v3954_v22 = vmax.f32 %v2882_v44, 0.0  ;;  %v3953_v8 = vmax.f32 %v2531_v54, 0.0  ;;  %3532 = vmatmul.mubr.bf16.gmra.mrb[200].mxu1 %v9746_v15  ;;  %4576 = vmax.xlane.f32.xlu1 %v4575_v58  ;;  %v4386_v34 = vmax.f32 %v3944_v24, %v3945_v39  ;;  %15591 = vst [vmem:[#allocation67_spill] sm:$0xff] %v11638_v18 }
 0x319   :  { %v3955_v13 = vmax.f32 %v2884_v26, 0.0  ;;  %3188 = vmatprep.mubr.bf16.mxu0 %v15545_v50  ;;  %3541 = vmatprep.mubr.bf16.mxu1 %v15545_v50  ;;  %v4578_v52 = vmax.f32 %v3946_v20, %v3947_v9 }
 0x31a   :  { %v2534_v3 = vpop.f32.mrb[96].mxu0  ;;  %v4389_v28 = vmax.f32 %v3952_v57, %v3953_v8 }
 0x31b   :  { %v2535_v11 = vadd.f32 %v2534_v3, %v11465_v21  ;;  %v2887_v31 = vpop.f32.mrb[96].mxu1  ;;  %4387 = vmax.xlane.f32.xlu0 %v4386_v34  ;;  %v2536_v44 = vpop.f32.mrb[97].mxu0  ;;  %v4581_v54 = vmax.f32 %v3954_v22, %v3955_v13 }
 0x31c   :  { %v2888_v58 = vadd.f32 %v2887_v31, %v11465_v21  ;;  %v2537_v24 = vadd.f32 %v2536_v44, %v11465_v21  ;;  %v2889_v39 = vpop.f32.mrb[97].mxu1  ;;  %v2538_v26 = vpop.f32.mrb[98].mxu0  ;;  %4390 = vmax.xlane.f32.xlu1 %v4389_v28  ;;  %v9747_v28 = vld [vmem:[%s15197_s5 + $0x18] sm:$0xff]  }
 0x31d   :  { %v3960_v15 = vmax.f32 %v2535_v11, 0.0  ;;  %v2890_v20 = vadd.f32 %v2889_v39, %v11465_v21  ;;  %v2539_v9 = vadd.f32 %v2538_v26, %v11460_v5  ;;  %v2891_v33 = vpop.f32.mrb[98].mxu1  ;;  %v2540_v57 = vpop.f32.mrb[99].mxu0 }
 0x31e   :  { %v3962_v8 = vmax.f32 %v2888_v58, 0.0  ;;  %v3961_v3 = vmax.f32 %v2537_v24, 0.0  ;;  %v2892_v34 = vadd.f32 %v2891_v33, %v11460_v5  ;;  %v2541_v22 = vadd.f32 %v2540_v57, %v11460_v5  ;;  %v2893_v13 = vpop.f32.mrb[99].mxu1  ;;  %v11651_v24 = vpop.permute.xlu0 %2135 }
 0x31f   :  { %v3963_v31 = vmax.f32 %v2890_v20, 0.0  ;;  %v3968_v25 = vmax.f32 %v2539_v9, 0.0  ;;  %v2894_v44 = vadd.f32 %v2893_v13, %v11460_v5  ;;  %4579 = vmax.xlane.f32.xlu0 %v4578_v52  ;;  %3189 = vmatmul.mubr.bf16.gmra.mrb[204].mxu0 %v9747_v28  ;;  %15592 = vst [vmem:[#allocation68_spill] sm:$0xff] %v11651_v24  ;;  %v11655_v20 = vpop.permute.xlu1 %2130 }
 0x320   :  { %v3970_v11 = vmax.f32 %v2892_v34, 0.0  ;;  %v3969_v39 = vmax.f32 %v2541_v22, 0.0  ;;  %3542 = vmatmul.mubr.bf16.gmra.mrb[204].mxu1 %v9747_v28  ;;  %4582 = vmax.xlane.f32.xlu1 %v4581_v54  ;;  %v4392_v58 = vmax.f32 %v3960_v15, %v3961_v3  ;;  %15593 = vst [vmem:[#allocation69_spill] sm:$0xff] %v11655_v20 }
 0x321   :  { %v3971_v33 = vmax.f32 %v2894_v44, 0.0  ;;  %3198 = vmatprep.mubr.bf16.mxu0 %v15545_v50  ;;  %3551 = vmatprep.mubr.bf16.mxu1 %v15545_v50  ;;  %v4584_v26 = vmax.f32 %v3962_v8, %v3963_v31 }
 0x322   :  { %v2544_v52 = vpop.f32.mrb[100].mxu0  ;;  %v4395_v9 = vmax.f32 %v3968_v25, %v3969_v39 }
 0x323   :  { %v2545_v57 = vadd.f32 %v2544_v52, %v11471_v51  ;;  %v2897_v13 = vpop.f32.mrb[100].mxu1  ;;  %4393 = vmax.xlane.f32.xlu0 %v4392_v58  ;;  %v2546_v34 = vpop.f32.mrb[101].mxu0  ;;  %v4587_v22 = vmax.f32 %v3970_v11, %v3971_v33 }
 0x324   :  { %v2898_v54 = vadd.f32 %v2897_v13, %v11471_v51  ;;  %v2547_v15 = vadd.f32 %v2546_v34, %v11471_v51  ;;  %v2899_v3 = vpop.f32.mrb[101].mxu1  ;;  %v2548_v44 = vpop.f32.mrb[102].mxu0  ;;  %4396 = vmax.xlane.f32.xlu1 %v4395_v9  ;;  %v9748_v9 = vld [vmem:[%s15197_s5 + $0x20] sm:$0xff]  }
 0x325   :  { %v3976_v28 = vmax.f32 %v2545_v57, 0.0  ;;  %v2900_v8 = vadd.f32 %v2899_v3, %v11471_v51  ;;  %v2549_v31 = vadd.f32 %v2548_v44, %v11468_v27  ;;  %v2901_v5 = vpop.f32.mrb[102].mxu1  ;;  %v2550_v25 = vpop.f32.mrb[103].mxu0 }
 0x326   :  { %v3978_v39 = vmax.f32 %v2898_v54, 0.0  ;;  %v3977_v52 = vmax.f32 %v2547_v15, 0.0  ;;  %v2902_v58 = vadd.f32 %v2901_v5, %v11468_v27  ;;  %v2551_v11 = vadd.f32 %v2550_v25, %v11468_v27  ;;  %v2903_v33 = vpop.f32.mrb[103].mxu1  ;;  %v11668_v15 = vpop.permute.xlu0 %2145 }
 0x327   :  { %v3979_v13 = vmax.f32 %v2900_v8, 0.0  ;;  %v3984_v21 = vmax.f32 %v2549_v31, 0.0  ;;  %v2904_v34 = vadd.f32 %v2903_v33, %v11468_v27  ;;  %4585 = vmax.xlane.f32.xlu0 %v4584_v26  ;;  %3199 = vmatmul.mubr.bf16.gmra.mrb[208].mxu0 %v9748_v9  ;;  %15594 = vst [vmem:[#allocation70_spill] sm:$0xff] %v11668_v15  ;;  %v11672_v8 = vpop.permute.xlu1 %2140 }
 0x328   :  { %v3986_v57 = vmax.f32 %v2902_v58, 0.0  ;;  %v3985_v3 = vmax.f32 %v2551_v11, 0.0  ;;  %3552 = vmatmul.mubr.bf16.gmra.mrb[208].mxu1 %v9748_v9  ;;  %4588 = vmax.xlane.f32.xlu1 %v4587_v22  ;;  %v4398_v54 = vmax.f32 %v3976_v28, %v3977_v52  ;;  %15595 = vst [vmem:[#allocation71_spill] sm:$0xff] %v11672_v8 }
 0x329   :  { %v3987_v5 = vmax.f32 %v2904_v34, 0.0  ;;  %3208 = vmatprep.mubr.bf16.mxu0 %v15545_v50  ;;  %3561 = vmatprep.mubr.bf16.mxu1 %v15545_v50  ;;  %v4590_v44 = vmax.f32 %v3978_v39, %v3979_v13 }
 0x32a   :  { %v2554_v26 = vpop.f32.mrb[104].mxu0  ;;  %v4401_v31 = vmax.f32 %v3984_v21, %v3985_v3 }
 0x32b   :  { %v2555_v25 = vadd.f32 %v2554_v26, %v11478_v38  ;;  %v2907_v33 = vpop.f32.mrb[104].mxu1  ;;  %4399 = vmax.xlane.f32.xlu0 %v4398_v54  ;;  %v2556_v58 = vpop.f32.mrb[105].mxu0  ;;  %v4593_v11 = vmax.f32 %v3986_v57, %v3987_v5 }
 0x32c   :  { %v2908_v22 = vadd.f32 %v2907_v33, %v11478_v38  ;;  %v2557_v28 = vadd.f32 %v2556_v58, %v11478_v38  ;;  %v2909_v52 = vpop.f32.mrb[105].mxu1  ;;  %v2558_v34 = vpop.f32.mrb[106].mxu0  ;;  %4402 = vmax.xlane.f32.xlu1 %v4401_v31  ;;  %v9749_v31 = vld [vmem:[%s15197_s5 + $0x28] sm:$0xff]  }
 0x32d   :  { %v3992_v9 = vmax.f32 %v2555_v25, 0.0  ;;  %v2910_v39 = vadd.f32 %v2909_v52, %v11478_v38  ;;  %v2559_v13 = vadd.f32 %v2558_v34, %v11476_v1  ;;  %v2911_v27 = vpop.f32.mrb[106].mxu1  ;;  %v2560_v21 = vpop.f32.mrb[107].mxu0 }
 0x32e   :  { %v3994_v3 = vmax.f32 %v2908_v22, 0.0  ;;  %v3993_v26 = vmax.f32 %v2557_v28, 0.0  ;;  %v2912_v54 = vadd.f32 %v2911_v27, %v11476_v1  ;;  %v2561_v57 = vadd.f32 %v2560_v21, %v11476_v1  ;;  %v2913_v5 = vpop.f32.mrb[107].mxu1  ;;  %v11685_v28 = vpop.permute.xlu0 %2155 }
 0x32f   :  { %v3995_v33 = vmax.f32 %v2910_v39, 0.0  ;;  %v4000_v51 = vmax.f32 %v2559_v13, 0.0  ;;  %v2914_v58 = vadd.f32 %v2913_v5, %v11476_v1  ;;  %4591 = vmax.xlane.f32.xlu0 %v4590_v44  ;;  %3209 = vmatmul.mubr.bf16.gmra.mrb[212].mxu0 %v9749_v31  ;;  %15596 = vst [vmem:[#allocation72_spill] sm:$0xff] %v11685_v28  ;;  %v11689_v39 = vpop.permute.xlu1 %2150 }
 0x330   :  { %v4002_v25 = vmax.f32 %v2912_v54, 0.0  ;;  %v4001_v52 = vmax.f32 %v2561_v57, 0.0  ;;  %3562 = vmatmul.mubr.bf16.gmra.mrb[212].mxu1 %v9749_v31  ;;  %4594 = vmax.xlane.f32.xlu1 %v4593_v11  ;;  %v4404_v22 = vmax.f32 %v3992_v9, %v3993_v26  ;;  %15597 = vst [vmem:[#allocation73_spill] sm:$0xff] %v11689_v39 }
 0x331   :  { %v4003_v27 = vmax.f32 %v2914_v58, 0.0  ;;  %3218 = vmatprep.mubr.bf16.mxu0 %v15545_v50  ;;  %3571 = vmatprep.mubr.bf16.mxu1 %v15545_v50  ;;  %v4596_v34 = vmax.f32 %v3994_v3, %v3995_v33 }
 0x332   :  { %v2564_v44 = vpop.f32.mrb[108].mxu0  ;;  %v4407_v13 = vmax.f32 %v4000_v51, %v4001_v52 }
 0x333   :  { %v2565_v21 = vadd.f32 %v2564_v44, %v11487_v53  ;;  %v2917_v5 = vpop.f32.mrb[108].mxu1  ;;  %4405 = vmax.xlane.f32.xlu0 %v4404_v22  ;;  %v2566_v54 = vpop.f32.mrb[109].mxu0  ;;  %v4599_v57 = vmax.f32 %v4002_v25, %v4003_v27 }
 0x334   :  { %v2918_v11 = vadd.f32 %v2917_v5, %v11487_v53  ;;  %v2567_v9 = vadd.f32 %v2566_v54, %v11487_v53  ;;  %v2919_v26 = vpop.f32.mrb[109].mxu1  ;;  %v2568_v58 = vpop.f32.mrb[110].mxu0  ;;  %4408 = vmax.xlane.f32.xlu1 %v4407_v13  ;;  %v9750_v13 = vld [vmem:[%s15197_s5 + $0x30] sm:$0xff]  }
 0x335   :  { %v4008_v31 = vmax.f32 %v2565_v21, 0.0  ;;  %v2920_v3 = vadd.f32 %v2919_v26, %v11487_v53  ;;  %v2569_v33 = vadd.f32 %v2568_v58, %v11485_v43  ;;  %v2921_v1 = vpop.f32.mrb[110].mxu1  ;;  %v2570_v51 = vpop.f32.mrb[111].mxu0 }
 0x336   :  { %v4010_v52 = vmax.f32 %v2918_v11, 0.0  ;;  %v4009_v44 = vmax.f32 %v2567_v9, 0.0  ;;  %v2922_v22 = vadd.f32 %v2921_v1, %v11485_v43  ;;  %v2571_v25 = vadd.f32 %v2570_v51, %v11485_v43  ;;  %v2923_v27 = vpop.f32.mrb[111].mxu1  ;;  %v11702_v9 = vpop.permute.xlu0 %2165 }
 0x337   :  { %v4011_v5 = vmax.f32 %v2920_v3, 0.0  ;;  %v4016_v38 = vmax.f32 %v2569_v33, 0.0  ;;  %v2924_v54 = vadd.f32 %v2923_v27, %v11485_v43  ;;  %4597 = vmax.xlane.f32.xlu0 %v4596_v34  ;;  %3219 = vmatmul.mubr.bf16.gmra.mrb[216].mxu0 %v9750_v13  ;;  %15598 = vst [vmem:[#allocation74_spill] sm:$0xff] %v11702_v9  ;;  %v11706_v3 = vpop.permute.xlu1 %2160 }
 0x338   :  { %v4018_v21 = vmax.f32 %v2922_v22, 0.0  ;;  %v4017_v26 = vmax.f32 %v2571_v25, 0.0  ;;  %3572 = vmatmul.mubr.bf16.gmra.mrb[216].mxu1 %v9750_v13  ;;  %4600 = vmax.xlane.f32.xlu1 %v4599_v57  ;;  %v4410_v11 = vmax.f32 %v4008_v31, %v4009_v44  ;;  %15599 = vst [vmem:[#allocation75_spill] sm:$0xff] %v11706_v3 }
 0x339   :  { %v4019_v1 = vmax.f32 %v2924_v54, 0.0  ;;  %3228 = vmatprep.mubr.bf16.mxu0 %v15545_v50  ;;  %3581 = vmatprep.mubr.bf16.mxu1 %v15545_v50  ;;  %v4602_v58 = vmax.f32 %v4010_v52, %v4011_v5 }
 0x33a   :  { %v2574_v34 = vpop.f32.mrb[112].mxu0  ;;  %v4413_v33 = vmax.f32 %v4016_v38, %v4017_v26 }
 0x33b   :  { %v2575_v51 = vadd.f32 %v2574_v34, %v11496_v37  ;;  %v2927_v27 = vpop.f32.mrb[112].mxu1  ;;  %4411 = vmax.xlane.f32.xlu0 %v4410_v11  ;;  %v2576_v22 = vpop.f32.mrb[113].mxu0  ;;  %v4605_v25 = vmax.f32 %v4018_v21, %v4019_v1 }
 0x33c   :  { %v2928_v57 = vadd.f32 %v2927_v27, %v11496_v37  ;;  %v2577_v31 = vadd.f32 %v2576_v22, %v11496_v37  ;;  %v2929_v44 = vpop.f32.mrb[113].mxu1  ;;  %v2578_v54 = vpop.f32.mrb[114].mxu0  ;;  %4414 = vmax.xlane.f32.xlu1 %v4413_v33  ;;  %v9751_v33 = vld [vmem:[%s15197_s5 + $0x38] sm:$0xff]  }
 0x33d   :  { %v4024_v13 = vmax.f32 %v2575_v51, 0.0  ;;  %v2930_v52 = vadd.f32 %v2929_v44, %v11496_v37  ;;  %v2579_v5 = vadd.f32 %v2578_v54, %v11491_v42  ;;  %v2931_v43 = vpop.f32.mrb[114].mxu1  ;;  %v2580_v38 = vpop.f32.mrb[115].mxu0 }
 0x33e   :  { %v4026_v26 = vmax.f32 %v2928_v57, 0.0  ;;  %v4025_v34 = vmax.f32 %v2577_v31, 0.0  ;;  %v2932_v11 = vadd.f32 %v2931_v43, %v11491_v42  ;;  %v2581_v21 = vadd.f32 %v2580_v38, %v11491_v42  ;;  %v2933_v1 = vpop.f32.mrb[115].mxu1  ;;  %v11719_v31 = vpop.permute.xlu0 %2175 }
 0x33f   :  { %v4027_v27 = vmax.f32 %v2930_v52, 0.0  ;;  %v4032_v53 = vmax.f32 %v2579_v5, 0.0  ;;  %v2934_v22 = vadd.f32 %v2933_v1, %v11491_v42  ;;  %4603 = vmax.xlane.f32.xlu0 %v4602_v58  ;;  %3229 = vmatmul.mubr.bf16.gmra.mrb[220].mxu0 %v9751_v33  ;;  %15600 = vst [vmem:[#allocation76_spill] sm:$0xff] %v11719_v31  ;;  %v11723_v52 = vpop.permute.xlu1 %2170 }
 0x340   :  { %v4034_v51 = vmax.f32 %v2932_v11, 0.0  ;;  %v4033_v44 = vmax.f32 %v2581_v21, 0.0  ;;  %3582 = vmatmul.mubr.bf16.gmra.mrb[220].mxu1 %v9751_v33  ;;  %4606 = vmax.xlane.f32.xlu1 %v4605_v25  ;;  %v4416_v57 = vmax.f32 %v4024_v13, %v4025_v34  ;;  %15601 = vst [vmem:[#allocation77_spill] sm:$0xff] %v11723_v52 }
 0x341   :  { %v4035_v43 = vmax.f32 %v2934_v22, 0.0  ;;  %3238 = vmatprep.mubr.bf16.mxu0 %v15545_v50  ;;  %3591 = vmatprep.mubr.bf16.mxu1 %v15545_v50  ;;  %v4608_v54 = vmax.f32 %v4026_v26, %v4027_v27 }
 0x342   :  { %v2584_v58 = vpop.f32.mrb[116].mxu0  ;;  %v4419_v5 = vmax.f32 %v4032_v53, %v4033_v44 }
 0x343   :  { %v2585_v38 = vadd.f32 %v2584_v58, %v11502_v48  ;;  %v2937_v1 = vpop.f32.mrb[116].mxu1  ;;  %4417 = vmax.xlane.f32.xlu0 %v4416_v57  ;;  %v2586_v11 = vpop.f32.mrb[117].mxu0  ;;  %v4611_v21 = vmax.f32 %v4034_v51, %v4035_v43 }
 0x344   :  { %v2938_v25 = vadd.f32 %v2937_v1, %v11502_v48  ;;  %v2587_v13 = vadd.f32 %v2586_v11, %v11502_v48  ;;  %v2939_v34 = vpop.f32.mrb[117].mxu1  ;;  %v2588_v22 = vpop.f32.mrb[118].mxu0  ;;  %4420 = vmax.xlane.f32.xlu1 %v4419_v5  ;;  %v9752_v5 = vld [vmem:[%s15197_s5 + $0x40] sm:$0xff]  }
 0x345   :  { %v4040_v33 = vmax.f32 %v2585_v38, 0.0  ;;  %v2940_v26 = vadd.f32 %v2939_v34, %v11502_v48  ;;  %v2589_v27 = vadd.f32 %v2588_v22, %v11499_v32  ;;  %v2941_v42 = vpop.f32.mrb[118].mxu1  ;;  %v2590_v53 = vpop.f32.mrb[119].mxu0 }
 0x346   :  { %v4042_v44 = vmax.f32 %v2938_v25, 0.0  ;;  %v4041_v58 = vmax.f32 %v2587_v13, 0.0  ;;  %v2942_v57 = vadd.f32 %v2941_v42, %v11499_v32  ;;  %v2591_v51 = vadd.f32 %v2590_v53, %v11499_v32  ;;  %v2943_v43 = vpop.f32.mrb[119].mxu1  ;;  %v11736_v13 = vpop.permute.xlu0 %2185 }
 0x347   :  { %v4043_v1 = vmax.f32 %v2940_v26, 0.0  ;;  %v4048_v37 = vmax.f32 %v2589_v27, 0.0  ;;  %v2944_v11 = vadd.f32 %v2943_v43, %v11499_v32  ;;  %4609 = vmax.xlane.f32.xlu0 %v4608_v54  ;;  %3239 = vmatmul.mubr.bf16.gmra.mrb[224].mxu0 %v9752_v5  ;;  %15602 = vst [vmem:[#allocation78_spill] sm:$0xff] %v11736_v13  ;;  %v11740_v26 = vpop.permute.xlu1 %2180 }
 0x348   :  { %v4050_v38 = vmax.f32 %v2942_v57, 0.0  ;;  %v4049_v34 = vmax.f32 %v2591_v51, 0.0  ;;  %3592 = vmatmul.mubr.bf16.gmra.mrb[224].mxu1 %v9752_v5  ;;  %4612 = vmax.xlane.f32.xlu1 %v4611_v21  ;;  %v4422_v25 = vmax.f32 %v4040_v33, %v4041_v58 }
 0x349   :  { %v4051_v42 = vmax.f32 %v2944_v11, 0.0  ;;  %3248 = vmatprep.mubr.bf16.mxu0 %v15545_v50  ;;  %3601 = vmatprep.mubr.bf16.mxu1 %v15545_v50  ;;  %v4614_v22 = vmax.f32 %v4042_v44, %v4043_v1 }
 0x34a   :  { %v2594_v54 = vpop.f32.mrb[120].mxu0  ;;  %v4425_v27 = vmax.f32 %v4048_v37, %v4049_v34 }
 0x34b   :  { %v2595_v53 = vadd.f32 %v2594_v54, %v11519_v46  ;;  %v2947_v43 = vpop.f32.mrb[120].mxu1  ;;  %4423 = vmax.xlane.f32.xlu0 %v4422_v25  ;;  %v2596_v57 = vpop.f32.mrb[121].mxu0  ;;  %v4617_v51 = vmax.f32 %v4050_v38, %v4051_v42 }
 0x34c   :  { %v2948_v21 = vadd.f32 %v2947_v43, %v11519_v46  ;;  %v2597_v33 = vadd.f32 %v2596_v57, %v11519_v46  ;;  %v2949_v58 = vpop.f32.mrb[121].mxu1  ;;  %v2598_v11 = vpop.f32.mrb[122].mxu0  ;;  %4426 = vmax.xlane.f32.xlu1 %v4425_v27  ;;  %v9753_v27 = vld [vmem:[%s15197_s5 + $0x48] sm:$0xff]  }
 0x34d   :  { %v4056_v5 = vmax.f32 %v2595_v53, 0.0  ;;  %v2950_v44 = vadd.f32 %v2949_v58, %v11519_v46  ;;  %v2599_v1 = vadd.f32 %v2598_v11, %v11516_v10  ;;  %v2951_v32 = vpop.f32.mrb[122].mxu1  ;;  %v2600_v37 = vpop.f32.mrb[123].mxu0 }
 0x34e   :  { %v4058_v34 = vmax.f32 %v2948_v21, 0.0  ;;  %v4057_v54 = vmax.f32 %v2597_v33, 0.0  ;;  %v2952_v25 = vadd.f32 %v2951_v32, %v11516_v10  ;;  %v2601_v38 = vadd.f32 %v2600_v37, %v11516_v10  ;;  %v2953_v42 = vpop.f32.mrb[123].mxu1  ;;  %v11753_v33 = vpop.permute.xlu0 %2195 }
 0x34f   :  { %v4059_v43 = vmax.f32 %v2950_v44, 0.0  ;;  %v4064_v48 = vmax.f32 %v2599_v1, 0.0  ;;  %v2954_v57 = vadd.f32 %v2953_v42, %v11516_v10  ;;  %4615 = vmax.xlane.f32.xlu0 %v4614_v22  ;;  %3249 = vmatmul.mubr.bf16.gmra.mrb[228].mxu0 %v9753_v27  ;;  %15603 = vst [vmem:[#allocation79_spill] sm:$0xff] %v11753_v33  ;;  %v11757_v44 = vpop.permute.xlu1 %2190 }
 0x350   :  { %v4066_v53 = vmax.f32 %v2952_v25, 0.0  ;;  %v4065_v58 = vmax.f32 %v2601_v38, 0.0  ;;  %3602 = vmatmul.mubr.bf16.gmra.mrb[228].mxu1 %v9753_v27  ;;  %4618 = vmax.xlane.f32.xlu1 %v4617_v51  ;;  %v4428_v21 = vmax.f32 %v4056_v5, %v4057_v54 }
 0x351   :  { %v4067_v32 = vmax.f32 %v2954_v57, 0.0  ;;  %3258 = vmatprep.mubr.bf16.mxu0 %v15545_v50  ;;  %3611 = vmatprep.mubr.bf16.mxu1 %v15545_v50  ;;  %v4620_v11 = vmax.f32 %v4058_v34, %v4059_v43 }
 0x352   :  { %v2604_v22 = vpop.f32.mrb[124].mxu0  ;;  %v4431_v1 = vmax.f32 %v4064_v48, %v4065_v58 }
 0x353   :  { %v2605_v37 = vadd.f32 %v2604_v22, %v11536_v41  ;;  %v2957_v42 = vpop.f32.mrb[124].mxu1  ;;  %4429 = vmax.xlane.f32.xlu0 %v4428_v21  ;;  %v2606_v25 = vpop.f32.mrb[125].mxu0  ;;  %v4623_v38 = vmax.f32 %v4066_v53, %v4067_v32 }
 0x354   :  { %v2958_v51 = vadd.f32 %v2957_v42, %v11536_v41  ;;  %v2607_v5 = vadd.f32 %v2606_v25, %v11536_v41  ;;  %v2959_v54 = vpop.f32.mrb[125].mxu1  ;;  %v2608_v57 = vpop.f32.mrb[126].mxu0  ;;  %4432 = vmax.xlane.f32.xlu1 %v4431_v1  ;;  %v9754_v1 = vld [vmem:[%s15197_s5 + $0x50] sm:$0xff]  }
 0x355   :  { %v4072_v27 = vmax.f32 %v2605_v37, 0.0  ;;  %v2960_v34 = vadd.f32 %v2959_v54, %v11536_v41  ;;  %v2609_v43 = vadd.f32 %v2608_v57, %v11533_v49  ;;  %v2961_v10 = vpop.f32.mrb[126].mxu1  ;;  %v2610_v48 = vpop.f32.mrb[127].mxu0 }
 0x356   :  { %v4074_v58 = vmax.f32 %v2958_v51, 0.0  ;;  %v4073_v22 = vmax.f32 %v2607_v5, 0.0  ;;  %v2962_v21 = vadd.f32 %v2961_v10, %v11533_v49  ;;  %v2611_v53 = vadd.f32 %v2610_v48, %v11533_v49  ;;  %v2963_v32 = vpop.f32.mrb[127].mxu1  ;;  %v11770_v5 = vpop.permute.xlu0 %2205 }
 0x357   :  { %v4075_v42 = vmax.f32 %v2960_v34, 0.0  ;;  %v4080_v46 = vmax.f32 %v2609_v43, 0.0  ;;  %v2964_v25 = vadd.f32 %v2963_v32, %v11533_v49  ;;  %4621 = vmax.xlane.f32.xlu0 %v4620_v11  ;;  %3259 = vmatmul.mubr.bf16.gmra.mrb[232].mxu0 %v9754_v1  ;;  %15604 = vst [vmem:[#allocation80_spill] sm:$0xff] %v11770_v5  ;;  %v11774_v34 = vpop.permute.xlu1 %2200 }
 0x358   :  { %v4082_v37 = vmax.f32 %v2962_v21, 0.0  ;;  %v4081_v54 = vmax.f32 %v2611_v53, 0.0  ;;  %3612 = vmatmul.mubr.bf16.gmra.mrb[232].mxu1 %v9754_v1  ;;  %4624 = vmax.xlane.f32.xlu1 %v4623_v38  ;;  %v4434_v51 = vmax.f32 %v4072_v27, %v4073_v22 }
 0x359   :  { %v4083_v10 = vmax.f32 %v2964_v25, 0.0  ;;  %3268 = vmatprep.mubr.bf16.mxu0 %v15545_v50  ;;  %3621 = vmatprep.mubr.bf16.mxu1 %v15545_v50  ;;  %v4626_v57 = vmax.f32 %v4074_v58, %v4075_v42 }
 0x35a   :  { %v2614_v11 = vpop.f32.mrb[128].mxu0  ;;  %v4437_v43 = vmax.f32 %v4080_v46, %v4081_v54 }
 0x35b   :  { %v2615_v48 = vadd.f32 %v2614_v11, %v11553_v30  ;;  %v2967_v32 = vpop.f32.mrb[128].mxu1  ;;  %4435 = vmax.xlane.f32.xlu0 %v4434_v51  ;;  %v2616_v21 = vpop.f32.mrb[129].mxu0  ;;  %v4629_v53 = vmax.f32 %v4082_v37, %v4083_v10 }
 0x35c   :  { %v2968_v38 = vadd.f32 %v2967_v32, %v11553_v30  ;;  %v2617_v27 = vadd.f32 %v2616_v21, %v11553_v30  ;;  %v2969_v22 = vpop.f32.mrb[129].mxu1  ;;  %v2618_v25 = vpop.f32.mrb[130].mxu0  ;;  %4438 = vmax.xlane.f32.xlu1 %v4437_v43  ;;  %v9755_v43 = vld [vmem:[%s15197_s5 + $0x58] sm:$0xff]  }
 0x35d   :  { %v4088_v1 = vmax.f32 %v2615_v48, 0.0  ;;  %v2970_v58 = vadd.f32 %v2969_v22, %v11553_v30  ;;  %v2619_v42 = vadd.f32 %v2618_v25, %v11549_v63  ;;  %v2971_v49 = vpop.f32.mrb[130].mxu1  ;;  %v2620_v46 = vpop.f32.mrb[131].mxu0 }
 0x35e   :  { %v4090_v54 = vmax.f32 %v2968_v38, 0.0  ;;  %v4089_v11 = vmax.f32 %v2617_v27, 0.0  ;;  %v2972_v51 = vadd.f32 %v2971_v49, %v11549_v63  ;;  %v2621_v37 = vadd.f32 %v2620_v46, %v11549_v63  ;;  %v2973_v10 = vpop.f32.mrb[131].mxu1  ;;  %v11787_v27 = vpop.permute.xlu0 %2215 }
 0x35f   :  { %v4091_v32 = vmax.f32 %v2970_v58, 0.0  ;;  %v4096_v41 = vmax.f32 %v2619_v42, 0.0  ;;  %v2974_v21 = vadd.f32 %v2973_v10, %v11549_v63  ;;  %4627 = vmax.xlane.f32.xlu0 %v4626_v57  ;;  %3269 = vmatmul.mubr.bf16.gmra.mrb[236].mxu0 %v9755_v43  ;;  %15605 = vst [vmem:[#allocation81_spill] sm:$0xff] %v11787_v27  ;;  %v11791_v58 = vpop.permute.xlu1 %2210 }
 0x360   :  { %v4098_v48 = vmax.f32 %v2972_v51, 0.0  ;;  %v4097_v22 = vmax.f32 %v2621_v37, 0.0  ;;  %3622 = vmatmul.mubr.bf16.gmra.mrb[236].mxu1 %v9755_v43  ;;  %4630 = vmax.xlane.f32.xlu1 %v4629_v53  ;;  %v4440_v38 = vmax.f32 %v4088_v1, %v4089_v11 }
 0x361   :  { %v4099_v49 = vmax.f32 %v2974_v21, 0.0  ;;  %3278 = vmatprep.mubr.bf16.mxu0 %v15545_v50  ;;  %3631 = vmatprep.mubr.bf16.mxu1 %v15545_v50  ;;  %v4632_v25 = vmax.f32 %v4090_v54, %v4091_v32 }
 0x362   :  { %v2624_v57 = vpop.f32.mrb[132].mxu0  ;;  %v4443_v42 = vmax.f32 %v4096_v41, %v4097_v22 }
 0x363   :  { %v2625_v46 = vadd.f32 %v2624_v57, %v11570_v47  ;;  %v2977_v10 = vpop.f32.mrb[132].mxu1  ;;  %4441 = vmax.xlane.f32.xlu0 %v4440_v38  ;;  %v2626_v51 = vpop.f32.mrb[133].mxu0  ;;  %v4635_v37 = vmax.f32 %v4098_v48, %v4099_v49 }
 0x364   :  { %v2978_v53 = vadd.f32 %v2977_v10, %v11570_v47  ;;  %v2627_v1 = vadd.f32 %v2626_v51, %v11570_v47  ;;  %v2979_v11 = vpop.f32.mrb[133].mxu1  ;;  %v2628_v21 = vpop.f32.mrb[134].mxu0  ;;  %4444 = vmax.xlane.f32.xlu1 %v4443_v42  ;;  %v9756_v42 = vld [vmem:[%s15197_s5 + $0x60] sm:$0xff]  }
 0x365   :  { %v4104_v43 = vmax.f32 %v2625_v46, 0.0  ;;  %v2980_v54 = vadd.f32 %v2979_v11, %v11570_v47  ;;  %v2629_v32 = vadd.f32 %v2628_v21, %v11566_v61  ;;  %v2981_v63 = vpop.f32.mrb[134].mxu1  ;;  %v2630_v41 = vpop.f32.mrb[135].mxu0 }
 0x366   :  { %v4106_v22 = vmax.f32 %v2978_v53, 0.0  ;;  %v4105_v57 = vmax.f32 %v2627_v1, 0.0  ;;  %v2982_v38 = vadd.f32 %v2981_v63, %v11566_v61  ;;  %v2631_v48 = vadd.f32 %v2630_v41, %v11566_v61  ;;  %v2983_v49 = vpop.f32.mrb[135].mxu1  ;;  %v11804_v1 = vpop.permute.xlu0 %2225 }
 0x367   :  { %v4107_v10 = vmax.f32 %v2980_v54, 0.0  ;;  %v4112_v30 = vmax.f32 %v2629_v32, 0.0  ;;  %v2984_v51 = vadd.f32 %v2983_v49, %v11566_v61  ;;  %4633 = vmax.xlane.f32.xlu0 %v4632_v25  ;;  %3279 = vmatmul.mubr.bf16.gmra.mrb[240].mxu0 %v9756_v42  ;;  %15606 = vst [vmem:[#allocation82_spill] sm:$0xff] %v11804_v1  ;;  %v11808_v54 = vpop.permute.xlu1 %2220 }
 0x368   :  { %v4114_v46 = vmax.f32 %v2982_v38, 0.0  ;;  %v4113_v11 = vmax.f32 %v2631_v48, 0.0  ;;  %3632 = vmatmul.mubr.bf16.gmra.mrb[240].mxu1 %v9756_v42  ;;  %4636 = vmax.xlane.f32.xlu1 %v4635_v37  ;;  %v4446_v53 = vmax.f32 %v4104_v43, %v4105_v57 }
 0x369   :  { %v4115_v63 = vmax.f32 %v2984_v51, 0.0  ;;  %3288 = vmatprep.mubr.bf16.mxu0 %v15545_v50  ;;  %3641 = vmatprep.mubr.bf16.mxu1 %v15545_v50  ;;  %v4638_v21 = vmax.f32 %v4106_v22, %v4107_v10 }
 0x36a   :  { %v2634_v25 = vpop.f32.mrb[136].mxu0  ;;  %v4449_v32 = vmax.f32 %v4112_v30, %v4113_v11 }
 0x36b   :  { %v2635_v41 = vadd.f32 %v2634_v25, %v11587_v23  ;;  %v2987_v49 = vpop.f32.mrb[136].mxu1  ;;  %4447 = vmax.xlane.f32.xlu0 %v4446_v53  ;;  %v2636_v38 = vpop.f32.mrb[137].mxu0  ;;  %v4641_v48 = vmax.f32 %v4114_v46, %v4115_v63 }
 0x36c   :  { %v2988_v37 = vadd.f32 %v2987_v49, %v11587_v23  ;;  %v2637_v43 = vadd.f32 %v2636_v38, %v11587_v23  ;;  %v2989_v57 = vpop.f32.mrb[137].mxu1  ;;  %v2638_v51 = vpop.f32.mrb[138].mxu0  ;;  %4450 = vmax.xlane.f32.xlu1 %v4449_v32  ;;  %v9757_v32 = vld [vmem:[%s15197_s5 + $0x68] sm:$0xff]  }
 0x36d   :  { %v4120_v42 = vmax.f32 %v2635_v41, 0.0  ;;  %v2990_v22 = vadd.f32 %v2989_v57, %v11587_v23  ;;  %v2639_v10 = vadd.f32 %v2638_v51, %v11583_v60  ;;  %v2991_v61 = vpop.f32.mrb[138].mxu1  ;;  %v2640_v30 = vpop.f32.mrb[139].mxu0 }
 0x36e   :  { %v4122_v11 = vmax.f32 %v2988_v37, 0.0  ;;  %v4121_v25 = vmax.f32 %v2637_v43, 0.0  ;;  %v2992_v53 = vadd.f32 %v2991_v61, %v11583_v60  ;;  %v2641_v46 = vadd.f32 %v2640_v30, %v11583_v60  ;;  %v2993_v63 = vpop.f32.mrb[139].mxu1 }
 0x36f   :  { %v4123_v49 = vmax.f32 %v2990_v22, 0.0  ;;  %v4128_v38 = vmax.f32 %v2639_v10, 0.0  ;;  %v2994_v47 = vadd.f32 %v2993_v63, %v11583_v60  ;;  %4639 = vmax.xlane.f32.xlu0 %v4638_v21  ;;  %3289 = vmatmul.mubr.bf16.gmra.mrb[244].mxu0 %v9757_v32  ;;  %v4346_v41 = vpop.xlane.xlu1 %4345 }
 0x370   :  { %v4130_v57 = vmax.f32 %v2992_v53, 0.0  ;;  %v4129_v51 = vmax.f32 %v2641_v46, 0.0  ;;  %3642 = vmatmul.mubr.bf16.gmra.mrb[244].mxu1 %v9757_v32  ;;  %v4538_v37 = vpop.xlane.xlu0 %4537  ;;  %4642 = vmax.xlane.f32.xlu1 %v4641_v48  ;;  %v4452_v61 = vmax.f32 %v4120_v42, %v4121_v25 }
 0x371   :  { %v4131_v43 = vmax.f32 %v2994_v47, 0.0  ;;  %v11822_v30 = vsel %vm5112_vm1, %v4346_v41, %v4538_v37  ;;  %3298 = vmatprep.mubr.bf16.mxu0 %v15545_v50  ;;  %3651 = vmatprep.mubr.bf16.mxu1 %v15545_v50  ;;  %v4644_v21 = vmax.f32 %v4122_v11, %v4123_v49 }
 0x372   :  { %15607 = vst [vmem:[#allocation83_spill] sm:$0xff] %v11822_v30  ;;  %v2644_v22 = vpop.f32.mrb[140].mxu0  ;;  %v4455_v10 = vmax.f32 %v4128_v38, %v4129_v51 }
 0x373   :  { %v2645_v63 = vadd.f32 %v2644_v22, %v11604_v4  ;;  %v2997_v60 = vpop.f32.mrb[140].mxu1  ;;  %4453 = vmax.xlane.f32.xlu0 %v4452_v61  ;;  %v2646_v53 = vpop.f32.mrb[141].mxu0  ;;  %v4647_v46 = vmax.f32 %v4130_v57, %v4131_v43 }
 0x374   :  { %v2998_v48 = vadd.f32 %v2997_v60, %v11604_v4  ;;  %v2647_v47 = vadd.f32 %v2646_v53, %v11604_v4  ;;  %v2999_v42 = vpop.f32.mrb[141].mxu1  ;;  %v4541_v25 = vpop.xlane.xlu1 %4540  ;;  %4456 = vmax.xlane.f32.xlu1 %v4455_v10 }
 0x375   :  { %v4136_v32 = vmax.f32 %v2645_v63, 0.0  ;;  %v3000_v41 = vadd.f32 %v2999_v42, %v11604_v4  ;;  %v4349_v37 = vpop.xlane.xlu0 %4348  ;;  %v2648_v11 = vpop.f32.mrb[142].mxu0  ;;  %v9758_v63 = vld [vmem:[%s15197_s5 + $0x70] sm:$0xff]  }
 0x376   :  { %v4138_v49 = vmax.f32 %v2998_v48, 0.0  ;;  %v4137_v38 = vmax.f32 %v2647_v47, 0.0  ;;  %v11831_v51 = vsel %vm5112_vm1, %v4349_v37, %v4541_v25  ;;  %v2649_v61 = vadd.f32 %v2648_v11, %v11600_v0  ;;  %v3001_v57 = vpop.f32.mrb[142].mxu1  ;;  %v2650_v43 = vpop.f32.mrb[143].mxu0 }
 0x377   :  { %15608 = vst [vmem:[#allocation84_spill] sm:$0xff] %v11831_v51  ;;  %v4139_v60 = vmax.f32 %v3000_v41, 0.0  ;;  %v3002_v22 = vadd.f32 %v3001_v57, %v11600_v0  ;;  %v2651_v53 = vadd.f32 %v2650_v43, %v11600_v0  ;;  %v3003_v10 = vpop.f32.mrb[143].mxu1  ;;  %4645 = vmax.xlane.f32.xlu0 %v4644_v21  ;;  %3299 = vmatmul.mubr.bf16.gmra.mrb[248].mxu0 %v9758_v63 }
 0x378   :  { %v4144_v48 = vmax.f32 %v2649_v61, 0.0  ;;  %v3004_v47 = vadd.f32 %v3003_v10, %v11600_v0  ;;  %3652 = vmatmul.mubr.bf16.gmra.mrb[248].mxu1 %v9758_v63  ;;  %4648 = vmax.xlane.f32.xlu1 %v4647_v46  ;;  %v4458_v42 = vmax.f32 %v4136_v32, %v4137_v38 }
 0x379   :  { %v4146_v25 = vmax.f32 %v3002_v22, 0.0  ;;  %v4145_v37 = vmax.f32 %v2651_v53, 0.0  ;;  %v4352_v41 = vpop.xlane.xlu0 %4351  ;;  %v4355_v11 = vpop.xlane.xlu1 %4354  ;;  %3308 = vmatprep.mubr.bf16.mxu0 %v15545_v50  ;;  %3661 = vmatprep.mubr.bf16.mxu1 %v15545_v50  ;;  %v4650_v21 = vmax.f32 %v4138_v49, %v4139_v60 }
 0x37a   :  { %v4147_v57 = vmax.f32 %v3004_v47, 0.0  ;;  %v2654_v43 = vpop.f32.mrb[144].mxu0 }
 0x37b   :  { %v2655_v51 = vadd.f32 %v2654_v43, %v11621_v12  ;;  %v3007_v4 = vpop.f32.mrb[144].mxu1  ;;  %4459 = vmax.xlane.f32.xlu0 %v4458_v42  ;;  %v2656_v61 = vpop.f32.mrb[145].mxu0  ;;  %v4461_v10 = vmax.f32 %v4144_v48, %v4145_v37 }
 0x37c   :  { %v3008_v46 = vadd.f32 %v3007_v4, %v11621_v12  ;;  %v2657_v32 = vadd.f32 %v2656_v61, %v11621_v12  ;;  %v3009_v38 = vpop.f32.mrb[145].mxu1  ;;  %v2658_v22 = vpop.f32.mrb[146].mxu0  ;;  %v4653_v53 = vmax.f32 %v4146_v25, %v4147_v57 }
 0x37d   :  { %v4152_v63 = vmax.f32 %v2655_v51, 0.0  ;;  %v3010_v0 = vadd.f32 %v3009_v38, %v11621_v12  ;;  %v4544_v30 = vpop.xlane.xlu0 %4543  ;;  %v2659_v49 = vadd.f32 %v2658_v22, %v11617_v2  ;;  %v3011_v60 = vpop.f32.mrb[146].mxu1  ;;  %4462 = vmax.xlane.f32.xlu1 %v4461_v10  ;;  %v9759_v10 = vld [vmem:[%s15197_s5 + $0x78] sm:$0xff]  }
 0x37e   :  { %v4154_v47 = vmax.f32 %v3008_v46, 0.0  ;;  %v4153_v43 = vmax.f32 %v2657_v32, 0.0  ;;  %v11848_v42 = vsel %vm5112_vm1, %v4352_v41, %v4544_v30  ;;  %v3012_v4 = vadd.f32 %v3011_v60, %v11617_v2  ;;  %v2660_v48 = vpop.f32.mrb[147].mxu0  ;;  %v3013_v37 = vpop.f32.mrb[147].mxu1 }
 0x37f   :  { %v4155_v61 = vmax.f32 %v3010_v0, 0.0  ;;  %v4160_v23 = vmax.f32 %v2659_v49, 0.0  ;;  %v2661_v51 = vadd.f32 %v2660_v48, %v11617_v2  ;;  %v3014_v25 = vadd.f32 %v3013_v37, %v11617_v2  ;;  %v4547_v57 = vpop.xlane.xlu1 %4546  ;;  %4651 = vmax.xlane.f32.xlu0 %v4650_v21  ;;  %3309 = vmatmul.mubr.bf16.gmra.mrb[252].mxu0 %v9759_v10 }
 0x380   :  { %v4162_v46 = vmax.f32 %v3012_v4, 0.0  ;;  %v11857_v30 = vsel %vm5112_vm1, %v4355_v11, %v4547_v57  ;;  %3662 = vmatmul.mubr.bf16.gmra.mrb[252].mxu1 %v9759_v10  ;;  %v4464_v41 = vmax.f32 %v4152_v63, %v4153_v43  ;;  %3318 = vmatprep.mubr.bf16.mxu0 %v15545_v50 }
 0x381   :  { %v4161_v0 = vmax.f32 %v2661_v51, 0.0  ;;  %v4163_v32 = vmax.f32 %v3014_v25, 0.0  ;;  %v4358_v38 = vpop.xlane.xlu0 %4357  ;;  %4654 = vmax.xlane.f32.xlu1 %v4653_v53  ;;  %3671 = vmatprep.mubr.bf16.mxu1 %v15545_v50  ;;  %v4656_v21 = vmax.f32 %v4154_v47, %v4155_v61 }
 0x382   :  { %v2664_v22 = vpop.f32.mrb[148].mxu0 }
 0x383   :  { %v4361_v49 = vpop.xlane.xlu1 %4360  ;;  %v2665_v60 = vadd.f32 %v2664_v22, %v11638_v18  ;;  %v3017_v48 = vpop.f32.mrb[148].mxu1  ;;  %4465 = vmax.xlane.f32.xlu0 %v4464_v41  ;;  %v4467_v4 = vmax.f32 %v4160_v23, %v4161_v0  ;;  %v4659_v11 = vmax.f32 %v4162_v46, %v4163_v32 }
 0x384   :  { %v3018_v37 = vadd.f32 %v3017_v48, %v11638_v18  ;;  %v2666_v63 = vpop.f32.mrb[149].mxu0  ;;  %v3019_v43 = vpop.f32.mrb[149].mxu1 }
 0x385   :  { %v4168_v57 = vmax.f32 %v2665_v60, 0.0  ;;  %v2667_v51 = vadd.f32 %v2666_v63, %v11638_v18  ;;  %v3020_v53 = vadd.f32 %v3019_v43, %v11638_v18  ;;  %v4550_v25 = vpop.xlane.xlu0 %4549  ;;  %v2668_v10 = vpop.f32.mrb[150].mxu0  ;;  %4468 = vmax.xlane.f32.xlu1 %v4467_v4  ;;  %v9760_v4 = vld [vmem:[%s15197_s5 + $0x80] sm:$0xff]  }
 0x386   :  { %v4170_v47 = vmax.f32 %v3018_v37, 0.0  ;;  %v11866_v61 = vsel %vm5112_vm1, %v4358_v38, %v4550_v25  ;;  %v2669_v41 = vadd.f32 %v2668_v10, %v11634_v35  ;;  %v3021_v23 = vpop.f32.mrb[150].mxu1  ;;  %v2670_v46 = vpop.f32.mrb[151].mxu0 }
 0x387   :  { %v4169_v0 = vmax.f32 %v2667_v51, 0.0  ;;  %v4171_v32 = vmax.f32 %v3020_v53, 0.0  ;;  %v3022_v22 = vadd.f32 %v3021_v23, %v11634_v35  ;;  %v2671_v60 = vadd.f32 %v2670_v46, %v11634_v35  ;;  %v3023_v48 = vpop.f32.mrb[151].mxu1  ;;  %v4553_v63 = vpop.xlane.xlu1 %4552  ;;  %4657 = vmax.xlane.f32.xlu0 %v4656_v21  ;;  %3319 = vmatmul.mubr.bf16.gmra.mrb[0].mxu0 %v9760_v4 }
 0x388   :  { %v4176_v38 = vmax.f32 %v2669_v41, 0.0  ;;  %v3024_v37 = vadd.f32 %v3023_v48, %v11634_v35  ;;  %v11876_v43 = vsel %vm5112_vm1, %v4361_v49, %v4553_v63  ;;  %3672 = vmatmul.mubr.bf16.gmra.mrb[0].mxu1 %v9760_v4  ;;  %3328 = vmatprep.mubr.bf16.mxu0 %v15545_v50 }
 0x389   :  { %v4178_v51 = vmax.f32 %v3022_v22, 0.0  ;;  %v4177_v53 = vmax.f32 %v2671_v60, 0.0  ;;  %v4364_v25 = vpop.xlane.xlu0 %4363  ;;  %4660 = vmax.xlane.f32.xlu1 %v4659_v11  ;;  %v4470_v10 = vmax.f32 %v4168_v57, %v4169_v0  ;;  %3681 = vmatprep.mubr.bf16.mxu1 %v15545_v50  ;;  %v4662_v21 = vmax.f32 %v4170_v47, %v4171_v32 }
 0x38a   :  { %v4179_v23 = vmax.f32 %v3024_v37, 0.0  ;;  %v2674_v46 = vpop.f32.mrb[152].mxu0 }
 0x38b   :  { %v4367_v18 = vpop.xlane.xlu1 %4366  ;;  %v2675_v41 = vadd.f32 %v2674_v46, %v11655_v20  ;;  %v3027_v48 = vpop.f32.mrb[152].mxu1  ;;  %4471 = vmax.xlane.f32.xlu0 %v4470_v10  ;;  %v4473_v49 = vmax.f32 %v4176_v38, %v4177_v53 }
 0x38c   :  { %v3028_v63 = vadd.f32 %v3027_v48, %v11655_v20  ;;  %v2676_v4 = vpop.f32.mrb[153].mxu0  ;;  %v3029_v35 = vpop.f32.mrb[153].mxu1  ;;  %v4665_v22 = vmax.f32 %v4178_v51, %v4179_v23 }
 0x38d   :  { %v4184_v60 = vmax.f32 %v2675_v41, 0.0  ;;  %v2677_v11 = vadd.f32 %v2676_v4, %v11655_v20  ;;  %v3030_v57 = vadd.f32 %v3029_v35, %v11655_v20  ;;  %v4556_v0 = vpop.xlane.xlu0 %4555  ;;  %v2678_v47 = vpop.f32.mrb[154].mxu0  ;;  %4474 = vmax.xlane.f32.xlu1 %v4473_v49  ;;  %v9761_v35 = vld [vmem:[%s15197_s5 + $0x88] sm:$0xff]  }
 0x38e   :  { %v4186_v32 = vmax.f32 %v3028_v63, 0.0  ;;  %v11885_v37 = vsel %vm5112_vm1, %v4364_v25, %v4556_v0  ;;  %v2679_v10 = vadd.f32 %v2678_v47, %v11651_v24  ;;  %v3031_v38 = vpop.f32.mrb[154].mxu1  ;;  %v2680_v53 = vpop.f32.mrb[155].mxu0 }
 0x38f   :  { %v4185_v46 = vmax.f32 %v2677_v11, 0.0  ;;  %v4187_v48 = vmax.f32 %v3030_v57, 0.0  ;;  %v3032_v51 = vadd.f32 %v3031_v38, %v11651_v24  ;;  %v2681_v23 = vadd.f32 %v2680_v53, %v11651_v24  ;;  %v3033_v41 = vpop.f32.mrb[155].mxu1  ;;  %v4559_v4 = vpop.xlane.xlu1 %4558  ;;  %4663 = vmax.xlane.f32.xlu0 %v4662_v21  ;;  %3329 = vmatmul.mubr.bf16.gmra.mrb[4].mxu0 %v9761_v35 }
 0x390   :  { %v4192_v25 = vmax.f32 %v2679_v10, 0.0  ;;  %v3034_v49 = vadd.f32 %v3033_v41, %v11651_v24  ;;  %v11895_v63 = vsel %vm5112_vm1, %v4367_v18, %v4559_v4  ;;  %3682 = vmatmul.mubr.bf16.gmra.mrb[4].mxu1 %v9761_v35  ;;  %3338 = vmatprep.mubr.bf16.mxu0 %v15545_v50 }
 0x391   :  { %v4194_v11 = vmax.f32 %v3032_v51, 0.0  ;;  %v4193_v57 = vmax.f32 %v2681_v23, 0.0  ;;  %v4370_v0 = vpop.xlane.xlu0 %4369  ;;  %4666 = vmax.xlane.f32.xlu1 %v4665_v22  ;;  %v4476_v47 = vmax.f32 %v4184_v60, %v4185_v46  ;;  %3691 = vmatprep.mubr.bf16.mxu1 %v15545_v50  ;;  %v4668_v21 = vmax.f32 %v4186_v32, %v4187_v48 }
 0x392   :  { %v4195_v38 = vmax.f32 %v3034_v49, 0.0  ;;  %v2684_v53 = vpop.f32.mrb[156].mxu0 }
 0x393   :  { %v4373_v20 = vpop.xlane.xlu1 %4372  ;;  %v2685_v10 = vadd.f32 %v2684_v53, %v11672_v8  ;;  %v3037_v41 = vpop.f32.mrb[156].mxu1  ;;  %4477 = vmax.xlane.f32.xlu0 %v4476_v47  ;;  %v4479_v18 = vmax.f32 %v4192_v25, %v4193_v57 }
 0x394   :  { %v3038_v4 = vadd.f32 %v3037_v41, %v11672_v8  ;;  %v2686_v35 = vpop.f32.mrb[157].mxu0  ;;  %v3039_v24 = vpop.f32.mrb[157].mxu1  ;;  %v4671_v51 = vmax.f32 %v4194_v11, %v4195_v38 }
 0x395   :  { %v4200_v23 = vmax.f32 %v2685_v10, 0.0  ;;  %v2687_v22 = vadd.f32 %v2686_v35, %v11672_v8  ;;  %v3040_v60 = vadd.f32 %v3039_v24, %v11672_v8  ;;  %v4562_v46 = vpop.xlane.xlu0 %4561  ;;  %v2688_v32 = vpop.f32.mrb[158].mxu0  ;;  %4480 = vmax.xlane.f32.xlu1 %v4479_v18  ;;  %v9762_v24 = vld [vmem:[%s15197_s5 + $0x90] sm:$0xff]  }
 0x396   :  { %v4202_v48 = vmax.f32 %v3038_v4, 0.0  ;;  %v11904_v49 = vsel %vm5112_vm1, %v4370_v0, %v4562_v46  ;;  %v2689_v47 = vadd.f32 %v2688_v32, %v11668_v15  ;;  %v3041_v25 = vpop.f32.mrb[158].mxu1  ;;  %v2690_v57 = vpop.f32.mrb[159].mxu0 }
 0x397   :  { %v4201_v53 = vmax.f32 %v2687_v22, 0.0  ;;  %v4203_v41 = vmax.f32 %v3040_v60, 0.0  ;;  %v3042_v11 = vadd.f32 %v3041_v25, %v11668_v15  ;;  %v2691_v38 = vadd.f32 %v2690_v57, %v11668_v15  ;;  %v3043_v10 = vpop.f32.mrb[159].mxu1  ;;  %v4565_v35 = vpop.xlane.xlu1 %4564  ;;  %4669 = vmax.xlane.f32.xlu0 %v4668_v21  ;;  %3339 = vmatmul.mubr.bf16.gmra.mrb[8].mxu0 %v9762_v24 }
 0x398   :  { %v4208_v0 = vmax.f32 %v2689_v47, 0.0  ;;  %v3044_v18 = vadd.f32 %v3043_v10, %v11668_v15  ;;  %v11914_v4 = vsel %vm5112_vm1, %v4373_v20, %v4565_v35  ;;  %3692 = vmatmul.mubr.bf16.gmra.mrb[8].mxu1 %v9762_v24  ;;  %3348 = vmatprep.mubr.bf16.mxu0 %v15545_v50 }
 0x399   :  { %v4210_v22 = vmax.f32 %v3042_v11, 0.0  ;;  %v4209_v60 = vmax.f32 %v2691_v38, 0.0  ;;  %v4376_v46 = vpop.xlane.xlu0 %4375  ;;  %4672 = vmax.xlane.f32.xlu1 %v4671_v51  ;;  %v4482_v32 = vmax.f32 %v4200_v23, %v4201_v53  ;;  %3701 = vmatprep.mubr.bf16.mxu1 %v15545_v50  ;;  %v4674_v21 = vmax.f32 %v4202_v48, %v4203_v41 }
 0x39a   :  { %v4211_v25 = vmax.f32 %v3044_v18, 0.0  ;;  %v2694_v57 = vpop.f32.mrb[160].mxu0 }
 0x39b   :  { %v4379_v8 = vpop.xlane.xlu1 %4378  ;;  %v2695_v47 = vadd.f32 %v2694_v57, %v11689_v39  ;;  %v3047_v10 = vpop.f32.mrb[160].mxu1  ;;  %4483 = vmax.xlane.f32.xlu0 %v4482_v32  ;;  %v4485_v20 = vmax.f32 %v4208_v0, %v4209_v60 }
 0x39c   :  { %v3048_v35 = vadd.f32 %v3047_v10, %v11689_v39  ;;  %v2696_v24 = vpop.f32.mrb[161].mxu0  ;;  %v3049_v15 = vpop.f32.mrb[161].mxu1  ;;  %v4677_v11 = vmax.f32 %v4210_v22, %v4211_v25 }
 0x39d   :  { %v4216_v38 = vmax.f32 %v2695_v47, 0.0  ;;  %v2697_v51 = vadd.f32 %v2696_v24, %v11689_v39  ;;  %v3050_v23 = vadd.f32 %v3049_v15, %v11689_v39  ;;  %v4568_v53 = vpop.xlane.xlu0 %4567  ;;  %v2698_v48 = vpop.f32.mrb[162].mxu0  ;;  %4486 = vmax.xlane.f32.xlu1 %v4485_v20  ;;  %v9763_v15 = vld [vmem:[%s15197_s5 + $0x98] sm:$0xff]  }
 0x39e   :  { %v4218_v41 = vmax.f32 %v3048_v35, 0.0  ;;  %v11923_v18 = vsel %vm5112_vm1, %v4376_v46, %v4568_v53  ;;  %v2699_v32 = vadd.f32 %v2698_v48, %v11685_v28  ;;  %v3051_v0 = vpop.f32.mrb[162].mxu1  ;;  %v2700_v60 = vpop.f32.mrb[163].mxu0 }
 0x39f   :  { %v4217_v57 = vmax.f32 %v2697_v51, 0.0  ;;  %v4219_v10 = vmax.f32 %v3050_v23, 0.0  ;;  %v3052_v22 = vadd.f32 %v3051_v0, %v11685_v28  ;;  %v2701_v25 = vadd.f32 %v2700_v60, %v11685_v28  ;;  %v3053_v47 = vpop.f32.mrb[163].mxu1  ;;  %v4571_v24 = vpop.xlane.xlu1 %4570  ;;  %4675 = vmax.xlane.f32.xlu0 %v4674_v21  ;;  %3349 = vmatmul.mubr.bf16.gmra.mrb[12].mxu0 %v9763_v15 }
 0x3a0   :  { %v4224_v46 = vmax.f32 %v2699_v32, 0.0  ;;  %v3054_v20 = vadd.f32 %v3053_v47, %v11685_v28  ;;  %v11933_v35 = vsel %vm5112_vm1, %v4379_v8, %v4571_v24  ;;  %3702 = vmatmul.mubr.bf16.gmra.mrb[12].mxu1 %v9763_v15  ;;  %3358 = vmatprep.mubr.bf16.mxu0 %v15545_v50 }
 0x3a1   :  { %v4226_v51 = vmax.f32 %v3052_v22, 0.0  ;;  %v4225_v23 = vmax.f32 %v2701_v25, 0.0  ;;  %v4382_v53 = vpop.xlane.xlu0 %4381  ;;  %4678 = vmax.xlane.f32.xlu1 %v4677_v11  ;;  %v4488_v48 = vmax.f32 %v4216_v38, %v4217_v57  ;;  %3711 = vmatprep.mubr.bf16.mxu1 %v15545_v50  ;;  %v4680_v21 = vmax.f32 %v4218_v41, %v4219_v10 }
 0x3a2   :  { %v4227_v0 = vmax.f32 %v3054_v20, 0.0  ;;  %v2704_v60 = vpop.f32.mrb[164].mxu0 }
 0x3a3   :  { %v4385_v39 = vpop.xlane.xlu1 %4384  ;;  %v2705_v32 = vadd.f32 %v2704_v60, %v11706_v3  ;;  %v3057_v47 = vpop.f32.mrb[164].mxu1  ;;  %4489 = vmax.xlane.f32.xlu0 %v4488_v48  ;;  %v4491_v8 = vmax.f32 %v4224_v46, %v4225_v23 }
 0x3a4   :  { %v3058_v24 = vadd.f32 %v3057_v47, %v11706_v3  ;;  %v2706_v15 = vpop.f32.mrb[165].mxu0  ;;  %v3059_v28 = vpop.f32.mrb[165].mxu1  ;;  %v4683_v22 = vmax.f32 %v4226_v51, %v4227_v0 }
 0x3a5   :  { %v4232_v25 = vmax.f32 %v2705_v32, 0.0  ;;  %v2707_v11 = vadd.f32 %v2706_v15, %v11706_v3  ;;  %v3060_v38 = vadd.f32 %v3059_v28, %v11706_v3  ;;  %v4574_v57 = vpop.xlane.xlu0 %4573  ;;  %v2708_v41 = vpop.f32.mrb[166].mxu0  ;;  %4492 = vmax.xlane.f32.xlu1 %v4491_v8  ;;  %v9764_v28 = vld [vmem:[%s15197_s5 + $0xa0] sm:$0xff]  }
 0x3a6   :  { %v4234_v10 = vmax.f32 %v3058_v24, 0.0  ;;  %v11942_v20 = vsel %vm5112_vm1, %v4382_v53, %v4574_v57  ;;  %v2709_v48 = vadd.f32 %v2708_v41, %v11702_v9  ;;  %v3061_v46 = vpop.f32.mrb[166].mxu1  ;;  %v2710_v23 = vpop.f32.mrb[167].mxu0 }
 0x3a7   :  { %v4233_v60 = vmax.f32 %v2707_v11, 0.0  ;;  %v4235_v47 = vmax.f32 %v3060_v38, 0.0  ;;  %v3062_v51 = vadd.f32 %v3061_v46, %v11702_v9  ;;  %v2711_v0 = vadd.f32 %v2710_v23, %v11702_v9  ;;  %v3063_v32 = vpop.f32.mrb[167].mxu1  ;;  %v4577_v15 = vpop.xlane.xlu1 %4576  ;;  %4681 = vmax.xlane.f32.xlu0 %v4680_v21  ;;  %3359 = vmatmul.mubr.bf16.gmra.mrb[16].mxu0 %v9764_v28 }
 0x3a8   :  { %v4240_v53 = vmax.f32 %v2709_v48, 0.0  ;;  %v3064_v8 = vadd.f32 %v3063_v32, %v11702_v9  ;;  %v11952_v24 = vsel %vm5112_vm1, %v4385_v39, %v4577_v15  ;;  %3712 = vmatmul.mubr.bf16.gmra.mrb[16].mxu1 %v9764_v28  ;;  %3368 = vmatprep.mubr.bf16.mxu0 %v15545_v50 }
 0x3a9   :  { %v4242_v11 = vmax.f32 %v3062_v51, 0.0  ;;  %v4241_v38 = vmax.f32 %v2711_v0, 0.0  ;;  %v4388_v57 = vpop.xlane.xlu0 %4387  ;;  %4684 = vmax.xlane.f32.xlu1 %v4683_v22  ;;  %v4494_v41 = vmax.f32 %v4232_v25, %v4233_v60  ;;  %3721 = vmatprep.mubr.bf16.mxu1 %v15545_v50  ;;  %v4686_v21 = vmax.f32 %v4234_v10, %v4235_v47 }
 0x3aa   :  { %v4243_v46 = vmax.f32 %v3064_v8, 0.0  ;;  %v2714_v23 = vpop.f32.mrb[168].mxu0 }
 0x3ab   :  { %v4391_v3 = vpop.xlane.xlu1 %4390  ;;  %v2715_v48 = vadd.f32 %v2714_v23, %v11723_v52  ;;  %v3067_v32 = vpop.f32.mrb[168].mxu1  ;;  %4495 = vmax.xlane.f32.xlu0 %v4494_v41  ;;  %v4497_v39 = vmax.f32 %v4240_v53, %v4241_v38 }
 0x3ac   :  { %v3068_v15 = vadd.f32 %v3067_v32, %v11723_v52  ;;  %v2716_v28 = vpop.f32.mrb[169].mxu0  ;;  %v3069_v9 = vpop.f32.mrb[169].mxu1  ;;  %v4689_v51 = vmax.f32 %v4242_v11, %v4243_v46 }
 0x3ad   :  { %v4248_v0 = vmax.f32 %v2715_v48, 0.0  ;;  %v2717_v22 = vadd.f32 %v2716_v28, %v11723_v52  ;;  %v3070_v25 = vadd.f32 %v3069_v9, %v11723_v52  ;;  %v4580_v60 = vpop.xlane.xlu0 %4579  ;;  %v2718_v10 = vpop.f32.mrb[170].mxu0  ;;  %4498 = vmax.xlane.f32.xlu1 %v4497_v39  ;;  %v9765_v9 = vld [vmem:[%s15197_s5 + $0xa8] sm:$0xff]  }
 0x3ae   :  { %v4250_v47 = vmax.f32 %v3068_v15, 0.0  ;;  %v11961_v8 = vsel %vm5112_vm1, %v4388_v57, %v4580_v60  ;;  %v2719_v41 = vadd.f32 %v2718_v10, %v11719_v31  ;;  %v3071_v53 = vpop.f32.mrb[170].mxu1  ;;  %v2720_v38 = vpop.f32.mrb[171].mxu0 }
 0x3af   :  { %v4249_v23 = vmax.f32 %v2717_v22, 0.0  ;;  %v4251_v32 = vmax.f32 %v3070_v25, 0.0  ;;  %v3072_v11 = vadd.f32 %v3071_v53, %v11719_v31  ;;  %v2721_v46 = vadd.f32 %v2720_v38, %v11719_v31  ;;  %v3073_v48 = vpop.f32.mrb[171].mxu1  ;;  %v4583_v28 = vpop.xlane.xlu1 %4582  ;;  %4687 = vmax.xlane.f32.xlu0 %v4686_v21  ;;  %3369 = vmatmul.mubr.bf16.gmra.mrb[20].mxu0 %v9765_v9 }
 0x3b0   :  { %v4256_v57 = vmax.f32 %v2719_v41, 0.0  ;;  %v3074_v39 = vadd.f32 %v3073_v48, %v11719_v31  ;;  %v11971_v15 = vsel %vm5112_vm1, %v4391_v3, %v4583_v28  ;;  %3722 = vmatmul.mubr.bf16.gmra.mrb[20].mxu1 %v9765_v9  ;;  %3378 = vmatprep.mubr.bf16.mxu0 %v15545_v50 }
 0x3b1   :  { %v4258_v22 = vmax.f32 %v3072_v11, 0.0  ;;  %v4257_v25 = vmax.f32 %v2721_v46, 0.0  ;;  %v4394_v60 = vpop.xlane.xlu0 %4393  ;;  %4690 = vmax.xlane.f32.xlu1 %v4689_v51  ;;  %v4500_v10 = vmax.f32 %v4248_v0, %v4249_v23  ;;  %3731 = vmatprep.mubr.bf16.mxu1 %v15545_v50  ;;  %v4692_v21 = vmax.f32 %v4250_v47, %v4251_v32 }
 0x3b2   :  { %v4259_v53 = vmax.f32 %v3074_v39, 0.0  ;;  %v2724_v38 = vpop.f32.mrb[172].mxu0 }
 0x3b3   :  { %v4397_v52 = vpop.xlane.xlu1 %4396  ;;  %v2725_v41 = vadd.f32 %v2724_v38, %v11740_v26  ;;  %v3077_v48 = vpop.f32.mrb[172].mxu1  ;;  %4501 = vmax.xlane.f32.xlu0 %v4500_v10  ;;  %v4503_v3 = vmax.f32 %v4256_v57, %v4257_v25 }
 0x3b4   :  { %v3078_v28 = vadd.f32 %v3077_v48, %v11740_v26  ;;  %v2726_v9 = vpop.f32.mrb[173].mxu0  ;;  %v3079_v31 = vpop.f32.mrb[173].mxu1  ;;  %v4695_v11 = vmax.f32 %v4258_v22, %v4259_v53 }
 0x3b5   :  { %v4264_v46 = vmax.f32 %v2725_v41, 0.0  ;;  %v2727_v51 = vadd.f32 %v2726_v9, %v11740_v26  ;;  %v3080_v0 = vadd.f32 %v3079_v31, %v11740_v26  ;;  %v4586_v23 = vpop.xlane.xlu0 %4585  ;;  %v2728_v47 = vpop.f32.mrb[174].mxu0  ;;  %4504 = vmax.xlane.f32.xlu1 %v4503_v3  ;;  %v9766_v31 = vld [vmem:[%s15197_s5 + $0xb0] sm:$0xff]  }
 0x3b6   :  { %v4266_v32 = vmax.f32 %v3078_v28, 0.0  ;;  %v11980_v39 = vsel %vm5112_vm1, %v4394_v60, %v4586_v23  ;;  %v2729_v10 = vadd.f32 %v2728_v47, %v11736_v13  ;;  %v3081_v57 = vpop.f32.mrb[174].mxu1  ;;  %v2730_v25 = vpop.f32.mrb[175].mxu0 }
 0x3b7   :  { %15609 = vst [vmem:[#allocation85_spill] sm:$0xff] %v11980_v39  ;;  %v4265_v38 = vmax.f32 %v2727_v51, 0.0  ;;  %v4267_v48 = vmax.f32 %v3080_v0, 0.0  ;;  %v3082_v22 = vadd.f32 %v3081_v57, %v11736_v13  ;;  %v2731_v53 = vadd.f32 %v2730_v25, %v11736_v13  ;;  %v3083_v41 = vpop.f32.mrb[175].mxu1  ;;  %v4589_v9 = vpop.xlane.xlu1 %4588  ;;  %4693 = vmax.xlane.f32.xlu0 %v4692_v21  ;;  %3379 = vmatmul.mubr.bf16.gmra.mrb[24].mxu0 %v9766_v31 }
 0x3b8   :  { %v4272_v60 = vmax.f32 %v2729_v10, 0.0  ;;  %v3084_v3 = vadd.f32 %v3083_v41, %v11736_v13  ;;  %v11990_v28 = vsel %vm5112_vm1, %v4397_v52, %v4589_v9  ;;  %3732 = vmatmul.mubr.bf16.gmra.mrb[24].mxu1 %v9766_v31  ;;  %3388 = vmatprep.mubr.bf16.mxu0 %v15545_v50 }
 0x3b9   :  { %v4274_v51 = vmax.f32 %v3082_v22, 0.0  ;;  %v4273_v0 = vmax.f32 %v2731_v53, 0.0  ;;  %v4400_v23 = vpop.xlane.xlu0 %4399  ;;  %4696 = vmax.xlane.f32.xlu1 %v4695_v11  ;;  %v4506_v47 = vmax.f32 %v4264_v46, %v4265_v38  ;;  %3741 = vmatprep.mubr.bf16.mxu1 %v15545_v50  ;;  %v4698_v21 = vmax.f32 %v4266_v32, %v4267_v48 }
 0x3ba   :  { %v4275_v57 = vmax.f32 %v3084_v3, 0.0  ;;  %v2734_v25 = vpop.f32.mrb[176].mxu0 }
 0x3bb   :  { %v4403_v39 = vpop.xlane.xlu1 %4402  ;;  %v2735_v10 = vadd.f32 %v2734_v25, %v11757_v44  ;;  %v3087_v41 = vpop.f32.mrb[176].mxu1  ;;  %4507 = vmax.xlane.f32.xlu0 %v4506_v47  ;;  %v4509_v52 = vmax.f32 %v4272_v60, %v4273_v0 }
 0x3bc   :  { %v3088_v9 = vadd.f32 %v3087_v41, %v11757_v44  ;;  %v2736_v31 = vpop.f32.mrb[177].mxu0  ;;  %v3089_v13 = vpop.f32.mrb[177].mxu1  ;;  %v4701_v22 = vmax.f32 %v4274_v51, %v4275_v57 }
 0x3bd   :  { %v4280_v53 = vmax.f32 %v2735_v10, 0.0  ;;  %v2737_v11 = vadd.f32 %v2736_v31, %v11757_v44  ;;  %v3090_v46 = vadd.f32 %v3089_v13, %v11757_v44  ;;  %v4592_v38 = vpop.xlane.xlu0 %4591  ;;  %v2738_v32 = vpop.f32.mrb[178].mxu0  ;;  %4510 = vmax.xlane.f32.xlu1 %v4509_v52  ;;  %v9767_v13 = vld [vmem:[%s15197_s5 + $0xb8] sm:$0xff]  }
 0x3be   :  { %v4282_v48 = vmax.f32 %v3088_v9, 0.0  ;;  %v11999_v3 = vsel %vm5112_vm1, %v4400_v23, %v4592_v38  ;;  %v2739_v47 = vadd.f32 %v2738_v32, %v11753_v33  ;;  %v3091_v60 = vpop.f32.mrb[178].mxu1  ;;  %v2740_v0 = vpop.f32.mrb[179].mxu0 }
 0x3bf   :  { %15610 = vst [vmem:[#allocation86_spill] sm:$0xff] %v11999_v3  ;;  %v4281_v25 = vmax.f32 %v2737_v11, 0.0  ;;  %v4283_v41 = vmax.f32 %v3090_v46, 0.0  ;;  %v3092_v51 = vadd.f32 %v3091_v60, %v11753_v33  ;;  %v2741_v57 = vadd.f32 %v2740_v0, %v11753_v33  ;;  %v3093_v10 = vpop.f32.mrb[179].mxu1  ;;  %v4595_v31 = vpop.xlane.xlu1 %4594  ;;  %4699 = vmax.xlane.f32.xlu0 %v4698_v21  ;;  %3389 = vmatmul.mubr.bf16.gmra.mrb[28].mxu0 %v9767_v13 }
 0x3c0   :  { %v4288_v23 = vmax.f32 %v2739_v47, 0.0  ;;  %v3094_v52 = vadd.f32 %v3093_v10, %v11753_v33  ;;  %v12009_v9 = vsel %vm5112_vm1, %v4403_v39, %v4595_v31  ;;  %3742 = vmatmul.mubr.bf16.gmra.mrb[28].mxu1 %v9767_v13  ;;  %3398 = vmatprep.mubr.bf16.mxu0 %v15545_v50 }
 0x3c1   :  { %v4290_v11 = vmax.f32 %v3092_v51, 0.0  ;;  %v4289_v46 = vmax.f32 %v2741_v57, 0.0  ;;  %v4406_v38 = vpop.xlane.xlu0 %4405  ;;  %4702 = vmax.xlane.f32.xlu1 %v4701_v22  ;;  %v4512_v32 = vmax.f32 %v4280_v53, %v4281_v25  ;;  %3751 = vmatprep.mubr.bf16.mxu1 %v15545_v50  ;;  %v4704_v21 = vmax.f32 %v4282_v48, %v4283_v41 }
 0x3c2   :  { %v4291_v60 = vmax.f32 %v3094_v52, 0.0  ;;  %v2744_v0 = vpop.f32.mrb[180].mxu0 }
 0x3c3   :  { %v4409_v3 = vpop.xlane.xlu1 %4408  ;;  %v2745_v47 = vadd.f32 %v2744_v0, %v11774_v34  ;;  %v3097_v10 = vpop.f32.mrb[180].mxu1  ;;  %4513 = vmax.xlane.f32.xlu0 %v4512_v32  ;;  %v4515_v39 = vmax.f32 %v4288_v23, %v4289_v46 }
 0x3c4   :  { %v3098_v31 = vadd.f32 %v3097_v10, %v11774_v34  ;;  %v2746_v13 = vpop.f32.mrb[181].mxu0  ;;  %v3099_v33 = vpop.f32.mrb[181].mxu1  ;;  %v4707_v51 = vmax.f32 %v4290_v11, %v4291_v60 }
 0x3c5   :  { %v4296_v57 = vmax.f32 %v2745_v47, 0.0  ;;  %v2747_v22 = vadd.f32 %v2746_v13, %v11774_v34  ;;  %v3100_v53 = vadd.f32 %v3099_v33, %v11774_v34  ;;  %v4598_v25 = vpop.xlane.xlu0 %4597  ;;  %v2748_v48 = vpop.f32.mrb[182].mxu0  ;;  %4516 = vmax.xlane.f32.xlu1 %v4515_v39  ;;  %v9768_v33 = vld [vmem:[%s15197_s5 + $0xc0] sm:$0xff]  }
 0x3c6   :  { %v4298_v41 = vmax.f32 %v3098_v31, 0.0  ;;  %v12018_v52 = vsel %vm5112_vm1, %v4406_v38, %v4598_v25  ;;  %v2749_v32 = vadd.f32 %v2748_v48, %v11770_v5  ;;  %v3101_v23 = vpop.f32.mrb[182].mxu1  ;;  %v2750_v46 = vpop.f32.mrb[183].mxu0 }
 0x3c7   :  { %15611 = vst [vmem:[#allocation87_spill] sm:$0xff] %v12018_v52  ;;  %v4297_v0 = vmax.f32 %v2747_v22, 0.0  ;;  %v4299_v10 = vmax.f32 %v3100_v53, 0.0  ;;  %v3102_v11 = vadd.f32 %v3101_v23, %v11770_v5  ;;  %v2751_v60 = vadd.f32 %v2750_v46, %v11770_v5  ;;  %v3103_v47 = vpop.f32.mrb[183].mxu1  ;;  %v4601_v13 = vpop.xlane.xlu1 %4600  ;;  %4705 = vmax.xlane.f32.xlu0 %v4704_v21  ;;  %3399 = vmatmul.mubr.bf16.gmra.mrb[32].mxu0 %v9768_v33 }
 0x3c8   :  { %v4304_v38 = vmax.f32 %v2749_v32, 0.0  ;;  %v3104_v39 = vadd.f32 %v3103_v47, %v11770_v5  ;;  %v12028_v31 = vsel %vm5112_vm1, %v4409_v3, %v4601_v13  ;;  %3752 = vmatmul.mubr.bf16.gmra.mrb[32].mxu1 %v9768_v33  ;;  %3408 = vmatprep.mubr.bf16.mxu0 %v15545_v50 }
 0x3c9   :  { %v4306_v22 = vmax.f32 %v3102_v11, 0.0  ;;  %v4305_v53 = vmax.f32 %v2751_v60, 0.0  ;;  %v4412_v25 = vpop.xlane.xlu0 %4411  ;;  %4708 = vmax.xlane.f32.xlu1 %v4707_v51  ;;  %v4518_v48 = vmax.f32 %v4296_v57, %v4297_v0  ;;  %3761 = vmatprep.mubr.bf16.mxu1 %v15545_v50  ;;  %v4710_v21 = vmax.f32 %v4298_v41, %v4299_v10 }
 0x3ca   :  { %v4307_v23 = vmax.f32 %v3104_v39, 0.0  ;;  %v2754_v46 = vpop.f32.mrb[184].mxu0 }
 0x3cb   :  { %v4415_v52 = vpop.xlane.xlu1 %4414  ;;  %v2755_v32 = vadd.f32 %v2754_v46, %v11791_v58  ;;  %v3107_v47 = vpop.f32.mrb[184].mxu1  ;;  %4519 = vmax.xlane.f32.xlu0 %v4518_v48  ;;  %v4521_v3 = vmax.f32 %v4304_v38, %v4305_v53 }
 0x3cc   :  { %v3108_v13 = vadd.f32 %v3107_v47, %v11791_v58  ;;  %v2756_v33 = vpop.f32.mrb[185].mxu0  ;;  %v3109_v5 = vpop.f32.mrb[185].mxu1  ;;  %v4713_v11 = vmax.f32 %v4306_v22, %v4307_v23 }
 0x3cd   :  { %v4312_v60 = vmax.f32 %v2755_v32, 0.0  ;;  %v2757_v51 = vadd.f32 %v2756_v33, %v11791_v58  ;;  %v3110_v57 = vadd.f32 %v3109_v5, %v11791_v58  ;;  %v4604_v0 = vpop.xlane.xlu0 %4603  ;;  %v2758_v41 = vpop.f32.mrb[186].mxu0  ;;  %4522 = vmax.xlane.f32.xlu1 %v4521_v3  ;;  %v9769_v5 = vld [vmem:[%s15197_s5 + $0xc8] sm:$0xff]  }
 0x3ce   :  { %v4314_v10 = vmax.f32 %v3108_v13, 0.0  ;;  %v12037_v39 = vsel %vm5112_vm1, %v4412_v25, %v4604_v0  ;;  %v2759_v48 = vadd.f32 %v2758_v41, %v11787_v27  ;;  %v3111_v38 = vpop.f32.mrb[186].mxu1  ;;  %v2760_v53 = vpop.f32.mrb[187].mxu0 }
 0x3cf   :  { %15612 = vst [vmem:[#allocation88_spill] sm:$0xff] %v12037_v39  ;;  %v4313_v46 = vmax.f32 %v2757_v51, 0.0  ;;  %v4315_v47 = vmax.f32 %v3110_v57, 0.0  ;;  %v3112_v22 = vadd.f32 %v3111_v38, %v11787_v27  ;;  %v2761_v23 = vadd.f32 %v2760_v53, %v11787_v27  ;;  %v3113_v32 = vpop.f32.mrb[187].mxu1  ;;  %v4607_v33 = vpop.xlane.xlu1 %4606  ;;  %4711 = vmax.xlane.f32.xlu0 %v4710_v21  ;;  %3409 = vmatmul.mubr.bf16.gmra.mrb[36].mxu0 %v9769_v5 }
 0x3d0   :  { %v4320_v25 = vmax.f32 %v2759_v48, 0.0  ;;  %v3114_v3 = vadd.f32 %v3113_v32, %v11787_v27  ;;  %v12047_v13 = vsel %vm5112_vm1, %v4415_v52, %v4607_v33  ;;  %3762 = vmatmul.mubr.bf16.gmra.mrb[36].mxu1 %v9769_v5  ;;  %3418 = vmatprep.mubr.bf16.mxu0 %v15545_v50 }
 0x3d1   :  { %v4322_v51 = vmax.f32 %v3112_v22, 0.0  ;;  %v4321_v57 = vmax.f32 %v2761_v23, 0.0  ;;  %v4418_v0 = vpop.xlane.xlu0 %4417  ;;  %4714 = vmax.xlane.f32.xlu1 %v4713_v11  ;;  %v4524_v41 = vmax.f32 %v4312_v60, %v4313_v46  ;;  %3771 = vmatprep.mubr.bf16.mxu1 %v15545_v50  ;;  %v4716_v21 = vmax.f32 %v4314_v10, %v4315_v47 }
 0x3d2   :  { %v4323_v38 = vmax.f32 %v3114_v3, 0.0  ;;  %v2764_v53 = vpop.f32.mrb[188].mxu0 }
 0x3d3   :  { %v4421_v39 = vpop.xlane.xlu1 %4420  ;;  %v2765_v48 = vadd.f32 %v2764_v53, %v11808_v54  ;;  %v3117_v32 = vpop.f32.mrb[188].mxu1  ;;  %4525 = vmax.xlane.f32.xlu0 %v4524_v41  ;;  %v4527_v52 = vmax.f32 %v4320_v25, %v4321_v57 }
 0x3d4   :  { %v3118_v33 = vadd.f32 %v3117_v32, %v11808_v54  ;;  %v2766_v5 = vpop.f32.mrb[189].mxu0  ;;  %v3119_v27 = vpop.f32.mrb[189].mxu1  ;;  %v4719_v22 = vmax.f32 %v4322_v51, %v4323_v38 }
 0x3d5   :  { %v4328_v23 = vmax.f32 %v2765_v48, 0.0  ;;  %v2767_v11 = vadd.f32 %v2766_v5, %v11808_v54  ;;  %v3120_v60 = vadd.f32 %v3119_v27, %v11808_v54  ;;  %v4610_v46 = vpop.xlane.xlu0 %4609  ;;  %v2768_v10 = vpop.f32.mrb[190].mxu0  ;;  %4528 = vmax.xlane.f32.xlu1 %v4527_v52  ;;  %v9770_v27 = vld [vmem:[%s15197_s5 + $0xd0] sm:$0xff]  }
 0x3d6   :  { %v4330_v47 = vmax.f32 %v3118_v33, 0.0  ;;  %v12056_v3 = vsel %vm5112_vm1, %v4418_v0, %v4610_v46  ;;  %v2769_v41 = vadd.f32 %v2768_v10, %v11804_v1  ;;  %v3121_v25 = vpop.f32.mrb[190].mxu1  ;;  %v2770_v57 = vpop.f32.mrb[191].mxu0 }
 0x3d7   :  { %15613 = vst [vmem:[#allocation89_spill] sm:$0xff] %v12056_v3  ;;  %v4329_v53 = vmax.f32 %v2767_v11, 0.0  ;;  %v4331_v32 = vmax.f32 %v3120_v60, 0.0  ;;  %v3122_v51 = vadd.f32 %v3121_v25, %v11804_v1  ;;  %v2771_v38 = vadd.f32 %v2770_v57, %v11804_v1  ;;  %v3123_v48 = vpop.f32.mrb[191].mxu1  ;;  %v4613_v5 = vpop.xlane.xlu1 %4612  ;;  %4717 = vmax.xlane.f32.xlu0 %v4716_v21  ;;  %3419 = vmatmul.mubr.bf16.gmra.mrb[40].mxu0 %v9770_v27 }
 0x3d8   :  { %v4336_v0 = vmax.f32 %v2769_v41, 0.0  ;;  %v3124_v52 = vadd.f32 %v3123_v48, %v11804_v1  ;;  %v12066_v33 = vsel %vm5112_vm1, %v4421_v39, %v4613_v5  ;;  %3772 = vmatmul.mubr.bf16.gmra.mrb[40].mxu1 %v9770_v27  ;;  %3428 = vmatprep.mubr.bf16.mxu0 %v15545_v50 }
 0x3d9   :  { %v4338_v11 = vmax.f32 %v3122_v51, 0.0  ;;  %v4337_v60 = vmax.f32 %v2771_v38, 0.0  ;;  %v4424_v46 = vpop.xlane.xlu0 %4423  ;;  %4720 = vmax.xlane.f32.xlu1 %v4719_v22  ;;  %v4530_v10 = vmax.f32 %v4328_v23, %v4329_v53  ;;  %3781 = vmatprep.mubr.bf16.mxu1 %v15545_v50  ;;  %v4722_v21 = vmax.f32 %v4330_v47, %v4331_v32 }
 0x3da   :  { %v4339_v25 = vmax.f32 %v3124_v52, 0.0  ;;  %v3160_v57 = vpop.f32.mrb[192].mxu0 }
 0x3db   :  { %v4427_v3 = vpop.xlane.xlu1 %4426  ;;  %v3161_v41 = vadd.f32 %v3160_v57, %v11403_v55  ;;  %v3513_v48 = vpop.f32.mrb[192].mxu1  ;;  %4531 = vmax.xlane.f32.xlu0 %v4530_v10  ;;  %v4533_v39 = vmax.f32 %v4336_v0, %v4337_v60 }
 0x3dc   :  { %v3514_v5 = vadd.f32 %v3513_v48, %v11403_v55  ;;  %v3162_v27 = vpop.f32.mrb[193].mxu0  ;;  %v3515_v1 = vpop.f32.mrb[193].mxu1  ;;  %v4725_v51 = vmax.f32 %v4338_v11, %v4339_v25 }
 0x3dd   :  { %v3836_v38 = vmax.f32 %v3161_v41, 0.0  ;;  %v3163_v22 = vadd.f32 %v3162_v27, %v11403_v55  ;;  %v3516_v23 = vadd.f32 %v3515_v1, %v11403_v55  ;;  %v4616_v53 = vpop.xlane.xlu0 %4615  ;;  %v3164_v47 = vpop.f32.mrb[194].mxu0  ;;  %4534 = vmax.xlane.f32.xlu1 %v4533_v39  ;;  %v9771_v55 = vld [vmem:[%s15197_s5 + $0xd8] sm:$0xff]  }
 0x3de   :  { %v3838_v32 = vmax.f32 %v3514_v5, 0.0  ;;  %v12075_v52 = vsel %vm5112_vm1, %v4424_v46, %v4616_v53  ;;  %v3165_v10 = vadd.f32 %v3164_v47, %v11398_v16  ;;  %v3517_v0 = vpop.f32.mrb[194].mxu1  ;;  %v3166_v60 = vpop.f32.mrb[195].mxu0 }
 0x3df   :  { %v3837_v57 = vmax.f32 %v3163_v22, 0.0  ;;  %v3839_v48 = vmax.f32 %v3516_v23, 0.0  ;;  %v3518_v11 = vadd.f32 %v3517_v0, %v11398_v16  ;;  %v3167_v25 = vadd.f32 %v3166_v60, %v11398_v16  ;;  %v3519_v41 = vpop.f32.mrb[195].mxu1  ;;  %v4619_v27 = vpop.xlane.xlu1 %4618  ;;  %4723 = vmax.xlane.f32.xlu0 %v4722_v21  ;;  %3429 = vmatmul.mubr.bf16.gmra.mrb[44].mxu0 %v9771_v55 }
 0x3e0   :  { %v3844_v1 = vmax.f32 %v3165_v10, 0.0  ;;  %v3520_v46 = vadd.f32 %v3519_v41, %v11398_v16  ;;  %v12085_v39 = vsel %vm5112_vm1, %v4427_v3, %v4619_v27  ;;  %3782 = vmatmul.mubr.bf16.gmra.mrb[44].mxu1 %v9771_v55  ;;  %3438 = vmatprep.mubr.bf16.mxu0 %v15545_v50 }
 0x3e1   :  { %v3846_v5 = vmax.f32 %v3518_v11, 0.0  ;;  %v3845_v22 = vmax.f32 %v3167_v25, 0.0  ;;  %v4430_v23 = vpop.xlane.xlu0 %4429  ;;  %4726 = vmax.xlane.f32.xlu1 %v4725_v51  ;;  %v4728_v53 = vmax.f32 %v3836_v38, %v3837_v57  ;;  %3791 = vmatprep.mubr.bf16.mxu1 %v15545_v50  ;;  %v4920_v21 = vmax.f32 %v3838_v32, %v3839_v48 }
 0x3e2   :  { %v3847_v47 = vmax.f32 %v3520_v46, 0.0  ;;  %v3170_v0 = vpop.f32.mrb[196].mxu0 }
 0x3e3   :  { %v4433_v60 = vpop.xlane.xlu1 %4432  ;;  %v3171_v10 = vadd.f32 %v3170_v0, %v11409_v7  ;;  %v3523_v16 = vpop.f32.mrb[196].mxu1  ;;  %4729 = vmax.xlane.f32.xlu0 %v4728_v53  ;;  %v4731_v3 = vmax.f32 %v3844_v1, %v3845_v22 }
 0x3e4   :  { %v3524_v41 = vadd.f32 %v3523_v16, %v11409_v7  ;;  %v3172_v27 = vpop.f32.mrb[197].mxu0  ;;  %v3525_v55 = vpop.f32.mrb[197].mxu1  ;;  %v4923_v11 = vmax.f32 %v3846_v5, %v3847_v47 }
 0x3e5   :  { %v3852_v25 = vmax.f32 %v3171_v10, 0.0  ;;  %v3173_v51 = vadd.f32 %v3172_v27, %v11409_v7  ;;  %v3526_v38 = vadd.f32 %v3525_v55, %v11409_v7  ;;  %v4622_v57 = vpop.xlane.xlu0 %4621  ;;  %v3174_v32 = vpop.f32.mrb[198].mxu0  ;;  %4732 = vmax.xlane.f32.xlu1 %v4731_v3  ;;  %v9772_v7 = vld [vmem:[%s15197_s5 + $0xe0] sm:$0xff]  }
 0x3e6   :  { %v3854_v48 = vmax.f32 %v3524_v41, 0.0  ;;  %v12094_v46 = vsel %vm5112_vm1, %v4430_v23, %v4622_v57  ;;  %v3175_v53 = vadd.f32 %v3174_v32, %v11406_v59  ;;  %v3527_v1 = vpop.f32.mrb[198].mxu1  ;;  %v3176_v22 = vpop.f32.mrb[199].mxu0 }
 0x3e7   :  { %v3853_v0 = vmax.f32 %v3173_v51, 0.0  ;;  %v3855_v16 = vmax.f32 %v3526_v38, 0.0  ;;  %v3528_v5 = vadd.f32 %v3527_v1, %v11406_v59  ;;  %v3177_v47 = vadd.f32 %v3176_v22, %v11406_v59  ;;  %v3529_v10 = vpop.f32.mrb[199].mxu1  ;;  %v4625_v27 = vpop.xlane.xlu1 %4624  ;;  %4921 = vmax.xlane.f32.xlu0 %v4920_v21  ;;  %3439 = vmatmul.mubr.bf16.gmra.mrb[48].mxu0 %v9772_v7 }
 0x3e8   :  { %v3860_v23 = vmax.f32 %v3175_v53, 0.0  ;;  %v3530_v3 = vadd.f32 %v3529_v10, %v11406_v59  ;;  %v12104_v41 = vsel %vm5112_vm1, %v4433_v60, %v4625_v27  ;;  %3792 = vmatmul.mubr.bf16.gmra.mrb[48].mxu1 %v9772_v7  ;;  %3448 = vmatprep.mubr.bf16.mxu0 %v15545_v50 }
 0x3e9   :  { %v3862_v55 = vmax.f32 %v3528_v5, 0.0  ;;  %v3861_v51 = vmax.f32 %v3177_v47, 0.0  ;;  %v4436_v38 = vpop.xlane.xlu0 %4435  ;;  %4924 = vmax.xlane.f32.xlu1 %v4923_v11  ;;  %v4734_v57 = vmax.f32 %v3852_v25, %v3853_v0  ;;  %3801 = vmatprep.mubr.bf16.mxu1 %v15545_v50  ;;  %v4926_v21 = vmax.f32 %v3854_v48, %v3855_v16 }
 0x3ea   :  { %v3863_v32 = vmax.f32 %v3530_v3, 0.0  ;;  %v3180_v1 = vpop.f32.mrb[200].mxu0 }
 0x3eb   :  { %v4439_v22 = vpop.xlane.xlu1 %4438  ;;  %v3181_v53 = vadd.f32 %v3180_v1, %v11416_v40  ;;  %v3533_v59 = vpop.f32.mrb[200].mxu1  ;;  %4735 = vmax.xlane.f32.xlu0 %v4734_v57  ;;  %v4737_v60 = vmax.f32 %v3860_v23, %v3861_v51 }
 0x3ec   :  { %v3534_v10 = vadd.f32 %v3533_v59, %v11416_v40  ;;  %v3182_v27 = vpop.f32.mrb[201].mxu0  ;;  %v3535_v7 = vpop.f32.mrb[201].mxu1  ;;  %v4929_v5 = vmax.f32 %v3862_v55, %v3863_v32 }
 0x3ed   :  { %v3868_v47 = vmax.f32 %v3181_v53, 0.0  ;;  %v3183_v11 = vadd.f32 %v3182_v27, %v11416_v40  ;;  %v3536_v25 = vadd.f32 %v3535_v7, %v11416_v40  ;;  %v4628_v0 = vpop.xlane.xlu0 %4627  ;;  %v3184_v48 = vpop.f32.mrb[202].mxu0  ;;  %4738 = vmax.xlane.f32.xlu1 %v4737_v60  ;;  %v9773_v40 = vld [vmem:[%s15197_s5 + $0xe8] sm:$0xff]  }
 0x3ee   :  { %v3870_v16 = vmax.f32 %v3534_v10, 0.0  ;;  %v12113_v3 = vsel %vm5112_vm1, %v4436_v38, %v4628_v0  ;;  %v3185_v57 = vadd.f32 %v3184_v48, %v11414_v6  ;;  %v3537_v23 = vpop.f32.mrb[202].mxu1  ;;  %v3186_v51 = vpop.f32.mrb[203].mxu0 }
 0x3ef   :  { %v3869_v1 = vmax.f32 %v3183_v11, 0.0  ;;  %v3871_v59 = vmax.f32 %v3536_v25, 0.0  ;;  %v3538_v55 = vadd.f32 %v3537_v23, %v11414_v6  ;;  %v3187_v32 = vadd.f32 %v3186_v51, %v11414_v6  ;;  %v3539_v53 = vpop.f32.mrb[203].mxu1  ;;  %v4631_v27 = vpop.xlane.xlu1 %4630  ;;  %4927 = vmax.xlane.f32.xlu0 %v4926_v21  ;;  %3449 = vmatmul.mubr.bf16.gmra.mrb[52].mxu0 %v9773_v40 }
 0x3f0   :  { %v3876_v38 = vmax.f32 %v3185_v57, 0.0  ;;  %v3540_v60 = vadd.f32 %v3539_v53, %v11414_v6  ;;  %v12123_v10 = vsel %vm5112_vm1, %v4439_v22, %v4631_v27  ;;  %3802 = vmatmul.mubr.bf16.gmra.mrb[52].mxu1 %v9773_v40  ;;  %3458 = vmatprep.mubr.bf16.mxu0 %v15545_v50 }
 0x3f1   :  { %v3878_v7 = vmax.f32 %v3538_v55, 0.0  ;;  %v3877_v11 = vmax.f32 %v3187_v32, 0.0  ;;  %v4442_v25 = vpop.xlane.xlu0 %4441  ;;  %4930 = vmax.xlane.f32.xlu1 %v4929_v5  ;;  %v4740_v0 = vmax.f32 %v3868_v47, %v3869_v1  ;;  %3811 = vmatprep.mubr.bf16.mxu1 %v15545_v50  ;;  %v4932_v21 = vmax.f32 %v3870_v16, %v3871_v59 }
 0x3f2   :  { %v3879_v48 = vmax.f32 %v3540_v60, 0.0  ;;  %v3190_v23 = vpop.f32.mrb[204].mxu0 }
 0x3f3   :  { %v4445_v51 = vpop.xlane.xlu1 %4444  ;;  %v3191_v57 = vadd.f32 %v3190_v23, %v11425_v62  ;;  %v3543_v6 = vpop.f32.mrb[204].mxu1  ;;  %4741 = vmax.xlane.f32.xlu0 %v4740_v0  ;;  %v4743_v22 = vmax.f32 %v3876_v38, %v3877_v11 }
 0x3f4   :  { %v3544_v53 = vadd.f32 %v3543_v6, %v11425_v62  ;;  %v3192_v27 = vpop.f32.mrb[205].mxu0  ;;  %v3545_v40 = vpop.f32.mrb[205].mxu1  ;;  %v4935_v55 = vmax.f32 %v3878_v7, %v3879_v48 }
 0x3f5   :  { %v3884_v32 = vmax.f32 %v3191_v57, 0.0  ;;  %v3193_v5 = vadd.f32 %v3192_v27, %v11425_v62  ;;  %v3546_v47 = vadd.f32 %v3545_v40, %v11425_v62  ;;  %v4634_v1 = vpop.xlane.xlu0 %4633  ;;  %v3194_v16 = vpop.f32.mrb[206].mxu0  ;;  %4744 = vmax.xlane.f32.xlu1 %v4743_v22  ;;  %v9774_v62 = vld [vmem:[%s15197_s5 + $0xf0] sm:$0xff]  }
 0x3f6   :  { %v3886_v59 = vmax.f32 %v3544_v53, 0.0  ;;  %v12132_v60 = vsel %vm5112_vm1, %v4442_v25, %v4634_v1  ;;  %v3195_v0 = vadd.f32 %v3194_v16, %v11423_v45  ;;  %v3547_v38 = vpop.f32.mrb[206].mxu1  ;;  %v3196_v11 = vpop.f32.mrb[207].mxu0 }
 0x3f7   :  { %v3885_v23 = vmax.f32 %v3193_v5, 0.0  ;;  %v3887_v6 = vmax.f32 %v3546_v47, 0.0  ;;  %v3548_v7 = vadd.f32 %v3547_v38, %v11423_v45  ;;  %v3197_v48 = vadd.f32 %v3196_v11, %v11423_v45  ;;  %v3549_v57 = vpop.f32.mrb[207].mxu1  ;;  %v4637_v27 = vpop.xlane.xlu1 %4636  ;;  %4933 = vmax.xlane.f32.xlu0 %v4932_v21  ;;  %3459 = vmatmul.mubr.bf16.gmra.mrb[56].mxu0 %v9774_v62 }
 0x3f8   :  { %v3892_v25 = vmax.f32 %v3195_v0, 0.0  ;;  %v3550_v22 = vadd.f32 %v3549_v57, %v11423_v45  ;;  %v12142_v53 = vsel %vm5112_vm1, %v4445_v51, %v4637_v27  ;;  %3812 = vmatmul.mubr.bf16.gmra.mrb[56].mxu1 %v9774_v62  ;;  %3468 = vmatprep.mubr.bf16.mxu0 %v15545_v50 }
 0x3f9   :  { %v3894_v40 = vmax.f32 %v3548_v7, 0.0  ;;  %v3893_v5 = vmax.f32 %v3197_v48, 0.0  ;;  %v4448_v47 = vpop.xlane.xlu0 %4447  ;;  %4936 = vmax.xlane.f32.xlu1 %v4935_v55  ;;  %v4746_v1 = vmax.f32 %v3884_v32, %v3885_v23  ;;  %3821 = vmatprep.mubr.bf16.mxu1 %v15545_v50  ;;  %v4938_v21 = vmax.f32 %v3886_v59, %v3887_v6 }
 0x3fa   :  { %v3895_v16 = vmax.f32 %v3550_v22, 0.0  ;;  %v3200_v38 = vpop.f32.mrb[208].mxu0 }
 0x3fb   :  { %v4451_v11 = vpop.xlane.xlu1 %4450  ;;  %v3201_v0 = vadd.f32 %v3200_v38, %v11434_v17  ;;  %v3553_v45 = vpop.f32.mrb[208].mxu1  ;;  %4747 = vmax.xlane.f32.xlu0 %v4746_v1  ;;  %v4749_v51 = vmax.f32 %v3892_v25, %v3893_v5 }
 0x3fc   :  { %v3554_v57 = vadd.f32 %v3553_v45, %v11434_v17  ;;  %v3202_v27 = vpop.f32.mrb[209].mxu0  ;;  %v3555_v62 = vpop.f32.mrb[209].mxu1  ;;  %v4941_v7 = vmax.f32 %v3894_v40, %v3895_v16 }
 0x3fd   :  { %v3900_v48 = vmax.f32 %v3201_v0, 0.0  ;;  %v3203_v55 = vadd.f32 %v3202_v27, %v11434_v17  ;;  %v3556_v32 = vadd.f32 %v3555_v62, %v11434_v17  ;;  %v4640_v23 = vpop.xlane.xlu0 %4639  ;;  %v3204_v59 = vpop.f32.mrb[210].mxu0  ;;  %4750 = vmax.xlane.f32.xlu1 %v4749_v51  ;;  %v9775_v17 = vld [vmem:[%s15197_s5 + $0xf8] sm:$0xff]  }
 0x3fe   :  { %v3902_v6 = vmax.f32 %v3554_v57, 0.0  ;;  %v12151_v22 = vsel %vm5112_vm1, %v4448_v47, %v4640_v23  ;;  %v3205_v1 = vadd.f32 %v3204_v59, %v11429_v29  ;;  %v3557_v25 = vpop.f32.mrb[210].mxu1  ;;  %v3206_v5 = vpop.f32.mrb[211].mxu0 }
 0x3ff   :  { %15614 = vst [vmem:[#allocation90_spill] sm:$0xff] %v12151_v22  ;;  %v3901_v38 = vmax.f32 %v3203_v55, 0.0  ;;  %v3903_v45 = vmax.f32 %v3556_v32, 0.0  ;;  %v3558_v40 = vadd.f32 %v3557_v25, %v11429_v29  ;;  %v3207_v16 = vadd.f32 %v3206_v5, %v11429_v29  ;;  %v3559_v0 = vpop.f32.mrb[211].mxu1  ;;  %v4643_v27 = vpop.xlane.xlu1 %4642  ;;  %4939 = vmax.xlane.f32.xlu0 %v4938_v21  ;;  %3469 = vmatmul.mubr.bf16.gmra.mrb[60].mxu0 %v9775_v17 }
 0x400   :  { %v3908_v47 = vmax.f32 %v3205_v1, 0.0  ;;  %v3560_v51 = vadd.f32 %v3559_v0, %v11429_v29  ;;  %v12161_v57 = vsel %vm5112_vm1, %v4451_v11, %v4643_v27  ;;  %3822 = vmatmul.mubr.bf16.gmra.mrb[60].mxu1 %v9775_v17 }
 0x401   :  { %15615 = vst [vmem:[#allocation91_spill] sm:$0xff] %v12161_v57  ;;  %v3910_v62 = vmax.f32 %v3558_v40, 0.0  ;;  %v3909_v55 = vmax.f32 %v3207_v16, 0.0  ;;  %v4454_v32 = vpop.xlane.xlu0 %4453  ;;  %4942 = vmax.xlane.f32.xlu1 %v4941_v7  ;;  %v4752_v23 = vmax.f32 %v3900_v48, %v3901_v38  ;;  %v4944_v59 = vmax.f32 %v3902_v6, %v3903_v45 }
 0x402   :  { %v3911_v25 = vmax.f32 %v3560_v51, 0.0  ;;  %v3210_v21 = vpop.f32.mrb[212].mxu0 }
 0x403   :  { %v4457_v5 = vpop.xlane.xlu1 %4456  ;;  %v3211_v50 = vadd.f32 %v3210_v21, %v11440_v14  ;;  %v3563_v22 = vpop.f32.mrb[212].mxu1  ;;  %4753 = vmax.xlane.f32.xlu0 %v4752_v23  ;;  %v4755_v1 = vmax.f32 %v3908_v47, %v3909_v55 }
 0x404   :  { %v3564_v29 = vadd.f32 %v3563_v22, %v11440_v14  ;;  %v3212_v0 = vpop.f32.mrb[213].mxu0  ;;  %v3565_v11 = vpop.f32.mrb[213].mxu1  ;;  %v4947_v27 = vmax.f32 %v3910_v62, %v3911_v25 }
 0x405   :  { %v3916_v17 = vmax.f32 %v3211_v50, 0.0  ;;  %v3213_v40 = vadd.f32 %v3212_v0, %v11440_v14  ;;  %v3566_v7 = vadd.f32 %v3565_v11, %v11440_v14  ;;  %v4646_v48 = vpop.xlane.xlu0 %4645  ;;  %v3214_v6 = vpop.f32.mrb[214].mxu0  ;;  %4756 = vmax.xlane.f32.xlu1 %v4755_v1 }
 0x406   :  { %v3918_v38 = vmax.f32 %v3564_v29, 0.0  ;;  %v12168_v45 = vsel %vm5112_vm1, %v4454_v32, %v4646_v48  ;;  %v3215_v16 = vadd.f32 %v3214_v6, %v11437_v19  ;;  %v3567_v47 = vpop.f32.mrb[214].mxu1  ;;  %v3216_v51 = vpop.f32.mrb[215].mxu0 }
 0x407   :  { %15616 = vst [vmem:[#allocation92_spill] sm:$0xff] %v12168_v45  ;;  %v3917_v22 = vmax.f32 %v3213_v40, 0.0  ;;  %v3919_v55 = vmax.f32 %v3566_v7, 0.0  ;;  %v3568_v62 = vadd.f32 %v3567_v47, %v11437_v19  ;;  %v3217_v50 = vadd.f32 %v3216_v51, %v11437_v19  ;;  %v3569_v23 = vpop.f32.mrb[215].mxu1  ;;  %v4649_v25 = vpop.xlane.xlu1 %4648  ;;  %4945 = vmax.xlane.f32.xlu0 %v4944_v59 }
 0x408   :  { %v3924_v14 = vmax.f32 %v3215_v16, 0.0  ;;  %v3570_v21 = vadd.f32 %v3569_v23, %v11437_v19  ;;  %v12175_v1 = vsel %vm5112_vm1, %v4457_v5, %v4649_v25 }
 0x409   :  { %15617 = vst [vmem:[#allocation93_spill] sm:$0xff] %v12175_v1  ;;  %v3926_v32 = vmax.f32 %v3568_v62, 0.0  ;;  %v3925_v29 = vmax.f32 %v3217_v50, 0.0  ;;  %v4460_v0 = vpop.xlane.xlu0 %4459  ;;  %4948 = vmax.xlane.f32.xlu1 %v4947_v27  ;;  %v4758_v11 = vmax.f32 %v3916_v17, %v3917_v22  ;;  %v4950_v40 = vmax.f32 %v3918_v38, %v3919_v55 }
 0x40a   :  { %v3927_v7 = vmax.f32 %v3570_v21, 0.0  ;;  %v3220_v48 = vpop.f32.mrb[216].mxu0 }
 0x40b   :  { %v4463_v6 = vpop.xlane.xlu1 %4462  ;;  %v3221_v47 = vadd.f32 %v3220_v48, %v11447_v56  ;;  %v3573_v51 = vpop.f32.mrb[216].mxu1  ;;  %4759 = vmax.xlane.f32.xlu0 %v4758_v11  ;;  %v4761_v59 = vmax.f32 %v3924_v14, %v3925_v29 }
 0x40c   :  { %v3574_v16 = vadd.f32 %v3573_v51, %v11447_v56  ;;  %v3222_v19 = vpop.f32.mrb[217].mxu0  ;;  %v3575_v23 = vpop.f32.mrb[217].mxu1  ;;  %v4953_v5 = vmax.f32 %v3926_v32, %v3927_v7 }
 0x40d   :  { %v3932_v25 = vmax.f32 %v3221_v47, 0.0  ;;  %v3223_v62 = vadd.f32 %v3222_v19, %v11447_v56  ;;  %v3576_v27 = vadd.f32 %v3575_v23, %v11447_v56  ;;  %v4652_v17 = vpop.xlane.xlu0 %4651  ;;  %v3224_v38 = vpop.f32.mrb[218].mxu0  ;;  %4762 = vmax.xlane.f32.xlu1 %v4761_v59 }
 0x40e   :  { %v3934_v22 = vmax.f32 %v3574_v16, 0.0  ;;  %v12182_v55 = vsel %vm5112_vm1, %v4460_v0, %v4652_v17  ;;  %v3225_v50 = vadd.f32 %v3224_v38, %v11445_v36  ;;  %v3577_v14 = vpop.f32.mrb[218].mxu1  ;;  %v3226_v21 = vpop.f32.mrb[219].mxu0 }
 0x40f   :  { %15618 = vst [vmem:[#allocation94_spill] sm:$0xff] %v12182_v55  ;;  %v3933_v29 = vmax.f32 %v3223_v62, 0.0  ;;  %v3935_v11 = vmax.f32 %v3576_v27, 0.0  ;;  %v3578_v32 = vadd.f32 %v3577_v14, %v11445_v36  ;;  %v3227_v7 = vadd.f32 %v3226_v21, %v11445_v36  ;;  %v3579_v48 = vpop.f32.mrb[219].mxu1  ;;  %v4655_v47 = vpop.xlane.xlu1 %4654  ;;  %4951 = vmax.xlane.f32.xlu0 %v4950_v40  ;;  %v15620_v14 = vld [vmem:[#allocation19_spill] sm:$0xff] }
 0x410   :  { %v3940_v56 = vmax.f32 %v3225_v50, 0.0  ;;  %v3580_v51 = vadd.f32 %v3579_v48, %v11445_v36  ;;  %v12189_v59 = vsel %vm5112_vm1, %v4463_v6, %v4655_v47 }
 0x411   :  { %15619 = vst [vmem:[#allocation95_spill] sm:$0xff] %v12189_v59  ;;  %v3942_v0 = vmax.f32 %v3578_v32, 0.0  ;;  %v3941_v16 = vmax.f32 %v3227_v7, 0.0  ;;  %v4466_v19 = vpop.xlane.xlu0 %4465  ;;  %4954 = vmax.xlane.f32.xlu1 %v4953_v5  ;;  %v4764_v23 = vmax.f32 %v3932_v25, %v3933_v29  ;;  %v4956_v62 = vmax.f32 %v3934_v22, %v3935_v11  ;;  %v15622_v7 = vld [vmem:[#allocation44_spill] sm:$0xff] }
 0x412   :  { %v3943_v27 = vmax.f32 %v3580_v51, 0.0  ;;  %v3230_v17 = vpop.f32.mrb[220].mxu0 }
 0x413   :  { %v4469_v38 = vpop.xlane.xlu1 %4468  ;;  %v3231_v21 = vadd.f32 %v3230_v17, %v15620_v14  ;;  %v3583_v55 = vpop.f32.mrb[220].mxu1  ;;  %4765 = vmax.xlane.f32.xlu0 %v4764_v23  ;;  %v4767_v40 = vmax.f32 %v3940_v56, %v3941_v16 }
 0x414   :  { %v3584_v50 = vadd.f32 %v3583_v55, %v15620_v14  ;;  %v3232_v36 = vpop.f32.mrb[221].mxu0  ;;  %v3585_v48 = vpop.f32.mrb[221].mxu1  ;;  %v4959_v6 = vmax.f32 %v3942_v0, %v3943_v27 }
 0x415   :  { %v3948_v47 = vmax.f32 %v3231_v21, 0.0  ;;  %v3233_v32 = vadd.f32 %v3232_v36, %v15620_v14  ;;  %v3586_v5 = vadd.f32 %v3585_v48, %v15620_v14  ;;  %v4658_v25 = vpop.xlane.xlu0 %4657  ;;  %v3234_v22 = vpop.f32.mrb[222].mxu0  ;;  %4768 = vmax.xlane.f32.xlu1 %v4767_v40 }
 0x416   :  { %v3950_v29 = vmax.f32 %v3584_v50, 0.0  ;;  %v12196_v11 = vsel %vm5112_vm1, %v4466_v19, %v4658_v25  ;;  %v3235_v51 = vadd.f32 %v3234_v22, %v15622_v7  ;;  %v3587_v56 = vpop.f32.mrb[222].mxu1  ;;  %v3236_v16 = vpop.f32.mrb[223].mxu0 }
 0x417   :  { %15621 = vst [vmem:[#allocation19_spill] sm:$0xff] %v12196_v11  ;;  %v3949_v55 = vmax.f32 %v3233_v32, 0.0  ;;  %v3951_v23 = vmax.f32 %v3586_v5, 0.0  ;;  %v3588_v0 = vadd.f32 %v3587_v56, %v15622_v7  ;;  %v3237_v27 = vadd.f32 %v3236_v16, %v15622_v7  ;;  %v3589_v17 = vpop.f32.mrb[223].mxu1  ;;  %v4661_v21 = vpop.xlane.xlu1 %4660  ;;  %4957 = vmax.xlane.f32.xlu0 %v4956_v62  ;;  %v15624_v11 = vld [vmem:[#allocation8_spill] sm:$0xff] }
 0x418   :  { %v3956_v14 = vmax.f32 %v3235_v51, 0.0  ;;  %v3590_v40 = vadd.f32 %v3589_v17, %v15622_v7  ;;  %v12203_v50 = vsel %vm5112_vm1, %v4469_v38, %v4661_v21 }
 0x419   :  { %15623 = vst [vmem:[#allocation44_spill] sm:$0xff] %v12203_v50  ;;  %v3958_v19 = vmax.f32 %v3588_v0, 0.0  ;;  %v3957_v36 = vmax.f32 %v3237_v27, 0.0  ;;  %v4472_v48 = vpop.xlane.xlu0 %4471  ;;  %4960 = vmax.xlane.f32.xlu1 %v4959_v6  ;;  %v4770_v25 = vmax.f32 %v3948_v47, %v3949_v55  ;;  %v4962_v32 = vmax.f32 %v3950_v29, %v3951_v23  ;;  %v15626_v27 = vld [vmem:[#allocation49_spill] sm:$0xff] }
 0x41a   :  { %v3959_v5 = vmax.f32 %v3590_v40, 0.0  ;;  %v3240_v22 = vpop.f32.mrb[224].mxu0 }
 0x41b   :  { %v4475_v56 = vpop.xlane.xlu1 %4474  ;;  %v3241_v16 = vadd.f32 %v3240_v22, %v15624_v11  ;;  %v3593_v59 = vpop.f32.mrb[224].mxu1  ;;  %4771 = vmax.xlane.f32.xlu0 %v4770_v25  ;;  %v4773_v62 = vmax.f32 %v3956_v14, %v3957_v36 }
 0x41c   :  { %v3594_v51 = vadd.f32 %v3593_v59, %v15624_v11  ;;  %v3242_v7 = vpop.f32.mrb[225].mxu0  ;;  %v3595_v17 = vpop.f32.mrb[225].mxu1  ;;  %v4965_v38 = vmax.f32 %v3958_v19, %v3959_v5 }
 0x41d   :  { %v3964_v21 = vmax.f32 %v3241_v16, 0.0  ;;  %v3243_v0 = vadd.f32 %v3242_v7, %v15624_v11  ;;  %v3596_v6 = vadd.f32 %v3595_v17, %v15624_v11  ;;  %v4664_v47 = vpop.xlane.xlu0 %4663  ;;  %v3244_v29 = vpop.f32.mrb[226].mxu0  ;;  %4774 = vmax.xlane.f32.xlu1 %v4773_v62 }
 0x41e   :  { %v3966_v55 = vmax.f32 %v3594_v51, 0.0  ;;  %v12210_v23 = vsel %vm5112_vm1, %v4472_v48, %v4664_v47  ;;  %v3245_v40 = vadd.f32 %v3244_v29, %v15626_v27  ;;  %v3597_v14 = vpop.f32.mrb[226].mxu1  ;;  %v3246_v36 = vpop.f32.mrb[227].mxu0 }
 0x41f   :  { %15625 = vst [vmem:[#allocation8_spill] sm:$0xff] %v12210_v23  ;;  %v3965_v59 = vmax.f32 %v3243_v0, 0.0  ;;  %v3967_v25 = vmax.f32 %v3596_v6, 0.0  ;;  %v3598_v19 = vadd.f32 %v3597_v14, %v15626_v27  ;;  %v3247_v5 = vadd.f32 %v3246_v36, %v15626_v27  ;;  %v3599_v22 = vpop.f32.mrb[227].mxu1  ;;  %v4667_v16 = vpop.xlane.xlu1 %4666  ;;  %4963 = vmax.xlane.f32.xlu0 %v4962_v32  ;;  %v15628_v23 = vld [vmem:[#allocation56_spill] sm:$0xff] }
 0x420   :  { %v3972_v11 = vmax.f32 %v3245_v40, 0.0  ;;  %v3600_v62 = vadd.f32 %v3599_v22, %v15626_v27  ;;  %v12217_v51 = vsel %vm5112_vm1, %v4475_v56, %v4667_v16 }
 0x421   :  { %15627 = vst [vmem:[#allocation49_spill] sm:$0xff] %v12217_v51  ;;  %v3974_v48 = vmax.f32 %v3598_v19, 0.0  ;;  %v3973_v7 = vmax.f32 %v3247_v5, 0.0  ;;  %v4478_v17 = vpop.xlane.xlu0 %4477  ;;  %4966 = vmax.xlane.f32.xlu1 %v4965_v38  ;;  %v4776_v47 = vmax.f32 %v3964_v21, %v3965_v59  ;;  %v4968_v0 = vmax.f32 %v3966_v55, %v3967_v25  ;;  %v15630_v5 = vld [vmem:[#allocation37_spill] sm:$0xff] }
 0x422   :  { %v3975_v6 = vmax.f32 %v3600_v62, 0.0  ;;  %v3250_v29 = vpop.f32.mrb[228].mxu0 }
 0x423   :  { %v4481_v14 = vpop.xlane.xlu1 %4480  ;;  %v3251_v36 = vadd.f32 %v3250_v29, %v15628_v23  ;;  %v3603_v50 = vpop.f32.mrb[228].mxu1  ;;  %4777 = vmax.xlane.f32.xlu0 %v4776_v47  ;;  %v4779_v32 = vmax.f32 %v3972_v11, %v3973_v7 }
 0x424   :  { %v3604_v40 = vadd.f32 %v3603_v50, %v15628_v23  ;;  %v3252_v27 = vpop.f32.mrb[229].mxu0  ;;  %v3605_v22 = vpop.f32.mrb[229].mxu1  ;;  %v4971_v56 = vmax.f32 %v3974_v48, %v3975_v6 }
 0x425   :  { %v3980_v16 = vmax.f32 %v3251_v36, 0.0  ;;  %v3253_v19 = vadd.f32 %v3252_v27, %v15628_v23  ;;  %v3606_v38 = vadd.f32 %v3605_v22, %v15628_v23  ;;  %v4670_v21 = vpop.xlane.xlu0 %4669  ;;  %v3254_v55 = vpop.f32.mrb[230].mxu0  ;;  %4780 = vmax.xlane.f32.xlu1 %v4779_v32 }
 0x426   :  { %v3982_v59 = vmax.f32 %v3604_v40, 0.0  ;;  %v12224_v25 = vsel %vm5112_vm1, %v4478_v17, %v4670_v21  ;;  %v3255_v62 = vadd.f32 %v3254_v55, %v15630_v5  ;;  %v3607_v11 = vpop.f32.mrb[230].mxu1  ;;  %v3256_v7 = vpop.f32.mrb[231].mxu0 }
 0x427   :  { %15629 = vst [vmem:[#allocation56_spill] sm:$0xff] %v12224_v25  ;;  %v3981_v50 = vmax.f32 %v3253_v19, 0.0  ;;  %v3983_v47 = vmax.f32 %v3606_v38, 0.0  ;;  %v3608_v48 = vadd.f32 %v3607_v11, %v15630_v5  ;;  %v3257_v6 = vadd.f32 %v3256_v7, %v15630_v5  ;;  %v3609_v29 = vpop.f32.mrb[231].mxu1  ;;  %v4673_v36 = vpop.xlane.xlu1 %4672  ;;  %4969 = vmax.xlane.f32.xlu0 %v4968_v0  ;;  %v15632_v25 = vld [vmem:[#allocation60_spill] sm:$0xff] }
 0x428   :  { %v3988_v23 = vmax.f32 %v3255_v62, 0.0  ;;  %v3610_v32 = vadd.f32 %v3609_v29, %v15630_v5  ;;  %v12231_v40 = vsel %vm5112_vm1, %v4481_v14, %v4673_v36 }
 0x429   :  { %15631 = vst [vmem:[#allocation37_spill] sm:$0xff] %v12231_v40  ;;  %v3990_v17 = vmax.f32 %v3608_v48, 0.0  ;;  %v3989_v27 = vmax.f32 %v3257_v6, 0.0  ;;  %v4484_v22 = vpop.xlane.xlu0 %4483  ;;  %4972 = vmax.xlane.f32.xlu1 %v4971_v56  ;;  %v4782_v21 = vmax.f32 %v3980_v16, %v3981_v50  ;;  %v4974_v19 = vmax.f32 %v3982_v59, %v3983_v47  ;;  %v15634_v6 = vld [vmem:[#allocation50_spill] sm:$0xff] }
 0x42a   :  { %v3991_v38 = vmax.f32 %v3610_v32, 0.0  ;;  %v3260_v55 = vpop.f32.mrb[232].mxu0 }
 0x42b   :  { %v4487_v11 = vpop.xlane.xlu1 %4486  ;;  %v3261_v7 = vadd.f32 %v3260_v55, %v15632_v25  ;;  %v3613_v51 = vpop.f32.mrb[232].mxu1  ;;  %4783 = vmax.xlane.f32.xlu0 %v4782_v21  ;;  %v4785_v0 = vmax.f32 %v3988_v23, %v3989_v27 }
 0x42c   :  { %v3614_v62 = vadd.f32 %v3613_v51, %v15632_v25  ;;  %v3262_v5 = vpop.f32.mrb[233].mxu0  ;;  %v3615_v29 = vpop.f32.mrb[233].mxu1  ;;  %v4977_v14 = vmax.f32 %v3990_v17, %v3991_v38 }
 0x42d   :  { %v3996_v36 = vmax.f32 %v3261_v7, 0.0  ;;  %v3263_v48 = vadd.f32 %v3262_v5, %v15632_v25  ;;  %v3616_v56 = vadd.f32 %v3615_v29, %v15632_v25  ;;  %v4676_v16 = vpop.xlane.xlu0 %4675  ;;  %v3264_v59 = vpop.f32.mrb[234].mxu0  ;;  %4786 = vmax.xlane.f32.xlu1 %v4785_v0 }
 0x42e   :  { %v3998_v50 = vmax.f32 %v3614_v62, 0.0  ;;  %v12238_v47 = vsel %vm5112_vm1, %v4484_v22, %v4676_v16  ;;  %v3265_v32 = vadd.f32 %v3264_v59, %v15634_v6  ;;  %v3617_v23 = vpop.f32.mrb[234].mxu1  ;;  %v3266_v27 = vpop.f32.mrb[235].mxu0 }
 0x42f   :  { %15633 = vst [vmem:[#allocation60_spill] sm:$0xff] %v12238_v47  ;;  %v3997_v51 = vmax.f32 %v3263_v48, 0.0  ;;  %v3999_v21 = vmax.f32 %v3616_v56, 0.0  ;;  %v3618_v17 = vadd.f32 %v3617_v23, %v15634_v6  ;;  %v3267_v38 = vadd.f32 %v3266_v27, %v15634_v6  ;;  %v3619_v55 = vpop.f32.mrb[235].mxu1  ;;  %v4679_v7 = vpop.xlane.xlu1 %4678  ;;  %4975 = vmax.xlane.f32.xlu0 %v4974_v19  ;;  %v15636_v47 = vld [vmem:[#allocation24_spill] sm:$0xff] }
 0x430   :  { %v4004_v25 = vmax.f32 %v3265_v32, 0.0  ;;  %v3620_v0 = vadd.f32 %v3619_v55, %v15634_v6  ;;  %v12245_v62 = vsel %vm5112_vm1, %v4487_v11, %v4679_v7 }
 0x431   :  { %15635 = vst [vmem:[#allocation50_spill] sm:$0xff] %v12245_v62  ;;  %v4006_v22 = vmax.f32 %v3618_v17, 0.0  ;;  %v4005_v5 = vmax.f32 %v3267_v38, 0.0  ;;  %v4490_v29 = vpop.xlane.xlu0 %4489  ;;  %4978 = vmax.xlane.f32.xlu1 %v4977_v14  ;;  %v4788_v16 = vmax.f32 %v3996_v36, %v3997_v51  ;;  %v4980_v48 = vmax.f32 %v3998_v50, %v3999_v21  ;;  %v15638_v38 = vld [vmem:[#allocation16_spill] sm:$0xff]  ;;  %v15640_v62 = vld [vmem:[#allocation38_spill] sm:$0xff] }
 0x432   :  { %v4007_v56 = vmax.f32 %v3620_v0, 0.0  ;;  %v3270_v59 = vpop.f32.mrb[236].mxu0 }
 0x433   :  { %v4493_v23 = vpop.xlane.xlu1 %4492  ;;  %v3271_v27 = vadd.f32 %v3270_v59, %v15636_v47  ;;  %v3623_v40 = vpop.f32.mrb[236].mxu1  ;;  %4789 = vmax.xlane.f32.xlu0 %v4788_v16  ;;  %v4791_v19 = vmax.f32 %v4004_v25, %v4005_v5 }
 0x434   :  { %v3624_v32 = vadd.f32 %v3623_v40, %v15636_v47  ;;  %v3272_v6 = vpop.f32.mrb[237].mxu0  ;;  %v3625_v55 = vpop.f32.mrb[237].mxu1  ;;  %v4983_v11 = vmax.f32 %v4006_v22, %v4007_v56 }
 0x435   :  { %v4012_v7 = vmax.f32 %v3271_v27, 0.0  ;;  %v3273_v17 = vadd.f32 %v3272_v6, %v15636_v47  ;;  %v3626_v14 = vadd.f32 %v3625_v55, %v15636_v47  ;;  %v4682_v36 = vpop.xlane.xlu0 %4681  ;;  %v3274_v50 = vpop.f32.mrb[238].mxu0  ;;  %4792 = vmax.xlane.f32.xlu1 %v4791_v19 }
 0x436   :  { %v4014_v51 = vmax.f32 %v3624_v32, 0.0  ;;  %v12252_v21 = vsel %vm5112_vm1, %v4490_v29, %v4682_v36  ;;  %v3275_v0 = vadd.f32 %v3274_v50, %v15638_v38  ;;  %v3627_v25 = vpop.f32.mrb[238].mxu1  ;;  %v3276_v5 = vpop.f32.mrb[239].mxu0 }
 0x437   :  { %15637 = vst [vmem:[#allocation24_spill] sm:$0xff] %v12252_v21  ;;  %v4013_v40 = vmax.f32 %v3273_v17, 0.0  ;;  %v4015_v16 = vmax.f32 %v3626_v14, 0.0  ;;  %v3628_v22 = vadd.f32 %v3627_v25, %v15638_v38  ;;  %v3277_v56 = vadd.f32 %v3276_v5, %v15638_v38  ;;  %v3629_v59 = vpop.f32.mrb[239].mxu1  ;;  %v4685_v27 = vpop.xlane.xlu1 %4684  ;;  %4981 = vmax.xlane.f32.xlu0 %v4980_v48 }
 0x438   :  { %v4020_v47 = vmax.f32 %v3275_v0, 0.0  ;;  %v3630_v19 = vadd.f32 %v3629_v59, %v15638_v38  ;;  %v12259_v32 = vsel %vm5112_vm1, %v4493_v23, %v4685_v27 }
 0x439   :  { %15639 = vst [vmem:[#allocation16_spill] sm:$0xff] %v12259_v32  ;;  %v4022_v29 = vmax.f32 %v3628_v22, 0.0  ;;  %v4021_v6 = vmax.f32 %v3277_v56, 0.0  ;;  %v4496_v55 = vpop.xlane.xlu0 %4495  ;;  %4984 = vmax.xlane.f32.xlu1 %v4983_v11  ;;  %v4794_v36 = vmax.f32 %v4012_v7, %v4013_v40  ;;  %v4986_v17 = vmax.f32 %v4014_v51, %v4015_v16  ;;  %v15642_v56 = vld [vmem:[#allocation9_spill] sm:$0xff] }
 0x43a   :  { %v4023_v14 = vmax.f32 %v3630_v19, 0.0  ;;  %v3280_v50 = vpop.f32.mrb[240].mxu0 }
 0x43b   :  { %v4499_v25 = vpop.xlane.xlu1 %4498  ;;  %v3281_v5 = vadd.f32 %v3280_v50, %v15640_v62  ;;  %v3633_v21 = vpop.f32.mrb[240].mxu1  ;;  %4795 = vmax.xlane.f32.xlu0 %v4794_v36  ;;  %v4797_v48 = vmax.f32 %v4020_v47, %v4021_v6 }
 0x43c   :  { %v3634_v0 = vadd.f32 %v3633_v21, %v15640_v62  ;;  %v3282_v38 = vpop.f32.mrb[241].mxu0  ;;  %v3635_v59 = vpop.f32.mrb[241].mxu1  ;;  %v4989_v23 = vmax.f32 %v4022_v29, %v4023_v14 }
 0x43d   :  { %v4028_v27 = vmax.f32 %v3281_v5, 0.0  ;;  %v3283_v22 = vadd.f32 %v3282_v38, %v15640_v62  ;;  %v3636_v11 = vadd.f32 %v3635_v59, %v15640_v62  ;;  %v4688_v7 = vpop.xlane.xlu0 %4687  ;;  %v3284_v51 = vpop.f32.mrb[242].mxu0  ;;  %4798 = vmax.xlane.f32.xlu1 %v4797_v48 }
 0x43e   :  { %v4030_v40 = vmax.f32 %v3634_v0, 0.0  ;;  %v12266_v16 = vsel %vm5112_vm1, %v4496_v55, %v4688_v7  ;;  %v3285_v19 = vadd.f32 %v3284_v51, %v15642_v56  ;;  %v3637_v47 = vpop.f32.mrb[242].mxu1  ;;  %v3286_v6 = vpop.f32.mrb[243].mxu0 }
 0x43f   :  { %15641 = vst [vmem:[#allocation38_spill] sm:$0xff] %v12266_v16  ;;  %v4029_v21 = vmax.f32 %v3283_v22, 0.0  ;;  %v4031_v36 = vmax.f32 %v3636_v11, 0.0  ;;  %v3638_v29 = vadd.f32 %v3637_v47, %v15642_v56  ;;  %v3287_v14 = vadd.f32 %v3286_v6, %v15642_v56  ;;  %v3639_v50 = vpop.f32.mrb[243].mxu1  ;;  %v4691_v5 = vpop.xlane.xlu1 %4690  ;;  %4987 = vmax.xlane.f32.xlu0 %v4986_v17  ;;  %v15644_v16 = vld [vmem:[#allocation39_spill] sm:$0xff] }
 0x440   :  { %v4036_v62 = vmax.f32 %v3285_v19, 0.0  ;;  %v3640_v48 = vadd.f32 %v3639_v50, %v15642_v56  ;;  %v12273_v0 = vsel %vm5112_vm1, %v4499_v25, %v4691_v5 }
 0x441   :  { %15643 = vst [vmem:[#allocation9_spill] sm:$0xff] %v12273_v0  ;;  %v4038_v55 = vmax.f32 %v3638_v29, 0.0  ;;  %v4037_v38 = vmax.f32 %v3287_v14, 0.0  ;;  %v4502_v59 = vpop.xlane.xlu0 %4501  ;;  %4990 = vmax.xlane.f32.xlu1 %v4989_v23  ;;  %v4800_v7 = vmax.f32 %v4028_v27, %v4029_v21  ;;  %v4992_v22 = vmax.f32 %v4030_v40, %v4031_v36  ;;  %v15646_v14 = vld [vmem:[#allocation10_spill] sm:$0xff] }
 0x442   :  { %v4039_v11 = vmax.f32 %v3640_v48, 0.0  ;;  %v3290_v51 = vpop.f32.mrb[244].mxu0 }
 0x443   :  { %v4505_v47 = vpop.xlane.xlu1 %4504  ;;  %v3291_v6 = vadd.f32 %v3290_v51, %v15644_v16  ;;  %v3643_v32 = vpop.f32.mrb[244].mxu1  ;;  %4801 = vmax.xlane.f32.xlu0 %v4800_v7  ;;  %v4803_v17 = vmax.f32 %v4036_v62, %v4037_v38 }
 0x444   :  { %v3644_v19 = vadd.f32 %v3643_v32, %v15644_v16  ;;  %v3292_v56 = vpop.f32.mrb[245].mxu0  ;;  %v3645_v50 = vpop.f32.mrb[245].mxu1  ;;  %v4995_v25 = vmax.f32 %v4038_v55, %v4039_v11 }
 0x445   :  { %v4044_v5 = vmax.f32 %v3291_v6, 0.0  ;;  %v3293_v29 = vadd.f32 %v3292_v56, %v15644_v16  ;;  %v3646_v23 = vadd.f32 %v3645_v50, %v15644_v16  ;;  %v4694_v27 = vpop.xlane.xlu0 %4693  ;;  %v3294_v40 = vpop.f32.mrb[246].mxu0  ;;  %4804 = vmax.xlane.f32.xlu1 %v4803_v17 }
 0x446   :  { %v4046_v21 = vmax.f32 %v3644_v19, 0.0  ;;  %v12280_v36 = vsel %vm5112_vm1, %v4502_v59, %v4694_v27  ;;  %v3295_v48 = vadd.f32 %v3294_v40, %v15646_v14  ;;  %v3647_v62 = vpop.f32.mrb[246].mxu1  ;;  %v3296_v38 = vpop.f32.mrb[247].mxu0 }
 0x447   :  { %15645 = vst [vmem:[#allocation39_spill] sm:$0xff] %v12280_v36  ;;  %v4045_v32 = vmax.f32 %v3293_v29, 0.0  ;;  %v4047_v7 = vmax.f32 %v3646_v23, 0.0  ;;  %v3648_v55 = vadd.f32 %v3647_v62, %v15646_v14  ;;  %v3297_v11 = vadd.f32 %v3296_v38, %v15646_v14  ;;  %v3649_v51 = vpop.f32.mrb[247].mxu1  ;;  %v4697_v6 = vpop.xlane.xlu1 %4696  ;;  %4993 = vmax.xlane.f32.xlu0 %v4992_v22  ;;  %v15648_v36 = vld [vmem:[#allocation40_spill] sm:$0xff] }
 0x448   :  { %v4052_v16 = vmax.f32 %v3295_v48, 0.0  ;;  %v3650_v17 = vadd.f32 %v3649_v51, %v15646_v14  ;;  %v12287_v19 = vsel %vm5112_vm1, %v4505_v47, %v4697_v6 }
 0x449   :  { %15647 = vst [vmem:[#allocation10_spill] sm:$0xff] %v12287_v19  ;;  %v4054_v59 = vmax.f32 %v3648_v55, 0.0  ;;  %v4053_v56 = vmax.f32 %v3297_v11, 0.0  ;;  %v4508_v50 = vpop.xlane.xlu0 %4507  ;;  %4996 = vmax.xlane.f32.xlu1 %v4995_v25  ;;  %v4806_v27 = vmax.f32 %v4044_v5, %v4045_v32  ;;  %v4998_v29 = vmax.f32 %v4046_v21, %v4047_v7  ;;  %v15650_v11 = vld [vmem:[#allocation11_spill] sm:$0xff] }
 0x44a   :  { %v4055_v23 = vmax.f32 %v3650_v17, 0.0  ;;  %v3300_v40 = vpop.f32.mrb[248].mxu0 }
 0x44b   :  { %v4511_v62 = vpop.xlane.xlu1 %4510  ;;  %v3301_v38 = vadd.f32 %v3300_v40, %v15648_v36  ;;  %v3653_v0 = vpop.f32.mrb[248].mxu1  ;;  %4807 = vmax.xlane.f32.xlu0 %v4806_v27  ;;  %v4809_v22 = vmax.f32 %v4052_v16, %v4053_v56 }
 0x44c   :  { %v3654_v48 = vadd.f32 %v3653_v0, %v15648_v36  ;;  %v3302_v14 = vpop.f32.mrb[249].mxu0  ;;  %v3655_v51 = vpop.f32.mrb[249].mxu1  ;;  %v5001_v47 = vmax.f32 %v4054_v59, %v4055_v23 }
 0x44d   :  { %v4060_v6 = vmax.f32 %v3301_v38, 0.0  ;;  %v3303_v55 = vadd.f32 %v3302_v14, %v15648_v36  ;;  %v3656_v25 = vadd.f32 %v3655_v51, %v15648_v36  ;;  %v4700_v5 = vpop.xlane.xlu0 %4699  ;;  %v3304_v21 = vpop.f32.mrb[250].mxu0  ;;  %4810 = vmax.xlane.f32.xlu1 %v4809_v22 }
 0x44e   :  { %v4062_v32 = vmax.f32 %v3654_v48, 0.0  ;;  %v12294_v7 = vsel %vm5112_vm1, %v4508_v50, %v4700_v5  ;;  %v3305_v17 = vadd.f32 %v3304_v21, %v15650_v11  ;;  %v3657_v16 = vpop.f32.mrb[250].mxu1  ;;  %v3306_v56 = vpop.f32.mrb[251].mxu0 }
 0x44f   :  { %15649 = vst [vmem:[#allocation40_spill] sm:$0xff] %v12294_v7  ;;  %v4061_v0 = vmax.f32 %v3303_v55, 0.0  ;;  %v4063_v27 = vmax.f32 %v3656_v25, 0.0  ;;  %v3658_v59 = vadd.f32 %v3657_v16, %v15650_v11  ;;  %v3307_v23 = vadd.f32 %v3306_v56, %v15650_v11  ;;  %v3659_v40 = vpop.f32.mrb[251].mxu1  ;;  %v4703_v38 = vpop.xlane.xlu1 %4702  ;;  %4999 = vmax.xlane.f32.xlu0 %v4998_v29  ;;  %v15652_v7 = vld [vmem:[#allocation45_spill] sm:$0xff] }
 0x450   :  { %v4068_v36 = vmax.f32 %v3305_v17, 0.0  ;;  %v3660_v22 = vadd.f32 %v3659_v40, %v15650_v11  ;;  %v12301_v48 = vsel %vm5112_vm1, %v4511_v62, %v4703_v38 }
 0x451   :  { %15651 = vst [vmem:[#allocation11_spill] sm:$0xff] %v12301_v48  ;;  %v4070_v50 = vmax.f32 %v3658_v59, 0.0  ;;  %v4069_v14 = vmax.f32 %v3307_v23, 0.0  ;;  %v4514_v51 = vpop.xlane.xlu0 %4513  ;;  %5002 = vmax.xlane.f32.xlu1 %v5001_v47  ;;  %v4812_v5 = vmax.f32 %v4060_v6, %v4061_v0  ;;  %v5004_v55 = vmax.f32 %v4062_v32, %v4063_v27  ;;  %v15654_v23 = vld [vmem:[#allocation12_spill] sm:$0xff] }
 0x452   :  { %v4071_v25 = vmax.f32 %v3660_v22, 0.0  ;;  %v3310_v21 = vpop.f32.mrb[252].mxu0 }
 0x453   :  { %v4517_v16 = vpop.xlane.xlu1 %4516  ;;  %v3311_v56 = vadd.f32 %v3310_v21, %v15652_v7  ;;  %v3663_v19 = vpop.f32.mrb[252].mxu1  ;;  %4813 = vmax.xlane.f32.xlu0 %v4812_v5  ;;  %v4815_v29 = vmax.f32 %v4068_v36, %v4069_v14 }
 0x454   :  { %v3664_v17 = vadd.f32 %v3663_v19, %v15652_v7  ;;  %v3312_v11 = vpop.f32.mrb[253].mxu0  ;;  %v3665_v40 = vpop.f32.mrb[253].mxu1  ;;  %v5007_v62 = vmax.f32 %v4070_v50, %v4071_v25 }
 0x455   :  { %v4076_v38 = vmax.f32 %v3311_v56, 0.0  ;;  %v3313_v59 = vadd.f32 %v3312_v11, %v15652_v7  ;;  %v3666_v47 = vadd.f32 %v3665_v40, %v15652_v7  ;;  %v4706_v6 = vpop.xlane.xlu0 %4705  ;;  %v3314_v32 = vpop.f32.mrb[254].mxu0  ;;  %4816 = vmax.xlane.f32.xlu1 %v4815_v29 }
 0x456   :  { %v4078_v0 = vmax.f32 %v3664_v17, 0.0  ;;  %v12308_v27 = vsel %vm5112_vm1, %v4514_v51, %v4706_v6  ;;  %v3315_v22 = vadd.f32 %v3314_v32, %v15654_v23  ;;  %v3667_v36 = vpop.f32.mrb[254].mxu1  ;;  %v3316_v14 = vpop.f32.mrb[255].mxu0 }
 0x457   :  { %15653 = vst [vmem:[#allocation45_spill] sm:$0xff] %v12308_v27  ;;  %v4077_v19 = vmax.f32 %v3313_v59, 0.0  ;;  %v4079_v5 = vmax.f32 %v3666_v47, 0.0  ;;  %v3668_v50 = vadd.f32 %v3667_v36, %v15654_v23  ;;  %v3317_v25 = vadd.f32 %v3316_v14, %v15654_v23  ;;  %v3669_v21 = vpop.f32.mrb[255].mxu1  ;;  %v4709_v56 = vpop.xlane.xlu1 %4708  ;;  %5005 = vmax.xlane.f32.xlu0 %v5004_v55  ;;  %v15656_v27 = vld [vmem:[#allocation57_spill] sm:$0xff] }
 0x458   :  { %v4084_v7 = vmax.f32 %v3315_v22, 0.0  ;;  %v3670_v29 = vadd.f32 %v3669_v21, %v15654_v23  ;;  %v12315_v17 = vsel %vm5112_vm1, %v4517_v16, %v4709_v56 }
 0x459   :  { %15655 = vst [vmem:[#allocation12_spill] sm:$0xff] %v12315_v17  ;;  %v4086_v51 = vmax.f32 %v3668_v50, 0.0  ;;  %v4085_v11 = vmax.f32 %v3317_v25, 0.0  ;;  %v4520_v40 = vpop.xlane.xlu0 %4519  ;;  %5008 = vmax.xlane.f32.xlu1 %v5007_v62  ;;  %v4818_v6 = vmax.f32 %v4076_v38, %v4077_v19  ;;  %v5010_v59 = vmax.f32 %v4078_v0, %v4079_v5  ;;  %v15658_v25 = vld [vmem:[#allocation55_spill] sm:$0xff] }
 0x45a   :  { %v4087_v47 = vmax.f32 %v3670_v29, 0.0  ;;  %v3320_v32 = vpop.f32.mrb[0].mxu0 }
 0x45b   :  { %v4523_v36 = vpop.xlane.xlu1 %4522  ;;  %v3321_v14 = vadd.f32 %v3320_v32, %v15656_v27  ;;  %v3673_v48 = vpop.f32.mrb[0].mxu1  ;;  %4819 = vmax.xlane.f32.xlu0 %v4818_v6  ;;  %v4821_v55 = vmax.f32 %v4084_v7, %v4085_v11 }
 0x45c   :  { %v3674_v22 = vadd.f32 %v3673_v48, %v15656_v27  ;;  %v3322_v23 = vpop.f32.mrb[1].mxu0  ;;  %v3675_v21 = vpop.f32.mrb[1].mxu1  ;;  %v5013_v16 = vmax.f32 %v4086_v51, %v4087_v47 }
 0x45d   :  { %v4092_v56 = vmax.f32 %v3321_v14, 0.0  ;;  %v3323_v50 = vadd.f32 %v3322_v23, %v15656_v27  ;;  %v3676_v62 = vadd.f32 %v3675_v21, %v15656_v27  ;;  %v4712_v38 = vpop.xlane.xlu0 %4711  ;;  %v3324_v0 = vpop.f32.mrb[2].mxu0  ;;  %4822 = vmax.xlane.f32.xlu1 %v4821_v55 }
 0x45e   :  { %v4094_v19 = vmax.f32 %v3674_v22, 0.0  ;;  %v12322_v5 = vsel %vm5112_vm1, %v4520_v40, %v4712_v38  ;;  %v3325_v29 = vadd.f32 %v3324_v0, %v15658_v25  ;;  %v3677_v7 = vpop.f32.mrb[2].mxu1  ;;  %v3326_v11 = vpop.f32.mrb[3].mxu0 }
 0x45f   :  { %15657 = vst [vmem:[#allocation57_spill] sm:$0xff] %v12322_v5  ;;  %v4093_v48 = vmax.f32 %v3323_v50, 0.0  ;;  %v4095_v6 = vmax.f32 %v3676_v62, 0.0  ;;  %v3678_v51 = vadd.f32 %v3677_v7, %v15658_v25  ;;  %v3327_v47 = vadd.f32 %v3326_v11, %v15658_v25  ;;  %v3679_v32 = vpop.f32.mrb[3].mxu1  ;;  %v4715_v14 = vpop.xlane.xlu1 %4714  ;;  %5011 = vmax.xlane.f32.xlu0 %v5010_v59  ;;  %v15660_v5 = vld [vmem:[#allocation47_spill] sm:$0xff] }
 0x460   :  { %v4100_v27 = vmax.f32 %v3325_v29, 0.0  ;;  %v3680_v55 = vadd.f32 %v3679_v32, %v15658_v25  ;;  %v12329_v22 = vsel %vm5112_vm1, %v4523_v36, %v4715_v14 }
 0x461   :  { %15659 = vst [vmem:[#allocation55_spill] sm:$0xff] %v12329_v22  ;;  %v4102_v40 = vmax.f32 %v3678_v51, 0.0  ;;  %v4101_v23 = vmax.f32 %v3327_v47, 0.0  ;;  %v4526_v21 = vpop.xlane.xlu0 %4525  ;;  %5014 = vmax.xlane.f32.xlu1 %v5013_v16  ;;  %v4824_v38 = vmax.f32 %v4092_v56, %v4093_v48  ;;  %v5016_v50 = vmax.f32 %v4094_v19, %v4095_v6  ;;  %v15662_v47 = vld [vmem:[#allocation46_spill] sm:$0xff] }
 0x462   :  { %v4103_v62 = vmax.f32 %v3680_v55, 0.0  ;;  %v3330_v0 = vpop.f32.mrb[4].mxu0 }
 0x463   :  { %v4529_v7 = vpop.xlane.xlu1 %4528  ;;  %v3331_v11 = vadd.f32 %v3330_v0, %v15660_v5  ;;  %v3683_v17 = vpop.f32.mrb[4].mxu1  ;;  %4825 = vmax.xlane.f32.xlu0 %v4824_v38  ;;  %v4827_v59 = vmax.f32 %v4100_v27, %v4101_v23 }
 0x464   :  { %v3684_v29 = vadd.f32 %v3683_v17, %v15660_v5  ;;  %v3332_v25 = vpop.f32.mrb[5].mxu0  ;;  %v3685_v32 = vpop.f32.mrb[5].mxu1  ;;  %v5019_v36 = vmax.f32 %v4102_v40, %v4103_v62 }
 0x465   :  { %v4108_v14 = vmax.f32 %v3331_v11, 0.0  ;;  %v3333_v51 = vadd.f32 %v3332_v25, %v15660_v5  ;;  %v3686_v16 = vadd.f32 %v3685_v32, %v15660_v5  ;;  %v4718_v56 = vpop.xlane.xlu0 %4717  ;;  %v3334_v19 = vpop.f32.mrb[6].mxu0  ;;  %4828 = vmax.xlane.f32.xlu1 %v4827_v59 }
 0x466   :  { %v4110_v48 = vmax.f32 %v3684_v29, 0.0  ;;  %v12336_v6 = vsel %vm5112_vm1, %v4526_v21, %v4718_v56  ;;  %v3335_v55 = vadd.f32 %v3334_v19, %v15662_v47  ;;  %v3687_v27 = vpop.f32.mrb[6].mxu1  ;;  %v3336_v23 = vpop.f32.mrb[7].mxu0 }
 0x467   :  { %15661 = vst [vmem:[#allocation47_spill] sm:$0xff] %v12336_v6  ;;  %v4109_v17 = vmax.f32 %v3333_v51, 0.0  ;;  %v4111_v38 = vmax.f32 %v3686_v16, 0.0  ;;  %v3688_v40 = vadd.f32 %v3687_v27, %v15662_v47  ;;  %v3337_v62 = vadd.f32 %v3336_v23, %v15662_v47  ;;  %v3689_v0 = vpop.f32.mrb[7].mxu1  ;;  %v4721_v11 = vpop.xlane.xlu1 %4720  ;;  %5017 = vmax.xlane.f32.xlu0 %v5016_v50  ;;  %v15664_v6 = vld [vmem:[#allocation63_spill] sm:$0xff] }
 0x468   :  { %v4116_v5 = vmax.f32 %v3335_v55, 0.0  ;;  %v3690_v59 = vadd.f32 %v3689_v0, %v15662_v47  ;;  %v12343_v29 = vsel %vm5112_vm1, %v4529_v7, %v4721_v11 }
 0x469   :  { %15663 = vst [vmem:[#allocation46_spill] sm:$0xff] %v12343_v29  ;;  %v4118_v21 = vmax.f32 %v3688_v40, 0.0  ;;  %v4117_v25 = vmax.f32 %v3337_v62, 0.0  ;;  %v4532_v32 = vpop.xlane.xlu0 %4531  ;;  %5020 = vmax.xlane.f32.xlu1 %v5019_v36  ;;  %v4830_v56 = vmax.f32 %v4108_v14, %v4109_v17  ;;  %v5022_v51 = vmax.f32 %v4110_v48, %v4111_v38  ;;  %v15666_v62 = vld [vmem:[#allocation48_spill] sm:$0xff]  ;;  %v15669_v29 = vld [vmem:[#allocation65_spill] sm:$0xff] }
 0x46a   :  { %v4119_v16 = vmax.f32 %v3690_v59, 0.0  ;;  %v3340_v19 = vpop.f32.mrb[8].mxu0 }
 0x46b   :  { %v4535_v27 = vpop.xlane.xlu1 %4534  ;;  %v3341_v23 = vadd.f32 %v3340_v19, %v15664_v6  ;;  %v3693_v22 = vpop.f32.mrb[8].mxu1  ;;  %4831 = vmax.xlane.f32.xlu0 %v4830_v56  ;;  %v4833_v50 = vmax.f32 %v4116_v5, %v4117_v25 }
 0x46c   :  { %v3694_v55 = vadd.f32 %v3693_v22, %v15664_v6  ;;  %v3342_v47 = vpop.f32.mrb[9].mxu0  ;;  %v3695_v0 = vpop.f32.mrb[9].mxu1  ;;  %v5025_v7 = vmax.f32 %v4118_v21, %v4119_v16 }
 0x46d   :  { %v4124_v11 = vmax.f32 %v3341_v23, 0.0  ;;  %v3343_v40 = vadd.f32 %v3342_v47, %v15664_v6  ;;  %v3696_v36 = vadd.f32 %v3695_v0, %v15664_v6  ;;  %v4724_v14 = vpop.xlane.xlu0 %4723  ;;  %v3344_v48 = vpop.f32.mrb[10].mxu0  ;;  %4834 = vmax.xlane.f32.xlu1 %v4833_v50 }
 0x46e   :  { %v4126_v17 = vmax.f32 %v3694_v55, 0.0  ;;  %v12350_v38 = vsel %vm5112_vm1, %v4532_v32, %v4724_v14  ;;  %v3345_v59 = vadd.f32 %v3344_v48, %v15666_v62  ;;  %v3697_v5 = vpop.f32.mrb[10].mxu1  ;;  %v3346_v25 = vpop.f32.mrb[11].mxu0  ;;  %v15668_v48 = vld [vmem:[#allocation83_spill] sm:$0xff] }
 0x46f   :  { %15665 = vst [vmem:[#allocation63_spill] sm:$0xff] %v12350_v38  ;;  %v4125_v22 = vmax.f32 %v3343_v40, 0.0  ;;  %v4127_v56 = vmax.f32 %v3696_v36, 0.0  ;;  %v3698_v21 = vadd.f32 %v3697_v5, %v15666_v62  ;;  %v3347_v16 = vadd.f32 %v3346_v25, %v15666_v62  ;;  %v3699_v19 = vpop.f32.mrb[11].mxu1  ;;  %v4727_v6 = vpop.xlane.xlu1 %4726  ;;  %5023 = vmax.xlane.f32.xlu0 %v5022_v51 }
 0x470   :  { %v4132_v23 = vmax.f32 %v3345_v59, 0.0  ;;  %v3700_v50 = vadd.f32 %v3699_v19, %v15666_v62  ;;  %v12357_v32 = vsel %vm5112_vm1, %v4535_v27, %v4727_v6  ;;  %v15670_v27 = vld [vmem:[#allocation84_spill] sm:$0xff] }
 0x471   :  { %15667 = vst [vmem:[#allocation48_spill] sm:$0xff] %v12357_v32  ;;  %v4134_v55 = vmax.f32 %v3698_v21, 0.0  ;;  %v4133_v47 = vmax.f32 %v3347_v16, 0.0  ;;  %v4730_v0 = vpop.xlane.xlu0 %4729  ;;  %5026 = vmax.xlane.f32.xlu1 %v5025_v7  ;;  %v4836_v14 = vmax.f32 %v4124_v11, %v4125_v22  ;;  %v5028_v40 = vmax.f32 %v4126_v17, %v4127_v56 }
 0x472   :  { %v4135_v36 = vmax.f32 %v3700_v50, 0.0  ;;  %v5178_v5 = vsel %vm5177_vm2, %v15668_v48, %v4730_v0  ;;  %v3350_v25 = vpop.f32.mrb[12].mxu0 }
 0x473   :  { %v4733_v38 = vpop.xlane.xlu1 %4732  ;;  %v3351_v51 = vadd.f32 %v3350_v25, %v15669_v29  ;;  %v3703_v59 = vpop.f32.mrb[12].mxu1  ;;  %4837 = vmax.xlane.f32.xlu0 %v4836_v14  ;;  %v4839_v62 = vmax.f32 %v4132_v23, %v4133_v47  ;;  %v15671_v23 = vld [vmem:[#allocation64_spill] sm:$0xff] }
 0x474   :  { %v5179_v21 = vsel %vm5177_vm2, %v15670_v27, %v4733_v38  ;;  %v3704_v16 = vadd.f32 %v3703_v59, %v15669_v29  ;;  %v3352_v7 = vpop.f32.mrb[13].mxu0  ;;  %v3705_v11 = vpop.f32.mrb[13].mxu1  ;;  %v5031_v17 = vmax.f32 %v4134_v55, %v4135_v36 }
 0x475   :  { %v4140_v22 = vmax.f32 %v3351_v51, 0.0  ;;  %v3353_v56 = vadd.f32 %v3352_v7, %v15669_v29  ;;  %v3706_v19 = vadd.f32 %v3705_v11, %v15669_v29  ;;  %v4922_v6 = vpop.xlane.xlu0 %4921  ;;  %v3354_v50 = vpop.f32.mrb[14].mxu0  ;;  %4840 = vmax.xlane.f32.xlu1 %v4839_v62  ;;  %v9622_v29 = vld [vmem:[%s15199_s7 + $0x4] ss:$16 sps:$4 sm:$0xff]  }
 0x476   :  { %v4142_v0 = vmax.f32 %v3704_v16, 0.0  ;;  %v12368_v14 = vsel %vm5242_vm3, %v5178_v5, %v4922_v6  ;;  %v3355_v47 = vadd.f32 %v3354_v50, %v15671_v23  ;;  %v3707_v38 = vpop.f32.mrb[14].mxu1  ;;  %v3356_v48 = vpop.f32.mrb[15].mxu0  ;;  %5851 = vmatprep.mubr.bf16.mxu0 %v9622_v29 }
 0x477   :  { %v4141_v25 = vmax.f32 %v3353_v56, 0.0  ;;  %v4143_v59 = vmax.f32 %v3706_v19, 0.0  ;;  %v3708_v55 = vadd.f32 %v3707_v38, %v15671_v23  ;;  %v3357_v36 = vadd.f32 %v3356_v48, %v15671_v23  ;;  %v3709_v51 = vpop.f32.mrb[15].mxu1  ;;  %v4925_v27 = vpop.xlane.xlu1 %4924  ;;  %5029 = vmax.xlane.f32.xlu0 %v5028_v40  ;;  %v15680_v56 = vld [vmem:[#allocation75_spill] sm:$0xff] }
 0x478   :  { %v4148_v62 = vmax.f32 %v3355_v47, 0.0  ;;  %v3710_v5 = vadd.f32 %v3709_v51, %v15671_v23  ;;  %v12378_v16 = vsel %vm5242_vm3, %v5179_v21, %v4925_v27 }
 0x479   :  { %v4150_v7 = vmax.f32 %v3708_v55, 0.0  ;;  %v4149_v11 = vmax.f32 %v3357_v36, 0.0  ;;  %v4736_v19 = vpop.xlane.xlu0 %4735  ;;  %5032 = vmax.xlane.f32.xlu1 %v5031_v17  ;;  %v4842_v6 = vmax.f32 %v4140_v22, %v4141_v25  ;;  %v5034_v47 = vmax.f32 %v4142_v0, %v4143_v59 }
 0x47a   :  { %v4151_v40 = vmax.f32 %v3710_v5, 0.0  ;;  %v5180_v50 = vsel %vm5177_vm2, %v11848_v42, %v4736_v19  ;;  %v3360_v38 = vpop.f32.mrb[16].mxu0 }
 0x47b   :  { %v4739_v48 = vpop.xlane.xlu1 %4738  ;;  %v3361_v23 = vadd.f32 %v3360_v38, %v11621_v12  ;;  %v3713_v21 = vpop.f32.mrb[16].mxu1  ;;  %4843 = vmax.xlane.f32.xlu0 %v4842_v6  ;;  %v4845_v55 = vmax.f32 %v4148_v62, %v4149_v11 }
 0x47c   :  { %v5181_v36 = vsel %vm5177_vm2, %v11857_v30, %v4739_v48  ;;  %v3714_v51 = vadd.f32 %v3713_v21, %v11621_v12  ;;  %v3362_v17 = vpop.f32.mrb[17].mxu0  ;;  %v3715_v22 = vpop.f32.mrb[17].mxu1  ;;  %v5037_v25 = vmax.f32 %v4150_v7, %v4151_v40 }
 0x47d   :  { %v4156_v27 = vmax.f32 %v3361_v23, 0.0  ;;  %v3363_v29 = vadd.f32 %v3362_v17, %v11621_v12  ;;  %v3716_v42 = vadd.f32 %v3715_v22, %v11621_v12  ;;  %v4928_v0 = vpop.xlane.xlu0 %4927  ;;  %v3364_v59 = vpop.f32.mrb[18].mxu0  ;;  %4846 = vmax.xlane.f32.xlu1 %v4845_v55 }
 0x47e   :  { %v4158_v5 = vmax.f32 %v3714_v51, 0.0  ;;  %v12391_v19 = vsel %vm5242_vm3, %v5180_v50, %v4928_v0  ;;  %v3365_v62 = vadd.f32 %v3364_v59, %v11617_v2  ;;  %v3717_v30 = vpop.f32.mrb[18].mxu1  ;;  %v3366_v11 = vpop.f32.mrb[19].mxu0 }
 0x47f   :  { %v4157_v6 = vmax.f32 %v3363_v29, 0.0  ;;  %v4159_v38 = vmax.f32 %v3716_v42, 0.0  ;;  %v3718_v7 = vadd.f32 %v3717_v30, %v11617_v2  ;;  %v3367_v40 = vadd.f32 %v3366_v11, %v11617_v2  ;;  %v3719_v48 = vpop.f32.mrb[19].mxu1  ;;  %v4931_v23 = vpop.xlane.xlu1 %4930  ;;  %5035 = vmax.xlane.f32.xlu0 %v5034_v47  ;;  %v15672_v30 = vld [vmem:[#allocation67_spill] sm:$0xff] }
 0x480   :  { %v4164_v12 = vmax.f32 %v3365_v62, 0.0  ;;  %v3720_v21 = vadd.f32 %v3719_v48, %v11617_v2  ;;  %v12398_v55 = vsel %vm5242_vm3, %v5181_v36, %v4931_v23 }
 0x481   :  { %v4166_v50 = vmax.f32 %v3718_v7, 0.0  ;;  %v4165_v51 = vmax.f32 %v3367_v40, 0.0  ;;  %v4742_v22 = vpop.xlane.xlu0 %4741  ;;  %5038 = vmax.xlane.f32.xlu1 %v5037_v25  ;;  %v4848_v29 = vmax.f32 %v4156_v27, %v4157_v6  ;;  %v5040_v47 = vmax.f32 %v4158_v5, %v4159_v38 }
 0x482   :  { %v4167_v42 = vmax.f32 %v3720_v21, 0.0  ;;  %v5182_v0 = vsel %vm5177_vm2, %v11866_v61, %v4742_v22  ;;  %v3370_v59 = vpop.f32.mrb[20].mxu0 }
 0x483   :  { %v4745_v62 = vpop.xlane.xlu1 %4744  ;;  %v3371_v2 = vadd.f32 %v3370_v59, %v15672_v30  ;;  %v3723_v11 = vpop.f32.mrb[20].mxu1  ;;  %4849 = vmax.xlane.f32.xlu0 %v4848_v29  ;;  %v4851_v36 = vmax.f32 %v4164_v12, %v4165_v51  ;;  %v15673_v12 = vld [vmem:[#allocation66_spill] sm:$0xff] }
 0x484   :  { %v5183_v7 = vsel %vm5177_vm2, %v11876_v43, %v4745_v62  ;;  %v3724_v40 = vadd.f32 %v3723_v11, %v15672_v30  ;;  %v3372_v48 = vpop.f32.mrb[21].mxu0  ;;  %v3725_v25 = vpop.f32.mrb[21].mxu1  ;;  %v5043_v27 = vmax.f32 %v4166_v50, %v4167_v42 }
 0x485   :  { %v4172_v6 = vmax.f32 %v3371_v2, 0.0  ;;  %v3373_v23 = vadd.f32 %v3372_v48, %v15672_v30  ;;  %v3726_v61 = vadd.f32 %v3725_v25, %v15672_v30  ;;  %v4934_v5 = vpop.xlane.xlu0 %4933  ;;  %v3374_v38 = vpop.f32.mrb[22].mxu0  ;;  %4852 = vmax.xlane.f32.xlu1 %v4851_v36  ;;  %v15676_v25 = vld [vmem:[#allocation71_spill] sm:$0xff] }
 0x486   :  { %v4174_v21 = vmax.f32 %v3724_v40, 0.0  ;;  %v12411_v22 = vsel %vm5242_vm3, %v5182_v0, %v4934_v5  ;;  %v3375_v51 = vadd.f32 %v3374_v38, %v15673_v12  ;;  %v3727_v43 = vpop.f32.mrb[22].mxu1  ;;  %v3376_v29 = vpop.f32.mrb[23].mxu0 }
 0x487   :  { %v4173_v59 = vmax.f32 %v3373_v23, 0.0  ;;  %v4175_v62 = vmax.f32 %v3726_v61, 0.0  ;;  %v3728_v50 = vadd.f32 %v3727_v43, %v15673_v12  ;;  %v3377_v42 = vadd.f32 %v3376_v29, %v15673_v12  ;;  %v3729_v2 = vpop.f32.mrb[23].mxu1  ;;  %v4937_v11 = vpop.xlane.xlu1 %4936  ;;  %5041 = vmax.xlane.f32.xlu0 %v5040_v47  ;;  %v15674_v29 = vld [vmem:[#allocation69_spill] sm:$0xff] }
 0x488   :  { %v4180_v30 = vmax.f32 %v3375_v51, 0.0  ;;  %v3730_v36 = vadd.f32 %v3729_v2, %v15673_v12  ;;  %v12418_v40 = vsel %vm5242_vm3, %v5183_v7, %v4937_v11 }
 0x489   :  { %v4182_v0 = vmax.f32 %v3728_v50, 0.0  ;;  %v4181_v48 = vmax.f32 %v3377_v42, 0.0  ;;  %v4748_v23 = vpop.xlane.xlu0 %4747  ;;  %5044 = vmax.xlane.f32.xlu1 %v5043_v27  ;;  %v4854_v61 = vmax.f32 %v4172_v6, %v4173_v59  ;;  %v5046_v47 = vmax.f32 %v4174_v21, %v4175_v62 }
 0x48a   :  { %v4183_v5 = vmax.f32 %v3730_v36, 0.0  ;;  %v5184_v38 = vsel %vm5177_vm2, %v11885_v37, %v4748_v23  ;;  %v3380_v43 = vpop.f32.mrb[24].mxu0 }
 0x48b   :  { %v4751_v51 = vpop.xlane.xlu1 %4750  ;;  %v3381_v12 = vadd.f32 %v3380_v43, %v15674_v29  ;;  %v3733_v2 = vpop.f32.mrb[24].mxu1  ;;  %4855 = vmax.xlane.f32.xlu0 %v4854_v61  ;;  %v4857_v7 = vmax.f32 %v4180_v30, %v4181_v48  ;;  %v15675_v30 = vld [vmem:[#allocation68_spill] sm:$0xff] }
 0x48c   :  { %v5185_v50 = vsel %vm5177_vm2, %v11895_v63, %v4751_v51  ;;  %v3734_v42 = vadd.f32 %v3733_v2, %v15674_v29  ;;  %v3382_v11 = vpop.f32.mrb[25].mxu0  ;;  %v3735_v27 = vpop.f32.mrb[25].mxu1  ;;  %v5049_v6 = vmax.f32 %v4182_v0, %v4183_v5 }
 0x48d   :  { %v4188_v59 = vmax.f32 %v3381_v12, 0.0  ;;  %v3383_v36 = vadd.f32 %v3382_v11, %v15674_v29  ;;  %v3736_v37 = vadd.f32 %v3735_v27, %v15674_v29  ;;  %v4940_v21 = vpop.xlane.xlu0 %4939  ;;  %v3384_v62 = vpop.f32.mrb[26].mxu0  ;;  %4858 = vmax.xlane.f32.xlu1 %v4857_v7 }
 0x48e   :  { %v4190_v23 = vmax.f32 %v3734_v42, 0.0  ;;  %v12431_v61 = vsel %vm5242_vm3, %v5184_v38, %v4940_v21  ;;  %v3385_v48 = vadd.f32 %v3384_v62, %v15675_v30  ;;  %v3737_v63 = vpop.f32.mrb[26].mxu1  ;;  %v3386_v43 = vpop.f32.mrb[27].mxu0 }
 0x48f   :  { %v4189_v51 = vmax.f32 %v3383_v36, 0.0  ;;  %v4191_v2 = vmax.f32 %v3736_v37, 0.0  ;;  %v3738_v0 = vadd.f32 %v3737_v63, %v15675_v30  ;;  %v3387_v5 = vadd.f32 %v3386_v43, %v15675_v30  ;;  %v3739_v12 = vpop.f32.mrb[27].mxu1  ;;  %v4943_v11 = vpop.xlane.xlu1 %4942  ;;  %5047 = vmax.xlane.f32.xlu0 %v5046_v47 }
 0x490   :  { %v4196_v29 = vmax.f32 %v3385_v48, 0.0  ;;  %v3740_v7 = vadd.f32 %v3739_v12, %v15675_v30  ;;  %v12438_v42 = vsel %vm5242_vm3, %v5185_v50, %v4943_v11 }
 0x491   :  { %v4198_v38 = vmax.f32 %v3738_v0, 0.0  ;;  %v4197_v27 = vmax.f32 %v3387_v5, 0.0  ;;  %v4754_v36 = vpop.xlane.xlu0 %4753  ;;  %5050 = vmax.xlane.f32.xlu1 %v5049_v6  ;;  %v4860_v37 = vmax.f32 %v4188_v59, %v4189_v51  ;;  %v5052_v47 = vmax.f32 %v4190_v23, %v4191_v2 }
 0x492   :  { %v4199_v62 = vmax.f32 %v3740_v7, 0.0  ;;  %v5186_v63 = vsel %vm5177_vm2, %v11904_v49, %v4754_v36  ;;  %v3390_v43 = vpop.f32.mrb[28].mxu0 }
 0x493   :  { %v4757_v48 = vpop.xlane.xlu1 %4756  ;;  %v3391_v30 = vadd.f32 %v3390_v43, %v15676_v25  ;;  %v3743_v12 = vpop.f32.mrb[28].mxu1  ;;  %4861 = vmax.xlane.f32.xlu0 %v4860_v37  ;;  %v4863_v50 = vmax.f32 %v4196_v29, %v4197_v27  ;;  %v15677_v29 = vld [vmem:[#allocation70_spill] sm:$0xff] }
 0x494   :  { %v5187_v0 = vsel %vm5177_vm2, %v11914_v4, %v4757_v48  ;;  %v3744_v5 = vadd.f32 %v3743_v12, %v15676_v25  ;;  %v3392_v11 = vpop.f32.mrb[29].mxu0  ;;  %v3745_v6 = vpop.f32.mrb[29].mxu1  ;;  %v5055_v59 = vmax.f32 %v4198_v38, %v4199_v62 }
 0x495   :  { %v4204_v51 = vmax.f32 %v3391_v30, 0.0  ;;  %v3393_v7 = vadd.f32 %v3392_v11, %v15676_v25  ;;  %v3746_v49 = vadd.f32 %v3745_v6, %v15676_v25  ;;  %v4946_v23 = vpop.xlane.xlu0 %4945  ;;  %v3394_v2 = vpop.f32.mrb[30].mxu0  ;;  %4864 = vmax.xlane.f32.xlu1 %v4863_v50 }
 0x496   :  { %v4206_v36 = vmax.f32 %v3744_v5, 0.0  ;;  %v12451_v37 = vsel %vm5242_vm3, %v5186_v63, %v4946_v23  ;;  %v3395_v27 = vadd.f32 %v3394_v2, %v15677_v29  ;;  %v3747_v4 = vpop.f32.mrb[30].mxu1  ;;  %v3396_v43 = vpop.f32.mrb[31].mxu0 }
 0x497   :  { %v4205_v48 = vmax.f32 %v3393_v7, 0.0  ;;  %v4207_v12 = vmax.f32 %v3746_v49, 0.0  ;;  %v3748_v38 = vadd.f32 %v3747_v4, %v15677_v29  ;;  %v3397_v62 = vadd.f32 %v3396_v43, %v15677_v29  ;;  %v3749_v30 = vpop.f32.mrb[31].mxu1  ;;  %v4949_v11 = vpop.xlane.xlu1 %4948  ;;  %5053 = vmax.xlane.f32.xlu0 %v5052_v47 }
 0x498   :  { %v4212_v25 = vmax.f32 %v3395_v27, 0.0  ;;  %v3750_v50 = vadd.f32 %v3749_v30, %v15677_v29  ;;  %v12458_v5 = vsel %vm5242_vm3, %v5187_v0, %v4949_v11  ;;  %v15678_v29 = vld [vmem:[#allocation73_spill] sm:$0xff] }
 0x499   :  { %v4214_v63 = vmax.f32 %v3748_v38, 0.0  ;;  %v4213_v6 = vmax.f32 %v3397_v62, 0.0  ;;  %v4760_v7 = vpop.xlane.xlu0 %4759  ;;  %5056 = vmax.xlane.f32.xlu1 %v5055_v59  ;;  %v4866_v49 = vmax.f32 %v4204_v51, %v4205_v48  ;;  %v12464_v47 = vmax.f32 %v4206_v36, %v4207_v12 }
 0x49a   :  { %v4215_v2 = vmax.f32 %v3750_v50, 0.0  ;;  %v5188_v4 = vsel %vm5177_vm2, %v11923_v18, %v4760_v7  ;;  %v3400_v43 = vpop.f32.mrb[32].mxu0 }
 0x49b   :  { %v4763_v27 = vpop.xlane.xlu1 %4762  ;;  %v3401_v30 = vadd.f32 %v3400_v43, %v15678_v29  ;;  %v3753_v0 = vpop.f32.mrb[32].mxu1  ;;  %4867 = vmax.xlane.f32.xlu0 %v4866_v49  ;;  %v4869_v38 = vmax.f32 %v4212_v25, %v4213_v6  ;;  %v15679_v6 = vld [vmem:[#allocation72_spill] sm:$0xff] }
 0x49c   :  { %v5189_v62 = vsel %vm5177_vm2, %v11933_v35, %v4763_v27  ;;  %v3754_v11 = vadd.f32 %v3753_v0, %v15678_v29  ;;  %v3402_v59 = vpop.f32.mrb[33].mxu0  ;;  %v3755_v51 = vpop.f32.mrb[33].mxu1  ;;  %v12470_v48 = vmax.f32 %v4214_v63, %v4215_v2 }
 0x49d   :  { %v4220_v50 = vmax.f32 %v3401_v30, 0.0  ;;  %v3403_v18 = vadd.f32 %v3402_v59, %v15678_v29  ;;  %v3756_v36 = vadd.f32 %v3755_v51, %v15678_v29  ;;  %v4952_v12 = vpop.xlane.xlu0 %4951  ;;  %v3404_v7 = vpop.f32.mrb[34].mxu0  ;;  %4870 = vmax.xlane.f32.xlu1 %v4869_v38 }
 0x49e   :  { %v4222_v43 = vmax.f32 %v3754_v11, 0.0  ;;  %v12475_v25 = vsel %vm5242_vm3, %v5188_v4, %v4952_v12  ;;  %v3405_v35 = vadd.f32 %v3404_v7, %v15679_v6  ;;  %v3757_v49 = vpop.f32.mrb[34].mxu1  ;;  %v3406_v27 = vpop.f32.mrb[35].mxu0 }
 0x49f   :  { %v4221_v0 = vmax.f32 %v3403_v18, 0.0  ;;  %v4223_v23 = vmax.f32 %v3756_v36, 0.0  ;;  %v3758_v63 = vadd.f32 %v3757_v49, %v15679_v6  ;;  %v3407_v2 = vadd.f32 %v3406_v27, %v15679_v6  ;;  %v3759_v30 = vpop.f32.mrb[35].mxu1  ;;  %v4955_v59 = vpop.xlane.xlu1 %4954 }
 0x4a0   :  { %v4228_v29 = vmax.f32 %v3405_v35, 0.0  ;;  %v3760_v51 = vadd.f32 %v3759_v30, %v15679_v6  ;;  %v12482_v38 = vsel %vm5242_vm3, %v5189_v62, %v4955_v59 }
 0x4a1   :  { %v4872_v4 = vmax.f32 %v4220_v50, %v4221_v0  ;;  %v5064_v11 = vmax.f32 %v4222_v43, %v4223_v23  ;;  %v4230_v12 = vmax.f32 %v3758_v63, 0.0  ;;  %v4229_v7 = vmax.f32 %v3407_v2, 0.0  ;;  %v4766_v21 = vpop.xlane.xlu0 %4765 }
 0x4a2   :  { %v4231_v17 = vmax.f32 %v3760_v51, 0.0  ;;  %v5190_v36 = vsel %vm5177_vm2, %v11942_v20, %v4766_v21  ;;  %v3410_v49 = vpop.f32.mrb[36].mxu0 }
 0x4a3   :  { %v4875_v27 = vmax.f32 %v4228_v29, %v4229_v7  ;;  %v4769_v35 = vpop.xlane.xlu1 %4768  ;;  %v3411_v6 = vadd.f32 %v3410_v49, %v15680_v56  ;;  %v3763_v30 = vpop.f32.mrb[36].mxu1  ;;  %4873 = vmax.xlane.f32.xlu0 %v4872_v4 }
 0x4a4   :  { %v5067_v62 = vmax.f32 %v4230_v12, %v4231_v17  ;;  %v5191_v23 = vsel %vm5177_vm2, %v11952_v24, %v4769_v35  ;;  %v3764_v50 = vadd.f32 %v3763_v30, %v15680_v56  ;;  %v3412_v43 = vpop.f32.mrb[37].mxu0  ;;  %v3765_v0 = vpop.f32.mrb[37].mxu1  ;;  %v15681_v17 = vld [vmem:[#allocation74_spill] sm:$0xff] }
 0x4a5   :  { %v4236_v63 = vmax.f32 %v3411_v6, 0.0  ;;  %v3413_v2 = vadd.f32 %v3412_v43, %v15680_v56  ;;  %v3766_v20 = vadd.f32 %v3765_v0, %v15680_v56  ;;  %v4958_v21 = vpop.xlane.xlu0 %4957  ;;  %v3414_v59 = vpop.f32.mrb[38].mxu0  ;;  %4876 = vmax.xlane.f32.xlu1 %v4875_v27 }
 0x4a6   :  { %v4238_v29 = vmax.f32 %v3764_v50, 0.0  ;;  %v12495_v51 = vsel %vm5242_vm3, %v5190_v36, %v4958_v21  ;;  %v3415_v4 = vadd.f32 %v3414_v59, %v15681_v17  ;;  %v3767_v12 = vpop.f32.mrb[38].mxu1  ;;  %v3416_v24 = vpop.f32.mrb[39].mxu0 }
 0x4a7   :  { %v4237_v7 = vmax.f32 %v3413_v2, 0.0  ;;  %v4239_v49 = vmax.f32 %v3766_v20, 0.0  ;;  %v3768_v35 = vadd.f32 %v3767_v12, %v15681_v17  ;;  %v3417_v6 = vadd.f32 %v3416_v24, %v15681_v17  ;;  %v3769_v30 = vpop.f32.mrb[39].mxu1  ;;  %v4961_v43 = vpop.xlane.xlu1 %4960  ;;  %5065 = vmax.xlane.f32.xlu0 %v5064_v11 }
 0x4a8   :  { %v4244_v56 = vmax.f32 %v3415_v4, 0.0  ;;  %v3770_v27 = vadd.f32 %v3769_v30, %v15681_v17  ;;  %v12502_v50 = vsel %vm5242_vm3, %v5191_v23, %v4961_v43  ;;  %v15682_v17 = vld [vmem:[#allocation77_spill] sm:$0xff] }
 0x4a9   :  { %v4878_v36 = vmax.f32 %v4236_v63, %v4237_v7  ;;  %v5070_v0 = vmax.f32 %v4238_v29, %v4239_v49  ;;  %v4246_v21 = vmax.f32 %v3768_v35, 0.0  ;;  %v4245_v59 = vmax.f32 %v3417_v6, 0.0  ;;  %v4772_v18 = vpop.xlane.xlu0 %4771  ;;  %5068 = vmax.xlane.f32.xlu1 %v5067_v62 }
 0x4aa   :  { %v4247_v2 = vmax.f32 %v3770_v27, 0.0  ;;  %v5192_v12 = vsel %vm5177_vm2, %v11961_v8, %v4772_v18  ;;  %v3420_v11 = vpop.f32.mrb[40].mxu0  ;;  %v15683_v27 = vld [vmem:[#allocation76_spill] sm:$0xff] }
 0x4ab   :  { %v4881_v4 = vmax.f32 %v4244_v56, %v4245_v59  ;;  %v4775_v24 = vpop.xlane.xlu1 %4774  ;;  %v3421_v30 = vadd.f32 %v3420_v11, %v15682_v17  ;;  %v3773_v23 = vpop.f32.mrb[40].mxu1  ;;  %4879 = vmax.xlane.f32.xlu0 %v4878_v36 }
 0x4ac   :  { %v5073_v63 = vmax.f32 %v4246_v21, %v4247_v2  ;;  %v5193_v29 = vsel %vm5177_vm2, %v11971_v15, %v4775_v24  ;;  %v3774_v62 = vadd.f32 %v3773_v23, %v15682_v17  ;;  %v3422_v7 = vpop.f32.mrb[41].mxu0  ;;  %v3775_v49 = vpop.f32.mrb[41].mxu1 }
 0x4ad   :  { %v4252_v35 = vmax.f32 %v3421_v30, 0.0  ;;  %v3423_v6 = vadd.f32 %v3422_v7, %v15682_v17  ;;  %v3776_v8 = vadd.f32 %v3775_v49, %v15682_v17  ;;  %v4964_v18 = vpop.xlane.xlu0 %4963  ;;  %v3424_v43 = vpop.f32.mrb[42].mxu0  ;;  %4882 = vmax.xlane.f32.xlu1 %v4881_v4 }
 0x4ae   :  { %v4254_v56 = vmax.f32 %v3774_v62, 0.0  ;;  %v3425_v59 = vadd.f32 %v3424_v43, %v15683_v27  ;;  %v3777_v36 = vpop.f32.mrb[42].mxu1  ;;  %v3426_v21 = vpop.f32.mrb[43].mxu0  ;;  %v12518_v7 = vsel %vm5242_vm3, %v5192_v12, %v4964_v18 }
 0x4af   :  { %v4253_v2 = vmax.f32 %v3423_v6, 0.0  ;;  %v4255_v11 = vmax.f32 %v3776_v8, 0.0  ;;  %v3778_v15 = vadd.f32 %v3777_v36, %v15683_v27  ;;  %v3427_v24 = vadd.f32 %v3426_v21, %v15683_v27  ;;  %v3779_v23 = vpop.f32.mrb[43].mxu1  ;;  %v4967_v30 = vpop.xlane.xlu1 %4966  ;;  %5071 = vmax.xlane.f32.xlu0 %v5070_v0 }
 0x4b0   :  { %v4260_v17 = vmax.f32 %v3425_v59, 0.0  ;;  %v3780_v4 = vadd.f32 %v3779_v23, %v15683_v27  ;;  %v12522_v62 = vsel %vm5242_vm3, %v5193_v29, %v4967_v30  ;;  %v15684_v23 = vld [vmem:[#allocation85_spill] sm:$0xff] }
 0x4b1   :  { %v4884_v49 = vmax.f32 %v4252_v35, %v4253_v2  ;;  %v5076_v43 = vmax.f32 %v4254_v56, %v4255_v11  ;;  %v4262_v6 = vmax.f32 %v3778_v15, 0.0  ;;  %v4261_v8 = vmax.f32 %v3427_v24, 0.0  ;;  %v4778_v20 = vpop.xlane.xlu0 %4777  ;;  %5074 = vmax.xlane.f32.xlu1 %v5073_v63 }
 0x4b2   :  { %v4263_v36 = vmax.f32 %v3780_v4, 0.0  ;;  %v3430_v0 = vpop.f32.mrb[44].mxu0  ;;  %v5194_v30 = vsel %vm5177_vm2, %v15684_v23, %v4778_v20 }
 0x4b3   :  { %v4887_v32 = vmax.f32 %v4260_v17, %v4261_v8  ;;  %v4781_v12 = vpop.xlane.xlu1 %4780  ;;  %v3431_v18 = vadd.f32 %v3430_v0, %v11740_v26  ;;  %v3783_v59 = vpop.f32.mrb[44].mxu1  ;;  %4885 = vmax.xlane.f32.xlu0 %v4884_v49  ;;  %v15685_v49 = vld [vmem:[#allocation78_spill] sm:$0xff] }
 0x4b4   :  { %v5079_v27 = vmax.f32 %v4262_v6, %v4263_v36  ;;  %v3784_v29 = vadd.f32 %v3783_v59, %v11740_v26  ;;  %v3432_v35 = vpop.f32.mrb[45].mxu0  ;;  %v3785_v56 = vpop.f32.mrb[45].mxu1  ;;  %v5195_v17 = vsel %vm5177_vm2, %v11990_v28, %v4781_v12 }
 0x4b5   :  { %v4268_v2 = vmax.f32 %v3431_v18, 0.0  ;;  %v3433_v11 = vadd.f32 %v3432_v35, %v11740_v26  ;;  %v3786_v63 = vadd.f32 %v3785_v56, %v11740_v26  ;;  %v4970_v15 = vpop.xlane.xlu0 %4969  ;;  %v3434_v24 = vpop.f32.mrb[46].mxu0  ;;  %4888 = vmax.xlane.f32.xlu1 %v4887_v32 }
 0x4b6   :  { %v4270_v4 = vmax.f32 %v3784_v29, 0.0  ;;  %v3435_v6 = vadd.f32 %v3434_v24, %v15685_v49  ;;  %v3787_v8 = vpop.f32.mrb[46].mxu1  ;;  %v3436_v36 = vpop.f32.mrb[47].mxu0  ;;  %v5259_v32 = vsel %vm5242_vm3, %v5194_v30, %v4970_v15 }
 0x4b7   :  { %v4269_v0 = vmax.f32 %v3433_v11, 0.0  ;;  %v4271_v18 = vmax.f32 %v3786_v63, 0.0  ;;  %v3788_v59 = vadd.f32 %v3787_v8, %v15685_v49  ;;  %v3437_v26 = vadd.f32 %v3436_v36, %v15685_v49  ;;  %v3789_v35 = vpop.f32.mrb[47].mxu1  ;;  %v4973_v56 = vpop.xlane.xlu1 %4972  ;;  %5077 = vmax.xlane.f32.xlu0 %v5076_v43 }
 0x4b8   :  { %v4276_v20 = vmax.f32 %v3435_v6, 0.0  ;;  %v3790_v23 = vadd.f32 %v3789_v35, %v15685_v49  ;;  %v5260_v28 = vsel %vm5242_vm3, %v5195_v17, %v4973_v56  ;;  %v15686_v49 = vpack.c.bf16 %v12378_v16, %v12368_v14 }
 0x4b9   :  { %v4890_v12 = vmax.f32 %v4268_v2, %v4269_v0  ;;  %v5082_v29 = vmax.f32 %v4270_v4, %v4271_v18  ;;  %v4278_v24 = vmax.f32 %v3788_v59, 0.0  ;;  %v4277_v21 = vmax.f32 %v3437_v26, 0.0  ;;  %v4784_v11 = vpop.xlane.xlu0 %4783  ;;  %5080 = vmax.xlane.f32.xlu1 %v5079_v27  ;;  %v15688_v26 = vld [vmem:[#allocation79_spill] sm:$0xff] }
 0x4ba   :  { %v4279_v63 = vmax.f32 %v3790_v23, 0.0  ;;  %v5315_v8 = vpack.c.bf16 %v5260_v28, %v5259_v32  ;;  %v3440_v1 = vpop.f32.mrb[48].mxu0 }
 0x4bb   :  { %v4893_v36 = vmax.f32 %v4276_v20, %v4277_v21  ;;  %v4787_v45 = vpop.xlane.xlu1 %4786  ;;  %v3441_v43 = vadd.f32 %v3440_v1, %v11757_v44  ;;  %v3793_v57 = vpop.f32.mrb[48].mxu1  ;;  %4891 = vmax.xlane.f32.xlu0 %v4890_v12  ;;  %v15687_v1 = vld [vmem:[#allocation86_spill] sm:$0xff] }
 0x4bc   :  { %v5085_v15 = vmax.f32 %v4278_v24, %v4279_v63  ;;  %9220 = vmatprep.subr.bf16.mxu0 %v5315_v8  ;;  %v3794_v30 = vadd.f32 %v3793_v57, %v11757_v44  ;;  %v3442_v17 = vpop.f32.mrb[49].mxu0  ;;  %v3795_v2 = vpop.f32.mrb[49].mxu1  ;;  %v5196_v18 = vsel %vm5177_vm2, %v15687_v1, %v4784_v11  ;;  %v5197_v57 = vsel %vm5177_vm2, %v12009_v9, %v4787_v45 }
 0x4bd   :  { %v4284_v4 = vmax.f32 %v3441_v43, 0.0  ;;  %9221 = vmatpush3.bf16.msra.mxu0 %v15686_v49  ;;  %v3443_v27 = vadd.f32 %v3442_v17, %v11757_v44  ;;  %v3796_v21 = vadd.f32 %v3795_v2, %v11757_v44  ;;  %v4976_v6 = vpop.xlane.xlu0 %4975  ;;  %v3444_v0 = vpop.f32.mrb[50].mxu0  ;;  %4894 = vmax.xlane.f32.xlu1 %v4893_v36 }
 0x4be   :  { %v4286_v59 = vmax.f32 %v3794_v30, 0.0  ;;  %v3445_v35 = vadd.f32 %v3444_v0, %v15688_v26  ;;  %v3797_v56 = vpop.f32.mrb[50].mxu1  ;;  %v3446_v32 = vpop.f32.mrb[51].mxu0  ;;  %v5261_v12 = vsel %vm5242_vm3, %v5196_v18, %v4976_v6 }
 0x4bf   :  { %v4285_v14 = vmax.f32 %v3443_v27, 0.0  ;;  %v4287_v16 = vmax.f32 %v3796_v21, 0.0  ;;  %v3798_v20 = vadd.f32 %v3797_v56, %v15688_v26  ;;  %v3447_v44 = vadd.f32 %v3446_v32, %v15688_v26  ;;  %v3799_v23 = vpop.f32.mrb[51].mxu1  ;;  %v4979_v28 = vpop.xlane.xlu1 %4978  ;;  %5083 = vmax.xlane.f32.xlu0 %v5082_v29  ;;  %v15690_v56 = vld [vmem:[#allocation87_spill] sm:$0xff] }
 0x4c0   :  { %v4292_v24 = vmax.f32 %v3445_v35, 0.0  ;;  %v3800_v11 = vadd.f32 %v3799_v23, %v15688_v26  ;;  %v5262_v9 = vsel %vm5242_vm3, %v5197_v57, %v4979_v28  ;;  %v15689_v57 = vpack.c.bf16 %v12398_v55, %v12391_v19 }
 0x4c1   :  { %v4896_v45 = vmax.f32 %v4284_v4, %v4285_v14  ;;  %v5088_v63 = vmax.f32 %v4286_v59, %v4287_v16  ;;  %v4294_v8 = vmax.f32 %v3798_v20, 0.0  ;;  %v4293_v36 = vmax.f32 %v3447_v44, 0.0  ;;  %v4790_v43 = vpop.xlane.xlu0 %4789  ;;  %5086 = vmax.xlane.f32.xlu1 %v5085_v15  ;;  %v15691_v20 = vld [vmem:[#allocation80_spill] sm:$0xff] }
 0x4c2   :  { %v4295_v30 = vmax.f32 %v3800_v11, 0.0  ;;  %v5316_v17 = vpack.c.bf16 %v5262_v9, %v5261_v12  ;;  %v3450_v2 = vpop.f32.mrb[52].mxu0  ;;  %v5198_v32 = vsel %vm5177_vm2, %v15690_v56, %v4790_v43 }
 0x4c3   :  { %v4899_v49 = vmax.f32 %v4292_v24, %v4293_v36  ;;  %v4793_v27 = vpop.xlane.xlu1 %4792  ;;  %v3451_v29 = vadd.f32 %v3450_v2, %v11774_v34  ;;  %v3803_v21 = vpop.f32.mrb[52].mxu1  ;;  %4897 = vmax.xlane.f32.xlu0 %v4896_v45 }
 0x4c4   :  { %v5091_v6 = vmax.f32 %v4294_v8, %v4295_v30  ;;  %9222 = vmatprep.subr.bf16.mxu0 %v5316_v17  ;;  %v3804_v0 = vadd.f32 %v3803_v21, %v11774_v34  ;;  %v3452_v1 = vpop.f32.mrb[53].mxu0  ;;  %v3805_v4 = vpop.f32.mrb[53].mxu1  ;;  %v5199_v14 = vsel %vm5177_vm2, %v12028_v31, %v4793_v27 }
 0x4c5   :  { %v4300_v18 = vmax.f32 %v3451_v29, 0.0  ;;  %9223 = vmatpush3.bf16.msra.mxu0 %v15689_v57  ;;  %v3453_v15 = vadd.f32 %v3452_v1, %v11774_v34  ;;  %v3806_v59 = vadd.f32 %v3805_v4, %v11774_v34  ;;  %v4982_v26 = vpop.xlane.xlu0 %4981  ;;  %v3454_v35 = vpop.f32.mrb[54].mxu0  ;;  %4900 = vmax.xlane.f32.xlu1 %v4899_v49 }
 0x4c6   :  { %v4302_v16 = vmax.f32 %v3804_v0, 0.0  ;;  %v3455_v44 = vadd.f32 %v3454_v35, %v15691_v20  ;;  %v3807_v23 = vpop.f32.mrb[54].mxu1  ;;  %v3456_v28 = vpop.f32.mrb[55].mxu0  ;;  %v5263_v9 = vsel %vm5242_vm3, %v5198_v32, %v4982_v26  ;;  %v15692_v26 = vpack.c.bf16 %v12418_v40, %v12411_v22 }
 0x4c7   :  { %v4301_v19 = vmax.f32 %v3453_v15, 0.0  ;;  %v4303_v55 = vmax.f32 %v3806_v59, 0.0  ;;  %v3808_v12 = vadd.f32 %v3807_v23, %v15691_v20  ;;  %v3457_v34 = vadd.f32 %v3456_v28, %v15691_v20  ;;  %v3809_v24 = vpop.f32.mrb[55].mxu1  ;;  %v4985_v11 = vpop.xlane.xlu1 %4984  ;;  %5089 = vmax.xlane.f32.xlu0 %v5088_v63  ;;  %v15694_v23 = vld [vmem:[#allocation81_spill] sm:$0xff] }
 0x4c8   :  { %v4308_v45 = vmax.f32 %v3455_v44, 0.0  ;;  %v3810_v8 = vadd.f32 %v3809_v24, %v15691_v20  ;;  %v5264_v31 = vsel %vm5242_vm3, %v5199_v14, %v4985_v11  ;;  %v15693_v14 = vld [vmem:[#allocation88_spill] sm:$0xff] }
 0x4c9   :  { %v4902_v36 = vmax.f32 %v4300_v18, %v4301_v19  ;;  %v5094_v43 = vmax.f32 %v4302_v16, %v4303_v55  ;;  %v4310_v30 = vmax.f32 %v3808_v12, 0.0  ;;  %v4309_v17 = vmax.f32 %v3457_v34, 0.0  ;;  %v4796_v2 = vpop.xlane.xlu0 %4795  ;;  %5092 = vmax.xlane.f32.xlu1 %v5091_v6 }
 0x4ca   :  { %v4311_v49 = vmax.f32 %v3810_v8, 0.0  ;;  %v5317_v27 = vpack.c.bf16 %v5264_v31, %v5263_v9  ;;  %v3460_v29 = vpop.f32.mrb[56].mxu0  ;;  %v5200_v16 = vsel %vm5177_vm2, %v15693_v14, %v4796_v2 }
 0x4cb   :  { %v4905_v21 = vmax.f32 %v4308_v45, %v4309_v17  ;;  %v4799_v0 = vpop.xlane.xlu1 %4798  ;;  %v3461_v63 = vadd.f32 %v3460_v29, %v11791_v58  ;;  %v3813_v1 = vpop.f32.mrb[56].mxu1  ;;  %4903 = vmax.xlane.f32.xlu0 %v4902_v36 }
 0x4cc   :  { %v5097_v4 = vmax.f32 %v4310_v30, %v4311_v49  ;;  %9224 = vmatprep.subr.bf16.mxu0 %v5317_v27  ;;  %v3814_v57 = vadd.f32 %v3813_v1, %v11791_v58  ;;  %v3462_v15 = vpop.f32.mrb[57].mxu0  ;;  %v3815_v18 = vpop.f32.mrb[57].mxu1  ;;  %v5201_v20 = vsel %vm5177_vm2, %v12047_v13, %v4799_v0 }
 0x4cd   :  { %v4316_v59 = vmax.f32 %v3461_v63, 0.0  ;;  %9225 = vmatpush3.bf16.msra.mxu0 %v15692_v26  ;;  %v3463_v6 = vadd.f32 %v3462_v15, %v11791_v58  ;;  %v3816_v35 = vadd.f32 %v3815_v18, %v11791_v58  ;;  %v4988_v56 = vpop.xlane.xlu0 %4987  ;;  %v3464_v32 = vpop.f32.mrb[58].mxu0  ;;  %4906 = vmax.xlane.f32.xlu1 %v4905_v21 }
 0x4ce   :  { %v4318_v44 = vmax.f32 %v3814_v57, 0.0  ;;  %v3465_v28 = vadd.f32 %v3464_v32, %v15694_v23  ;;  %v3817_v19 = vpop.f32.mrb[58].mxu1  ;;  %v3466_v55 = vpop.f32.mrb[59].mxu0  ;;  %v5265_v11 = vsel %vm5242_vm3, %v5200_v16, %v4988_v56  ;;  %v15696_v56 = vld [vmem:[#allocation89_spill] sm:$0xff] }
 0x4cf   :  { %v4317_v22 = vmax.f32 %v3463_v6, 0.0  ;;  %v4319_v40 = vmax.f32 %v3816_v35, 0.0  ;;  %v3818_v12 = vadd.f32 %v3817_v19, %v15694_v23  ;;  %v3467_v58 = vadd.f32 %v3466_v55, %v15694_v23  ;;  %v3819_v34 = vpop.f32.mrb[59].mxu1  ;;  %v4991_v24 = vpop.xlane.xlu1 %4990  ;;  %5095 = vmax.xlane.f32.xlu0 %v5094_v43 }
 0x4d0   :  { %v4324_v9 = vmax.f32 %v3465_v28, 0.0  ;;  %v3820_v45 = vadd.f32 %v3819_v34, %v15694_v23  ;;  %v5266_v13 = vsel %vm5242_vm3, %v5201_v20, %v4991_v24  ;;  %v15697_v20 = vld [vmem:[#allocation82_spill] sm:$0xff] }
 0x4d1   :  { %v4908_v8 = vmax.f32 %v4316_v59, %v4317_v22  ;;  %v5100_v31 = vmax.f32 %v4318_v44, %v4319_v40  ;;  %v4326_v36 = vmax.f32 %v3818_v12, 0.0  ;;  %v4325_v30 = vmax.f32 %v3467_v58, 0.0  ;;  %v4802_v17 = vpop.xlane.xlu0 %4801  ;;  %5098 = vmax.xlane.f32.xlu1 %v5097_v4 }
 0x4d2   :  { %v4327_v2 = vmax.f32 %v3820_v45, 0.0  ;;  %v5318_v49 = vpack.c.bf16 %v5266_v13, %v5265_v11  ;;  %v3470_v27 = vpop.f32.mrb[60].mxu0  ;;  %v15695_v59 = vpack.c.bf16 %v12438_v42, %v12431_v61  ;;  %v5202_v32 = vsel %vm5177_vm2, %v15696_v56, %v4802_v17 }
 0x4d3   :  { %v4911_v29 = vmax.f32 %v4324_v9, %v4325_v30  ;;  %v4805_v21 = vpop.xlane.xlu1 %4804  ;;  %v3471_v43 = vadd.f32 %v3470_v27, %v11808_v54  ;;  %v3823_v0 = vpop.f32.mrb[60].mxu1  ;;  %4909 = vmax.xlane.f32.xlu0 %v4908_v8 }
 0x4d4   :  { %v5103_v63 = vmax.f32 %v4326_v36, %v4327_v2  ;;  %9226 = vmatprep.subr.bf16.mxu0 %v5318_v49  ;;  %v3824_v1 = vadd.f32 %v3823_v0, %v11808_v54  ;;  %v3472_v57 = vpop.f32.mrb[61].mxu0  ;;  %v3825_v15 = vpop.f32.mrb[61].mxu1  ;;  %v5203_v14 = vsel %vm5177_vm2, %v12066_v33, %v4805_v21 }
 0x4d5   :  { %v4332_v18 = vmax.f32 %v3471_v43, 0.0  ;;  %9227 = vmatpush3.bf16.msra.mxu0 %v15695_v59  ;;  %v3473_v4 = vadd.f32 %v3472_v57, %v11808_v54  ;;  %v3826_v26 = vadd.f32 %v3825_v15, %v11808_v54  ;;  %v4994_v6 = vpop.xlane.xlu0 %4993  ;;  %v3474_v35 = vpop.f32.mrb[62].mxu0  ;;  %4912 = vmax.xlane.f32.xlu1 %v4911_v29 }
 0x4d6   :  { %v4334_v16 = vmax.f32 %v3824_v1, 0.0  ;;  %v3475_v44 = vadd.f32 %v3474_v35, %v15697_v20  ;;  %v3827_v23 = vpop.f32.mrb[62].mxu1  ;;  %v3476_v28 = vpop.f32.mrb[63].mxu0  ;;  %v5267_v40 = vsel %vm5242_vm3, %v5202_v32, %v4994_v6 }
 0x4d7   :  { %v4333_v61 = vmax.f32 %v3473_v4, 0.0  ;;  %v4335_v42 = vmax.f32 %v3826_v26, 0.0  ;;  %v3828_v19 = vadd.f32 %v3827_v23, %v15697_v20  ;;  %v3477_v54 = vadd.f32 %v3476_v28, %v15697_v20  ;;  %v3829_v55 = vpop.f32.mrb[63].mxu1  ;;  %v4997_v22 = vpop.xlane.xlu1 %4996  ;;  %5101 = vmax.xlane.f32.xlu0 %v5100_v31 }
 0x4d8   :  { %v4340_v12 = vmax.f32 %v3475_v44, 0.0  ;;  %v3830_v58 = vadd.f32 %v3829_v55, %v15697_v20  ;;  %v5268_v33 = vsel %vm5242_vm3, %v5203_v14, %v4997_v22  ;;  %v15698_v31 = vpack.c.bf16 %v12458_v5, %v12451_v37  ;;  %v15702_v14 = vld [vmem:[#allocation51_spill] sm:$0xff]  ;;  %v323_v20 = vld [vmem:[%s15201_s9] sm:$0xff] }
 0x4d9   :  { %v4914_v34 = vmax.f32 %v4332_v18, %v4333_v61  ;;  %v5106_v24 = vmax.f32 %v4334_v16, %v4335_v42  ;;  %v4342_v11 = vmax.f32 %v3828_v19, 0.0  ;;  %v4341_v9 = vmax.f32 %v3477_v54, 0.0  ;;  %v4808_v45 = vpop.xlane.xlu0 %4807  ;;  %5104 = vmax.xlane.f32.xlu1 %v5103_v63  ;;  %v15703_v42 = vld [vmem:[#allocation53_spill] sm:$0xff]  ;;  %v9671_v54 = vld [vmem:[%s15199_s7 + $0xc] ss:$16 sps:$4 sm:$0xff]  }
 0x4da   :  { %v4343_v13 = vmax.f32 %v3830_v58, 0.0  ;;  %v5319_v8 = vpack.c.bf16 %v5268_v33, %v5267_v40  ;;  %v5204_v49 = vsel %vm5177_vm2, %v12075_v52, %v4808_v45  ;;  %v15699_v37 = vpack.c.bf16 %v12482_v38, %v12475_v25  ;;  %v15704_v19 = vld [vmem:[#allocation25_spill] sm:$0xff]  ;;  %v326_v55 = vld [vmem:[%s15201_s9 + $0x18] sm:$0xff]  ;;  %6012 = vmatprep.mubr.bf16.mxu1 %v9671_v54 }
 0x4db   :  { %v4917_v36 = vmax.f32 %v4340_v12, %v4341_v9  ;;  %v4811_v30 = vpop.xlane.xlu1 %4810  ;;  %4915 = vmax.xlane.f32.xlu0 %v4914_v34  ;;  %v15700_v25 = vpack.c.bf16 %v12502_v50, %v12495_v51  ;;  %v9620_v51 = vld [vmem:[%s15199_s7] ss:$16 sps:$4 sm:$0xff]   ;;  %v9625_v50 = vld [vmem:[%s15199_s7 + $0x24] ss:$16 sps:$4 sm:$0xff]  }
 0x4dc   :  { %v5109_v17 = vmax.f32 %v4342_v11, %v4343_v13  ;;  %9228 = vmatprep.subr.bf16.mxu0 %v5319_v8  ;;  %v5205_v27 = vsel %vm5177_vm2, %v12085_v39, %v4811_v30  ;;  %v9623_v40 = vld [vmem:[%s15199_s7 + $0x20] ss:$16 sps:$4 sm:$0xff]   ;;  %v9628_v33 = vld [vmem:[%s15199_s7 + $0x44] ss:$16 sps:$4 sm:$0xff]   ;;  %v328_v11 = vld [vmem:[%s15201_s9 + $0x28] sm:$0xff] }
 0x4dd   :  { %9229 = vmatpush3.bf16.msra.mxu0 %v15698_v31  ;;  %v5000_v2 = vpop.xlane.xlu0 %4999  ;;  %4918 = vmax.xlane.f32.xlu1 %v4917_v36  ;;  %v327_v12 = vld [vmem:[%s15201_s9 + $0x20] sm:$0xff]  ;;  %v15705_v58 = vld [vmem:[#allocation27_spill] sm:$0xff]  ;;  %v15707_v9 = vld [vmem:[#allocation90_spill] sm:$0xff] }
 0x4de   :  { %v5269_v21 = vsel %vm5242_vm3, %v5204_v49, %v5000_v2  ;;  %v15706_v34 = vld [vmem:[#allocation21_spill] sm:$0xff]  ;;  %v15708_v13 = vld [vmem:[#allocation91_spill] sm:$0xff] }
 0x4df   :  { %v5003_v29 = vpop.xlane.xlu1 %5002  ;;  %5107 = vmax.xlane.f32.xlu0 %v5106_v24  ;;  %v329_v30 = vld [vmem:[%s15201_s9 + $0x30] sm:$0xff]  ;;  %v339_v54 = vld [vmem:[%s15201_s9 + $0x80] sm:$0xff] }
 0x4e0   :  { %v5270_v43 = vsel %vm5242_vm3, %v5205_v27, %v5003_v29  ;;  %v15709_v2 = vld [vmem:[#allocation23_spill] sm:$0xff]  ;;  %v15710_v27 = vld [vmem:[#allocation29_spill] sm:$0xff] }
 0x4e1   :  { %v5320_v0 = vpack.c.bf16 %v5270_v43, %v5269_v21  ;;  %v4814_v63 = vpop.xlane.xlu0 %4813  ;;  %5110 = vmax.xlane.f32.xlu1 %v5109_v17  ;;  %v330_v21 = vld [vmem:[%s15201_s9 + $0x38] sm:$0xff] }
 0x4e2   :  { %v5206_v39 = vsel %vm5177_vm2, %v12094_v46, %v4814_v63  ;;  %v331_v63 = vld [vmem:[%s15201_s9 + $0x40] sm:$0xff] }
 0x4e3   :  { %v4817_v1 = vpop.xlane.xlu1 %4816  ;;  %9230 = vmatprep.subr.bf16.mxu0 %v5320_v0  ;;  %5059 = vmax.xlane.f32.xlu0 %v12464_v47  ;;  %v9626_v0 = vld [vmem:[%s15199_s7 + $0x40] ss:$16 sps:$4 sm:$0xff]  }
 0x4e4   :  { %9231 = vmatpush3.bf16.msra.mxu0 %v15699_v37  ;;  %v5207_v5 = vsel %vm5177_vm2, %v12104_v41, %v4817_v1  ;;  %v15711_v1 = vld [vmem:[#allocation41_spill] sm:$0xff] }
 0x4e5   :  { %v5006_v52 = vpop.xlane.xlu0 %5005  ;;  %5062 = vmax.xlane.f32.xlu1 %v12470_v48  ;;  %v9631_v37 = vld [vmem:[%s15199_s7 + $0x64] ss:$16 sps:$4 sm:$0xff]  }
 0x4e6   :  { %v5271_v15 = vsel %vm5242_vm3, %v5206_v39, %v5006_v52  ;;  %v15712_v52 = vld [vmem:[#allocation13_spill] sm:$0xff] }
 0x4e7   :  { %v5009_v57 = vpop.xlane.xlu1 %5008 }
 0x4e8   :  { %v5272_v18 = vsel %vm5242_vm3, %v5207_v5, %v5009_v57  ;;  %v332_v5 = vld [vmem:[%s15201_s9 + $0x48] sm:$0xff]  ;;  %v15713_v57 = vld [vmem:[#allocation92_spill] sm:$0xff] }
 0x4e9   :  { %v5321_v59 = vpack.c.bf16 %v5272_v18, %v5271_v15  ;;  %v4820_v47 = vpop.xlane.xlu0 %4819  ;;  %v15714_v18 = vld [vmem:[#allocation93_spill] sm:$0xff] }
 0x4ea   :  { %v5208_v46 = vsel %vm5177_vm2, %v12113_v3, %v4820_v47  ;;  %v324_v3 = vld [vmem:[%s15201_s9 + $0x8] sm:$0xff] }
 0x4eb   :  { %v4823_v4 = vpop.xlane.xlu1 %4822  ;;  %9232 = vmatprep.subr.bf16.mxu0 %v5321_v59 }
 0x4ec   :  { %9233 = vmatpush3.bf16.msra.mxu0 %v15700_v25  ;;  %v5209_v41 = vsel %vm5177_vm2, %v12123_v10, %v4823_v4  ;;  %v15701_v10 = vpack.c.bf16 %v12522_v62, %v12518_v7  ;;  %v325_v62 = vld [vmem:[%s15201_s9 + $0x10] sm:$0xff] }
 0x4ed   :  { %v5012_v48 = vpop.xlane.xlu0 %5011  ;;  %v333_v4 = vld [vmem:[%s15201_s9 + $0x50] sm:$0xff] }
 0x4ee   :  { %v5273_v26 = vsel %vm5242_vm3, %v5208_v46, %v5012_v48 }
 0x4ef   :  { %v5015_v38 = vpop.xlane.xlu1 %5014 }
 0x4f0   :  { %v5274_v6 = vsel %vm5242_vm3, %v5209_v41, %v5015_v38  ;;  %v334_v38 = vld [vmem:[%s15201_s9 + $0x58] sm:$0xff] }
 0x4f1   :  { %v5322_v35 = vpack.c.bf16 %v5274_v6, %v5273_v26  ;;  %v4826_v56 = vpop.xlane.xlu0 %4825  ;;  %v9629_v6 = vld [vmem:[%s15199_s7 + $0x60] ss:$16 sps:$4 sm:$0xff]  }
 0x4f2   :  { %v5210_v44 = vsel %vm5177_vm2, %v12132_v60, %v4826_v56  ;;  %v9634_v56 = vld [vmem:[%s15199_s7 + $0x84] ss:$16 sps:$4 sm:$0xff]  }
 0x4f3   :  { %v4829_v32 = vpop.xlane.xlu1 %4828  ;;  %9234 = vmatprep.subr.bf16.mxu0 %v5322_v35  ;;  %v335_v35 = vld [vmem:[%s15201_s9 + $0x60] sm:$0xff] }
 0x4f4   :  { %9235 = vmatpush3.bf16.msra.mxu0 %v15701_v10  ;;  %v5211_v23 = vsel %vm5177_vm2, %v12142_v53, %v4829_v32 }
 0x4f5   :  { %6269 = vmatprep.subr.bf16.mxu0 %v15702_v14  ;;  %v5018_v16 = vpop.xlane.xlu0 %5017 }
 0x4f6   :  { %5346 = vperm.xlu1 %9470, %v324_v3   ;;  %v12661_v28 = vsel %vm5242_vm3, %v5210_v44, %v5018_v16  ;;  %v15715_v3 = vld [vmem:[#allocation94_spill] sm:$0xff] }
 0x4f7   :  { %v5021_v7 = vpop.xlane.xlu1 %5020  ;;  %5852 = vmatmul.mubr.bf16.vlgmr.msra.gmra.mrb[64].mxu0 %v9620_v51  ;;  %v336_v51 = vld [vmem:[%s15201_s9 + $0x68] sm:$0xff] }
 0x4f8   :  { %v12664_v61 = vsel %vm5242_vm3, %v5211_v23, %v5021_v7  ;;  %6270 = vmatpush1.bf16.msra.mxu0 %v15703_v42  ;;  %5859 = vmatprep.mubr.bf16.mxu0 %v9625_v50  ;;  %v15716_v50 = vld [vmem:[#allocation95_spill] sm:$0xff] }
 0x4f9   :  { %v5323_v60 = vpack.c.bf16 %v12664_v61, %v12661_v28  ;;  %6271 = vmatprep.subr.bf16.mxu0 %v15704_v19  ;;  %v4832_v53 = vpop.xlane.xlu0 %4831  ;;  %5341 = vperm.xlu0 %9471, %v323_v20   ;;  %v337_v20 = vld [vmem:[%s15201_s9 + $0x70] sm:$0xff]  ;;  %v338_v42 = vld [vmem:[%s15201_s9 + $0x78] sm:$0xff] }
 0x4fa   :  { %5351 = vperm.xlu1 %9470, %v325_v62   ;;  %v5212_v45 = vsel %vm5177_vm2, %v15707_v9, %v4832_v53  ;;  %v9632_v53 = vld [vmem:[%s15199_s7 + $0x80] ss:$16 sps:$4 sm:$0xff]  }
 0x4fb   :  { %v4835_v22 = vpop.xlane.xlu1 %4834 }
 0x4fc   :  { %6272 = vmatpush1.bf16.msra.mxu0 %v15705_v58  ;;  %v5213_v8 = vsel %vm5177_vm2, %v15708_v13, %v4835_v22 }
 0x4fd   :  { %6273 = vmatprep.subr.bf16.mxu0 %v15706_v34  ;;  %v5024_v24 = vpop.xlane.xlu0 %5023  ;;  %5356 = vperm.xlu0 %9471, %v326_v55   ;;  %v9637_v55 = vld [vmem:[%s15199_s7 + $0xa4] ss:$16 sps:$4 sm:$0xff]  }
 0x4fe   :  { %5361 = vperm.xlu1 %9470, %v327_v12   ;;  %v12698_v17 = vsel %vm5242_vm3, %v5212_v45, %v5024_v24  ;;  %v15717_v12 = vld [vmem:[#allocation19_spill] sm:$0xff] }
 0x4ff   :  { %v5027_v36 = vpop.xlane.xlu1 %5026  ;;  %5860 = vmatmul.mubr.bf16.gmra.mrb[68].mxu0 %v9623_v40  ;;  %v340_v40 = vld [vmem:[%s15201_s9 + $0x88] sm:$0xff] }
 0x500   :  { %v12701_v31 = vsel %vm5242_vm3, %v5213_v8, %v5027_v36  ;;  %6274 = vmatpush1.bf16.msra.mxu0 %v15709_v2  ;;  %5867 = vmatprep.mubr.bf16.mxu0 %v9628_v33  ;;  %v15718_v33 = vld [vmem:[#allocation44_spill] sm:$0xff] }
 0x501   :  { %v5324_v49 = vpack.c.bf16 %v12701_v31, %v12698_v17  ;;  %6275 = vmatprep.subr.bf16.mxu0 %v15710_v27  ;;  %v4838_v29 = vpop.xlane.xlu0 %4837  ;;  %5366 = vperm.xlu0 %9471, %v328_v11   ;;  %v341_v11 = vld [vmem:[%s15201_s9 + $0x90] sm:$0xff]  ;;  %v342_v36 = vld [vmem:[%s15201_s9 + $0x98] sm:$0xff]  ;;  %v343_v27 = vld [vmem:[%s15201_s9 + $0xa0] sm:$0xff] }
 0x502   :  { %5371 = vperm.xlu1 %9470, %v329_v30   ;;  %v5214_v15 = vsel %vm5177_vm2, %v15713_v57, %v4838_v29  ;;  %v9635_v2 = vld [vmem:[%s15199_s7 + $0xa0] ss:$16 sps:$4 sm:$0xff]   ;;  %v9640_v29 = vld [vmem:[%s15199_s7 + $0xc4] ss:$16 sps:$4 sm:$0xff]  }
 0x503   :  { %v4841_v43 = vpop.xlane.xlu1 %4840 }
 0x504   :  { %6276 = vmatpush1.bf16.msra.mxu0 %v15711_v1  ;;  %v5215_v59 = vsel %vm5177_vm2, %v15714_v18, %v4841_v43  ;;  %v344_v43 = vld [vmem:[%s15201_s9 + $0xa8] sm:$0xff] }
 0x505   :  { %6655 = vmatprep.subr.bf16.mxu0 %v15712_v52  ;;  %v5030_v39 = vpop.xlane.xlu0 %5029  ;;  %5376 = vperm.xlu0 %9471, %v330_v21   ;;  %v15720_v1 = vld [vmem:[#allocation49_spill] sm:$0xff] }
 0x506   :  { %5381 = vperm.xlu1 %9470, %v331_v63   ;;  %v12732_v25 = vsel %vm5242_vm3, %v5214_v15, %v5030_v39  ;;  %v345_v39 = vld [vmem:[%s15201_s9 + $0xb0] sm:$0xff] }
 0x507   :  { %v5033_v47 = vpop.xlane.xlu1 %5032  ;;  %5868 = vmatmul.mubr.bf16.gmra.mrb[72].mxu0 %v9626_v0  ;;  %v15719_v0 = vld [vmem:[#allocation8_spill] sm:$0xff] }
 0x508   :  { %v12735_v48 = vsel %vm5242_vm3, %v5215_v59, %v5033_v47  ;;  %5875 = vmatprep.mubr.bf16.mxu0 %v9631_v37  ;;  %v346_v59 = vld [vmem:[%s15201_s9 + $0xb8] sm:$0xff] }
 0x509   :  { %v5325_v46 = vpack.c.bf16 %v12735_v48, %v12732_v25  ;;  %v4844_v41 = vpop.xlane.xlu0 %4843  ;;  %5386 = vperm.xlu0 %9471, %v332_v5  }
 0x50a   :  { %5391 = vperm.xlu1 %9470, %v333_v4   ;;  %v5216_v10 = vsel %vm5177_vm2, %v15715_v3, %v4844_v41  ;;  %v9638_v4 = vld [vmem:[%s15199_s7 + $0xc0] ss:$16 sps:$4 sm:$0xff]  }
 0x50b   :  { %v4847_v26 = vpop.xlane.xlu1 %4846  ;;  %v347_v41 = vld [vmem:[%s15201_s9 + $0xc0] sm:$0xff] }
 0x50c   :  { %v5217_v14 = vsel %vm5177_vm2, %v15716_v50, %v4847_v26 }
 0x50d   :  { %v5036_v32 = vpop.xlane.xlu0 %5035  ;;  %5396 = vperm.xlu0 %9471, %v334_v38   ;;  %v9643_v38 = vld [vmem:[%s15199_s7 + $0xe4] ss:$16 sps:$4 sm:$0xff]  }
 0x50e   :  { %5401 = vperm.xlu1 %9470, %v335_v35   ;;  %v12762_v44 = vsel %vm5242_vm3, %v5216_v10, %v5036_v32  ;;  %v15721_v35 = vld [vmem:[#allocation56_spill] sm:$0xff]  ;;  %v15722_v32 = vld [vmem:[#allocation37_spill] sm:$0xff]  ;;  %v349_v10 = vld [vmem:[%s15201_s9 + $0xd0] sm:$0xff] }
 0x50f   :  { %v5039_v16 = vpop.xlane.xlu1 %5038  ;;  %5876 = vmatmul.mubr.bf16.gmra.mrb[76].mxu0 %v9629_v6  ;;  %v348_v6 = vld [vmem:[%s15201_s9 + $0xc8] sm:$0xff] }
 0x510   :  { %v12765_v23 = vsel %vm5242_vm3, %v5217_v14, %v5039_v16  ;;  %5883 = vmatprep.mubr.bf16.mxu0 %v9634_v56 }
 0x511   :  { %v5326_v7 = vpack.c.bf16 %v12765_v23, %v12762_v44  ;;  %v4850_v62 = vpop.xlane.xlu0 %4849  ;;  %5406 = vperm.xlu0 %9471, %v336_v51  }
 0x512   :  { %5411 = vperm.xlu1 %9470, %v337_v20   ;;  %v5218_v58 = vsel %vm5177_vm2, %v15717_v12, %v4850_v62  ;;  %v350_v20 = vld [vmem:[%s15201_s9 + $0xd8] sm:$0xff]  ;;  %v9641_v62 = vld [vmem:[%s15199_s7 + $0xe0] ss:$16 sps:$4 sm:$0xff]  }
 0x513   :  { %v4853_v19 = vpop.xlane.xlu1 %4852 }
 0x514   :  { %v5219_v34 = vsel %vm5177_vm2, %v15718_v33, %v4853_v19  ;;  %v9644_v33 = vld [vmem:[%s15199_s7 + $0x100] ss:$16 sps:$4 sm:$0xff]  }
 0x515   :  { %v5042_v22 = vpop.xlane.xlu0 %5041  ;;  %5416 = vperm.xlu0 %9471, %v338_v42   ;;  %v351_v42 = vld [vmem:[%s15201_s9 + $0xe0] sm:$0xff] }
 0x516   :  { %5421 = vperm.xlu1 %9470, %v339_v54   ;;  %v12792_v9 = vsel %vm5242_vm3, %v5218_v58, %v5042_v22  ;;  %v353_v22 = vld [vmem:[%s15201_s9 + $0xf0] sm:$0xff]  ;;  %v354_v58 = vld [vmem:[%s15201_s9 + $0xf8] sm:$0xff] }
 0x517   :  { %v5045_v24 = vpop.xlane.xlu1 %5044  ;;  %5884 = vmatmul.mubr.bf16.gmra.mrb[80].mxu0 %v9632_v53  ;;  %v9646_v53 = vld [vmem:[%s15199_s7 + $0x104] ss:$16 sps:$4 sm:$0xff]  }
 0x518   :  { %v12795_v45 = vsel %vm5242_vm3, %v5219_v34, %v5045_v24  ;;  %5891 = vmatprep.mubr.bf16.mxu0 %v9637_v55  ;;  %v352_v55 = vld [vmem:[%s15201_s9 + $0xe8] sm:$0xff]  ;;  %v9649_v24 = vld [vmem:[%s15199_s7 + $0x124] ss:$16 sps:$4 sm:$0xff]  }
 0x519   :  { %v5327_v13 = vpack.c.bf16 %v12795_v45, %v12792_v9  ;;  %v4856_v8 = vpop.xlane.xlu0 %4855  ;;  %5426 = vperm.xlu0 %9471, %v340_v40  }
 0x51a   :  { %5431 = vperm.xlu1 %9470, %v341_v11   ;;  %v5220_v63 = vsel %vm5177_vm2, %v15719_v0, %v4856_v8  ;;  %v15723_v11 = vld [vmem:[#allocation24_spill] sm:$0xff]  ;;  %v15725_v0 = vmov 2  }
 0x51b   :  { %v4859_v30 = vpop.xlane.xlu1 %4858 }
 0x51c   :  { %v5221_v37 = vsel %vm5177_vm2, %v15720_v1, %v4859_v30  ;;  %v9647_v1 = vld [vmem:[%s15199_s7 + $0x120] ss:$16 sps:$4 sm:$0xff]  }
 0x51d   :  { %v5048_v21 = vpop.xlane.xlu0 %5047  ;;  %5436 = vperm.xlu0 %9471, %v342_v36   ;;  %v15724_v36 = vld [vmem:[#allocation16_spill] sm:$0xff] }
 0x51e   :  { %5441 = vperm.xlu1 %9470, %v343_v27   ;;  %v12822_v5 = vsel %vm5242_vm3, %v5220_v63, %v5048_v21 }
 0x51f   :  { %v5051_v52 = vpop.xlane.xlu1 %5050  ;;  %5892 = vmatmul.mubr.bf16.gmra.mrb[84].mxu0 %v9635_v2 }
 0x520   :  { %v12825_v57 = vsel %vm5242_vm3, %v5221_v37, %v5051_v52  ;;  %5899 = vmatprep.mubr.bf16.mxu0 %v9640_v29  ;;  %v9652_v52 = vld [vmem:[%s15199_s7 + $0x144] ss:$16 sps:$4 sm:$0xff]  }
 0x521   :  { %v5328_v15 = vpack.c.bf16 %v12825_v57, %v12822_v5  ;;  %v4862_v18 = vpop.xlane.xlu0 %4861  ;;  %5446 = vperm.xlu0 %9471, %v344_v43  }
 0x522   :  { %5451 = vperm.xlu1 %9470, %v345_v39   ;;  %v5222_v56 = vsel %vm5177_vm2, %v15721_v35, %v4862_v18  ;;  %v15726_v39 = vld [vmem:[#allocation38_spill] sm:$0xff]  ;;  %v9655_v35 = vld [vmem:[%s15199_s7 + $0x164] ss:$16 sps:$4 sm:$0xff]  }
 0x523   :  { %v4865_v47 = vpop.xlane.xlu1 %4864 }
 0x524   :  { %v5223_v51 = vsel %vm5177_vm2, %v15722_v32, %v4865_v47 }
 0x525   :  { %v5054_v26 = vpop.xlane.xlu0 %5053  ;;  %5456 = vperm.xlu0 %9471, %v346_v59   ;;  %v15727_v59 = vld [vmem:[#allocation9_spill] sm:$0xff] }
 0x526   :  { %5461 = vperm.xlu1 %9470, %v347_v41   ;;  %v12852_v50 = vsel %vm5242_vm3, %v5222_v56, %v5054_v26  ;;  %v9650_v26 = vld [vmem:[%s15199_s7 + $0x140] ss:$16 sps:$4 sm:$0xff]  }
 0x527   :  { %v5057_v3 = vpop.xlane.xlu1 %5056  ;;  %5900 = vmatmul.mubr.bf16.gmra.mrb[88].mxu0 %v9638_v4  ;;  %v15728_v56 = vld [vmem:[#allocation39_spill] sm:$0xff] }
 0x528   :  { %v12855_v14 = vsel %vm5242_vm3, %v5223_v51, %v5057_v3  ;;  %5907 = vmatprep.mubr.bf16.mxu0 %v9643_v38  ;;  %v15729_v51 = vld [vmem:[#allocation10_spill] sm:$0xff] }
 0x529   :  { %v5329_v16 = vpack.c.bf16 %v12855_v14, %v12852_v50  ;;  %5466 = vperm.xlu0 %9471, %v348_v6   ;;  %v12868_v19 = vpop.xlane.xlu0 %4867  ;;  %v15740_v14 = vmov 0  }
 0x52a   :  { %5471 = vperm.xlu1 %9470, %v349_v10  }
 0x52b   :  { %v12873_v54 = vpop.xlane.xlu1 %4870 }
 0x52d   :  { %5476 = vperm.xlu0 %9471, %v350_v20  }
 0x52e   :  { %5481 = vperm.xlu1 %9470, %v351_v42   ;;  %v9653_v42 = vld [vmem:[%s15199_s7 + $0x160] ss:$16 sps:$4 sm:$0xff]  }
 0x52f   :  { %5908 = vmatmul.mubr.bf16.gmra.mrb[92].mxu0 %v9641_v62 }
 0x530   :  { %v4874_v40 = vpop.xlane.xlu0 %4873  ;;  %5915 = vmatprep.mubr.bf16.mxu0 %v9646_v53 }
 0x531   :  { %5486 = vperm.xlu0 %9471, %v352_v55   ;;  %v5226_v8 = vsel %vm5177_vm2, %v15723_v11, %v4874_v40  ;;  %v9658_v55 = vld [vmem:[%s15199_s7 + $0x184] ss:$16 sps:$4 sm:$0xff]   ;;  %v9656_v11 = vld [vmem:[%s15199_s7 + $0x180] ss:$16 sps:$4 sm:$0xff]  }
 0x532   :  { %5491 = vperm.xlu1 %9470, %v353_v22   ;;  %v4877_v12 = vpop.xlane.xlu1 %4876  ;;  %v15730_v22 = vld [vmem:[#allocation40_spill] sm:$0xff] }
 0x533   :  { %v5227_v30 = vsel %vm5177_vm2, %v15724_v36, %v4877_v12  ;;  %v15731_v12 = vld [vmem:[#allocation11_spill] sm:$0xff] }
 0x534   :  { %v5066_v34 = vpop.xlane.xlu0 %5065  ;;  %v9661_v36 = vld [vmem:[%s15199_s7 + $0x1a4] ss:$16 sps:$4 sm:$0xff]  }
 0x535   :  { %5496 = vperm.xlu0 %9471, %v354_v58   ;;  %v5291_v27 = vsel %vm5242_vm3, %v5226_v8, %v5066_v34 }
 0x536   :  { %v5069_v2 = vpop.xlane.xlu1 %5068 }
 0x537   :  { %v5292_v29 = vsel %vm5242_vm3, %v5227_v30, %v5069_v2  ;;  %5916 = vmatmul.mubr.bf16.gmra.mrb[96].mxu0 %v9644_v33  ;;  %v15732_v30 = vld [vmem:[#allocation45_spill] sm:$0xff] }
 0x538   :  { %v5331_v21 = vpack.c.bf16 %v5292_v29, %v5291_v27  ;;  %v4880_v43 = vpop.xlane.xlu0 %4879  ;;  %5923 = vmatprep.mubr.bf16.mxu0 %v9649_v24  ;;  %v15733_v27 = vld [vmem:[#allocation12_spill] sm:$0xff] }
 0x539   :  { %9473 = vset.pattern.permute.xlu0 %v15725_v0  ;;  %v5228_v18 = vsel %vm5177_vm2, %v15726_v39, %v4880_v43  ;;  %v15734_v39 = vld [vmem:[#allocation57_spill] sm:$0xff] }
 0x53a   :  { %v4883_v63 = vpop.xlane.xlu1 %4882  ;;  %9332 = vmatprep.subr.bf16.mxu1 %v5331_v21 }
 0x53b   :  { %9333 = vmatpush3.bf16.msra.mxu1 %v5323_v60  ;;  %v5229_v47 = vsel %vm5177_vm2, %v15727_v59, %v4883_v63  ;;  %v15735_v59 = vld [vmem:[#allocation55_spill] sm:$0xff] }
 0x53c   :  { %v5072_v37 = vpop.xlane.xlu0 %5071 }
 0x53d   :  { %v5293_v41 = vsel %vm5242_vm3, %v5228_v18, %v5072_v37 }
 0x53e   :  { %v5075_v4 = vpop.xlane.xlu1 %5074 }
 0x53f   :  { %v5294_v28 = vsel %vm5242_vm3, %v5229_v47, %v5075_v4  ;;  %5924 = vmatmul.mubr.bf16.gmra.mrb[100].mxu0 %v9647_v1  ;;  %v9659_v1 = vld [vmem:[%s15199_s7 + $0x1a0] ss:$16 sps:$4 sm:$0xff]  }
 0x540   :  { %v5332_v61 = vpack.c.bf16 %v5294_v28, %v5293_v41  ;;  %v4886_v60 = vpop.xlane.xlu0 %4885  ;;  %5931 = vmatprep.mubr.bf16.mxu0 %v9652_v52  ;;  %v9664_v52 = vld [vmem:[%s15199_s7 + $0x1c4] ss:$16 sps:$4 sm:$0xff]  }
 0x541   :  { %v5230_v32 = vsel %vm5177_vm2, %v15728_v56, %v4886_v60 }
 0x542   :  { %v4889_v38 = vpop.xlane.xlu1 %4888  ;;  %9334 = vmatprep.subr.bf16.mxu1 %v5332_v61  ;;  %v9662_v61 = vld [vmem:[%s15199_s7 + $0x1c0] ss:$16 sps:$4 sm:$0xff]  }
 0x543   :  { %9335 = vmatpush3.bf16.msra.mxu1 %v5324_v49  ;;  %v5231_v3 = vsel %vm5177_vm2, %v15729_v51, %v4889_v38  ;;  %v9667_v38 = vld [vmem:[%s15199_s7 + $0x1e4] ss:$16 sps:$4 sm:$0xff]  }
 0x544   :  { %v5078_v6 = vpop.xlane.xlu0 %5077 }
 0x545   :  { %v5295_v20 = vsel %vm5242_vm3, %v5230_v32, %v5078_v6 }
 0x546   :  { %v5081_v10 = vpop.xlane.xlu1 %5080 }
 0x547   :  { %v5296_v17 = vsel %vm5242_vm3, %v5231_v3, %v5081_v10  ;;  %5932 = vmatmul.mubr.bf16.gmra.mrb[104].mxu0 %v9650_v26  ;;  %v15736_v26 = vld [vmem:[#allocation47_spill] sm:$0xff] }
 0x548   :  { %v5333_v31 = vpack.c.bf16 %v5296_v17, %v5295_v20  ;;  %v4892_v49 = vpop.xlane.xlu0 %4891  ;;  %5939 = vmatprep.mubr.bf16.mxu0 %v9655_v35  ;;  %v15737_v35 = vld [vmem:[#allocation46_spill] sm:$0xff]  ;;  %v15738_v17 = vld [vmem:[#allocation63_spill] sm:$0xff] }
 0x549   :  { %v5232_v40 = vsel %vm5177_vm2, %v15730_v22, %v4892_v49  ;;  %v9665_v10 = vld [vmem:[%s15199_s7 + $0x1e0] ss:$16 sps:$4 sm:$0xff]  }
 0x54a   :  { %v4895_v62 = vpop.xlane.xlu1 %4894  ;;  %9336 = vmatprep.subr.bf16.mxu1 %v5333_v31  ;;  %v15739_v49 = vld [vmem:[#allocation48_spill] sm:$0xff] }
 0x54b   :  { %9337 = vmatpush3.bf16.msra.mxu1 %v5325_v46  ;;  %v5233_v58 = vsel %vm5177_vm2, %v15731_v12, %v4895_v62  ;;  %v15742_v12 = vld [vmem:[#allocation50_spill] sm:$0xff] }
 0x54c   :  { %v5084_v53 = vpop.xlane.xlu0 %5083 }
 0x54d   :  { %v5297_v34 = vsel %vm5242_vm3, %v5232_v40, %v5084_v53 }
 0x54e   :  { %v5087_v33 = vpop.xlane.xlu1 %5086 }
 0x54f   :  { %v5298_v25 = vsel %vm5242_vm3, %v5233_v58, %v5087_v33  ;;  %5940 = vmatmul.mubr.bf16.gmra.mrb[108].mxu0 %v9653_v42  ;;  %v5225_v58 = vsel %vm5177_vm2, %v15742_v12, %v12873_v54  ;;  %v9674_v54 = vld [vmem:[%s15199_s7 + $0x2c] ss:$16 sps:$4 sm:$0xff]  }
 0x550   :  { %v5334_v48 = vpack.c.bf16 %v5298_v25, %v5297_v34  ;;  %v4898_v46 = vpop.xlane.xlu0 %4897  ;;  %5947 = vmatprep.mubr.bf16.mxu0 %v9658_v55 }
 0x551   :  { %v5234_v2 = vsel %vm5177_vm2, %v15732_v30, %v4898_v46  ;;  %v15747_v30 = vld [vmem:[#allocation26_spill] sm:$0xff] }
 0x552   :  { %v4901_v24 = vpop.xlane.xlu1 %4900  ;;  %9338 = vmatprep.subr.bf16.mxu1 %v5334_v48  ;;  %v13011_v48 = vld [vmem:[%s15200_s8] sm:$0xff]  }
 0x553   :  { %9339 = vmatpush3.bf16.msra.mxu1 %v5326_v7  ;;  %v5235_v29 = vsel %vm5177_vm2, %v15733_v27, %v4901_v24  ;;  %v15743_v24 = vld [vmem:[#allocation52_spill] sm:$0xff] }
 0x554   :  { %v5090_v8 = vpop.xlane.xlu0 %5089  ;;  %v15748_v27 = vld [vmem:[#allocation36_spill] sm:$0xff] }
 0x555   :  { %v5299_v43 = vsel %vm5242_vm3, %v5234_v2, %v5090_v8  ;;  %v15745_v8 = vld [vmem:[#allocation34_spill] sm:$0xff] }
 0x556   :  { %v5093_v21 = vpop.xlane.xlu1 %5092  ;;  %v13030_v2 = vld [vmem:[%s15200_s8 + $0x8] sm:$0xff]  }
 0x557   :  { %v5300_v44 = vsel %vm5242_vm3, %v5235_v29, %v5093_v21  ;;  %5948 = vmatmul.mubr.bf16.gmra.mrb[112].mxu0 %v9656_v11  ;;  %v15744_v11 = vld [vmem:[#allocation15_spill] sm:$0xff]  ;;  %v15749_v29 = vld [vmem:[#allocation17_spill] sm:$0xff] }
 0x558   :  { %v5335_v23 = vpack.c.bf16 %v5300_v44, %v5299_v43  ;;  %v4904_v7 = vpop.xlane.xlu0 %4903  ;;  %5955 = vmatprep.mubr.bf16.mxu0 %v9661_v36  ;;  %v15746_v36 = vld [vmem:[#allocation54_spill] sm:$0xff]  ;;  %v15750_v43 = vld [vmem:[#allocation28_spill] sm:$0xff] }
 0x559   :  { %v5236_v18 = vsel %vm5177_vm2, %v15734_v39, %v4904_v7  ;;  %v9672_v21 = vld [vmem:[%s15199_s7 + $0x28] ss:$16 sps:$4 sm:$0xff]   ;;  %v9678_v44 = vld [vmem:[%s15199_s7 + $0x4c] ss:$16 sps:$4 sm:$0xff]  }
 0x55a   :  { %v4907_v63 = vpop.xlane.xlu1 %4906  ;;  %9340 = vmatprep.subr.bf16.mxu1 %v5335_v23  ;;  %v15751_v23 = vld [vmem:[#allocation22_spill] sm:$0xff]  ;;  %v15752_v7 = vld [vmem:[#allocation31_spill] sm:$0xff] }
 0x55b   :  { %9341 = vmatpush3.bf16.msra.mxu1 %v5327_v13  ;;  %v5237_v47 = vsel %vm5177_vm2, %v15735_v59, %v4907_v63  ;;  %v15753_v63 = vld [vmem:[#allocation59_spill] sm:$0xff]  ;;  %v15756_v39 = vld [vmem:[#allocation62_spill] sm:$0xff] }
 0x55c   :  { %v5096_v37 = vpop.xlane.xlu0 %5095  ;;  %v15757_v59 = vld [vmem:[#allocation42_spill] sm:$0xff] }
 0x55d   :  { %v5301_v41 = vsel %vm5242_vm3, %v5236_v18, %v5096_v37  ;;  %v15755_v37 = vld [vmem:[#allocation30_spill] sm:$0xff] }
 0x55e   :  { %v5099_v4 = vpop.xlane.xlu1 %5098  ;;  %v9676_v18 = vld [vmem:[%s15199_s7 + $0x48] ss:$16 sps:$4 sm:$0xff]  }
 0x55f   :  { %v5302_v9 = vsel %vm5242_vm3, %v5237_v47, %v5099_v4  ;;  %5956 = vmatmul.mubr.bf16.gmra.mrb[116].mxu0 %v9659_v1  ;;  %v15754_v1 = vld [vmem:[#allocation33_spill] sm:$0xff]  ;;  %v9682_v47 = vld [vmem:[%s15199_s7 + $0x6c] ss:$16 sps:$4 sm:$0xff]  }
 0x560   :  { %v5336_v45 = vpack.c.bf16 %v5302_v9, %v5301_v41  ;;  %v4910_v13 = vpop.xlane.xlu0 %4909  ;;  %5963 = vmatprep.mubr.bf16.mxu0 %v9664_v52  ;;  %v13052_v52 = vld [vmem:[%s15200_s8 + $0x10] sm:$0xff]   ;;  %v13069_v41 = vld [vmem:[%s15200_s8 + $0x18] sm:$0xff]  }
 0x561   :  { %v5238_v6 = vsel %vm5177_vm2, %v15736_v26, %v4910_v13  ;;  %v15758_v4 = vld [vmem:[#allocation14_spill] sm:$0xff]  ;;  %v13083_v13 = vld [vmem:[%s15200_s8 + $0x20] sm:$0xff]  }
 0x562   :  { %v4913_v28 = vpop.xlane.xlu1 %4912  ;;  %9342 = vmatprep.subr.bf16.mxu1 %v5336_v45  ;;  %v9680_v9 = vld [vmem:[%s15199_s7 + $0x68] ss:$16 sps:$4 sm:$0xff]   ;;  %v9686_v45 = vld [vmem:[%s15199_s7 + $0x8c] ss:$16 sps:$4 sm:$0xff]  }
 0x563   :  { %9343 = vmatpush3.bf16.msra.mxu1 %v5328_v15  ;;  %v5239_v56 = vsel %vm5177_vm2, %v15737_v35, %v4913_v28  ;;  %v9684_v28 = vld [vmem:[%s15199_s7 + $0x88] ss:$16 sps:$4 sm:$0xff]   ;;  %v9694_v26 = vld [vmem:[%s15199_s7 + $0xcc] ss:$16 sps:$4 sm:$0xff]  }
 0x564   :  { %v5102_v60 = vpop.xlane.xlu0 %5101  ;;  %v9692_v35 = vld [vmem:[%s15199_s7 + $0xc8] ss:$16 sps:$4 sm:$0xff]  }
 0x565   :  { %v5303_v51 = vsel %vm5242_vm3, %v5238_v6, %v5102_v60  ;;  %v13097_v60 = vld [vmem:[%s15200_s8 + $0x28] sm:$0xff]   ;;  %v13111_v6 = vld [vmem:[%s15200_s8 + $0x30] sm:$0xff]  }
 0x566   :  { %v5105_v32 = vpop.xlane.xlu1 %5104 }
 0x567   :  { %v5304_v5 = vsel %vm5242_vm3, %v5239_v56, %v5105_v32  ;;  %5964 = vmatmul.mubr.bf16.gmra.mrb[120].mxu0 %v9662_v61  ;;  %v9690_v61 = vld [vmem:[%s15199_s7 + $0xac] ss:$16 sps:$4 sm:$0xff]  }
 0x568   :  { %v5337_v57 = vpack.c.bf16 %v5304_v5, %v5303_v51  ;;  %v4916_v15 = vpop.xlane.xlu0 %4915  ;;  %5971 = vmatprep.mubr.bf16.mxu0 %v9667_v38  ;;  %v9688_v38 = vld [vmem:[%s15199_s7 + $0xa8] ss:$16 sps:$4 sm:$0xff]   ;;  %v9698_v56 = vld [vmem:[%s15199_s7 + $0xec] ss:$16 sps:$4 sm:$0xff]  }
 0x569   :  { %v5240_v31 = vsel %vm5177_vm2, %v15738_v17, %v4916_v15  ;;  %v13125_v32 = vld [vmem:[%s15200_s8 + $0x38] sm:$0xff]  }
 0x56a   :  { %v4919_v3 = vpop.xlane.xlu1 %4918  ;;  %9344 = vmatprep.subr.bf16.mxu1 %v5337_v57  ;;  %v9696_v51 = vld [vmem:[%s15199_s7 + $0xe8] ss:$16 sps:$4 sm:$0xff]   ;;  %v9702_v5 = vld [vmem:[%s15199_s7 + $0x10c] ss:$16 sps:$4 sm:$0xff]   ;;  %v13139_v57 = vld [vmem:[%s15200_s8 + $0x40] sm:$0xff]  }
 0x56b   :  { %9345 = vmatpush3.bf16.msra.mxu1 %v5329_v16  ;;  %v5241_v62 = vsel %vm5177_vm2, %v15739_v49, %v4919_v3  ;;  %v15741_v16 = vld [vmem:[#allocation60_spill] sm:$0xff] }
 0x56c   :  { %v5108_v20 = vpop.xlane.xlu0 %5107  ;;  %v5224_v40 = vsel %vm5177_vm2, %v15741_v16, %v12868_v19  ;;  %v9669_v19 = vld [vmem:[%s15199_s7 + $0x8] ss:$16 sps:$4 sm:$0xff]   ;;  %v9706_v3 = vld [vmem:[%s15199_s7 + $0x12c] ss:$16 sps:$4 sm:$0xff]  }
 0x56d   :  { %v5305_v53 = vsel %vm5242_vm3, %v5240_v31, %v5108_v20  ;;  %v9700_v15 = vld [vmem:[%s15199_s7 + $0x108] ss:$16 sps:$4 sm:$0xff]   ;;  %v9710_v17 = vld [vmem:[%s15199_s7 + $0x14c] ss:$16 sps:$4 sm:$0xff]   ;;  %v13167_v31 = vld [vmem:[%s15200_s8 + $0x50] sm:$0xff]  }
 0x56e   :  { %v5111_v42 = vpop.xlane.xlu1 %5110  ;;  %v9704_v20 = vld [vmem:[%s15199_s7 + $0x128] ss:$16 sps:$4 sm:$0xff]  }
 0x56f   :  { %v5306_v55 = vsel %vm5242_vm3, %v5241_v62, %v5111_v42  ;;  %5972 = vmatmul.mubr.bf16.gmra.mrb[124].mxu0 %v9665_v10  ;;  %v13153_v10 = vld [vmem:[%s15200_s8 + $0x48] sm:$0xff]  }
 0x570   :  { %v5338_v22 = vpack.c.bf16 %v5306_v55, %v5305_v53  ;;  %v5060_v50 = vpop.xlane.xlu0 %5059  ;;  %6301 = vmatprep.mubr.bf16.mxu0 %v15740_v14  ;;  %v9708_v49 = vld [vmem:[%s15199_s7 + $0x148] ss:$16 sps:$4 sm:$0xff]   ;;  %v9714_v62 = vld [vmem:[%s15199_s7 + $0x16c] ss:$16 sps:$4 sm:$0xff]  }
 0x571   :  { %v5289_v34 = vsel %vm5242_vm3, %v5224_v40, %v5060_v50  ;;  %v13181_v55 = vld [vmem:[%s15200_s8 + $0x58] sm:$0xff]  }
 0x572   :  { %v5063_v33 = vpop.xlane.xlu1 %5062  ;;  %9346 = vmatprep.subr.bf16.mxu1 %v5338_v22  ;;  %v9712_v40 = vld [vmem:[%s15199_s7 + $0x168] ss:$16 sps:$4 sm:$0xff]  }
 0x573   :  { %v5290_v25 = vsel %vm5242_vm3, %v5225_v58, %v5063_v33  ;;  %v9718_v58 = vld [vmem:[%s15199_s7 + $0x18c] ss:$16 sps:$4 sm:$0xff]  }
 0x574   :  { %v5330_v46 = vpack.c.bf16 %v5290_v25, %v5289_v34  ;;  %v13199_v25 = vld [vmem:[%s15200_s8 + $0x60] sm:$0xff]  }
 0x576   :  { %9347 = vmatpush3.bf16.msra.mxu1 %v5330_v46 }
 0x577   :  { %9148 = vmatmul.mubr.msk.bf16.vlgmr.msra.gmra.mrb[128].mxu0 %vm1239_vm0, %v13011_v48  ;;  %6462 = vmatprep.subr.bf16.mxu1 %v15743_v24  ;;  %v9716_v24 = vld [vmem:[%s15199_s7 + $0x188] ss:$16 sps:$4 sm:$0xff]  }
 0x578   :  { %6656 = vmatpush1.bf16.msra.mxu0 %v15744_v11  ;;  %6311 = vmatprep.mubr.bf16.mxu0 %v15740_v14 }
 0x579   :  { %6657 = vmatprep.subr.bf16.mxu0 %v15745_v8  ;;  %6013 = vmatmul.mubr.bf16.vlgmr.msra.gmra.mrb[64].mxu1 %v9669_v19  ;;  %v9722_v8 = vld [vmem:[%s15199_s7 + $0x1ac] ss:$16 sps:$4 sm:$0xff]  }
 0x57a   :  { %6463 = vmatpush1.bf16.msra.mxu1 %v15746_v36  ;;  %6020 = vmatprep.mubr.bf16.mxu1 %v9674_v54 }
 0x57b   :  { %6464 = vmatprep.subr.bf16.mxu1 %v15747_v30 }
 0x57c   :  { %6658 = vmatpush1.bf16.msra.mxu0 %v15748_v27  ;;  %v13217_v27 = vld [vmem:[%s15200_s8 + $0x68] sm:$0xff]  }
 0x57d   :  { %6659 = vmatprep.subr.bf16.mxu0 %v15749_v29 }
 0x57e   :  { %6465 = vmatpush1.bf16.msra.mxu1 %v15750_v43 }
 0x57f   :  { %6466 = vmatprep.subr.bf16.mxu1 %v15751_v23  ;;  %9149 = vmatmul.mubr.msk.bf16.gmra.mrb[132].mxu0 %vm1239_vm0, %v13030_v2 }
 0x580   :  { %6660 = vmatpush1.bf16.msra.mxu0 %v15752_v7  ;;  %6321 = vmatprep.mubr.bf16.mxu0 %v15740_v14  ;;  %v9726_v7 = vld [vmem:[%s15199_s7 + $0x1cc] ss:$16 sps:$4 sm:$0xff]  }
 0x581   :  { %6661 = vmatprep.subr.bf16.mxu0 %v15753_v63  ;;  %6021 = vmatmul.mubr.bf16.gmra.mrb[68].mxu1 %v9672_v21 }
 0x582   :  { %6467 = vmatpush1.bf16.msra.mxu1 %v15754_v1  ;;  %6028 = vmatprep.mubr.bf16.mxu1 %v9678_v44  ;;  %v9720_v44 = vld [vmem:[%s15199_s7 + $0x1a8] ss:$16 sps:$4 sm:$0xff]  }
 0x583   :  { %6468 = vmatprep.subr.bf16.mxu1 %v15755_v37  ;;  %v13235_v37 = vld [vmem:[%s15200_s8 + $0x70] sm:$0xff]  }
 0x584   :  { %6662 = vmatpush1.bf16.msra.mxu0 %v15756_v39 }
 0x586   :  { %6469 = vmatpush1.bf16.msra.mxu1 %v15757_v59 }
 0x587   :  { %6848 = vmatprep.subr.bf16.mxu1 %v15758_v4  ;;  %9150 = vmatmul.mubr.msk.bf16.gmra.mrb[136].mxu0 %vm1239_vm0, %v13052_v52 }
 0x588   :  { %6331 = vmatprep.mubr.bf16.mxu0 %v15740_v14 }
 0x589   :  { %6029 = vmatmul.mubr.bf16.gmra.mrb[72].mxu1 %v9676_v18 }
 0x58a   :  { %6036 = vmatprep.mubr.bf16.mxu1 %v9682_v47  ;;  %v9724_v47 = vld [vmem:[%s15199_s7 + $0x1c8] ss:$16 sps:$4 sm:$0xff]  }
 0x58f   :  { %9151 = vmatmul.mubr.msk.bf16.gmra.mrb[140].mxu0 %vm1239_vm0, %v13069_v41 }
 0x590   :  { %6341 = vmatprep.mubr.bf16.mxu0 %v15740_v14 }
 0x591   :  { %6037 = vmatmul.mubr.bf16.gmra.mrb[76].mxu1 %v9680_v9  ;;  %v9730_v9 = vld [vmem:[%s15199_s7 + $0x1ec] ss:$16 sps:$4 sm:$0xff]  }
 0x592   :  { %6044 = vmatprep.mubr.bf16.mxu1 %v9686_v45 }
 0x597   :  { %9152 = vmatmul.mubr.msk.bf16.gmra.mrb[144].mxu0 %vm1239_vm0, %v13083_v13 }
 0x598   :  { %6351 = vmatprep.mubr.bf16.mxu0 %v15740_v14 }
 0x599   :  { %6045 = vmatmul.mubr.bf16.gmra.mrb[80].mxu1 %v9684_v28 }
 0x59a   :  { %6052 = vmatprep.mubr.bf16.mxu1 %v9690_v61  ;;  %v13253_v61 = vld [vmem:[%s15200_s8 + $0x78] sm:$0xff]  }
 0x59f   :  { %9153 = vmatmul.mubr.msk.bf16.gmra.mrb[148].mxu0 %vm1239_vm0, %v13097_v60 }
 0x5a0   :  { %6361 = vmatprep.mubr.bf16.mxu0 %v15740_v14 }
 0x5a1   :  { %6053 = vmatmul.mubr.bf16.gmra.mrb[84].mxu1 %v9688_v38 }
 0x5a2   :  { %6060 = vmatprep.mubr.bf16.mxu1 %v9694_v26 }
 0x5a7   :  { %9154 = vmatmul.mubr.msk.bf16.gmra.mrb[152].mxu0 %vm1239_vm0, %v13111_v6 }
 0x5a8   :  { %6371 = vmatprep.mubr.bf16.mxu0 %v15740_v14 }
 0x5a9   :  { %6061 = vmatmul.mubr.bf16.gmra.mrb[88].mxu1 %v9692_v35 }
 0x5aa   :  { %6068 = vmatprep.mubr.bf16.mxu1 %v9698_v56  ;;  %v9728_v56 = vld [vmem:[%s15199_s7 + $0x1e8] ss:$16 sps:$4 sm:$0xff]  }
 0x5af   :  { %9155 = vmatmul.mubr.msk.bf16.gmra.mrb[156].mxu0 %vm1239_vm0, %v13125_v32 }
 0x5b0   :  { %6381 = vmatprep.mubr.bf16.mxu0 %v15740_v14 }
 0x5b1   :  { %6069 = vmatmul.mubr.bf16.gmra.mrb[92].mxu1 %v9696_v51 }
 0x5b2   :  { %6076 = vmatprep.mubr.bf16.mxu1 %v9702_v5 }
 0x5b7   :  { %9156 = vmatmul.mubr.msk.bf16.gmra.mrb[160].mxu0 %vm1239_vm0, %v13139_v57 }
 0x5b8   :  { %6391 = vmatprep.mubr.bf16.mxu0 %v15740_v14 }
 0x5b9   :  { %6077 = vmatmul.mubr.bf16.gmra.mrb[96].mxu1 %v9700_v15 }
 0x5ba   :  { %6084 = vmatprep.mubr.bf16.mxu1 %v9706_v3 }
 0x5bf   :  { %9157 = vmatmul.mubr.msk.bf16.gmra.mrb[164].mxu0 %vm1239_vm0, %v13153_v10 }
 0x5c0   :  { %6401 = vmatprep.mubr.bf16.mxu0 %v15740_v14 }
 0x5c1   :  { %6085 = vmatmul.mubr.bf16.gmra.mrb[100].mxu1 %v9704_v20 }
 0x5c2   :  { %6092 = vmatprep.mubr.bf16.mxu1 %v9710_v17 }
 0x5c7   :  { %9158 = vmatmul.mubr.msk.bf16.gmra.mrb[168].mxu0 %vm1239_vm0, %v13167_v31 }
 0x5c8   :  { %6411 = vmatprep.mubr.bf16.mxu0 %v15740_v14 }
 0x5c9   :  { %6093 = vmatmul.mubr.bf16.gmra.mrb[104].mxu1 %v9708_v49 }
 0x5ca   :  { %v9236_v42 = vpop.f32.mrb[64].mxu0  ;;  %6100 = vmatprep.mubr.bf16.mxu1 %v9714_v62 }
 0x5cb   :  { %v9237_v53 = vpop.f32.mrb[65].mxu0 }
 0x5cc   :  { %v13183_v22 = vadd.f32 %v9237_v53, %v9236_v42  ;;  %v9239_v50 = vpop.f32.mrb[66].mxu0  ;;  %v15759_v42 = vld [vmem:[#allocation20_spill] sm:$0xff] }
 0x5cd   :  { %v9240_v16 = vpop.f32.mrb[67].mxu0 }
 0x5ce   :  { %v13188_v12 = vadd.f32 %v9240_v16, %v9239_v50  ;;  %v15760_v50 = vld [vmem:[#allocation35_spill] sm:$0xff] }
 0x5cf   :  { %9159 = vmatmul.mubr.msk.bf16.gmra.mrb[172].mxu0 %vm1239_vm0, %v13181_v55 }
 0x5d0   :  { %6421 = vmatprep.mubr.bf16.mxu0 %v15740_v14 }
 0x5d1   :  { %6101 = vmatmul.mubr.bf16.gmra.mrb[108].mxu1 %v9712_v40 }
 0x5d2   :  { %v9242_v33 = vpop.f32.mrb[68].mxu0  ;;  %6108 = vmatprep.mubr.bf16.mxu1 %v9718_v58 }
 0x5d3   :  { %v9243_v34 = vpop.f32.mrb[69].mxu0 }
 0x5d4   :  { %v13201_v46 = vadd.f32 %v9243_v34, %v9242_v33  ;;  %v9245_v19 = vpop.f32.mrb[70].mxu0  ;;  %v15761_v34 = vld [vmem:[#allocation43_spill] sm:$0xff] }
 0x5d5   :  { %v9246_v54 = vpop.f32.mrb[71].mxu0 }
 0x5d6   :  { %v13206_v11 = vadd.f32 %v9246_v54, %v9245_v19  ;;  %v15762_v19 = vld [vmem:[#allocation18_spill] sm:$0xff] }
 0x5d7   :  { %9160 = vmatmul.mubr.msk.bf16.gmra.mrb[176].mxu0 %vm1239_vm0, %v13199_v25 }
 0x5d8   :  { %6431 = vmatprep.mubr.bf16.mxu0 %v15740_v14 }
 0x5d9   :  { %6109 = vmatmul.mubr.bf16.gmra.mrb[112].mxu1 %v9716_v24  ;;  %v15763_v24 = vld [vmem:[#allocation58_spill] sm:$0xff] }
 0x5da   :  { %v9248_v36 = vpop.f32.mrb[72].mxu0  ;;  %6116 = vmatprep.mubr.bf16.mxu1 %v9722_v8 }
 0x5db   :  { %v9249_v30 = vpop.f32.mrb[73].mxu0 }
 0x5dc   :  { %v13219_v29 = vadd.f32 %v9249_v30, %v9248_v36  ;;  %v9251_v21 = vpop.f32.mrb[74].mxu0  ;;  %v15764_v36 = vld [vmem:[#allocation61_spill] sm:$0xff] }
 0x5dd   :  { %v9252_v43 = vpop.f32.mrb[75].mxu0 }
 0x5de   :  { %v13224_v23 = vadd.f32 %v9252_v43, %v9251_v21 }
 0x5df   :  { %9161 = vmatmul.mubr.msk.bf16.gmra.mrb[180].mxu0 %vm1239_vm0, %v13217_v27 }
 0x5e0   :  { %6441 = vmatprep.mubr.bf16.mxu0 %v15740_v14 }
 0x5e1   :  { %6117 = vmatmul.mubr.bf16.gmra.mrb[116].mxu1 %v9720_v44 }
 0x5e2   :  { %v9254_v63 = vpop.f32.mrb[76].mxu0  ;;  %6124 = vmatprep.mubr.bf16.mxu1 %v9726_v7  ;;  %v15765_v7 = vld [vmem:[#allocation32_spill] sm:$0xff] }
 0x5e3   :  { %v9255_v1 = vpop.f32.mrb[77].mxu0 }
 0x5e4   :  { %v13237_v39 = vadd.f32 %v9255_v1, %v9254_v63  ;;  %v9257_v18 = vpop.f32.mrb[78].mxu0 }
 0x5e5   :  { %v9258_v59 = vpop.f32.mrb[79].mxu0 }
 0x5e6   :  { %v13242_v4 = vadd.f32 %v9258_v59, %v9257_v18 }
 0x5e7   :  { %9162 = vmatmul.mubr.msk.bf16.gmra.mrb[184].mxu0 %vm1239_vm0, %v13235_v37 }
 0x5e8   :  { %6451 = vmatprep.mubr.bf16.mxu0 %v15740_v14 }
 0x5e9   :  { %6125 = vmatmul.mubr.bf16.gmra.mrb[120].mxu1 %v9724_v47 }
 0x5ea   :  { %v9260_v45 = vpop.f32.mrb[80].mxu0  ;;  %6132 = vmatprep.mubr.bf16.mxu1 %v9730_v9 }
 0x5eb   :  { %v9261_v28 = vpop.f32.mrb[81].mxu0 }
 0x5ec   :  { %v13255_v38 = vadd.f32 %v9261_v28, %v9260_v45  ;;  %v9263_v26 = vpop.f32.mrb[82].mxu0 }
 0x5ed   :  { %v9264_v35 = vpop.f32.mrb[83].mxu0 }
 0x5ee   :  { %v13260_v51 = vadd.f32 %v9264_v35, %v9263_v26 }
 0x5ef   :  { %9163 = vmatmul.mubr.msk.bf16.gmra.mrb[188].mxu0 %vm1239_vm0, %v13253_v61 }
 0x5f0   :  { %6687 = vmatprep.mubr.bf16.mxu0 %v15740_v14 }
 0x5f1   :  { %6133 = vmatmul.mubr.bf16.gmra.mrb[124].mxu1 %v9728_v56 }
 0x5f2   :  { %v9266_v5 = vpop.f32.mrb[84].mxu0  ;;  %6494 = vmatprep.mubr.bf16.mxu1 %v15740_v14 }
 0x5f3   :  { %v9267_v15 = vpop.f32.mrb[85].mxu0 }
 0x5f4   :  { %v13266_v3 = vadd.f32 %v9267_v15, %v9266_v5  ;;  %v9269_v20 = vpop.f32.mrb[86].mxu0 }
 0x5f5   :  { %v9270_v17 = vpop.f32.mrb[87].mxu0 }
 0x5f6   :  { %v13268_v49 = vadd.f32 %v9270_v17, %v9269_v20 }
 0x5f7   :  { %9180 = vmatmul.mubr.msk.bf16.vlgmr.msra.gmra.mrb[192].mxu0 %vm1239_vm0, %v13011_v48 }
 0x5f8   :  { %6697 = vmatprep.mubr.bf16.mxu0 %v15740_v14 }
 0x5f9   :  { %9164 = vmatmul.mubr.msk.bf16.vlgmr.msra.gmra.mrb[128].mxu1 %vm1239_vm0, %v13011_v48 }
 0x5fa   :  { %v9272_v62 = vpop.f32.mrb[88].mxu0  ;;  %6849 = vmatpush1.bf16.msra.mxu1 %v15759_v42  ;;  %6504 = vmatprep.mubr.bf16.mxu1 %v15740_v14 }
 0x5fb   :  { %v9273_v53 = vpop.f32.mrb[89].mxu0  ;;  %6850 = vmatprep.subr.bf16.mxu1 %v15760_v50 }
 0x5fc   :  { %v13278_v16 = vadd.f32 %v9273_v53, %v9272_v62  ;;  %v9275_v40 = vpop.f32.mrb[90].mxu0 }
 0x5fd   :  { %v9276_v58 = vpop.f32.mrb[91].mxu0 }
 0x5fe   :  { %v13280_v33 = vadd.f32 %v9276_v58, %v9275_v40  ;;  %6851 = vmatpush1.bf16.msra.mxu1 %v15761_v34 }
 0x5ff   :  { %6852 = vmatprep.subr.bf16.mxu1 %v15762_v19  ;;  %9181 = vmatmul.mubr.msk.bf16.gmra.mrb[196].mxu0 %vm1239_vm0, %v13030_v2 }
 0x600   :  { %6707 = vmatprep.mubr.bf16.mxu0 %v15740_v14 }
 0x601   :  { %9165 = vmatmul.mubr.msk.bf16.gmra.mrb[132].mxu1 %vm1239_vm0, %v13030_v2 }
 0x602   :  { %v9278_v54 = vpop.f32.mrb[92].mxu0  ;;  %6853 = vmatpush1.bf16.msra.mxu1 %v15763_v24  ;;  %6514 = vmatprep.mubr.bf16.mxu1 %v15740_v14 }
 0x603   :  { %v9279_v8 = vpop.f32.mrb[93].mxu0  ;;  %6854 = vmatprep.subr.bf16.mxu1 %v15764_v36 }
 0x604   :  { %v13292_v30 = vadd.f32 %v9279_v8, %v9278_v54  ;;  %v9281_v21 = vpop.f32.mrb[94].mxu0 }
 0x605   :  { %v9282_v43 = vpop.f32.mrb[95].mxu0 }
 0x606   :  { %v13294_v44 = vadd.f32 %v9282_v43, %v9281_v21  ;;  %6855 = vmatpush1.bf16.msra.mxu1 %v15765_v7 }
 0x607   :  { %9182 = vmatmul.mubr.msk.bf16.gmra.mrb[200].mxu0 %vm1239_vm0, %v13052_v52 }
 0x608   :  { %6717 = vmatprep.mubr.bf16.mxu0 %v15740_v14 }
 0x609   :  { %9166 = vmatmul.mubr.msk.bf16.gmra.mrb[136].mxu1 %vm1239_vm0, %v13052_v52 }
 0x60a   :  { %v9284_v63 = vpop.f32.mrb[96].mxu0  ;;  %6524 = vmatprep.mubr.bf16.mxu1 %v15740_v14 }
 0x60b   :  { %v9285_v1 = vpop.f32.mrb[97].mxu0 }
 0x60c   :  { %v13303_v18 = vadd.f32 %v9285_v1, %v9284_v63  ;;  %v9287_v59 = vpop.f32.mrb[98].mxu0 }
 0x60d   :  { %v9288_v47 = vpop.f32.mrb[99].mxu0 }
 0x60e   :  { %v13305_v9 = vadd.f32 %v9288_v47, %v9287_v59 }
 0x60f   :  { %9183 = vmatmul.mubr.msk.bf16.gmra.mrb[204].mxu0 %vm1239_vm0, %v13069_v41 }
 0x610   :  { %6727 = vmatprep.mubr.bf16.mxu0 %v15740_v14 }
 0x611   :  { %9167 = vmatmul.mubr.msk.bf16.gmra.mrb[140].mxu1 %vm1239_vm0, %v13069_v41 }
 0x612   :  { %v9290_v45 = vpop.f32.mrb[100].mxu0  ;;  %6534 = vmatprep.mubr.bf16.mxu1 %v15740_v14 }
 0x613   :  { %v9291_v28 = vpop.f32.mrb[101].mxu0 }
 0x614   :  { %v13313_v26 = vadd.f32 %v9291_v28, %v9290_v45  ;;  %v9293_v35 = vpop.f32.mrb[102].mxu0 }
 0x615   :  { %v9294_v56 = vpop.f32.mrb[103].mxu0 }
 0x616   :  { %v13315_v5 = vadd.f32 %v9294_v56, %v9293_v35 }
 0x617   :  { %9184 = vmatmul.mubr.msk.bf16.gmra.mrb[208].mxu0 %vm1239_vm0, %v13083_v13 }
 0x618   :  { %6737 = vmatprep.mubr.bf16.mxu0 %v15740_v14 }
 0x619   :  { %9168 = vmatmul.mubr.msk.bf16.gmra.mrb[144].mxu1 %vm1239_vm0, %v13083_v13 }
 0x61a   :  { %v9296_v15 = vpop.f32.mrb[104].mxu0  ;;  %6544 = vmatprep.mubr.bf16.mxu1 %v15740_v14 }
 0x61b   :  { %v9297_v20 = vpop.f32.mrb[105].mxu0 }
 0x61c   :  { %v13323_v17 = vadd.f32 %v9297_v20, %v9296_v15  ;;  %v9299_v62 = vpop.f32.mrb[106].mxu0 }
 0x61d   :  { %v9300_v42 = vpop.f32.mrb[107].mxu0 }
 0x61e   :  { %v13325_v53 = vadd.f32 %v9300_v42, %v9299_v62 }
 0x61f   :  { %9185 = vmatmul.mubr.msk.bf16.gmra.mrb[212].mxu0 %vm1239_vm0, %v13097_v60 }
 0x620   :  { %6747 = vmatprep.mubr.bf16.mxu0 %v15740_v14 }
 0x621   :  { %9169 = vmatmul.mubr.msk.bf16.gmra.mrb[148].mxu1 %vm1239_vm0, %v13097_v60 }
 0x622   :  { %v9302_v50 = vpop.f32.mrb[108].mxu0  ;;  %6554 = vmatprep.mubr.bf16.mxu1 %v15740_v14 }
 0x623   :  { %v9303_v40 = vpop.f32.mrb[109].mxu0 }
 0x624   :  { %v13333_v58 = vadd.f32 %v9303_v40, %v9302_v50  ;;  %v9305_v34 = vpop.f32.mrb[110].mxu0 }
 0x625   :  { %v9306_v19 = vpop.f32.mrb[111].mxu0 }
 0x626   :  { %v13335_v54 = vadd.f32 %v9306_v19, %v9305_v34 }
 0x627   :  { %9186 = vmatmul.mubr.msk.bf16.gmra.mrb[216].mxu0 %vm1239_vm0, %v13111_v6 }
 0x628   :  { %6757 = vmatprep.mubr.bf16.mxu0 %v15740_v14 }
 0x629   :  { %9170 = vmatmul.mubr.msk.bf16.gmra.mrb[152].mxu1 %vm1239_vm0, %v13111_v6 }
 0x62a   :  { %v9308_v24 = vpop.f32.mrb[112].mxu0  ;;  %6564 = vmatprep.mubr.bf16.mxu1 %v15740_v14 }
 0x62b   :  { %v9309_v8 = vpop.f32.mrb[113].mxu0 }
 0x62c   :  { %v13343_v36 = vadd.f32 %v9309_v8, %v9308_v24  ;;  %v9311_v21 = vpop.f32.mrb[114].mxu0  ;;  %v5347_v24 = vpop.permute.xlu1 %5346 }
 0x62d   :  { %v9312_v43 = vpop.f32.mrb[115].mxu0  ;;  %v5342_v8 = vpop.permute.xlu0 %5341 }
 0x62e   :  { %v13345_v7 = vadd.f32 %v9312_v43, %v9311_v21 }
 0x62f   :  { %9187 = vmatmul.mubr.msk.bf16.gmra.mrb[220].mxu0 %vm1239_vm0, %v13125_v32 }
 0x630   :  { %6767 = vmatprep.mubr.bf16.mxu0 %v15740_v14 }
 0x631   :  { %9171 = vmatmul.mubr.msk.bf16.gmra.mrb[156].mxu1 %vm1239_vm0, %v13125_v32 }
 0x632   :  { %v9314_v63 = vpop.f32.mrb[116].mxu0  ;;  %6574 = vmatprep.mubr.bf16.mxu1 %v15740_v14 }
 0x633   :  { %v9315_v1 = vpop.f32.mrb[117].mxu0 }
 0x634   :  { %v13353_v59 = vadd.f32 %v9315_v1, %v9314_v63  ;;  %v9317_v47 = vpop.f32.mrb[118].mxu0 }
 0x635   :  { %v9318_v45 = vpop.f32.mrb[119].mxu0 }
 0x636   :  { %v13355_v28 = vadd.f32 %v9318_v45, %v9317_v47  ;;  %v5854_v45 = vadd.f32 %v13183_v22, %v5342_v8 }
 0x637   :  { %9188 = vmatmul.mubr.msk.bf16.gmra.mrb[224].mxu0 %vm1239_vm0, %v13139_v57 }
 0x638   :  { %6777 = vmatprep.mubr.bf16.mxu0 %v15740_v14 }
 0x639   :  { %9172 = vmatmul.mubr.msk.bf16.gmra.mrb[160].mxu1 %vm1239_vm0, %v13139_v57 }
 0x63a   :  { %v9320_v35 = vpop.f32.mrb[120].mxu0  ;;  %6584 = vmatprep.mubr.bf16.mxu1 %v15740_v14 }
 0x63b   :  { %v9321_v32 = vpop.f32.mrb[121].mxu0 }
 0x63c   :  { %v13363_v56 = vadd.f32 %v9321_v32, %v9320_v35  ;;  %v9323_v15 = vpop.f32.mrb[122].mxu0 }
 0x63d   :  { %v9324_v20 = vpop.f32.mrb[123].mxu0 }
 0x63e   :  { %v13365_v62 = vadd.f32 %v9324_v20, %v9323_v15 }
 0x63f   :  { %9189 = vmatmul.mubr.msk.bf16.gmra.mrb[228].mxu0 %vm1239_vm0, %v13153_v10 }
 0x640   :  { %6787 = vmatprep.mubr.bf16.mxu0 %v15740_v14 }
 0x641   :  { %9173 = vmatmul.mubr.msk.bf16.gmra.mrb[164].mxu1 %vm1239_vm0, %v13153_v10 }
 0x642   :  { %v9326_v42 = vpop.f32.mrb[124].mxu0  ;;  %6594 = vmatprep.mubr.bf16.mxu1 %v15740_v14 }
 0x643   :  { %v9327_v57 = vpop.f32.mrb[125].mxu0 }
 0x644   :  { %v13373_v50 = vadd.f32 %v9327_v57, %v9326_v42  ;;  %v9329_v40 = vpop.f32.mrb[126].mxu0 }
 0x645   :  { %v9330_v34 = vpop.f32.mrb[127].mxu0 }
 0x646   :  { %v13375_v19 = vadd.f32 %v9330_v34, %v9329_v40  ;;  %v5352_v40 = vpop.permute.xlu1 %5351 }
 0x647   :  { %9190 = vmatmul.mubr.msk.bf16.gmra.mrb[232].mxu0 %vm1239_vm0, %v13167_v31 }
 0x648   :  { %6797 = vmatprep.mubr.bf16.mxu0 %v15740_v14 }
 0x649   :  { %9174 = vmatmul.mubr.msk.bf16.gmra.mrb[168].mxu1 %vm1239_vm0, %v13167_v31  ;;  %v5857_v31 = vadd.f32 %v13188_v12, %v5347_v24 }
 0x64a   :  { %6604 = vmatprep.mubr.bf16.mxu1 %v15740_v14  ;;  %v13383_v10 = vpop.f32.mrb[128].mxu0 }
 0x64b   :  { %v13385_v21 = vpop.f32.mrb[129].mxu0 }
 0x64c   :  { %v9348_v43 = vpop.f32.mrb[64].mxu1  ;;  %v13387_v63 = vpop.f32.mrb[130].mxu0 }
 0x64d   :  { %v9349_v1 = vpop.f32.mrb[65].mxu1  ;;  %v13389_v47 = vpop.f32.mrb[131].mxu0 }
 0x64e   :  { %v9350_v35 = vadd.f32 %v9349_v1, %v9348_v43  ;;  %v9351_v32 = vpop.f32.mrb[66].mxu1  ;;  %v5862_v1 = vadd.f32 %v13201_v46, %v5352_v40 }
 0x64f   :  { %v9352_v15 = vpop.f32.mrb[67].mxu1  ;;  %9191 = vmatmul.mubr.msk.bf16.gmra.mrb[236].mxu0 %vm1239_vm0, %v13181_v55 }
 0x650   :  { %v6015_v20 = vadd.f32 %v9350_v35, %v5854_v45  ;;  %v9353_v42 = vadd.f32 %v9352_v15, %v9351_v32  ;;  %6807 = vmatprep.mubr.bf16.mxu0 %v15740_v14  ;;  %v15768_v35 = vmov 1   ;;  %v5357_v32 = vpop.permute.xlu0 %5356 }
 0x651   :  { %9175 = vmatmul.mubr.msk.bf16.gmra.mrb[172].mxu1 %vm1239_vm0, %v13181_v55 }
 0x652   :  { %v13398_v57 = vadd.f32 %v9353_v42, %v5857_v31  ;;  %7586 = vperm.xlu0 %9473, %v6015_v20   ;;  %7043 = vperm.xlu1 %9470, %v6015_v20   ;;  %v13400_v22 = vpop.f32.mrb[132].mxu0  ;;  %v5865_v31 = vadd.f32 %v13206_v11, %v5357_v32  ;;  %v15375_v11 = vmov 3  }
 0x653   :  { %15766 = vst [vmem:[#allocation83_spill] sm:$0xff] %v13400_v22  ;;  %6614 = vmatprep.mubr.bf16.mxu1 %v15740_v14  ;;  %v13403_v34 = vpop.f32.mrb[133].mxu0 }
 0x654   :  { %15767 = vst [vmem:[#allocation65_spill] sm:$0xff] %v13403_v34  ;;  %v9354_v8 = vpop.f32.mrb[68].mxu1  ;;  %v13405_v12 = vpop.f32.mrb[134].mxu0 }
 0x655   :  { %v9355_v24 = vpop.f32.mrb[69].mxu1  ;;  %v13407_v43 = vpop.f32.mrb[135].mxu0 }
 0x656   :  { %v9356_v55 = vadd.f32 %v9355_v24, %v9354_v8  ;;  %v9357_v45 = vpop.f32.mrb[70].mxu1  ;;  %9475 = vset.pattern.permute.xlu0 %v15740_v14  ;;  %9472 = vset.pattern.permute.xlu1 %v15768_v35  ;;  %v5362_v8 = vpop.permute.xlu1 %5361 }
 0x657   :  { %v9358_v15 = vpop.f32.mrb[71].mxu1  ;;  %7048 = vperm.xlu0 %9475, %v13398_v57   ;;  %7330 = vperm.xlu1 %9472, %v6015_v20  }
 0x658   :  { %v13414_v42 = vadd.f32 %v9356_v55, %v5862_v1  ;;  %v9359_v34 = vadd.f32 %v9358_v15, %v9357_v45  ;;  %9192 = vmatmul.mubr.msk.bf16.gmra.mrb[240].mxu0 %vm1239_vm0, %v13199_v25  ;;  %v5870_v45 = vadd.f32 %v13219_v29, %v5362_v8 }
 0x659   :  { %9176 = vmatmul.mubr.msk.bf16.gmra.mrb[176].mxu1 %vm1239_vm0, %v13199_v25  ;;  %6817 = vmatprep.mubr.bf16.mxu0 %v15740_v14 }
 0x65a   :  { %v13421_v46 = vadd.f32 %v9359_v34, %v5865_v31  ;;  %6624 = vmatprep.mubr.bf16.mxu1 %v15740_v14  ;;  %v13424_v40 = vpop.f32.mrb[136].mxu0  ;;  %v5367_v31 = vpop.permute.xlu0 %5366 }
 0x65b   :  { %15769 = vst [vmem:[#allocation84_spill] sm:$0xff] %v13424_v40  ;;  %9476 = vset.pattern.permute.xlu0 %v15768_v35  ;;  %9474 = vset.pattern.permute.xlu1 %v15375_v11  ;;  %v13428_v24 = vpop.f32.mrb[137].mxu0  ;;  %v5873_v22 = vadd.f32 %v13224_v23, %v5367_v31  ;;  %v5372_v23 = vpop.permute.xlu1 %5371 }
 0x65c   :  { %15770 = vst [vmem:[#allocation64_spill] sm:$0xff] %v13428_v24  ;;  %v9360_v1 = vpop.f32.mrb[72].mxu1  ;;  %7334 = vperm.xlu0 %9476, %v13398_v57   ;;  %7842 = vperm.xlu1 %9474, %v6015_v20   ;;  %v13431_v25 = vpop.f32.mrb[138].mxu0 }
 0x65d   :  { %v9361_v34 = vpop.f32.mrb[73].mxu1  ;;  %v13433_v55 = vpop.f32.mrb[139].mxu0 }
 0x65e   :  { %v9362_v32 = vadd.f32 %v9361_v34, %v9360_v1  ;;  %v9363_v15 = vpop.f32.mrb[74].mxu1 }
 0x65f   :  { %v9364_v40 = vpop.f32.mrb[75].mxu1 }
 0x660   :  { %v13437_v11 = vadd.f32 %v9362_v32, %v5870_v45  ;;  %v9365_v24 = vadd.f32 %v9364_v40, %v9363_v15  ;;  %9481 = vset.pattern.permute.xlu0 %v15740_v14  ;;  %9477 = vset.pattern.permute.xlu1 %v15725_v0  ;;  %v5377_v15 = vpop.permute.xlu0 %5376 }
 0x661   :  { %9177 = vmatmul.mubr.msk.bf16.gmra.mrb[180].mxu1 %vm1239_vm0, %v13217_v27  ;;  %7590 = vperm.xlu1 %9477, %v13398_v57   ;;  %v5881_v31 = vadd.f32 %v13242_v4, %v5377_v15 }
 0x662   :  { %v13444_v20 = vadd.f32 %v9365_v24, %v5873_v22  ;;  %7058 = vperm.xlu0 %9481, %v13421_v46   ;;  %6634 = vmatprep.mubr.bf16.mxu1 %v15740_v14  ;;  %v13448_v29 = vpop.f32.mrb[140].mxu0  ;;  %v5878_v24 = vadd.f32 %v13237_v39, %v5372_v23  ;;  %v5382_v23 = vpop.permute.xlu1 %5381 }
 0x663   :  { %15771 = vst [vmem:[#allocation67_spill] sm:$0xff] %v13448_v29  ;;  %v13450_v8 = vpop.f32.mrb[141].mxu0  ;;  %9193 = vmatmul.mubr.msk.bf16.gmra.mrb[244].mxu0 %vm1239_vm0, %v13217_v27 }
 0x664   :  { %15772 = vst [vmem:[#allocation66_spill] sm:$0xff] %v13450_v8  ;;  %v9366_v40 = vpop.f32.mrb[76].mxu1  ;;  %v13454_v1 = vpop.f32.mrb[142].mxu0  ;;  %6827 = vmatprep.mubr.bf16.mxu0 %v15740_v14 }
 0x665   :  { %v9367_v34 = vpop.f32.mrb[77].mxu1  ;;  %9478 = vset.pattern.permute.xlu1 %v15740_v14  ;;  %v13458_v22 = vpop.f32.mrb[143].mxu0 }
 0x666   :  { %15773 = vst [vmem:[#allocation69_spill] sm:$0xff] %v13458_v22  ;;  %v9368_v45 = vadd.f32 %v9367_v34, %v9366_v40  ;;  %9486 = vset.pattern.permute.xlu0 %v15768_v35  ;;  %v9369_v32 = vpop.f32.mrb[78].mxu1  ;;  %7053 = vperm.xlu1 %9478, %v13414_v42  }
 0x667   :  { %7346 = vperm.xlu0 %9486, %v13437_v11   ;;  %v9370_v27 = vpop.f32.mrb[79].mxu1 }
 0x668   :  { %v13465_v8 = vadd.f32 %v9368_v45, %v5878_v24  ;;  %v9371_v29 = vadd.f32 %v9370_v27, %v9369_v32  ;;  %v5886_v45 = vadd.f32 %v13255_v38, %v5382_v23  ;;  %v5387_v27 = vpop.permute.xlu0 %5386  ;;  %v5392_v23 = vpop.permute.xlu1 %5391 }
 0x669   :  { %9178 = vmatmul.mubr.msk.bf16.gmra.mrb[184].mxu1 %vm1239_vm0, %v13235_v37 }
 0x66a   :  { %v13469_v22 = vadd.f32 %v9371_v29, %v5881_v31  ;;  %9479 = vset.pattern.permute.xlu1 %v15768_v35  ;;  %6644 = vmatprep.mubr.bf16.mxu1 %v15740_v14  ;;  %v13473_v39 = vpop.f32.mrb[144].mxu0 }
 0x66b   :  { %15774 = vst [vmem:[#allocation68_spill] sm:$0xff] %v13473_v39  ;;  %9487 = vset.pattern.permute.xlu0 %v15725_v0  ;;  %7338 = vperm.xlu1 %9479, %v13414_v42   ;;  %v13477_v4 = vpop.f32.mrb[145].mxu0 }
 0x66c   :  { %15775 = vst [vmem:[#allocation71_spill] sm:$0xff] %v13477_v4  ;;  %7602 = vperm.xlu0 %9487, %v13437_v11   ;;  %v9372_v40 = vpop.f32.mrb[80].mxu1  ;;  %v13480_v34 = vpop.f32.mrb[146].mxu0  ;;  %9194 = vmatmul.mubr.msk.bf16.gmra.mrb[248].mxu0 %vm1239_vm0, %v13235_v37  ;;  %v5889_v4 = vadd.f32 %v13260_v51, %v5387_v27 }
 0x66d   :  { %15776 = vst [vmem:[#allocation70_spill] sm:$0xff] %v13480_v34  ;;  %v9373_v29 = vpop.f32.mrb[81].mxu1  ;;  %v13484_v24 = vpop.f32.mrb[147].mxu0  ;;  %6837 = vmatprep.mubr.bf16.mxu0 %v15740_v14 }
 0x66e   :  { %15777 = vst [vmem:[#allocation73_spill] sm:$0xff] %v13484_v24  ;;  %v9374_v32 = vadd.f32 %v9373_v29, %v9372_v40  ;;  %v9375_v15 = vpop.f32.mrb[82].mxu1  ;;  %v5397_v27 = vpop.permute.xlu0 %5396 }
 0x66f   :  { %v9376_v31 = vpop.f32.mrb[83].mxu1  ;;  %9480 = vset.pattern.permute.xlu1 %v15725_v0 }
 0x670   :  { %v13490_v39 = vadd.f32 %v9374_v32, %v5886_v45  ;;  %v9377_v34 = vadd.f32 %v9376_v31, %v9375_v15  ;;  %9489 = vset.pattern.permute.xlu0 %v15740_v14  ;;  %7594 = vperm.xlu1 %9480, %v13414_v42  }
 0x671   :  { %7068 = vperm.xlu0 %9489, %v13444_v20   ;;  %9179 = vmatmul.mubr.msk.bf16.gmra.mrb[188].mxu1 %vm1239_vm0, %v13253_v61 }
 0x672   :  { %v13497_v37 = vadd.f32 %v9377_v34, %v5889_v4  ;;  %6880 = vmatprep.mubr.bf16.mxu1 %v15740_v14  ;;  %v13500_v38 = vpop.f32.mrb[148].mxu0  ;;  %v5894_v34 = vadd.f32 %v13266_v3, %v5392_v23  ;;  %v5402_v23 = vpop.permute.xlu1 %5401 }
 0x673   :  { %15778 = vst [vmem:[#allocation72_spill] sm:$0xff] %v13500_v38  ;;  %v13502_v51 = vpop.f32.mrb[149].mxu0 }
 0x674   :  { %15779 = vst [vmem:[#allocation75_spill] sm:$0xff] %v13502_v51  ;;  %v9378_v40 = vpop.f32.mrb[84].mxu1  ;;  %9482 = vset.pattern.permute.xlu1 %v15768_v35  ;;  %v13505_v29 = vpop.f32.mrb[150].mxu0  ;;  %9195 = vmatmul.mubr.msk.bf16.gmra.mrb[252].mxu0 %vm1239_vm0, %v13253_v61  ;;  %v5897_v51 = vadd.f32 %v13268_v49, %v5397_v27  ;;  %v15787_v27 = vmov 3  }
 0x675   :  { %15780 = vst [vmem:[#allocation74_spill] sm:$0xff] %v13505_v29  ;;  %9493 = vset.pattern.permute.xlu0 %v15768_v35  ;;  %v9379_v45 = vpop.f32.mrb[85].mxu1  ;;  %7342 = vperm.xlu1 %9482, %v13421_v46   ;;  %v13511_v4 = vpop.f32.mrb[151].mxu0 }
 0x676   :  { %15781 = vst [vmem:[#allocation77_spill] sm:$0xff] %v13511_v4  ;;  %v9380_v32 = vadd.f32 %v9379_v45, %v9378_v40  ;;  %7354 = vperm.xlu0 %9493, %v13465_v8   ;;  %v9381_v15 = vpop.f32.mrb[86].mxu1 }
 0x677   :  { %v9382_v31 = vpop.f32.mrb[87].mxu1 }
 0x678   :  { %v13516_v38 = vadd.f32 %v9380_v32, %v5894_v34  ;;  %v9383_v61 = vadd.f32 %v9382_v31, %v9381_v15  ;;  %v5407_v31 = vpop.permute.xlu0 %5406 }
 0x679   :  { %9196 = vmatmul.mubr.msk.bf16.vlgmr.msra.gmra.mrb[192].mxu1 %vm1239_vm0, %v13011_v48  ;;  %9483 = vset.pattern.permute.xlu1 %v15725_v0 }
 0x67a   :  { %15782 = vst [vmem:[#allocation76_spill] sm:$0xff] %v13516_v38  ;;  %v13521_v29 = vadd.f32 %v9383_v61, %v5897_v51  ;;  %9495 = vset.pattern.permute.xlu0 %v15740_v14  ;;  %7598 = vperm.xlu1 %9483, %v13421_v46   ;;  %v13525_v3 = vpop.f32.mrb[152].mxu0  ;;  %v5902_v51 = vadd.f32 %v13278_v16, %v5402_v23 }
 0x67b   :  { %15783 = vst [vmem:[#allocation85_spill] sm:$0xff] %v13525_v3  ;;  %7078 = vperm.xlu0 %9495, %v13469_v22   ;;  %6890 = vmatprep.mubr.bf16.mxu1 %v15740_v14  ;;  %v13529_v49 = vpop.f32.mrb[153].mxu0 }
 0x67c   :  { %15784 = vst [vmem:[#allocation78_spill] sm:$0xff] %v13529_v49  ;;  %v9384_v40 = vpop.f32.mrb[88].mxu1  ;;  %v13531_v45 = vpop.f32.mrb[154].mxu0  ;;  %v5905_v49 = vadd.f32 %v13280_v33, %v5407_v31 }
 0x67d   :  { %15785 = vst [vmem:[#allocation86_spill] sm:$0xff] %v13531_v45  ;;  %v9385_v48 = vpop.f32.mrb[89].mxu1  ;;  %v13533_v34 = vpop.f32.mrb[155].mxu0 }
 0x67e   :  { %15786 = vst [vmem:[#allocation79_spill] sm:$0xff] %v13533_v34  ;;  %v9386_v32 = vadd.f32 %v9385_v48, %v9384_v40  ;;  %v9387_v15 = vpop.f32.mrb[90].mxu1  ;;  %9484 = vset.pattern.permute.xlu1 %v15787_v27  ;;  %v5412_v40 = vpop.permute.xlu1 %5411 }
 0x67f   :  { %9500 = vset.pattern.permute.xlu0 %v15768_v35  ;;  %v9388_v61 = vpop.f32.mrb[91].mxu1  ;;  %7854 = vperm.xlu1 %9484, %v13421_v46  }
 0x680   :  { %v13540_v3 = vadd.f32 %v9386_v32, %v5902_v51  ;;  %v9389_v45 = vadd.f32 %v9388_v61, %v9387_v15  ;;  %7362 = vperm.xlu0 %9500, %v13490_v39   ;;  %v5417_v15 = vpop.permute.xlu0 %5416 }
 0x681   :  { %9197 = vmatmul.mubr.msk.bf16.gmra.mrb[196].mxu1 %vm1239_vm0, %v13030_v2  ;;  %v5913_v61 = vadd.f32 %v13294_v44, %v5417_v15 }
 0x682   :  { %v13545_v16 = vadd.f32 %v9389_v45, %v5905_v49  ;;  %6900 = vmatprep.mubr.bf16.mxu1 %v15740_v14  ;;  %v13548_v23 = vpop.f32.mrb[156].mxu0  ;;  %v5910_v45 = vadd.f32 %v13292_v30, %v5412_v40  ;;  %v5422_v40 = vpop.permute.xlu1 %5421 }
 0x683   :  { %15788 = vst [vmem:[#allocation87_spill] sm:$0xff] %v13548_v23  ;;  %9485 = vset.pattern.permute.xlu1 %v15740_v14  ;;  %v13551_v46 = vpop.f32.mrb[157].mxu0 }
 0x684   :  { %15789 = vst [vmem:[#allocation80_spill] sm:$0xff] %v13551_v46  ;;  %9501 = vset.pattern.permute.xlu0 %v15725_v0  ;;  %v9390_v33 = vpop.f32.mrb[92].mxu1  ;;  %7063 = vperm.xlu1 %9485, %v13437_v11   ;;  %v13555_v48 = vpop.f32.mrb[158].mxu0 }
 0x685   :  { %15790 = vst [vmem:[#allocation88_spill] sm:$0xff] %v13555_v48  ;;  %7618 = vperm.xlu0 %9501, %v13490_v39   ;;  %v9391_v2 = vpop.f32.mrb[93].mxu1  ;;  %v13558_v49 = vpop.f32.mrb[159].mxu0 }
 0x686   :  { %15791 = vst [vmem:[#allocation81_spill] sm:$0xff] %v13558_v49  ;;  %v9392_v51 = vadd.f32 %v9391_v2, %v9390_v33  ;;  %v9393_v32 = vpop.f32.mrb[94].mxu1 }
 0x687   :  { %v9394_v31 = vpop.f32.mrb[95].mxu1 }
 0x688   :  { %v13562_v46 = vadd.f32 %v9392_v51, %v5910_v45  ;;  %v9395_v23 = vadd.f32 %v9394_v31, %v9393_v32  ;;  %9488 = vset.pattern.permute.xlu1 %v15787_v27  ;;  %v5427_v32 = vpop.permute.xlu0 %5426 }
 0x689   :  { %9503 = vset.pattern.permute.xlu0 %v15740_v14  ;;  %9198 = vmatmul.mubr.msk.bf16.gmra.mrb[200].mxu1 %vm1239_vm0, %v13052_v52  ;;  %v5918_v52 = vadd.f32 %v13303_v18, %v5422_v40  ;;  %v5921_v31 = vadd.f32 %v13305_v9, %v5427_v32 }
 0x68a   :  { %v13568_v48 = vadd.f32 %v9395_v23, %v5913_v61  ;;  %7858 = vperm.xlu1 %9488, %v13437_v11   ;;  %7088 = vperm.xlu0 %9503, %v13497_v37   ;;  %v13572_v30 = vpop.f32.mrb[160].mxu0 }
 0x68b   :  { %15792 = vst [vmem:[#allocation89_spill] sm:$0xff] %v13572_v30  ;;  %6910 = vmatprep.mubr.bf16.mxu1 %v15740_v14  ;;  %v13575_v44 = vpop.f32.mrb[161].mxu0 }
 0x68c   :  { %15793 = vst [vmem:[#allocation82_spill] sm:$0xff] %v13575_v44  ;;  %v9396_v33 = vpop.f32.mrb[96].mxu1  ;;  %v13577_v2 = vpop.f32.mrb[162].mxu0 }
 0x68d   :  { %15794 = vst [vmem:[#allocation51_spill] sm:$0xff] %v13577_v2  ;;  %v9397_v45 = vpop.f32.mrb[97].mxu1  ;;  %v13579_v51 = vpop.f32.mrb[163].mxu0 }
 0x68e   :  { %15795 = vst [vmem:[#allocation53_spill] sm:$0xff] %v13579_v51  ;;  %v9398_v23 = vadd.f32 %v9397_v45, %v9396_v33  ;;  %9490 = vset.pattern.permute.xlu1 %v15768_v35  ;;  %9507 = vset.pattern.permute.xlu0 %v15768_v35  ;;  %v9399_v11 = vpop.f32.mrb[98].mxu1  ;;  %v5432_v33 = vpop.permute.xlu1 %5431 }
 0x68f   :  { %7350 = vperm.xlu1 %9490, %v13444_v20   ;;  %7370 = vperm.xlu0 %9507, %v13516_v38   ;;  %v9400_v15 = vpop.f32.mrb[99].mxu1 }
 0x690   :  { %v13587_v61 = vadd.f32 %v9398_v23, %v5918_v52  ;;  %v9401_v44 = vadd.f32 %v9400_v15, %v9399_v11  ;;  %v5926_v23 = vadd.f32 %v13313_v26, %v5432_v33  ;;  %v5437_v15 = vpop.permute.xlu0 %5436 }
 0x691   :  { %9199 = vmatmul.mubr.msk.bf16.gmra.mrb[204].mxu1 %vm1239_vm0, %v13069_v41 }
 0x692   :  { %v13591_v18 = vadd.f32 %v9401_v44, %v5921_v31  ;;  %6920 = vmatprep.mubr.bf16.mxu1 %v15740_v14  ;;  %v13594_v40 = vpop.f32.mrb[164].mxu0  ;;  %v5442_v33 = vpop.permute.xlu1 %5441 }
 0x693   :  { %15796 = vst [vmem:[#allocation25_spill] sm:$0xff] %v13594_v40  ;;  %9491 = vset.pattern.permute.xlu1 %v15725_v0  ;;  %9509 = vset.pattern.permute.xlu0 %v15740_v14  ;;  %v13598_v45 = vpop.f32.mrb[165].mxu0  ;;  %v5929_v40 = vadd.f32 %v13315_v5, %v5437_v15 }
 0x694   :  { %15797 = vst [vmem:[#allocation27_spill] sm:$0xff] %v13598_v45  ;;  %7606 = vperm.xlu1 %9491, %v13444_v20   ;;  %7098 = vperm.xlu0 %9509, %v13521_v29   ;;  %v9402_v9 = vpop.f32.mrb[100].mxu1  ;;  %v13602_v52 = vpop.f32.mrb[166].mxu0 }
 0x695   :  { %15798 = vst [vmem:[#allocation21_spill] sm:$0xff] %v13602_v52  ;;  %v9403_v41 = vpop.f32.mrb[101].mxu1  ;;  %v13604_v44 = vpop.f32.mrb[167].mxu0 }
 0x696   :  { %15799 = vst [vmem:[#allocation90_spill] sm:$0xff] %v13604_v44  ;;  %v9404_v11 = vadd.f32 %v9403_v41, %v9402_v9  ;;  %v9405_v32 = vpop.f32.mrb[102].mxu1 }
 0x697   :  { %v9406_v31 = vpop.f32.mrb[103].mxu1 }
 0x698   :  { %v13608_v30 = vadd.f32 %v9404_v11, %v5926_v23  ;;  %v9407_v45 = vadd.f32 %v9406_v31, %v9405_v32  ;;  %9492 = vset.pattern.permute.xlu1 %v15740_v14  ;;  %9514 = vset.pattern.permute.xlu0 %v15768_v35  ;;  %v5447_v32 = vpop.permute.xlu0 %5446 }
 0x699   :  { %7073 = vperm.xlu1 %9492, %v13465_v8   ;;  %7378 = vperm.xlu0 %9514, %v13540_v3   ;;  %v5937_v31 = vadd.f32 %v13325_v53, %v5447_v32 }
 0x69a   :  { %v13614_v44 = vadd.f32 %v9407_v45, %v5929_v40  ;;  %9200 = vmatmul.mubr.msk.bf16.gmra.mrb[208].mxu1 %vm1239_vm0, %v13083_v13  ;;  %v13618_v26 = vpop.f32.mrb[168].mxu0  ;;  %v5934_v45 = vadd.f32 %v13323_v17, %v5442_v33  ;;  %v5452_v33 = vpop.permute.xlu1 %5451 }
 0x69b   :  { %15801 = vst [vmem:[#allocation23_spill] sm:$0xff] %v13618_v26  ;;  %6930 = vmatprep.mubr.bf16.mxu1 %v15740_v14  ;;  %v13621_v5 = vpop.f32.mrb[169].mxu0 }
 0x69c   :  { %15800 = vst [vmem:[#allocation91_spill] sm:$0xff] %v13614_v44  ;;  %15802 = vst [vmem:[#allocation29_spill] sm:$0xff] %v13621_v5  ;;  %v9408_v9 = vpop.f32.mrb[104].mxu1  ;;  %v13623_v41 = vpop.f32.mrb[170].mxu0 }
 0x69d   :  { %15803 = vst [vmem:[#allocation41_spill] sm:$0xff] %v13623_v41  ;;  %9494 = vset.pattern.permute.xlu1 %v15725_v0  ;;  %9515 = vset.pattern.permute.xlu0 %v15725_v0  ;;  %v9409_v23 = vpop.f32.mrb[105].mxu1  ;;  %v13627_v40 = vpop.f32.mrb[171].mxu0 }
 0x69e   :  { %15804 = vst [vmem:[#allocation13_spill] sm:$0xff] %v13627_v40  ;;  %v9410_v13 = vadd.f32 %v9409_v23, %v9408_v9  ;;  %7610 = vperm.xlu1 %9494, %v13465_v8   ;;  %7634 = vperm.xlu0 %9515, %v13540_v3   ;;  %v9411_v11 = vpop.f32.mrb[106].mxu1  ;;  %v5457_v32 = vpop.permute.xlu0 %5456  ;;  %v9780_v40 = vld [vmem:[%s15200_s8 + $0x58] sm:$0xff]  }
 0x69f   :  { %v9412_v15 = vpop.f32.mrb[107].mxu1 }
 0x6a0   :  { %v13633_v5 = vadd.f32 %v9410_v13, %v5934_v45  ;;  %v9413_v26 = vadd.f32 %v9412_v15, %v9411_v11  ;;  %v5942_v45 = vadd.f32 %v13333_v58, %v5452_v33  ;;  %v5462_v33 = vpop.permute.xlu1 %5461 }
 0x6a2   :  { %v13635_v41 = vadd.f32 %v9413_v26, %v5937_v31  ;;  %9201 = vmatmul.mubr.msk.bf16.gmra.mrb[212].mxu1 %vm1239_vm0, %v13097_v60  ;;  %9496 = vset.pattern.permute.xlu1 %v15768_v35  ;;  %v13640_v17 = vpop.f32.mrb[172].mxu0  ;;  %v5945_v31 = vadd.f32 %v13335_v54, %v5457_v32  ;;  %v5467_v32 = vpop.permute.xlu0 %5466 }
 0x6a3   :  { %15806 = vst [vmem:[#allocation93_spill] sm:$0xff] %v13640_v17  ;;  %9517 = vset.pattern.permute.xlu0 %v15740_v14  ;;  %7358 = vperm.xlu1 %9496, %v13469_v22   ;;  %v13644_v9 = vpop.f32.mrb[173].mxu0 }
 0x6a4   :  { %15805 = vst [vmem:[#allocation92_spill] sm:$0xff] %v13635_v41  ;;  %15807 = vst [vmem:[#allocation94_spill] sm:$0xff] %v13644_v9  ;;  %7108 = vperm.xlu0 %9517, %v13545_v16   ;;  %v9414_v53 = vpop.f32.mrb[108].mxu1  ;;  %6940 = vmatprep.mubr.bf16.mxu1 %v15740_v14  ;;  %v13648_v26 = vpop.f32.mrb[174].mxu0 }
 0x6a5   :  { %15808 = vst [vmem:[#allocation95_spill] sm:$0xff] %v13648_v26  ;;  %v9415_v23 = vpop.f32.mrb[109].mxu1  ;;  %v13650_v60 = vpop.f32.mrb[175].mxu0 }
 0x6a6   :  { %15809 = vst [vmem:[#allocation19_spill] sm:$0xff] %v13650_v60  ;;  %v9416_v13 = vadd.f32 %v9415_v23, %v9414_v53  ;;  %v9417_v11 = vpop.f32.mrb[110].mxu1 }
 0x6a7   :  { %9497 = vset.pattern.permute.xlu1 %v15725_v0  ;;  %v9418_v15 = vpop.f32.mrb[111].mxu1 }
 0x6a8   :  { %v13655_v9 = vadd.f32 %v9416_v13, %v5942_v45  ;;  %9521 = vset.pattern.permute.xlu0 %v15768_v35  ;;  %v9419_v17 = vadd.f32 %v9418_v15, %v9417_v11  ;;  %7614 = vperm.xlu1 %9497, %v13469_v22  }
 0x6a9   :  { %7386 = vperm.xlu0 %9521, %v13562_v46  }
 0x6aa   :  { %15810 = vst [vmem:[#allocation44_spill] sm:$0xff] %v13655_v9  ;;  %v13660_v60 = vadd.f32 %v9419_v17, %v5945_v31  ;;  %9202 = vmatmul.mubr.msk.bf16.gmra.mrb[216].mxu1 %vm1239_vm0, %v13111_v6  ;;  %v13664_v58 = vpop.f32.mrb[176].mxu0  ;;  %v5950_v6 = vadd.f32 %v13343_v36, %v5462_v33  ;;  %v5953_v31 = vadd.f32 %v13345_v7, %v5467_v32  ;;  %v9776_v36 = vld [vmem:[%s15200_s8 + $0x38] sm:$0xff]   ;;  %v5472_v33 = vpop.permute.xlu1 %5471 }
 0x6ab   :  { %15812 = vst [vmem:[#allocation49_spill] sm:$0xff] %v13664_v58  ;;  %6950 = vmatprep.mubr.bf16.mxu1 %v15740_v14  ;;  %v13667_v54 = vpop.f32.mrb[177].mxu0 }
 0x6ac   :  { %15811 = vst [vmem:[#allocation8_spill] sm:$0xff] %v13660_v60  ;;  %15813 = vst [vmem:[#allocation56_spill] sm:$0xff] %v13667_v54  ;;  %9498 = vset.pattern.permute.xlu1 %v15787_v27  ;;  %v9420_v53 = vpop.f32.mrb[112].mxu1  ;;  %v13670_v23 = vpop.f32.mrb[178].mxu0 }
 0x6ad   :  { %15814 = vst [vmem:[#allocation37_spill] sm:$0xff] %v13670_v23  ;;  %9523 = vset.pattern.permute.xlu0 %v15740_v14  ;;  %7870 = vperm.xlu1 %9498, %v13469_v22   ;;  %v9421_v17 = vpop.f32.mrb[113].mxu1  ;;  %v13674_v45 = vpop.f32.mrb[179].mxu0 }
 0x6ae   :  { %15815 = vst [vmem:[#allocation24_spill] sm:$0xff] %v13674_v45  ;;  %7118 = vperm.xlu0 %9523, %v13568_v48   ;;  %v9422_v13 = vadd.f32 %v9421_v17, %v9420_v53  ;;  %v9423_v11 = vpop.f32.mrb[114].mxu1 }
 0x6af   :  { %v9424_v15 = vpop.f32.mrb[115].mxu1 }
 0x6b0   :  { %v13679_v54 = vadd.f32 %v9422_v13, %v5950_v6  ;;  %v9425_v58 = vadd.f32 %v9424_v15, %v9423_v11  ;;  %v5958_v13 = vadd.f32 %v13353_v59, %v5472_v33  ;;  %v5477_v15 = vpop.permute.xlu0 %5476  ;;  %v9777_v59 = vld [vmem:[%s15200_s8 + $0x40] sm:$0xff]  }
 0x6b1   :  { %9499 = vset.pattern.permute.xlu1 %v15740_v14 }
 0x6b2   :  { %v13682_v23 = vadd.f32 %v9425_v58, %v5953_v31  ;;  %9528 = vset.pattern.permute.xlu0 %v15768_v35  ;;  %9203 = vmatmul.mubr.msk.bf16.gmra.mrb[220].mxu1 %vm1239_vm0, %v9776_v36  ;;  %v13689_v22 = vpop.f32.mrb[180].mxu0  ;;  %v5961_v36 = vadd.f32 %v13355_v28, %v5477_v15 }
 0x6b3   :  { %15817 = vst [vmem:[#allocation38_spill] sm:$0xff] %v13689_v22  ;;  %7083 = vperm.xlu1 %9499, %v13490_v39   ;;  %7394 = vperm.xlu0 %9528, %v13587_v61   ;;  %v13693_v7 = vpop.f32.mrb[181].mxu0 }
 0x6b4   :  { %15816 = vst [vmem:[#allocation16_spill] sm:$0xff] %v13682_v23  ;;  %15818 = vst [vmem:[#allocation9_spill] sm:$0xff] %v13693_v7  ;;  %v9426_v53 = vpop.f32.mrb[116].mxu1  ;;  %6960 = vmatprep.mubr.bf16.mxu1 %v15740_v14  ;;  %v13696_v58 = vpop.f32.mrb[182].mxu0 }
 0x6b5   :  { %15819 = vst [vmem:[#allocation39_spill] sm:$0xff] %v13696_v58  ;;  %v9427_v17 = vpop.f32.mrb[117].mxu1  ;;  %v13698_v6 = vpop.f32.mrb[183].mxu0 }
 0x6b6   :  { %15820 = vst [vmem:[#allocation10_spill] sm:$0xff] %v13698_v6  ;;  %v9428_v11 = vadd.f32 %v9427_v17, %v9426_v53  ;;  %v9429_v32 = vpop.f32.mrb[118].mxu1  ;;  %v5482_v53 = vpop.permute.xlu1 %5481 }
 0x6b7   :  { %9502 = vset.pattern.permute.xlu1 %v15787_v27  ;;  %9529 = vset.pattern.permute.xlu0 %v15725_v0  ;;  %v9430_v31 = vpop.f32.mrb[119].mxu1 }
 0x6b8   :  { %v13704_v7 = vadd.f32 %v9428_v11, %v5958_v13  ;;  %7874 = vperm.xlu1 %9502, %v13490_v39   ;;  %7650 = vperm.xlu0 %9529, %v13587_v61   ;;  %v9431_v22 = vadd.f32 %v9430_v31, %v9429_v32  ;;  %v5966_v11 = vadd.f32 %v13363_v56, %v5482_v53  ;;  %v5487_v31 = vpop.permute.xlu0 %5486 }
 0x6ba   :  { %15821 = vst [vmem:[#allocation40_spill] sm:$0xff] %v13704_v7  ;;  %v13708_v6 = vadd.f32 %v9431_v22, %v5961_v36  ;;  %9204 = vmatmul.mubr.msk.bf16.gmra.mrb[224].mxu1 %vm1239_vm0, %v9777_v59  ;;  %v13714_v33 = vpop.f32.mrb[184].mxu0  ;;  %v5969_v59 = vadd.f32 %v13365_v62, %v5487_v31  ;;  %v5492_v53 = vpop.permute.xlu1 %5491  ;;  %v9778_v62 = vld [vmem:[%s15200_s8 + $0x48] sm:$0xff]  }
 0x6bb   :  { %15823 = vst [vmem:[#allocation45_spill] sm:$0xff] %v13714_v33  ;;  %6970 = vmatprep.mubr.bf16.mxu1 %v15740_v14  ;;  %v13717_v28 = vpop.f32.mrb[185].mxu0 }
 0x6bc   :  { %15822 = vst [vmem:[#allocation11_spill] sm:$0xff] %v13708_v6  ;;  %15824 = vst [vmem:[#allocation12_spill] sm:$0xff] %v13717_v28  ;;  %9504 = vset.pattern.permute.xlu1 %v15768_v35  ;;  %9531 = vset.pattern.permute.xlu0 %v15740_v14  ;;  %v9432_v39 = vpop.f32.mrb[120].mxu1  ;;  %v13721_v22 = vpop.f32.mrb[186].mxu0 }
 0x6bd   :  { %15825 = vst [vmem:[#allocation57_spill] sm:$0xff] %v13721_v22  ;;  %7366 = vperm.xlu1 %9504, %v13497_v37   ;;  %7128 = vperm.xlu0 %9531, %v13591_v18   ;;  %v9433_v17 = vpop.f32.mrb[121].mxu1  ;;  %v13725_v13 = vpop.f32.mrb[187].mxu0 }
 0x6be   :  { %15826 = vst [vmem:[#allocation55_spill] sm:$0xff] %v13725_v13  ;;  %v9434_v32 = vadd.f32 %v9433_v17, %v9432_v39  ;;  %v9435_v15 = vpop.f32.mrb[122].mxu1 }
 0x6bf   :  { %v9436_v36 = vpop.f32.mrb[123].mxu1 }
 0x6c0   :  { %v13729_v28 = vadd.f32 %v9434_v32, %v5966_v11  ;;  %v9437_v33 = vadd.f32 %v9436_v36, %v9435_v15  ;;  %v5974_v15 = vadd.f32 %v13373_v50, %v5492_v53 }
 0x6c1   :  { %9505 = vset.pattern.permute.xlu1 %v15725_v0  ;;  %9535 = vset.pattern.permute.xlu0 %v15768_v35 }
 0x6c2   :  { %15827 = vst [vmem:[#allocation47_spill] sm:$0xff] %v13729_v28  ;;  %v13733_v22 = vadd.f32 %v9437_v33, %v5969_v59  ;;  %7622 = vperm.xlu1 %9505, %v13497_v37   ;;  %7402 = vperm.xlu0 %9535, %v13608_v30   ;;  %v13737_v56 = vpop.f32.mrb[188].mxu0  ;;  %v5497_v59 = vpop.permute.xlu0 %5496 }
 0x6c3   :  { %15829 = vst [vmem:[#allocation63_spill] sm:$0xff] %v13737_v56  ;;  %9205 = vmatmul.mubr.msk.bf16.gmra.mrb[228].mxu1 %vm1239_vm0, %v9778_v62  ;;  %v13743_v39 = vpop.f32.mrb[189].mxu0 }
 0x6c4   :  { %15828 = vst [vmem:[#allocation46_spill] sm:$0xff] %v13733_v22  ;;  %15830 = vst [vmem:[#allocation48_spill] sm:$0xff] %v13743_v39  ;;  %v9438_v17 = vpop.f32.mrb[124].mxu1  ;;  %6980 = vmatprep.mubr.bf16.mxu1 %v15740_v14  ;;  %v13746_v33 = vpop.f32.mrb[190].mxu0  ;;  %v5977_v39 = vadd.f32 %v13375_v19, %v5497_v59  ;;  %v9779_v19 = vld [vmem:[%s15200_s8 + $0x50] sm:$0xff]  }
 0x6c5   :  { %15831 = vst [vmem:[#allocation60_spill] sm:$0xff] %v13746_v33  ;;  %v9439_v11 = vpop.f32.mrb[125].mxu1  ;;  %v13748_v32 = vpop.f32.mrb[191].mxu0 }
 0x6c6   :  { %15832 = vst [vmem:[#allocation50_spill] sm:$0xff] %v13748_v32  ;;  %9506 = vset.pattern.permute.xlu1 %v15740_v14  ;;  %9537 = vset.pattern.permute.xlu0 %v15740_v14  ;;  %v9440_v31 = vadd.f32 %v9439_v11, %v9438_v17  ;;  %v9441_v36 = vpop.f32.mrb[126].mxu1 }
 0x6c7   :  { %7093 = vperm.xlu1 %9506, %v13516_v38   ;;  %7138 = vperm.xlu0 %9537, %v13614_v44   ;;  %v9442_v62 = vpop.f32.mrb[127].mxu1 }
 0x6c8   :  { %v13756_v33 = vadd.f32 %v9440_v31, %v5974_v15  ;;  %v9443_v56 = vadd.f32 %v9442_v62, %v9441_v36 }
 0x6ca   :  { %15833 = vst [vmem:[#allocation52_spill] sm:$0xff] %v13756_v33  ;;  %v13758_v32 = vadd.f32 %v9443_v56, %v5977_v39  ;;  %v13760_v50 = vpop.f32.mrb[192].mxu0 }
 0x6cb   :  { %9508 = vset.pattern.permute.xlu1 %v15725_v0  ;;  %9541 = vset.pattern.permute.xlu0 %v15768_v35  ;;  %v13764_v53 = vpop.f32.mrb[193].mxu0 }
 0x6cc   :  { %15834 = vst [vmem:[#allocation15_spill] sm:$0xff] %v13758_v32  ;;  %7626 = vperm.xlu1 %9508, %v13516_v38   ;;  %7410 = vperm.xlu0 %9541, %v13633_v5   ;;  %v6496_v17 = vpop.f32.mrb[128].mxu1  ;;  %v13768_v11 = vpop.f32.mrb[194].mxu0 }
 0x6cd   :  { %9206 = vmatmul.mubr.msk.bf16.gmra.mrb[232].mxu1 %vm1239_vm0, %v9779_v19  ;;  %v6498_v56 = vpop.f32.mrb[129].mxu1  ;;  %v13774_v39 = vpop.f32.mrb[195].mxu0 }
 0x6ce   :  { %6990 = vmatprep.mubr.bf16.mxu1 %v15740_v14  ;;  %v6500_v15 = vpop.f32.mrb[130].mxu1 }
 0x6cf   :  { %v6502_v31 = vpop.f32.mrb[131].mxu1 }
 0x6d0   :  { %9510 = vset.pattern.permute.xlu1 %v15768_v35  ;;  %9542 = vset.pattern.permute.xlu0 %v15740_v14 }
 0x6d1   :  { %7374 = vperm.xlu1 %9510, %v13521_v29   ;;  %7148 = vperm.xlu0 %9542, %v13635_v41   ;;  %v7044_v36 = vpop.permute.xlu1 %7043  ;;  %v7587_v59 = vpop.permute.xlu0 %7586 }
 0x6d2   :  { %v13781_v62 = vpop.f32.mrb[196].mxu0  ;;  %v7201_v45 = vadd.f32 %v7044_v36, %v13383_v10  ;;  %v7202_v26 = vadd.f32 %v7044_v36, %v13385_v21 }
 0x6d3   :  { %v13783_v19 = vpop.f32.mrb[197].mxu0 }
 0x6d4   :  { %v13785_v13 = vpop.f32.mrb[132].mxu1  ;;  %v13787_v58 = vpop.f32.mrb[198].mxu0  ;;  %v7265_v32 = vmax.f32 %v7201_v45, 0.0  ;;  %v7266_v34 = vmax.f32 %v7202_v26, 0.0 }
 0x6d5   :  { %9207 = vmatmul.mubr.msk.bf16.gmra.mrb[236].mxu1 %vm1239_vm0, %v9780_v40  ;;  %9511 = vset.pattern.permute.xlu1 %v15725_v0  ;;  %v13796_v52 = vpop.f32.mrb[133].mxu1  ;;  %v13798_v51 = vpop.f32.mrb[199].mxu0 }
 0x6d6   :  { %9545 = vset.pattern.permute.xlu0 %v15768_v35  ;;  %7630 = vperm.xlu1 %9511, %v13521_v29   ;;  %v7331_v2 = vpop.permute.xlu1 %7330  ;;  %v7049_v10 = vpop.permute.xlu0 %7048 }
 0x6d7   :  { %7418 = vperm.xlu0 %9545, %v13655_v9   ;;  %v7203_v21 = vadd.f32 %v7049_v10, %v13387_v63  ;;  %v7204_v36 = vadd.f32 %v7049_v10, %v13389_v47  ;;  %v13805_v49 = vpop.f32.mrb[134].mxu1  ;;  %7000 = vmatprep.mubr.bf16.mxu1 %v15740_v14  ;;  %v7457_v24 = vadd.f32 %v7331_v2, %v6496_v17 }
 0x6d8   :  { %v13808_v40 = vpop.f32.mrb[135].mxu1  ;;  %v7458_v44 = vadd.f32 %v7331_v2, %v6498_v56 }
 0x6d9   :  { %v7267_v4 = vmax.f32 %v7203_v21, 0.0  ;;  %v7268_v41 = vmax.f32 %v7204_v36, 0.0  ;;  %v7713_v36 = vadd.f32 %v7587_v59, %v13760_v50 }
 0x6da   :  { %9512 = vset.pattern.permute.xlu1 %v15787_v27  ;;  %v13811_v38 = vpop.f32.mrb[200].mxu0 }
 0x6db   :  { %v8097_v9 = vpack.c.bf16 %v7267_v4, %v7265_v32  ;;  %9546 = vset.pattern.permute.xlu0 %v15740_v14  ;;  %7886 = vperm.xlu1 %9512, %v13521_v29   ;;  %v13815_v63 = vpop.permute.xlu1 %7842  ;;  %v7335_v47 = vpop.permute.xlu0 %7334  ;;  %v8098_v10 = vpack.c.bf16 %v7268_v41, %v7266_v34  ;;  %v9781_v4 = vld [vmem:[%s15200_s8 + $0x60] sm:$0xff]   ;;  %v7521_v34 = vmax.f32 %v7457_v24, 0.0  ;;  %v7522_v41 = vmax.f32 %v7458_v44, 0.0 }
 0x6dc   :  { %15835 = vst [vmem:[#allocation34_spill] sm:$0xff] %v13815_v63  ;;  %7158 = vperm.xlu0 %9546, %v13660_v60   ;;  %v7459_v26 = vadd.f32 %v7335_v47, %v6500_v15  ;;  %v7460_v45 = vadd.f32 %v7335_v47, %v6502_v31  ;;  %v13818_v21 = vpop.f32.mrb[136].mxu1  ;;  %v13820_v2 = vpop.f32.mrb[201].mxu0  ;;  %v7714_v47 = vadd.f32 %v7587_v59, %v13764_v53  ;;  %v7777_v59 = vmax.f32 %v7713_v36, 0.0  ;;  %v9782_v36 = vld [vmem:[%s15200_s8 + $0x68] sm:$0xff]  }
 0x6dd   :  { %9208 = vmatmul.mubr.msk.bf16.gmra.mrb[240].mxu1 %vm1239_vm0, %v9781_v4  ;;  %8305 = vmatprep.subr.bf16.mxu0 %v8098_v10  ;;  %v13826_v29 = vpop.f32.mrb[137].mxu1  ;;  %v13828_v32 = vpop.f32.mrb[202].mxu0 }
 0x6de   :  { %v7523_v17 = vmax.f32 %v7459_v26, 0.0  ;;  %v7524_v56 = vmax.f32 %v7460_v45, 0.0  ;;  %8306 = vmatpush1.bf16.msra.mxu0 %v8097_v9  ;;  %7010 = vmatprep.mubr.bf16.mxu1 %v15740_v14  ;;  %v13831_v15 = vpop.f32.mrb[138].mxu1  ;;  %v13833_v31 = vpop.f32.mrb[203].mxu0  ;;  %v7778_v45 = vmax.f32 %v7714_v47, 0.0 }
 0x6df   :  { %9513 = vset.pattern.permute.xlu1 %v15740_v14  ;;  %v13838_v10 = vpop.f32.mrb[139].mxu1 }
 0x6e0   :  { %v8099_v4 = vpack.c.bf16 %v7523_v17, %v7521_v34  ;;  %9549 = vset.pattern.permute.xlu0 %v15768_v35  ;;  %7103 = vperm.xlu1 %9513, %v13540_v3   ;;  %v7591_v24 = vpop.permute.xlu1 %7590  ;;  %v8100_v44 = vpack.c.bf16 %v7524_v56, %v7522_v41 }
 0x6e1   :  { %7426 = vperm.xlu0 %9549, %v13679_v54   ;;  %v7715_v9 = vadd.f32 %v7591_v24, %v13768_v11  ;;  %v7716_v26 = vadd.f32 %v7591_v24, %v13774_v39  ;;  %v7059_v50 = vpop.permute.xlu0 %7058  ;;  %v15839_v24 = vld [vmem:[#allocation65_spill] sm:$0xff] }
 0x6e2   :  { %8378 = vmatprep.subr.bf16.mxu1 %v8100_v44  ;;  %v13845_v53 = vpop.f32.mrb[204].mxu0  ;;  %v7207_v60 = vadd.f32 %v7059_v50, %v13405_v12  ;;  %v7208_v41 = vadd.f32 %v7059_v50, %v13407_v43 }
 0x6e3   :  { %v7779_v63 = vmax.f32 %v7715_v9, 0.0  ;;  %v7780_v34 = vmax.f32 %v7716_v26, 0.0  ;;  %8379 = vmatpush1.bf16.msra.mxu1 %v8099_v4  ;;  %v13847_v17 = vpop.f32.mrb[205].mxu0  ;;  %v15838_v4 = vld [vmem:[#allocation83_spill] sm:$0xff] }
 0x6e4   :  { %9516 = vset.pattern.permute.xlu1 %v15787_v27  ;;  %v13852_v11 = vpop.f32.mrb[140].mxu1  ;;  %v13854_v39 = vpop.f32.mrb[206].mxu0 }
 0x6e5   :  { %v13856_v56 = vpack.c.bf16 %v7779_v63, %v7777_v59  ;;  %9550 = vset.pattern.permute.xlu0 %v15740_v14  ;;  %9209 = vmatmul.mubr.msk.bf16.gmra.mrb[244].mxu1 %vm1239_vm0, %v9782_v36  ;;  %v7054_v47 = vpop.permute.xlu1 %7053  ;;  %v13863_v12 = vpop.f32.mrb[141].mxu1  ;;  %v13865_v43 = vpack.c.bf16 %v7780_v34, %v7778_v45  ;;  %v7271_v45 = vmax.f32 %v7207_v60, 0.0  ;;  %v7272_v34 = vmax.f32 %v7208_v41, 0.0 }
 0x6e6   :  { %7890 = vperm.xlu1 %9516, %v13540_v3   ;;  %7168 = vperm.xlu0 %9550, %v13682_v23   ;;  %v7205_v63 = vadd.f32 %v7054_v47, %v15838_v4  ;;  %v7206_v44 = vadd.f32 %v7054_v47, %v15839_v24  ;;  %v13871_v9 = vpop.permute.xlu0 %7346  ;;  %v13873_v26 = vpop.f32.mrb[142].mxu1 }
 0x6e7   :  { %15836 = vst [vmem:[#allocation54_spill] sm:$0xff] %v13856_v56  ;;  %15837 = vst [vmem:[#allocation26_spill] sm:$0xff] %v13865_v43  ;;  %7020 = vmatprep.mubr.bf16.mxu1 %v15740_v14  ;;  %v13876_v50 = vpop.f32.mrb[143].mxu1  ;;  %v13878_v59 = vpop.f32.mrb[207].mxu0 }
 0x6e8   :  { %15840 = vst [vmem:[#allocation36_spill] sm:$0xff] %v13878_v59  ;;  %v7269_v36 = vmax.f32 %v7205_v63, 0.0  ;;  %v7270_v3 = vmax.f32 %v7206_v44, 0.0  ;;  %v9783_v63 = vld [vmem:[%s15200_s8 + $0x70] sm:$0xff]  }
 0x6ea   :  { %v8105_v56 = vpack.c.bf16 %v7271_v45, %v7269_v36  ;;  %9518 = vset.pattern.permute.xlu1 %v15768_v35  ;;  %9553 = vset.pattern.permute.xlu0 %v15768_v35  ;;  %v7339_v47 = vpop.permute.xlu1 %7338  ;;  %v8106_v4 = vpack.c.bf16 %v7272_v34, %v7270_v3  ;;  %v13882_v24 = vpop.f32.mrb[208].mxu0 }
 0x6eb   :  { %15841 = vst [vmem:[#allocation17_spill] sm:$0xff] %v13882_v24  ;;  %7382 = vperm.xlu1 %9518, %v13545_v16   ;;  %7434 = vperm.xlu0 %9553, %v13704_v7   ;;  %v13886_v43 = vpop.permute.xlu0 %7602  ;;  %v13888_v23 = vpop.f32.mrb[209].mxu0  ;;  %v7462_v7 = vadd.f32 %v7339_v47, %v13796_v52 }
 0x6ec   :  { %15842 = vst [vmem:[#allocation28_spill] sm:$0xff] %v13888_v23  ;;  %8307 = vmatprep.subr.bf16.mxu0 %v8106_v4  ;;  %v13890_v60 = vpop.f32.mrb[144].mxu1  ;;  %v13892_v41 = vpop.f32.mrb[210].mxu0 }
 0x6ed   :  { %15843 = vst [vmem:[#allocation22_spill] sm:$0xff] %v13890_v60  ;;  %15844 = vst [vmem:[#allocation31_spill] sm:$0xff] %v13892_v41  ;;  %9210 = vmatmul.mubr.msk.bf16.gmra.mrb[248].mxu1 %vm1239_vm0, %v9783_v63  ;;  %8308 = vmatpush1.bf16.msra.mxu0 %v8105_v56  ;;  %v13898_v44 = vpop.f32.mrb[145].mxu1  ;;  %v13900_v45 = vpop.f32.mrb[211].mxu0  ;;  %v7461_v63 = vadd.f32 %v7339_v47, %v13785_v13 }
 0x6ee   :  { %15845 = vst [vmem:[#allocation59_spill] sm:$0xff] %v13898_v44  ;;  %15846 = vst [vmem:[#allocation33_spill] sm:$0xff] %v13900_v45  ;;  %7030 = vmatprep.mubr.bf16.mxu1 %v15740_v14  ;;  %v13903_v34 = vpop.f32.mrb[146].mxu1 }
 0x6ef   :  { %15847 = vst [vmem:[#allocation30_spill] sm:$0xff] %v13903_v34  ;;  %9519 = vset.pattern.permute.xlu1 %v15725_v0  ;;  %9554 = vset.pattern.permute.xlu0 %v15740_v14  ;;  %v7595_v36 = vpop.permute.xlu1 %7594  ;;  %v13907_v3 = vpop.f32.mrb[147].mxu1 }
 0x6f0   :  { %15848 = vst [vmem:[#allocation62_spill] sm:$0xff] %v13907_v3  ;;  %7638 = vperm.xlu1 %9519, %v13545_v16   ;;  %7178 = vperm.xlu0 %9554, %v13708_v6   ;;  %v7069_v56 = vpop.permute.xlu0 %7068  ;;  %v9784_v6 = vld [vmem:[%s15200_s8 + $0x78] sm:$0xff]   ;;  %v7526_v3 = vmax.f32 %v7462_v7, 0.0 }
 0x6f2   :  { %v13911_v4 = vpop.f32.mrb[212].mxu0 }
 0x6f3   :  { %15849 = vst [vmem:[#allocation42_spill] sm:$0xff] %v13911_v4  ;;  %v13915_v45 = vpop.f32.mrb[213].mxu0 }
 0x6f4   :  { %15850 = vst [vmem:[#allocation14_spill] sm:$0xff] %v13915_v45  ;;  %9520 = vset.pattern.permute.xlu1 %v15740_v14  ;;  %7183 = vperm.xlu0 %9554, %v13729_v28   ;;  %v7343_v41 = vpop.permute.xlu1 %7342  ;;  %v13919_v23 = vpop.f32.mrb[148].mxu1 }
 0x6f5   :  { %15851 = vst [vmem:[#allocation20_spill] sm:$0xff] %v13919_v23  ;;  %7113 = vperm.xlu1 %9520, %v13562_v46   ;;  %9211 = vmatmul.mubr.msk.bf16.gmra.mrb[252].mxu1 %vm1239_vm0, %v9784_v6  ;;  %v7463_v13 = vadd.f32 %v7343_v41, %v13805_v49  ;;  %v7464_v52 = vadd.f32 %v7343_v41, %v13808_v40  ;;  %v13928_v47 = vpop.permute.xlu0 %7354  ;;  %v13930_v45 = vpop.f32.mrb[149].mxu1  ;;  %v7525_v23 = vmax.f32 %v7461_v63, 0.0 }
 0x6f6   :  { %v13932_v4 = vpop.f32.mrb[150].mxu1  ;;  %v13934_v24 = vpop.f32.mrb[214].mxu0  ;;  %v7717_v49 = vadd.f32 %v7595_v36, %v13781_v62  ;;  %v7718_v6 = vadd.f32 %v7595_v36, %v13783_v19 }
 0x6f7   :  { %15852 = vst [vmem:[#allocation35_spill] sm:$0xff] %v13934_v24  ;;  %v7527_v34 = vmax.f32 %v7463_v13, 0.0  ;;  %v7528_v44 = vmax.f32 %v7464_v52, 0.0  ;;  %v13936_v60 = vpop.f32.mrb[151].mxu1  ;;  %v13938_v59 = vpop.f32.mrb[215].mxu0 }
 0x6f8   :  { %15853 = vst [vmem:[#allocation43_spill] sm:$0xff] %v13938_v59  ;;  %9557 = vset.pattern.permute.xlu0 %v15768_v35 }
 0x6f9   :  { %v8107_v40 = vpack.c.bf16 %v7527_v34, %v7525_v23  ;;  %9522 = vset.pattern.permute.xlu1 %v15725_v0  ;;  %7446 = vperm.xlu0 %9557, %v13733_v22   ;;  %v7599_v41 = vpop.permute.xlu1 %7598  ;;  %v8108_v63 = vpack.c.bf16 %v7528_v44, %v7526_v3  ;;  %v7781_v23 = vmax.f32 %v7717_v49, 0.0  ;;  %v7782_v34 = vmax.f32 %v7718_v6, 0.0 }
 0x6fa   :  { %7642 = vperm.xlu1 %9522, %v13562_v46   ;;  %v7719_v7 = vadd.f32 %v7599_v41, %v13787_v58  ;;  %v7720_v13 = vadd.f32 %v7599_v41, %v13798_v51  ;;  %v13948_v52 = vpop.permute.xlu0 %7078  ;;  %v13950_v62 = vpop.f32.mrb[216].mxu0 }
 0x6fb   :  { %8380 = vmatprep.subr.bf16.mxu1 %v8108_v63  ;;  %v13952_v19 = vpop.f32.mrb[217].mxu0 }
 0x6fc   :  { %v7783_v36 = vmax.f32 %v7719_v7, 0.0  ;;  %v7784_v59 = vmax.f32 %v7720_v13, 0.0  ;;  %8381 = vmatpush1.bf16.msra.mxu1 %v8107_v40  ;;  %v13954_v24 = vpop.f32.mrb[152].mxu1  ;;  %v13956_v44 = vpop.f32.mrb[218].mxu0  ;;  %v7211_v7 = vadd.f32 %v7069_v56, %v13431_v25  ;;  %v7212_v13 = vadd.f32 %v7069_v56, %v13433_v55 }
 0x6fd   :  { %15854 = vst [vmem:[#allocation18_spill] sm:$0xff] %v13956_v44  ;;  %7450 = vperm.xlu0 %9557, %v13756_v33   ;;  %v13959_v58 = vpop.f32.mrb[153].mxu1  ;;  %v13961_v51 = vpop.f32.mrb[219].mxu0 }
 0x6fe   :  { %15855 = vst [vmem:[#allocation58_spill] sm:$0xff] %v13959_v58  ;;  %15856 = vst [vmem:[#allocation61_spill] sm:$0xff] %v13961_v51  ;;  %v13963_v3 = vpack.c.bf16 %v7783_v36, %v7781_v23  ;;  %9524 = vset.pattern.permute.xlu1 %v15768_v35  ;;  %v13966_v41 = vpop.permute.xlu1 %7854  ;;  %v13968_v49 = vpop.f32.mrb[154].mxu1  ;;  %v13970_v6 = vpack.c.bf16 %v7784_v59, %v7782_v34  ;;  %v15864_v36 = vld [vmem:[#allocation84_spill] sm:$0xff]  ;;  %v7276_v44 = vmax.f32 %v7212_v13, 0.0 }
 0x6ff   :  { %15858 = vst [vmem:[#allocation83_spill] sm:$0xff] %v13966_v41  ;;  %15859 = vst [vmem:[#allocation65_spill] sm:$0xff] %v13968_v49  ;;  %7390 = vperm.xlu1 %9524, %v13568_v48   ;;  %v13973_v40 = vpop.permute.xlu0 %7362  ;;  %v13975_v63 = vpop.f32.mrb[155].mxu1 }
 0x700   :  { %15857 = vst [vmem:[#allocation32_spill] sm:$0xff] %v13963_v3  ;;  %15860 = vst [vmem:[#allocation96_spill] sm:$0xff] %v13970_v6  ;;  %v15865_v6 = vld [vmem:[#allocation64_spill] sm:$0xff] }
 0x701   :  { %15861 = vst [vmem:[#allocation97_spill] sm:$0xff] %v13975_v63  ;;  %9560 = vset.pattern.permute.xlu0 %v15725_v0 }
 0x702   :  { %7666 = vperm.xlu0 %9560, %v13633_v5   ;;  %v13981_v23 = vpop.f32.mrb[220].mxu0 }
 0x703   :  { %15862 = vst [vmem:[#allocation98_spill] sm:$0xff] %v13981_v23  ;;  %9525 = vset.pattern.permute.xlu1 %v15725_v0  ;;  %v7064_v59 = vpop.permute.xlu1 %7063  ;;  %v13984_v34 = vpop.f32.mrb[221].mxu0  ;;  %v7275_v23 = vmax.f32 %v7211_v7, 0.0 }
 0x704   :  { %15863 = vst [vmem:[#allocation99_spill] sm:$0xff] %v13984_v34  ;;  %7646 = vperm.xlu1 %9525, %v13568_v48   ;;  %v7209_v3 = vadd.f32 %v7064_v59, %v15864_v36  ;;  %v7210_v41 = vadd.f32 %v7064_v59, %v15865_v6  ;;  %v13989_v51 = vpop.permute.xlu0 %7618  ;;  %v13991_v25 = vpop.f32.mrb[156].mxu1 }
 0x705   :  { %v13993_v55 = vpop.f32.mrb[157].mxu1  ;;  %v13995_v56 = vpop.f32.mrb[222].mxu0 }
 0x706   :  { %15866 = vst [vmem:[#allocation84_spill] sm:$0xff] %v13993_v55  ;;  %15867 = vst [vmem:[#allocation64_spill] sm:$0xff] %v13995_v56  ;;  %v7273_v63 = vmax.f32 %v7209_v3, 0.0  ;;  %v7274_v49 = vmax.f32 %v7210_v41, 0.0  ;;  %7682 = vperm.xlu0 %9560, %v13679_v54   ;;  %v13998_v34 = vpop.f32.mrb[158].mxu1  ;;  %v14000_v58 = vpop.f32.mrb[223].mxu0  ;;  %v7722_v56 = vadd.f32 %v13886_v43, %v13820_v2 }
 0x707   :  { %15868 = vst [vmem:[#allocation100_spill] sm:$0xff] %v14000_v58  ;;  %v14002_v36 = vpop.f32.mrb[159].mxu1  ;;  %v7721_v58 = vadd.f32 %v13886_v43, %v13811_v38 }
 0x708   :  { %v8113_v6 = vpack.c.bf16 %v7275_v23, %v7273_v63  ;;  %9526 = vset.pattern.permute.xlu1 %v15787_v27  ;;  %v8114_v59 = vpack.c.bf16 %v7276_v44, %v7274_v49  ;;  %v7465_v44 = vadd.f32 %v13871_v9, %v13818_v21 }
 0x709   :  { %7902 = vperm.xlu1 %9526, %v13568_v48   ;;  %v14006_v55 = vpop.permute.xlu1 %7858  ;;  %v14008_v7 = vpop.permute.xlu0 %7088  ;;  %v7466_v48 = vadd.f32 %v13871_v9, %v13826_v29 }
 0x70a   :  { %15869 = vst [vmem:[#allocation101_spill] sm:$0xff] %v14006_v55  ;;  %7698 = vperm.xlu0 %9560, %v13729_v28   ;;  %8309 = vmatprep.subr.bf16.mxu0 %v8114_v59  ;;  %v14011_v3 = vpop.f32.mrb[224].mxu0  ;;  %v7529_v55 = vmax.f32 %v7465_v44, 0.0 }
 0x70b   :  { %8310 = vmatpush1.bf16.msra.mxu0 %v8113_v6  ;;  %v14013_v41 = vpop.f32.mrb[225].mxu0 }
 0x70c   :  { %v14015_v13 = vpop.f32.mrb[160].mxu1  ;;  %v14017_v63 = vpop.f32.mrb[226].mxu0 }
 0x70d   :  { %15870 = vst [vmem:[#allocation102_spill] sm:$0xff] %v14015_v13  ;;  %15871 = vst [vmem:[#allocation103_spill] sm:$0xff] %v14017_v63  ;;  %9527 = vset.pattern.permute.xlu1 %v15740_v14  ;;  %v14024_v49 = vpop.f32.mrb[161].mxu1  ;;  %v14026_v23 = vpop.f32.mrb[227].mxu0 }
 0x70e   :  { %15872 = vst [vmem:[#allocation104_spill] sm:$0xff] %v14024_v49  ;;  %15873 = vst [vmem:[#allocation105_spill] sm:$0xff] %v14026_v23  ;;  %7123 = vperm.xlu1 %9527, %v13587_v61   ;;  %9569 = vset.pattern.permute.xlu0 %v15787_v27  ;;  %v7351_v6 = vpop.permute.xlu1 %7350  ;;  %v14030_v59 = vpop.permute.xlu0 %7370  ;;  %v7530_v49 = vmax.f32 %v7466_v48, 0.0 }
 0x70f   :  { %7846 = vperm.xlu0 %9569, %v13398_v57   ;;  %v7467_v21 = vadd.f32 %v7351_v6, %v13831_v15  ;;  %v7468_v63 = vadd.f32 %v7351_v6, %v13838_v10  ;;  %v14035_v29 = vpop.f32.mrb[162].mxu1 }
 0x710   :  { %v14037_v9 = vpop.f32.mrb[163].mxu1 }
 0x711   :  { %v7531_v23 = vmax.f32 %v7467_v21, 0.0  ;;  %v7532_v13 = vmax.f32 %v7468_v63, 0.0 }
 0x712   :  { %9530 = vset.pattern.permute.xlu1 %v15787_v27  ;;  %v14044_v57 = vpop.f32.mrb[228].mxu0 }
 0x713   :  { %15874 = vst [vmem:[#allocation106_spill] sm:$0xff] %v14044_v57  ;;  %v8115_v15 = vpack.c.bf16 %v7531_v23, %v7529_v55  ;;  %7906 = vperm.xlu1 %9530, %v13587_v61   ;;  %7850 = vperm.xlu0 %9569, %v13414_v42   ;;  %v7607_v10 = vpop.permute.xlu1 %7606  ;;  %v14048_v44 = vpop.permute.xlu0 %7098  ;;  %v8116_v48 = vpack.c.bf16 %v7532_v13, %v7530_v49  ;;  %v7785_v61 = vmax.f32 %v7721_v58, 0.0  ;;  %v7786_v23 = vmax.f32 %v7722_v56, 0.0 }
 0x714   :  { %v7723_v63 = vadd.f32 %v7607_v10, %v13828_v32  ;;  %v7724_v38 = vadd.f32 %v7607_v10, %v13833_v31  ;;  %v14052_v6 = vpop.f32.mrb[164].mxu1  ;;  %v14054_v2 = vpop.f32.mrb[229].mxu0  ;;  %v7215_v32 = vadd.f32 %v13948_v52, %v13454_v1  ;;  %v15881_v31 = vld [vmem:[#allocation69_spill] sm:$0xff] }
 0x715   :  { %15875 = vst [vmem:[#allocation107_spill] sm:$0xff] %v14052_v6  ;;  %15876 = vst [vmem:[#allocation108_spill] sm:$0xff] %v14054_v2  ;;  %8382 = vmatprep.subr.bf16.mxu1 %v8116_v48  ;;  %v14056_v43 = vpop.f32.mrb[165].mxu1  ;;  %v14058_v55 = vpop.f32.mrb[230].mxu0  ;;  %v7216_v49 = vadd.f32 %v13948_v52, %v15881_v31 }
 0x716   :  { %15877 = vst [vmem:[#allocation109_spill] sm:$0xff] %v14056_v43  ;;  %15878 = vst [vmem:[#allocation110_spill] sm:$0xff] %v14058_v55  ;;  %v7787_v42 = vmax.f32 %v7723_v63, 0.0  ;;  %v7788_v21 = vmax.f32 %v7724_v38, 0.0  ;;  %8383 = vmatpush1.bf16.msra.mxu1 %v8115_v15  ;;  %v14060_v57 = vpop.f32.mrb[166].mxu1  ;;  %v14062_v13 = vpop.f32.mrb[231].mxu0 }
 0x717   :  { %15879 = vst [vmem:[#allocation111_spill] sm:$0xff] %v14060_v57  ;;  %15880 = vst [vmem:[#allocation112_spill] sm:$0xff] %v14062_v13  ;;  %9532 = vset.pattern.permute.xlu1 %v15768_v35  ;;  %7862 = vperm.xlu0 %9569, %v13444_v20   ;;  %v14070_v10 = vpop.f32.mrb[167].mxu1  ;;  %v15885_v63 = vld [vmem:[#allocation67_spill] sm:$0xff]  ;;  %v15886_v38 = vld [vmem:[#allocation66_spill] sm:$0xff]  ;;  %v7279_v31 = vmax.f32 %v7215_v32, 0.0 }
 0x718   :  { %15882 = vst [vmem:[#allocation69_spill] sm:$0xff] %v14070_v10  ;;  %v14072_v58 = vpack.c.bf16 %v7787_v42, %v7785_v61  ;;  %7398 = vperm.xlu1 %9532, %v13591_v18   ;;  %v7074_v56 = vpop.permute.xlu1 %7073  ;;  %v14075_v15 = vpop.permute.xlu0 %7378  ;;  %v14077_v48 = vpack.c.bf16 %v7788_v21, %v7786_v23  ;;  %v7280_v55 = vmax.f32 %v7216_v49, 0.0 }
 0x719   :  { %v7213_v1 = vadd.f32 %v7074_v56, %v15885_v63  ;;  %v7214_v13 = vadd.f32 %v7074_v56, %v15886_v38 }
 0x71a   :  { %15883 = vst [vmem:[#allocation113_spill] sm:$0xff] %v14072_v58  ;;  %15884 = vst [vmem:[#allocation114_spill] sm:$0xff] %v14077_v48  ;;  %v14081_v52 = vpop.f32.mrb[232].mxu0 }
 0x71b   :  { %15887 = vst [vmem:[#allocation67_spill] sm:$0xff] %v14081_v52  ;;  %v7277_v20 = vmax.f32 %v7213_v1, 0.0  ;;  %v7278_v57 = vmax.f32 %v7214_v13, 0.0  ;;  %7866 = vperm.xlu0 %9569, %v13465_v8   ;;  %v14084_v61 = vpop.f32.mrb[233].mxu0 }
 0x71c   :  { %15888 = vst [vmem:[#allocation66_spill] sm:$0xff] %v14084_v61  ;;  %9533 = vset.pattern.permute.xlu1 %v15725_v0  ;;  %v14087_v42 = vpop.f32.mrb[168].mxu1  ;;  %v14089_v23 = vpop.f32.mrb[234].mxu0 }
 0x71d   :  { %15889 = vst [vmem:[#allocation115_spill] sm:$0xff] %v14087_v42  ;;  %15890 = vst [vmem:[#allocation116_spill] sm:$0xff] %v14089_v23  ;;  %v8121_v21 = vpack.c.bf16 %v7279_v31, %v7277_v20  ;;  %7654 = vperm.xlu1 %9533, %v13591_v18   ;;  %v7611_v56 = vpop.permute.xlu1 %7610  ;;  %v7635_v63 = vpop.permute.xlu0 %7634  ;;  %v8122_v38 = vpack.c.bf16 %v7280_v55, %v7278_v57  ;;  %v7469_v57 = vadd.f32 %v13928_v47, %v13852_v11 }
 0x71e   :  { %v14093_v32 = vadd.f32 %v7635_v63, %v13950_v62  ;;  %v14096_v13 = vadd.f32 %v7635_v63, %v13952_v19  ;;  %v14098_v8 = vpop.f32.mrb[169].mxu1  ;;  %v14100_v49 = vpop.f32.mrb[235].mxu0  ;;  %v7470_v62 = vadd.f32 %v13928_v47, %v13863_v12 }
 0x71f   :  { %15891 = vst [vmem:[#allocation117_spill] sm:$0xff] %v14098_v8  ;;  %15892 = vst [vmem:[#allocation118_spill] sm:$0xff] %v14100_v49  ;;  %7878 = vperm.xlu0 %9569, %v13497_v37   ;;  %8311 = vmatprep.subr.bf16.mxu0 %v8122_v38  ;;  %v14103_v1 = vpop.f32.mrb[170].mxu1  ;;  %v15896_v37 = vld [vmem:[#allocation76_spill] sm:$0xff]  ;;  %v7533_v47 = vmax.f32 %v7469_v57, 0.0 }
 0x720   :  { %15893 = vst [vmem:[#allocation119_spill] sm:$0xff] %v14103_v1  ;;  %8312 = vmatpush1.bf16.msra.mxu0 %v8121_v21  ;;  %v14105_v31 = vpop.f32.mrb[171].mxu1  ;;  %v7534_v58 = vmax.f32 %v7470_v62, 0.0 }
 0x721   :  { %15894 = vst [vmem:[#allocation120_spill] sm:$0xff] %v14105_v31  ;;  %9534 = vset.pattern.permute.xlu1 %v15740_v14 }
 0x722   :  { %7133 = vperm.xlu1 %9534, %v13608_v30   ;;  %v7359_v19 = vpop.permute.xlu1 %7358  ;;  %v14113_v55 = vpop.f32.mrb[236].mxu0 }
 0x723   :  { %15895 = vst [vmem:[#allocation121_spill] sm:$0xff] %v14113_v55  ;;  %7882 = vperm.xlu0 %9569, %v15896_v37   ;;  %v7471_v20 = vadd.f32 %v7359_v19, %v13873_v26  ;;  %v7472_v21 = vadd.f32 %v7359_v19, %v13876_v50  ;;  %v14118_v63 = vpop.permute.xlu0 %7108  ;;  %v14120_v38 = vpop.f32.mrb[237].mxu0  ;;  %v7725_v26 = vadd.f32 %v7611_v56, %v13845_v53 }
 0x724   :  { %15897 = vst [vmem:[#allocation76_spill] sm:$0xff] %v14120_v38  ;;  %v14122_v11 = vpop.f32.mrb[172].mxu1  ;;  %v14124_v12 = vpop.f32.mrb[238].mxu0  ;;  %v7726_v50 = vadd.f32 %v7611_v56, %v13847_v17 }
 0x725   :  { %15898 = vst [vmem:[#allocation122_spill] sm:$0xff] %v14122_v11  ;;  %15899 = vst [vmem:[#allocation123_spill] sm:$0xff] %v14124_v12  ;;  %v7535_v48 = vmax.f32 %v7471_v20, 0.0  ;;  %v7536_v49 = vmax.f32 %v7472_v21, 0.0  ;;  %v14126_v23 = vpop.f32.mrb[173].mxu1  ;;  %v14128_v55 = vpop.f32.mrb[239].mxu0 }
 0x726   :  { %15900 = vst [vmem:[#allocation124_spill] sm:$0xff] %v14126_v23  ;;  %15901 = vst [vmem:[#allocation125_spill] sm:$0xff] %v14128_v55  ;;  %9536 = vset.pattern.permute.xlu1 %v15725_v0  ;;  %v14133_v19 = vpop.f32.mrb[174].mxu1  ;;  %v15904_v55 = vld [vmem:[#allocation36_spill] sm:$0xff]  ;;  %v7789_v17 = vmax.f32 %v7725_v26, 0.0  ;;  %v7790_v56 = vmax.f32 %v7726_v50, 0.0 }
 0x727   :  { %15902 = vst [vmem:[#allocation126_spill] sm:$0xff] %v14133_v19  ;;  %v8123_v37 = vpack.c.bf16 %v7535_v48, %v7533_v47  ;;  %7658 = vperm.xlu1 %9536, %v13608_v30   ;;  %7894 = vperm.xlu0 %9569, %v13545_v16   ;;  %v7615_v57 = vpop.permute.xlu1 %7614  ;;  %v8124_v62 = vpack.c.bf16 %v7536_v49, %v7534_v58  ;;  %v14137_v20 = vpop.f32.mrb[175].mxu1  ;;  %v15907_v48 = vld [vmem:[#allocation91_spill] sm:$0xff]  ;;  %v15946_v11 = vld [vmem:[#allocation40_spill] sm:$0xff] }
 0x728   :  { %15903 = vst [vmem:[#allocation127_spill] sm:$0xff] %v14137_v20  ;;  %v7727_v21 = vadd.f32 %v7615_v57, %v13854_v39  ;;  %v7728_v12 = vadd.f32 %v7615_v57, %v15904_v55  ;;  %v14141_v53 = vpop.permute.xlu0 %7386  ;;  %v15939_v20 = vld [vmem:[#allocation17_spill] sm:$0xff] }
 0x729   :  { %8384 = vmatprep.subr.bf16.mxu1 %v8124_v62  ;;  %v15917_v62 = vld [vmem:[#allocation73_spill] sm:$0xff] }
 0x72a   :  { %v7791_v38 = vmax.f32 %v7727_v21, 0.0  ;;  %v7792_v61 = vmax.f32 %v7728_v12, 0.0  ;;  %8385 = vmatpush1.bf16.msra.mxu1 %v8123_v37  ;;  %v7220_v21 = vadd.f32 %v14008_v7, %v15917_v62 }
 0x72b   :  { %9538 = vset.pattern.permute.xlu1 %v15768_v35  ;;  %7898 = vperm.xlu0 %9569, %v13562_v46   ;;  %v14145_v16 = vpop.f32.mrb[240].mxu0 }
 0x72c   :  { %15905 = vst [vmem:[#allocation36_spill] sm:$0xff] %v14145_v16  ;;  %v14147_v58 = vpack.c.bf16 %v7791_v38, %v7789_v17  ;;  %7406 = vperm.xlu1 %9538, %v15907_v48   ;;  %v14150_v39 = vpop.permute.xlu1 %7870  ;;  %v14152_v49 = vpop.f32.mrb[176].mxu1  ;;  %v14154_v55 = vpack.c.bf16 %v7792_v61, %v7790_v56  ;;  %v15916_v61 = vld [vmem:[#allocation70_spill] sm:$0xff]  ;;  %v15919_v16 = vld [vmem:[#allocation71_spill] sm:$0xff] }
 0x72d   :  { %15908 = vst [vmem:[#allocation91_spill] sm:$0xff] %v14152_v49  ;;  %v14156_v47 = vpop.permute.xlu0 %7118  ;;  %v14158_v12 = vpop.f32.mrb[177].mxu1  ;;  %v7219_v57 = vadd.f32 %v14008_v7, %v15916_v61 }
 0x72e   :  { %15906 = vst [vmem:[#allocation128_spill] sm:$0xff] %v14147_v58  ;;  %15909 = vst [vmem:[#allocation129_spill] sm:$0xff] %v14154_v55  ;;  %v14160_v26 = vpop.f32.mrb[178].mxu1  ;;  %v14162_v50 = vpop.f32.mrb[241].mxu0  ;;  %v7284_v55 = vmax.f32 %v7220_v21, 0.0 }
 0x72f   :  { %15910 = vst [vmem:[#allocation130_spill] sm:$0xff] %v14158_v12  ;;  %15911 = vst [vmem:[#allocation131_spill] sm:$0xff] %v14160_v26  ;;  %7910 = vperm.xlu0 %9569, %v13591_v18   ;;  %v14165_v46 = vpop.f32.mrb[179].mxu1  ;;  %v14167_v38 = vpop.f32.mrb[242].mxu0  ;;  %v15918_v18 = vld [vmem:[#allocation68_spill] sm:$0xff] }
 0x730   :  { %15912 = vst [vmem:[#allocation132_spill] sm:$0xff] %v14162_v50  ;;  %15913 = vst [vmem:[#allocation133_spill] sm:$0xff] %v14165_v46  ;;  %9539 = vset.pattern.permute.xlu1 %v15725_v0  ;;  %v14170_v37 = vpop.f32.mrb[243].mxu0 }
 0x731   :  { %15914 = vst [vmem:[#allocation134_spill] sm:$0xff] %v14167_v38  ;;  %15915 = vst [vmem:[#allocation135_spill] sm:$0xff] %v14170_v37  ;;  %7662 = vperm.xlu1 %9539, %v15907_v48   ;;  %v7283_v37 = vmax.f32 %v7219_v57, 0.0 }
 0x732   :  { %v7084_v17 = vpop.permute.xlu1 %7083  ;;  %v14177_v56 = vpop.permute.xlu0 %7394 }
 0x733   :  { %v7217_v50 = vadd.f32 %v7084_v17, %v15918_v18  ;;  %v7218_v58 = vadd.f32 %v7084_v17, %v15919_v16  ;;  %7914 = vperm.xlu0 %9569, %v13608_v30   ;;  %v15924_v16 = vld [vmem:[#allocation92_spill] sm:$0xff] }
 0x734   :  { %v14182_v38 = vpop.f32.mrb[180].mxu1 }
 0x735   :  { %15920 = vst [vmem:[#allocation70_spill] sm:$0xff] %v14182_v38  ;;  %v7281_v52 = vmax.f32 %v7217_v50, 0.0  ;;  %v7282_v61 = vmax.f32 %v7218_v58, 0.0  ;;  %9540 = vset.pattern.permute.xlu1 %v15740_v14  ;;  %v14185_v7 = vpop.f32.mrb[181].mxu1 }
 0x736   :  { %15921 = vst [vmem:[#allocation73_spill] sm:$0xff] %v14185_v7  ;;  %7143 = vperm.xlu1 %9540, %v13633_v5   ;;  %v14188_v62 = vpop.f32.mrb[182].mxu1  ;;  %v14190_v46 = vpop.f32.mrb[244].mxu0 }
 0x737   :  { %15922 = vst [vmem:[#allocation68_spill] sm:$0xff] %v14188_v62  ;;  %15923 = vst [vmem:[#allocation71_spill] sm:$0xff] %v14190_v46  ;;  %v8129_v18 = vpack.c.bf16 %v7283_v37, %v7281_v52  ;;  %7926 = vperm.xlu0 %9569, %v15924_v16   ;;  %v14193_v30 = vpop.permute.xlu1 %7874  ;;  %v7651_v17 = vpop.permute.xlu0 %7650  ;;  %v8130_v57 = vpack.c.bf16 %v7284_v55, %v7282_v61  ;;  %v15929_v37 = vld [vmem:[#allocation22_spill] sm:$0xff] }
 0x738   :  { %v14196_v50 = vadd.f32 %v7651_v17, %v14011_v3  ;;  %v14199_v58 = vadd.f32 %v7651_v17, %v14013_v41  ;;  %v14201_v21 = vpop.f32.mrb[183].mxu1  ;;  %v14203_v7 = vpop.f32.mrb[245].mxu0  ;;  %v7473_v55 = vadd.f32 %v13973_v40, %v15929_v37  ;;  %v15930_v3 = vld [vmem:[#allocation59_spill] sm:$0xff]  ;;  %v15931_v41 = vld [vmem:[#allocation44_spill] sm:$0xff]  ;;  %v15933_v46 = vld [vmem:[#allocation62_spill] sm:$0xff] }
 0x739   :  { %15925 = vst [vmem:[#allocation92_spill] sm:$0xff] %v14201_v21  ;;  %15926 = vst [vmem:[#allocation136_spill] sm:$0xff] %v14203_v7  ;;  %8313 = vmatprep.subr.bf16.mxu0 %v8130_v57  ;;  %v14205_v62 = vpop.f32.mrb[246].mxu0  ;;  %v7474_v61 = vadd.f32 %v13973_v40, %v15930_v3  ;;  %v15932_v57 = vld [vmem:[#allocation30_spill] sm:$0xff]  ;;  %v15936_v40 = vld [vmem:[#allocation16_spill] sm:$0xff] }
 0x73a   :  { %15927 = vst [vmem:[#allocation137_spill] sm:$0xff] %v14205_v62  ;;  %9543 = vset.pattern.permute.xlu1 %v15768_v35  ;;  %8314 = vmatpush1.bf16.msra.mxu0 %v8129_v18  ;;  %v14208_v52 = vpop.f32.mrb[247].mxu0  ;;  %v7537_v38 = vmax.f32 %v7473_v55, 0.0 }
 0x73b   :  { %15928 = vst [vmem:[#allocation138_spill] sm:$0xff] %v14208_v52  ;;  %7414 = vperm.xlu1 %9543, %v15924_v16   ;;  %7930 = vperm.xlu0 %9569, %v15931_v41   ;;  %v7538_v37 = vmax.f32 %v7474_v61, 0.0 }
 0x73c   :  { %v7367_v17 = vpop.permute.xlu1 %7366  ;;  %v14216_v7 = vpop.permute.xlu0 %7128 }
 0x73d   :  { %v7475_v62 = vadd.f32 %v7367_v17, %v15932_v57  ;;  %v7476_v21 = vadd.f32 %v7367_v17, %v15933_v46  ;;  %v14220_v18 = vpop.f32.mrb[184].mxu1  ;;  %v7729_v57 = vadd.f32 %v13989_v51, %v15939_v20  ;;  %v15940_v46 = vld [vmem:[#allocation28_spill] sm:$0xff] }
 0x73e   :  { %15934 = vst [vmem:[#allocation22_spill] sm:$0xff] %v14220_v18  ;;  %v14222_v52 = vpop.f32.mrb[185].mxu1  ;;  %v7730_v17 = vadd.f32 %v13989_v51, %v15940_v46 }
 0x73f   :  { %15935 = vst [vmem:[#allocation59_spill] sm:$0xff] %v14222_v52  ;;  %v7539_v26 = vmax.f32 %v7475_v62, 0.0  ;;  %v7540_v12 = vmax.f32 %v7476_v21, 0.0  ;;  %9544 = vset.pattern.permute.xlu1 %v15740_v14  ;;  %7942 = vperm.xlu0 %9569, %v15936_v40   ;;  %v14226_v3 = vpop.f32.mrb[186].mxu1  ;;  %v14228_v49 = vpop.f32.mrb[248].mxu0  ;;  %v7793_v20 = vmax.f32 %v7729_v57, 0.0 }
 0x740   :  { %15937 = vst [vmem:[#allocation44_spill] sm:$0xff] %v14226_v3  ;;  %15938 = vst [vmem:[#allocation30_spill] sm:$0xff] %v14228_v49  ;;  %7153 = vperm.xlu1 %9544, %v15931_v41   ;;  %v14235_v55 = vpop.f32.mrb[187].mxu1  ;;  %v14237_v62 = vpop.f32.mrb[249].mxu0  ;;  %v15944_v3 = vld [vmem:[#allocation31_spill] sm:$0xff]  ;;  %v15945_v49 = vld [vmem:[#allocation33_spill] sm:$0xff] }
 0x741   :  { %15941 = vst [vmem:[#allocation62_spill] sm:$0xff] %v14235_v55  ;;  %15942 = vst [vmem:[#allocation16_spill] sm:$0xff] %v14237_v62  ;;  %v8131_v21 = vpack.c.bf16 %v7539_v26, %v7537_v38  ;;  %v7623_v61 = vpop.permute.xlu1 %7622  ;;  %v14239_v52 = vpop.permute.xlu0 %7402  ;;  %v8132_v18 = vpack.c.bf16 %v7540_v12, %v7538_v37  ;;  %v7794_v51 = vmax.f32 %v7730_v17, 0.0  ;;  %v15948_v26 = vld [vmem:[#allocation74_spill] sm:$0xff]  ;;  %v15949_v12 = vld [vmem:[#allocation77_spill] sm:$0xff] }
 0x742   :  { %15943 = vst [vmem:[#allocation17_spill] sm:$0xff] %v14239_v52  ;;  %v7731_v19 = vadd.f32 %v7623_v61, %v15944_v3  ;;  %v7732_v23 = vadd.f32 %v7623_v61, %v15945_v49  ;;  %v7223_v38 = vadd.f32 %v14048_v44, %v15948_v26  ;;  %v7224_v37 = vadd.f32 %v14048_v44, %v15949_v12  ;;  %v15950_v3 = vld [vmem:[#allocation8_spill] sm:$0xff]  ;;  %v15955_v61 = vld [vmem:[#allocation75_spill] sm:$0xff] }
 0x743   :  { %7946 = vperm.xlu0 %9569, %v15946_v11   ;;  %8386 = vmatprep.subr.bf16.mxu1 %v8132_v18  ;;  %v15954_v17 = vld [vmem:[#allocation72_spill] sm:$0xff] }
 0x744   :  { %v7795_v46 = vmax.f32 %v7731_v19, 0.0  ;;  %v7796_v31 = vmax.f32 %v7732_v23, 0.0  ;;  %9547 = vset.pattern.permute.xlu1 %v15768_v35  ;;  %8387 = vmatpush1.bf16.msra.mxu1 %v8131_v21  ;;  %v14245_v62 = vpop.f32.mrb[188].mxu1  ;;  %v7287_v12 = vmax.f32 %v7223_v38, 0.0  ;;  %v7288_v55 = vmax.f32 %v7224_v37, 0.0  ;;  %v15959_v38 = vld [vmem:[#allocation20_spill] sm:$0xff] }
 0x745   :  { %15947 = vst [vmem:[#allocation28_spill] sm:$0xff] %v14245_v62  ;;  %7422 = vperm.xlu1 %9547, %v15950_v3   ;;  %v14252_v49 = vpop.f32.mrb[189].mxu1  ;;  %v7477_v37 = vadd.f32 %v14030_v59, %v15959_v38 }
 0x746   :  { %15951 = vst [vmem:[#allocation31_spill] sm:$0xff] %v14252_v49  ;;  %v14254_v18 = vpack.c.bf16 %v7795_v46, %v7793_v20  ;;  %v7094_v57 = vpop.permute.xlu1 %7093  ;;  %v14256_v19 = vpop.permute.xlu0 %7138  ;;  %v14258_v23 = vpack.c.bf16 %v7796_v31, %v7794_v51 }
 0x747   :  { %v7221_v21 = vadd.f32 %v7094_v57, %v15954_v17  ;;  %v7222_v62 = vadd.f32 %v7094_v57, %v15955_v61  ;;  %7958 = vperm.xlu0 %9569, %v13733_v22   ;;  %v14263_v26 = vpop.f32.mrb[190].mxu1 }
 0x748   :  { %15952 = vst [vmem:[#allocation33_spill] sm:$0xff] %v14254_v18  ;;  %15953 = vst [vmem:[#allocation40_spill] sm:$0xff] %v14258_v23  ;;  %v14265_v44 = vpop.f32.mrb[191].mxu1 }
 0x749   :  { %15956 = vst [vmem:[#allocation74_spill] sm:$0xff] %v14263_v26  ;;  %15957 = vst [vmem:[#allocation77_spill] sm:$0xff] %v14265_v44  ;;  %v7285_v49 = vmax.f32 %v7221_v21, 0.0  ;;  %v7286_v20 = vmax.f32 %v7222_v62, 0.0  ;;  %9548 = vset.pattern.permute.xlu1 %v15740_v14  ;;  %v15962_v44 = vld [vmem:[#allocation14_spill] sm:$0xff] }
 0x74a   :  { %7163 = vperm.xlu1 %9548, %v13679_v54  }
 0x74b   :  { %v8137_v31 = vpack.c.bf16 %v7287_v12, %v7285_v49  ;;  %7962 = vperm.xlu0 %9569, %v13756_v33   ;;  %v7627_v51 = vpop.permute.xlu1 %7626  ;;  %v14270_v46 = vpop.permute.xlu0 %7410  ;;  %v8138_v57 = vpack.c.bf16 %v7288_v55, %v7286_v20  ;;  %v7478_v49 = vadd.f32 %v14030_v59, %v13930_v45  ;;  %v15961_v45 = vld [vmem:[#allocation42_spill] sm:$0xff] }
 0x74c   :  { %15958 = vst [vmem:[#allocation8_spill] sm:$0xff] %v14270_v46  ;;  %v14272_v17 = vpop.f32.mrb[192].mxu1  ;;  %v7733_v59 = vadd.f32 %v7627_v51, %v15961_v45  ;;  %v7734_v26 = vadd.f32 %v7627_v51, %v15962_v44 }
 0x74d   :  { %8315 = vmatprep.subr.bf16.mxu0 %v8138_v57  ;;  %v14274_v61 = vpop.f32.mrb[193].mxu1  ;;  %v7541_v57 = vmax.f32 %v7477_v37, 0.0  ;;  %v7542_v18 = vmax.f32 %v7478_v49, 0.0  ;;  %v15964_v49 = vld [vmem:[#allocation43_spill] sm:$0xff] }
 0x74e   :  { %9551 = vset.pattern.permute.xlu1 %v15768_v35  ;;  %8316 = vmatpush1.bf16.msra.mxu0 %v8137_v31  ;;  %v14277_v62 = vpop.f32.mrb[194].mxu1  ;;  %v7797_v44 = vmax.f32 %v7733_v59, 0.0  ;;  %v7798_v51 = vmax.f32 %v7734_v26, 0.0  ;;  %v15971_v59 = vld [vmem:[#allocation86_spill] sm:$0xff] }
 0x74f   :  { %7430 = vperm.xlu1 %9551, %v15936_v40   ;;  %v14284_v21 = vpop.f32.mrb[195].mxu1  ;;  %9574 = vset.pattern.permute.xlu0 %v15740_v14 }
 0x750   :  { %v7375_v55 = vpop.permute.xlu1 %7374  ;;  %v14287_v12 = vpop.permute.xlu0 %7148 }
 0x751   :  { %15960 = vst [vmem:[#allocation72_spill] sm:$0xff] %v14287_v12  ;;  %v7479_v20 = vadd.f32 %v7375_v55, %v13932_v4  ;;  %v7480_v31 = vadd.f32 %v7375_v55, %v13936_v60  ;;  %v15963_v60 = vld [vmem:[#allocation35_spill] sm:$0xff] }
 0x753   :  { %v7543_v23 = vmax.f32 %v7479_v20, 0.0  ;;  %v7544_v38 = vmax.f32 %v7480_v31, 0.0  ;;  %9552 = vset.pattern.permute.xlu1 %v15740_v14 }
 0x754   :  { %7173 = vperm.xlu1 %9552, %v15946_v11   ;;  %v14295_v1 = vpop.f32.mrb[196].mxu1 }
 0x755   :  { %v8139_v8 = vpack.c.bf16 %v7543_v23, %v7541_v57  ;;  %v7631_v46 = vpop.permute.xlu1 %7630  ;;  %v14297_v42 = vpop.f32.mrb[197].mxu1  ;;  %v8140_v4 = vpack.c.bf16 %v7544_v38, %v7542_v18  ;;  %v15966_v23 = vld [vmem:[#allocation11_spill] sm:$0xff] }
 0x756   :  { %v7735_v37 = vadd.f32 %v7631_v46, %v15963_v60  ;;  %v7736_v55 = vadd.f32 %v7631_v46, %v15964_v49  ;;  %v14301_v20 = vpop.permute.xlu0 %7418  ;;  %v14303_v31 = vpop.f32.mrb[198].mxu1  ;;  %v7227_v60 = vadd.f32 %v14118_v63, %v15971_v59 }
 0x757   :  { %15965 = vst [vmem:[#allocation75_spill] sm:$0xff] %v14301_v20  ;;  %8388 = vmatprep.subr.bf16.mxu1 %v8140_v4  ;;  %v14305_v45 = vpop.f32.mrb[199].mxu1 }
 0x758   :  { %v7799_v12 = vmax.f32 %v7735_v37, 0.0  ;;  %v7800_v10 = vmax.f32 %v7736_v55, 0.0  ;;  %9555 = vset.pattern.permute.xlu1 %v15768_v35  ;;  %8389 = vmatpush1.bf16.msra.mxu1 %v8139_v8  ;;  %v15972_v8 = vld [vmem:[#allocation79_spill] sm:$0xff]  ;;  %v7291_v20 = vmax.f32 %v7227_v60, 0.0 }
 0x759   :  { %7438 = vperm.xlu1 %9555, %v15966_v23   ;;  %v7228_v37 = vadd.f32 %v14118_v63, %v15972_v8 }
 0x75a   :  { %v14309_v18 = vpack.c.bf16 %v7799_v12, %v7797_v44  ;;  %v14311_v57 = vpop.permute.xlu1 %7886  ;;  %v14313_v46 = vpack.c.bf16 %v7800_v10, %v7798_v51  ;;  %v15973_v10 = vld [vmem:[#allocation85_spill] sm:$0xff]  ;;  %v15974_v51 = vld [vmem:[#allocation78_spill] sm:$0xff] }
 0x75b   :  { %15968 = vst [vmem:[#allocation42_spill] sm:$0xff] %v14311_v57  ;;  %v14315_v38 = vpop.permute.xlu0 %7158 }
 0x75c   :  { %15967 = vst [vmem:[#allocation20_spill] sm:$0xff] %v14309_v18  ;;  %15969 = vst [vmem:[#allocation14_spill] sm:$0xff] %v14313_v46  ;;  %v14317_v4 = vpop.f32.mrb[200].mxu1 }
 0x75d   :  { %15970 = vst [vmem:[#allocation35_spill] sm:$0xff] %v14315_v38  ;;  %7442 = vperm.xlu1 %9555, %v13729_v28   ;;  %v14320_v26 = vpop.f32.mrb[201].mxu1  ;;  %v7292_v38 = vmax.f32 %v7228_v37, 0.0 }
 0x75e   :  { %v14326_v12 = vpop.f32.mrb[202].mxu1 }
 0x75f   :  { %v7104_v49 = vpop.permute.xlu1 %7103  ;;  %v14328_v55 = vpop.f32.mrb[203].mxu1 }
 0x760   :  { %v7225_v44 = vadd.f32 %v7104_v49, %v15973_v10  ;;  %v7226_v18 = vadd.f32 %v7104_v49, %v15974_v51  ;;  %v14332_v46 = vpop.permute.xlu0 %7426  ;;  %v15979_v10 = vld [vmem:[#allocation15_spill] sm:$0xff]  ;;  %v15981_v51 = vld [vmem:[#allocation65_spill] sm:$0xff] }
 0x761   :  { %15975 = vst [vmem:[#allocation43_spill] sm:$0xff] %v14332_v46  ;;  %9556 = vset.pattern.permute.xlu1 %v15740_v14 }
 0x762   :  { %v7289_v28 = vmax.f32 %v7225_v44, 0.0  ;;  %v7290_v59 = vmax.f32 %v7226_v18, 0.0  ;;  %7188 = vperm.xlu1 %9556, %v13733_v22  }
 0x764   :  { %v8145_v63 = vpack.c.bf16 %v7291_v20, %v7289_v28  ;;  %v14336_v8 = vpop.f32.mrb[204].mxu1  ;;  %v8146_v43 = vpack.c.bf16 %v7292_v38, %v7290_v59  ;;  %v7481_v28 = vadd.f32 %v14075_v15, %v13954_v24  ;;  %v15978_v20 = vld [vmem:[#allocation58_spill] sm:$0xff]  ;;  %v15982_v59 = vld [vmem:[#allocation97_spill] sm:$0xff] }
 0x765   :  { %v14338_v52 = vpop.permute.xlu1 %7890  ;;  %v14340_v6 = vpop.permute.xlu0 %7168  ;;  %v7482_v18 = vadd.f32 %v14075_v15, %v15978_v20 }
 0x766   :  { %15976 = vst [vmem:[#allocation11_spill] sm:$0xff] %v14338_v52  ;;  %15977 = vst [vmem:[#allocation86_spill] sm:$0xff] %v14340_v6  ;;  %7193 = vperm.xlu1 %9556, %v13756_v33   ;;  %8317 = vmatprep.subr.bf16.mxu0 %v8146_v43  ;;  %v14343_v49 = vpop.f32.mrb[205].mxu1 }
 0x767   :  { %8318 = vmatpush1.bf16.msra.mxu0 %v8145_v63  ;;  %v14345_v60 = vpop.f32.mrb[206].mxu1  ;;  %v7545_v63 = vmax.f32 %v7481_v28, 0.0  ;;  %v7546_v6 = vmax.f32 %v7482_v18, 0.0 }
 0x768   :  { %v14347_v37 = vpop.f32.mrb[207].mxu1 }
 0x76a   :  { %v7383_v38 = vpop.permute.xlu1 %7382  ;;  %7198 = vperm.xlu1 %9556, %v15979_v10   ;;  %v14354_v44 = vpop.permute.xlu0 %7434 }
 0x76b   :  { %15980 = vst [vmem:[#allocation79_spill] sm:$0xff] %v14354_v44  ;;  %v7483_v43 = vadd.f32 %v7383_v38, %v15981_v51  ;;  %v7484_v46 = vadd.f32 %v7383_v38, %v15982_v59  ;;  %v15984_v51 = vld [vmem:[#allocation18_spill] sm:$0xff]  ;;  %v15985_v38 = vld [vmem:[#allocation61_spill] sm:$0xff] }
 0x76d   :  { %v7547_v14 = vmax.f32 %v7483_v43, 0.0  ;;  %v7548_v33 = vmax.f32 %v7484_v46, 0.0  ;;  %v14358_v22 = vpop.f32.mrb[208].mxu1  ;;  %v7802_v43 = vmax.f32 %v14096_v13, 0.0  ;;  %v15992_v13 = vld [vmem:[#allocation87_spill] sm:$0xff] }
 0x76e   :  { %9558 = vset.pattern.permute.xlu1 %v15768_v35  ;;  %v14361_v24 = vpop.f32.mrb[209].mxu1  ;;  %v7801_v35 = vmax.f32 %v14093_v32, 0.0 }
 0x76f   :  { %v8147_v15 = vpack.c.bf16 %v7547_v14, %v7545_v63  ;;  %v7639_v20 = vpop.permute.xlu1 %7638  ;;  %7454 = vperm.xlu1 %9558, %v15979_v10   ;;  %v14364_v2 = vpop.permute.xlu0 %7178  ;;  %v8148_v44 = vpack.c.bf16 %v7548_v33, %v7546_v6  ;;  %v15987_v63 = vld [vmem:[#allocation88_spill] sm:$0xff]  ;;  %v15989_v6 = vld [vmem:[#allocation81_spill] sm:$0xff] }
 0x770   :  { %15983 = vst [vmem:[#allocation85_spill] sm:$0xff] %v14364_v2  ;;  %v7739_v52 = vadd.f32 %v7639_v20, %v15984_v51  ;;  %v7740_v28 = vadd.f32 %v7639_v20, %v15985_v38  ;;  %v14368_v18 = vpop.f32.mrb[210].mxu1  ;;  %v7231_v2 = vadd.f32 %v14156_v47, %v15987_v63  ;;  %v7232_v20 = vadd.f32 %v14156_v47, %v15989_v6 }
 0x771   :  { %8390 = vmatprep.subr.bf16.mxu1 %v8148_v44  ;;  %v14370_v46 = vpop.f32.mrb[211].mxu1 }
 0x772   :  { %15986 = vst [vmem:[#allocation78_spill] sm:$0xff] %v14370_v46  ;;  %v7803_v14 = vmax.f32 %v7739_v52, 0.0  ;;  %v7804_v59 = vmax.f32 %v7740_v28, 0.0  ;;  %8391 = vmatpush1.bf16.msra.mxu1 %v8147_v15  ;;  %v15993_v15 = vld [vmem:[#allocation80_spill] sm:$0xff]  ;;  %v7295_v10 = vmax.f32 %v7231_v2, 0.0  ;;  %v7296_v47 = vmax.f32 %v7232_v20, 0.0 }
 0x773   :  { %9559 = vset.pattern.permute.xlu1 %v15787_v27  ;;  %v14377_v33 = vpop.permute.xlu0 %7183  ;;  %v7485_v20 = vadd.f32 %v14141_v53, %v13991_v25 }
 0x774   :  { %15988 = vst [vmem:[#allocation58_spill] sm:$0xff] %v14377_v33  ;;  %v14381_v44 = vpack.c.bf16 %v7803_v14, %v7801_v35  ;;  %v7114_v51 = vpop.permute.xlu1 %7113  ;;  %7918 = vperm.xlu1 %9559, %v15907_v48   ;;  %v14384_v32 = vpack.c.bf16 %v7804_v59, %v7802_v43  ;;  %v9734_v43 = vld [vmem:[%s15202_s10 + $0x4] ss:$8 sps:$4 sm:$0xff]  }
 0x775   :  { %v7229_v52 = vadd.f32 %v7114_v51, %v15992_v13  ;;  %v7230_v38 = vadd.f32 %v7114_v51, %v15993_v15  ;;  %v14388_v28 = vpop.f32.mrb[212].mxu1  ;;  %8337 = vmatprep.mubr.bf16.mxu0 %v9734_v43  ;;  %8410 = vmatprep.mubr.bf16.mxu1 %v9734_v43  ;;  %v15996_v51 = vld [vmem:[#allocation84_spill] sm:$0xff] }
 0x776   :  { %15990 = vst [vmem:[#allocation65_spill] sm:$0xff] %v14381_v44  ;;  %15991 = vst [vmem:[#allocation97_spill] sm:$0xff] %v14384_v32  ;;  %v14390_v63 = vpop.f32.mrb[213].mxu1  ;;  %v7486_v13 = vadd.f32 %v14141_v53, %v15996_v51  ;;  %v15999_v44 = vld [vmem:[#allocation99_spill] sm:$0xff] }
 0x777   :  { %v7293_v33 = vmax.f32 %v7229_v52, 0.0  ;;  %v7294_v57 = vmax.f32 %v7230_v38, 0.0  ;;  %v14392_v46 = vpop.f32.mrb[214].mxu1  ;;  %v7549_v38 = vmax.f32 %v7485_v20, 0.0 }
 0x778   :  { %9561 = vset.pattern.permute.xlu1 %v15725_v0  ;;  %v14395_v35 = vpop.permute.xlu0 %7446  ;;  %v14397_v48 = vpop.f32.mrb[215].mxu1  ;;  %v7550_v53 = vmax.f32 %v7486_v13, 0.0 }
 0x779   :  { %15994 = vst [vmem:[#allocation18_spill] sm:$0xff] %v14395_v35  ;;  %v8153_v14 = vpack.c.bf16 %v7295_v10, %v7293_v33  ;;  %v7643_v59 = vpop.permute.xlu1 %7642  ;;  %7670 = vperm.xlu1 %9561, %v15924_v16   ;;  %v8154_v2 = vpack.c.bf16 %v7296_v47, %v7294_v57  ;;  %v16001_v35 = vld [vmem:[#allocation100_spill] sm:$0xff] }
 0x77b   :  { %8319 = vmatprep.subr.bf16.mxu0 %v8154_v2  ;;  %v15998_v2 = vld [vmem:[#allocation98_spill] sm:$0xff] }
 0x77c   :  { %v14403_v6 = vpop.permute.xlu0 %7450  ;;  %8320 = vmatpush1.bf16.msra.mxu0 %v8153_v14  ;;  %v7741_v51 = vadd.f32 %v7643_v59, %v15998_v2 }
 0x77d   :  { %15995 = vst [vmem:[#allocation61_spill] sm:$0xff] %v14403_v6  ;;  %9562 = vset.pattern.permute.xlu1 %v15787_v27  ;;  %v14410_v52 = vpop.f32.mrb[216].mxu1 }
 0x77e   :  { %v7391_v10 = vpop.permute.xlu1 %7390  ;;  %7922 = vperm.xlu1 %9562, %v13633_v5   ;;  %v14413_v16 = vpop.f32.mrb[217].mxu1  ;;  %v7742_v5 = vadd.f32 %v7643_v59, %v15999_v44 }
 0x77f   :  { %v7487_v57 = vadd.f32 %v7391_v10, %v13998_v34  ;;  %v7488_v33 = vadd.f32 %v7391_v10, %v14002_v36  ;;  %v14417_v15 = vpop.f32.mrb[218].mxu1  ;;  %v16000_v10 = vld [vmem:[#allocation64_spill] sm:$0xff] }
 0x780   :  { %v14419_v25 = vpop.f32.mrb[219].mxu1  ;;  %v7806_v2 = vmax.f32 %v7742_v5, 0.0  ;;  %v16009_v5 = vld [vmem:[#allocation53_spill] sm:$0xff] }
 0x781   :  { %v7551_v47 = vmax.f32 %v7487_v57, 0.0  ;;  %v7552_v43 = vmax.f32 %v7488_v33, 0.0  ;;  %v14421_v14 = vpop.permute.xlu0 %7666  ;;  %v7805_v33 = vmax.f32 %v7741_v51, 0.0 }
 0x782   :  { %15997 = vst [vmem:[#allocation88_spill] sm:$0xff] %v14421_v14  ;;  %9563 = vset.pattern.permute.xlu1 %v15725_v0 }
 0x783   :  { %v8155_v32 = vpack.c.bf16 %v7551_v47, %v7549_v38  ;;  %v7647_v34 = vpop.permute.xlu1 %7646  ;;  %7674 = vperm.xlu1 %9563, %v15931_v41   ;;  %v8156_v36 = vpack.c.bf16 %v7552_v43, %v7550_v53 }
 0x784   :  { %v7743_v6 = vadd.f32 %v7647_v34, %v16000_v10  ;;  %v7744_v20 = vadd.f32 %v7647_v34, %v16001_v35 }
 0x785   :  { %8392 = vmatprep.subr.bf16.mxu1 %v8156_v36  ;;  %v14429_v13 = vpop.permute.xlu0 %7682  ;;  %v14431_v57 = vpop.f32.mrb[220].mxu1  ;;  %v7236_v36 = vadd.f32 %v14216_v7, %v16009_v5 }
 0x786   :  { %16002 = vst [vmem:[#allocation81_spill] sm:$0xff] %v14429_v13  ;;  %v7807_v14 = vmax.f32 %v7743_v6, 0.0  ;;  %v7808_v44 = vmax.f32 %v7744_v20, 0.0  ;;  %8393 = vmatpush1.bf16.msra.mxu1 %v8155_v32  ;;  %v14433_v59 = vpop.f32.mrb[221].mxu1  ;;  %v16008_v32 = vld [vmem:[#allocation51_spill] sm:$0xff] }
 0x787   :  { %7678 = vperm.xlu1 %9563, %v15950_v3   ;;  %v6956_v41 = vpop.f32.mrb[222].mxu1  ;;  %v7235_v6 = vadd.f32 %v14216_v7, %v16008_v32  ;;  %v16013_v32 = vld [vmem:[#allocation102_spill] sm:$0xff]  ;;  %v16014_v7 = vld [vmem:[#allocation104_spill] sm:$0xff] }
 0x788   :  { %v14436_v38 = vpack.c.bf16 %v7807_v14, %v7805_v33  ;;  %v7903_v53 = vpop.permute.xlu1 %7902  ;;  %v6958_v47 = vpop.f32.mrb[223].mxu1  ;;  %v14438_v35 = vpack.c.bf16 %v7808_v44, %v7806_v2  ;;  %v16010_v14 = vld [vmem:[#allocation34_spill] sm:$0xff]  ;;  %v16011_v44 = vld [vmem:[#allocation89_spill] sm:$0xff]  ;;  %v14460_v13 = vadd.f32 %v14177_v56, %v16013_v32 }
 0x789   :  { %v14440_v43 = vadd.f32 %v7903_v53, %v6956_v41  ;;  %v14442_v34 = vpop.permute.xlu0 %7698  ;;  %v14444_v51 = vadd.f32 %v7903_v53, %v6958_v47  ;;  %v7969_v10 = vadd.f32 %v16010_v14, %v14272_v17  ;;  %v7970_v2 = vadd.f32 %v16010_v14, %v14274_v61  ;;  %v16012_v53 = vld [vmem:[#allocation82_spill] sm:$0xff] }
 0x78a   :  { %16003 = vst [vmem:[#allocation87_spill] sm:$0xff] %v14436_v38  ;;  %16004 = vst [vmem:[#allocation80_spill] sm:$0xff] %v14438_v35  ;;  %v7299_v61 = vmax.f32 %v7235_v6, 0.0  ;;  %v7300_v14 = vmax.f32 %v7236_v36, 0.0 }
 0x78b   :  { %16005 = vst [vmem:[#allocation84_spill] sm:$0xff] %v14440_v43  ;;  %16006 = vst [vmem:[#allocation98_spill] sm:$0xff] %v14442_v34  ;;  %9564 = vset.pattern.permute.xlu1 %v15787_v27  ;;  %v8033_v32 = vmax.f32 %v7969_v10, 0.0 }
 0x78c   :  { %16007 = vst [vmem:[#allocation99_spill] sm:$0xff] %v14444_v51  ;;  %7934 = vperm.xlu1 %9564, %v15950_v3   ;;  %v14464_v3 = vadd.f32 %v14177_v56, %v16014_v7  ;;  %v16016_v51 = vld [vmem:[#allocation83_spill] sm:$0xff] }
 0x78d   :  { %v7124_v20 = vpop.permute.xlu1 %7123  ;;  %v6962_v33 = vpop.f32.mrb[224].mxu1  ;;  %v7975_v43 = vadd.f32 %v16016_v51, %v14303_v31 }
 0x78e   :  { %v7233_v41 = vadd.f32 %v7124_v20, %v16011_v44  ;;  %v7234_v47 = vadd.f32 %v7124_v20, %v16012_v53  ;;  %v7847_v34 = vpop.permute.xlu0 %7846  ;;  %v6964_v38 = vpop.f32.mrb[225].mxu1 }
 0x78f   :  { %v7971_v17 = vadd.f32 %v7847_v34, %v14277_v62  ;;  %v7972_v5 = vadd.f32 %v7847_v34, %v14284_v21  ;;  %v14468_v35 = vpop.f32.mrb[226].mxu1  ;;  %v8034_v62 = vmax.f32 %v7970_v2, 0.0  ;;  %v7976_v21 = vadd.f32 %v16016_v51, %v14305_v45  ;;  %v16017_v45 = vld [vmem:[#allocation101_spill] sm:$0xff] }
 0x790   :  { %16015 = vst [vmem:[#allocation64_spill] sm:$0xff] %v14468_v35  ;;  %v7297_v44 = vmax.f32 %v7233_v41, 0.0  ;;  %v7298_v20 = vmax.f32 %v7234_v47, 0.0  ;;  %9565 = vset.pattern.permute.xlu1 %v15725_v0  ;;  %v14471_v53 = vpop.f32.mrb[227].mxu1  ;;  %v8039_v2 = vmax.f32 %v7975_v43, 0.0  ;;  %v7977_v51 = vadd.f32 %v16017_v45, %v14317_v4 }
 0x791   :  { %v8035_v56 = vmax.f32 %v7971_v17, 0.0  ;;  %v8036_v7 = vmax.f32 %v7972_v5, 0.0  ;;  %7686 = vperm.xlu1 %9565, %v15936_v40   ;;  %v7978_v5 = vadd.f32 %v16017_v45, %v14320_v26  ;;  %v7554_v4 = vmax.f32 %v14464_v3, 0.0 }
 0x792   :  { %v8161_v34 = vpack.c.bf16 %v7299_v61, %v7297_v44  ;;  %v7907_v6 = vpop.permute.xlu1 %7906  ;;  %v7851_v36 = vpop.permute.xlu0 %7850  ;;  %v8162_v41 = vpack.c.bf16 %v7300_v14, %v7298_v20  ;;  %v8041_v3 = vmax.f32 %v7977_v51, 0.0  ;;  %v7985_v45 = vadd.f32 %v14193_v30, %v14358_v22 }
 0x793   :  { %v14478_v47 = vpack.c.bf16 %v8035_v56, %v8033_v32  ;;  %v14480_v35 = vadd.f32 %v7907_v6, %v6962_v33  ;;  %v14482_v10 = vadd.f32 %v7907_v6, %v6964_v38  ;;  %v7973_v31 = vadd.f32 %v7851_v36, %v14295_v1 }
 0x794   :  { %v7974_v17 = vadd.f32 %v7851_v36, %v14297_v42  ;;  %8321 = vmatprep.subr.bf16.mxu0 %v8162_v41  ;;  %v14486_v40 = vpack.c.bf16 %v8036_v7, %v8034_v62  ;;  %v7553_v38 = vmax.f32 %v14460_v13, 0.0  ;;  %v8040_v33 = vmax.f32 %v7976_v21, 0.0 }
 0x795   :  { %v8037_v61 = vmax.f32 %v7973_v31, 0.0  ;;  %9566 = vset.pattern.permute.xlu1 %v15787_v27  ;;  %8322 = vmatpush1.bf16.msra.mxu0 %v8161_v34  ;;  %v7983_v42 = vadd.f32 %v14150_v39, %v14345_v60  ;;  %v7809_v56 = vmax.f32 %v14196_v50, 0.0  ;;  %v8042_v21 = vmax.f32 %v7978_v5, 0.0 }
 0x796   :  { %v8038_v1 = vmax.f32 %v7974_v17, 0.0  ;;  %7938 = vperm.xlu1 %9566, %v13679_v54   ;;  %v7863_v43 = vpop.permute.xlu0 %7862  ;;  %v14497_v14 = vpop.f32.mrb[228].mxu1  ;;  %v7984_v36 = vadd.f32 %v14150_v39, %v14347_v37  ;;  %v7986_v39 = vadd.f32 %v14193_v30, %v14361_v24 }
 0x797   :  { %v14500_v44 = vpack.c.bf16 %v8039_v2, %v8037_v61  ;;  %v7979_v26 = vadd.f32 %v7863_v43, %v14326_v12  ;;  %v7980_v20 = vadd.f32 %v7863_v43, %v14328_v55  ;;  %v7399_v32 = vpop.permute.xlu1 %7398  ;;  %v14504_v13 = vpop.f32.mrb[229].mxu1  ;;  %v8047_v55 = vmax.f32 %v7983_v42, 0.0  ;;  %v16018_v42 = vld [vmem:[#allocation103_spill] sm:$0xff] }
 0x798   :  { %v7491_v60 = vadd.f32 %v7399_v32, %v14035_v29  ;;  %v7492_v54 = vadd.f32 %v7399_v32, %v14037_v9  ;;  %v14509_v7 = vpop.f32.mrb[230].mxu1  ;;  %v14511_v62 = vpack.c.bf16 %v8040_v33, %v8038_v1  ;;  %v8048_v32 = vmax.f32 %v7984_v36, 0.0 }
 0x799   :  { %v8043_v34 = vmax.f32 %v7979_v26, 0.0  ;;  %v8044_v6 = vmax.f32 %v7980_v20, 0.0  ;;  %v14513_v12 = vpop.f32.mrb[231].mxu1  ;;  %v16021_v20 = vld [vmem:[#allocation90_spill] sm:$0xff] }
 0x79a   :  { %v7555_v41 = vmax.f32 %v7491_v60, 0.0  ;;  %v7556_v50 = vmax.f32 %v7492_v54, 0.0  ;;  %9567 = vset.pattern.permute.xlu1 %v15725_v0  ;;  %v7867_v29 = vpop.permute.xlu0 %7866  ;;  %v7240_v22 = vadd.f32 %v14256_v19, %v16021_v20  ;;  %v8049_v54 = vmax.f32 %v7985_v45, 0.0  ;;  %v16024_v45 = vld [vmem:[#allocation25_spill] sm:$0xff] }
 0x79b   :  { %v14518_v9 = vpack.c.bf16 %v8043_v34, %v8041_v3  ;;  %v7981_v31 = vadd.f32 %v7867_v29, %v14336_v8  ;;  %v7982_v17 = vadd.f32 %v7867_v29, %v14343_v49  ;;  %7690 = vperm.xlu1 %9567, %v15946_v11   ;;  %v14523_v2 = vpack.c.bf16 %v8044_v6, %v8042_v21  ;;  %v16019_v8 = vld [vmem:[#allocation105_spill] sm:$0xff]  ;;  %v16022_v3 = vld [vmem:[#allocation78_spill] sm:$0xff] }
 0x79c   :  { %v8163_v37 = vpack.c.bf16 %v7555_v41, %v7553_v38  ;;  %v7655_v51 = vpop.permute.xlu1 %7654  ;;  %v8164_v5 = vpack.c.bf16 %v7556_v50, %v7554_v4  ;;  %v7810_v49 = vmax.f32 %v14199_v58, 0.0  ;;  %v16020_v11 = vld [vmem:[#allocation21_spill] sm:$0xff]  ;;  %v8050_v58 = vmax.f32 %v7986_v39, 0.0 }
 0x79d   :  { %v8045_v61 = vmax.f32 %v7981_v31, 0.0  ;;  %v8046_v33 = vmax.f32 %v7982_v17, 0.0  ;;  %v7747_v1 = vadd.f32 %v7655_v51, %v16018_v42  ;;  %v7748_v43 = vadd.f32 %v7655_v51, %v16019_v8 }
 0x79e   :  { %v7239_v26 = vadd.f32 %v14256_v19, %v16020_v11  ;;  %8394 = vmatprep.subr.bf16.mxu1 %v8164_v5  ;;  %v7879_v30 = vpop.permute.xlu0 %7878  ;;  %v16023_v19 = vld [vmem:[#allocation42_spill] sm:$0xff] }
 0x79f   :  { %v14536_v24 = vpack.c.bf16 %v8047_v55, %v8045_v61  ;;  %v7811_v38 = vmax.f32 %v7747_v1, 0.0  ;;  %v7812_v4 = vmax.f32 %v7748_v43, 0.0  ;;  %v7987_v60 = vadd.f32 %v7879_v30, %v14368_v18  ;;  %7694 = vperm.xlu1 %9567, %v15966_v23   ;;  %8395 = vmatpush1.bf16.msra.mxu1 %v8163_v37  ;;  %v16025_v37 = vld [vmem:[#allocation27_spill] sm:$0xff] }
 0x7a0   :  { %v7988_v21 = vadd.f32 %v7879_v30, %v16022_v3  ;;  %v14541_v34 = vpop.f32.mrb[232].mxu1  ;;  %v14543_v6 = vpack.c.bf16 %v8048_v32, %v8046_v33  ;;  %v7991_v36 = vadd.f32 %v16023_v19, %v14392_v46  ;;  %v7992_v31 = vadd.f32 %v16023_v19, %v14397_v48  ;;  %v16027_v3 = vld [vmem:[#allocation106_spill] sm:$0xff] }
 0x7a1   :  { %v14547_v55 = vpack.c.bf16 %v7811_v38, %v7809_v56  ;;  %v8051_v41 = vmax.f32 %v7987_v60, 0.0  ;;  %v7134_v50 = vpop.permute.xlu1 %7133  ;;  %v14549_v29 = vpop.f32.mrb[233].mxu1  ;;  %v14551_v18 = vpack.c.bf16 %v7812_v4, %v7810_v49  ;;  %v7303_v46 = vmax.f32 %v7239_v26, 0.0  ;;  %v16026_v26 = vld [vmem:[#allocation11_spill] sm:$0xff] }
 0x7a2   :  { %v8052_v17 = vmax.f32 %v7988_v21, 0.0  ;;  %v7237_v39 = vadd.f32 %v7134_v50, %v16024_v45  ;;  %v7238_v51 = vadd.f32 %v7134_v50, %v16025_v37  ;;  %v7883_v5 = vpop.permute.xlu0 %7882  ;;  %v14557_v61 = vpop.f32.mrb[234].mxu1  ;;  %v7304_v48 = vmax.f32 %v7240_v22, 0.0 }
 0x7a3   :  { %v14559_v56 = vpack.c.bf16 %v8051_v41, %v8049_v54  ;;  %v7989_v33 = vadd.f32 %v7883_v5, %v14388_v28  ;;  %v7990_v42 = vadd.f32 %v7883_v5, %v14390_v63  ;;  %9568 = vset.pattern.permute.xlu1 %v15787_v27  ;;  %v14564_v1 = vpop.f32.mrb[235].mxu1  ;;  %v8055_v11 = vmax.f32 %v7991_v36, 0.0  ;;  %v14588_v41 = vpop.f32.mrb[250].mxu0 }
 0x7a4   :  { %v7301_v8 = vmax.f32 %v7237_v39, 0.0  ;;  %v7302_v43 = vmax.f32 %v7238_v51, 0.0  ;;  %7950 = vperm.xlu1 %9568, %v15966_v23   ;;  %v14567_v49 = vpack.c.bf16 %v8052_v17, %v8050_v58  ;;  %v7993_v20 = vadd.f32 %v16026_v26, %v14410_v52  ;;  %v16028_v58 = vld [vmem:[#allocation108_spill] sm:$0xff]  ;;  %16029 = vst [vmem:[#allocation100_spill] sm:$0xff] %v14588_v41  ;;  %v16030_v17 = vld [vmem:[#allocation46_spill] sm:$0xff]  ;;  %v14593_v39 = vpop.f32.mrb[251].mxu0 }
 0x7a5   :  { %v8053_v32 = vmax.f32 %v7989_v33, 0.0  ;;  %v8054_v30 = vmax.f32 %v7990_v42, 0.0  ;;  %v8056_v28 = vmax.f32 %v7992_v31, 0.0  ;;  %v7994_v63 = vadd.f32 %v16026_v26, %v14413_v16  ;;  %16031 = vst [vmem:[#allocation51_spill] sm:$0xff] %v14593_v39  ;;  %v16034_v51 = vld [vmem:[#allocation109_spill] sm:$0xff] }
 0x7a6   :  { %v8169_v38 = vpack.c.bf16 %v7303_v46, %v7301_v8  ;;  %v7659_v4 = vpop.permute.xlu1 %7658  ;;  %v7895_v60 = vpop.permute.xlu0 %7894  ;;  %v8170_v22 = vpack.c.bf16 %v7304_v48, %v7302_v43  ;;  %v8057_v50 = vmax.f32 %v7993_v20, 0.0 }
 0x7a7   :  { %v14573_v54 = vpack.c.bf16 %v8055_v11, %v8053_v32  ;;  %v14576_v23 = vadd.f32 %v7659_v4, %v16027_v3  ;;  %v14579_v21 = vadd.f32 %v7659_v4, %v16028_v58  ;;  %v7995_v52 = vadd.f32 %v7895_v60, %v14417_v15  ;;  %v16032_v15 = vld [vmem:[#allocation107_spill] sm:$0xff] }
 0x7a8   :  { %v7996_v19 = vadd.f32 %v7895_v60, %v14419_v25  ;;  %9570 = vset.pattern.permute.xlu1 %v15725_v0  ;;  %8323 = vmatprep.subr.bf16.mxu0 %v8170_v22  ;;  %v14584_v16 = vpop.f32.mrb[236].mxu1  ;;  %v14586_v36 = vpack.c.bf16 %v8056_v28, %v8054_v30  ;;  %v16033_v25 = vld [vmem:[#allocation17_spill] sm:$0xff]  ;;  %v8058_v46 = vmax.f32 %v7994_v63, 0.0  ;;  %v16035_v32 = vld [vmem:[#allocation111_spill] sm:$0xff]  ;;  %v16037_v63 = vld [vmem:[#allocation84_spill] sm:$0xff] }
 0x7a9   :  { %v8059_v31 = vmax.f32 %v7995_v52, 0.0  ;;  %7702 = vperm.xlu1 %9570, %v16030_v17   ;;  %8324 = vmatpush1.bf16.msra.mxu0 %v8169_v38  ;;  %v14591_v45 = vpop.f32.mrb[237].mxu1  ;;  %v7493_v37 = vadd.f32 %v16033_v25, %v16032_v15  ;;  %v7494_v5 = vadd.f32 %v16033_v25, %v16034_v51  ;;  %v16036_v28 = vld [vmem:[#allocation69_spill] sm:$0xff]  ;;  %v8063_v60 = vmax.f32 %v16037_v63, 0.0  ;;  %v16038_v22 = vld [vmem:[#allocation99_spill] sm:$0xff]  ;;  %v16040_v25 = vld [vmem:[#allocation64_spill] sm:$0xff] }
 0x7aa   :  { %v8060_v33 = vmax.f32 %v7996_v19, 0.0  ;;  %v7899_v42 = vpop.permute.xlu0 %7898  ;;  %v14599_v48 = vpop.f32.mrb[238].mxu1  ;;  %v8064_v3 = vmax.f32 %v16038_v22, 0.0  ;;  %v8066_v22 = vmax.f32 %v14482_v10, 0.0  ;;  %v16045_v10 = vld [vmem:[#allocation41_spill] sm:$0xff] }
 0x7ab   :  { %v14601_v8 = vpack.c.bf16 %v8059_v31, %v8057_v50  ;;  %v7997_v43 = vadd.f32 %v7899_v42, %v14431_v57  ;;  %v7998_v11 = vadd.f32 %v7899_v42, %v14433_v59  ;;  %v7407_v26 = vpop.permute.xlu1 %7406  ;;  %v14605_v20 = vpop.f32.mrb[239].mxu1  ;;  %v7557_v57 = vmax.f32 %v7493_v37, 0.0  ;;  %v16039_v31 = vld [vmem:[#allocation47_spill] sm:$0xff] }
 0x7ac   :  { %v7495_v30 = vadd.f32 %v7407_v26, %v16035_v32  ;;  %v7496_v38 = vadd.f32 %v7407_v26, %v16036_v28  ;;  %v14609_v4 = vpack.c.bf16 %v8060_v33, %v8058_v46  ;;  %v7558_v19 = vmax.f32 %v7494_v5, 0.0 }
 0x7ad   :  { %v8061_v58 = vmax.f32 %v7997_v43, 0.0  ;;  %v8062_v52 = vmax.f32 %v7998_v11, 0.0  ;;  %9571 = vset.pattern.permute.xlu1 %v15787_v27  ;;  %v8065_v42 = vmax.f32 %v14480_v35, 0.0 }
 0x7ae   :  { %v7559_v59 = vmax.f32 %v7495_v30, 0.0  ;;  %v7560_v50 = vmax.f32 %v7496_v38, 0.0  ;;  %7954 = vperm.xlu1 %9571, %v16039_v31   ;;  %v7911_v17 = vpop.permute.xlu0 %7910  ;;  %v16041_v30 = vld [vmem:[#allocation110_spill] sm:$0xff]  ;;  %v16042_v38 = vld [vmem:[#allocation112_spill] sm:$0xff] }
 0x7af   :  { %v14615_v15 = vpack.c.bf16 %v8063_v60, %v8061_v58  ;;  %v8003_v51 = vadd.f32 %v7911_v17, %v16040_v25  ;;  %v8004_v46 = vadd.f32 %v7911_v17, %v14471_v53  ;;  %v14619_v33 = vpack.c.bf16 %v8064_v3, %v8062_v52 }
 0x7b0   :  { %v8171_v43 = vpack.c.bf16 %v7559_v59, %v7557_v57  ;;  %v7663_v11 = vpop.permute.xlu1 %7662  ;;  %v8172_v26 = vpack.c.bf16 %v7560_v50, %v7558_v19  ;;  %v14622_v37 = vpop.f32.mrb[240].mxu1  ;;  %v7813_v53 = vmax.f32 %v14576_v23, 0.0  ;;  %v7814_v3 = vmax.f32 %v14579_v21, 0.0  ;;  %v16043_v19 = vld [vmem:[#allocation52_spill] sm:$0xff] }
 0x7b1   :  { %v8067_v5 = vmax.f32 %v8003_v51, 0.0  ;;  %v8068_v32 = vmax.f32 %v8004_v46, 0.0  ;;  %v7751_v28 = vadd.f32 %v7663_v11, %v16041_v30  ;;  %v7752_v63 = vadd.f32 %v7663_v11, %v16042_v38  ;;  %v14626_v60 = vpop.f32.mrb[241].mxu1  ;;  %v14639_v50 = vpop.f32.mrb[252].mxu0  ;;  %v16046_v23 = vld [vmem:[#allocation72_spill] sm:$0xff]  ;;  %v16050_v11 = vld [vmem:[#allocation23_spill] sm:$0xff] }
 0x7b2   :  { %9572 = vset.pattern.permute.xlu1 %v15725_v0  ;;  %8396 = vmatprep.subr.bf16.mxu1 %v8172_v26  ;;  %v14631_v35 = vpop.f32.mrb[242].mxu1  ;;  %16044 = vst [vmem:[#allocation53_spill] sm:$0xff] %v14639_v50  ;;  %v7243_v31 = vadd.f32 %v16046_v23, %v16045_v10  ;;  %v16047_v0 = vld [vmem:[#allocation13_spill] sm:$0xff]  ;;  %v14647_v21 = vpop.f32.mrb[253].mxu0  ;;  %v16053_v38 = vld [vmem:[#allocation15_spill] sm:$0xff] }
 0x7b3   :  { %v14634_v58 = vpack.c.bf16 %v8067_v5, %v8065_v42  ;;  %v7815_v52 = vmax.f32 %v7751_v28, 0.0  ;;  %v7816_v57 = vmax.f32 %v7752_v63, 0.0  ;;  %7706 = vperm.xlu1 %9572, %v16043_v19   ;;  %8397 = vmatpush1.bf16.msra.mxu1 %v8171_v43  ;;  %v14637_v59 = vpop.f32.mrb[243].mxu1  ;;  %v7244_v17 = vadd.f32 %v16046_v23, %v16047_v0  ;;  %16048 = vst [vmem:[#allocation34_spill] sm:$0xff] %v14647_v21  ;;  %v14653_v43 = vpop.f32.mrb[254].mxu0  ;;  %v16051_v5 = vld [vmem:[#allocation29_spill] sm:$0xff] }
 0x7b4   :  { %v14645_v25 = vpack.c.bf16 %v8068_v32, %v8066_v22  ;;  %16049 = vst [vmem:[#allocation89_spill] sm:$0xff] %v14653_v43  ;;  %v14657_v28 = vpop.f32.mrb[255].mxu0  ;;  %v7307_v63 = vmax.f32 %v7243_v31, 0.0  ;;  %v16060_v21 = vld [vmem:[#allocation120_spill] sm:$0xff]  ;;  %v16066_v50 = vld [vmem:[#allocation93_spill] sm:$0xff] }
 0x7b5   :  { %v14649_v51 = vpack.c.bf16 %v7815_v52, %v7813_v53  ;;  %v7144_v46 = vpop.permute.xlu1 %7143  ;;  %v14651_v42 = vpack.c.bf16 %v7816_v57, %v7814_v3  ;;  %16052 = vst [vmem:[#allocation82_spill] sm:$0xff] %v14657_v28  ;;  %v7308_v32 = vmax.f32 %v7244_v17, 0.0  ;;  %v16055_v53 = vld [vmem:[#allocation115_spill] sm:$0xff]  ;;  %v16056_v52 = vld [vmem:[#allocation8_spill] sm:$0xff]  ;;  %v16057_v57 = vld [vmem:[#allocation117_spill] sm:$0xff] }
 0x7b6   :  { %v7241_v26 = vadd.f32 %v7144_v46, %v16050_v11  ;;  %v7242_v30 = vadd.f32 %v7144_v46, %v16051_v5  ;;  %v7497_v3 = vadd.f32 %v16056_v52, %v16055_v53  ;;  %v7498_v23 = vadd.f32 %v16056_v52, %v16057_v57  ;;  %v16059_v28 = vld [vmem:[#allocation119_spill] sm:$0xff] }
 0x7b7   :  { %7710 = vperm.xlu1 %9572, %v16053_v38  }
 0x7b8   :  { %v7305_v22 = vmax.f32 %v7241_v26, 0.0  ;;  %v7306_v19 = vmax.f32 %v7242_v30, 0.0  ;;  %v14660_v10 = vpop.f32.mrb[244].mxu1  ;;  %v7561_v30 = vmax.f32 %v7497_v3, 0.0  ;;  %v7562_v53 = vmax.f32 %v7498_v23, 0.0 }
 0x7b9   :  { %16054 = vst [vmem:[#allocation102_spill] sm:$0xff] %v14660_v10  ;;  %v14666_v0 = vpop.f32.mrb[245].mxu1  ;;  %v16069_v3 = vmov 0  }
 0x7ba   :  { %16058 = vst [vmem:[#allocation104_spill] sm:$0xff] %v14666_v0  ;;  %v8177_v11 = vpack.c.bf16 %v7307_v63, %v7305_v22  ;;  %v7415_v46 = vpop.permute.xlu1 %7414  ;;  %v8178_v5 = vpack.c.bf16 %v7308_v32, %v7306_v19  ;;  %v14671_v17 = vpop.f32.mrb[246].mxu1  ;;  %v16063_v63 = vld [vmem:[#allocation95_spill] sm:$0xff]  ;;  %v16103_v0 = vld [vmem:[#allocation18_spill] sm:$0xff] }
 0x7bb   :  { %v7499_v43 = vadd.f32 %v7415_v46, %v16059_v28  ;;  %v7500_v31 = vadd.f32 %v7415_v46, %v16060_v21  ;;  %9573 = vset.pattern.permute.xlu1 %v15787_v27  ;;  %16061 = vst [vmem:[#allocation83_spill] sm:$0xff] %v14671_v17  ;;  %v14674_v26 = vpop.f32.mrb[247].mxu1  ;;  %v16064_v32 = vld [vmem:[#allocation35_spill] sm:$0xff]  ;;  %v16080_v17 = vld [vmem:[#allocation24_spill] sm:$0xff] }
 0x7bc   :  { %7966 = vperm.xlu1 %9573, %v16053_v38   ;;  %8325 = vmatprep.subr.bf16.mxu0 %v8178_v5  ;;  %16062 = vst [vmem:[#allocation101_spill] sm:$0xff] %v14674_v26  ;;  %v7247_v22 = vadd.f32 %v16064_v32, %v16063_v63  ;;  %v16065_v28 = vld [vmem:[#allocation19_spill] sm:$0xff]  ;;  %v16067_v38 = vld [vmem:[#allocation94_spill] sm:$0xff] }
 0x7bd   :  { %v7563_v52 = vmax.f32 %v7499_v43, 0.0  ;;  %v7564_v57 = vmax.f32 %v7500_v31, 0.0  ;;  %8326 = vmatpush1.bf16.msra.mxu0 %v8177_v11  ;;  %v7248_v21 = vadd.f32 %v16064_v32, %v16065_v28 }
 0x7be   :  { %v7311_v23 = vmax.f32 %v7247_v22, 0.0  ;;  %v16077_v22 = vld [vmem:[#allocation127_spill] sm:$0xff] }
 0x7bf   :  { %v8179_v19 = vpack.c.bf16 %v7563_v52, %v7561_v30  ;;  %v7154_v27 = vpop.permute.xlu1 %7153  ;;  %v8180_v46 = vpack.c.bf16 %v7564_v57, %v7562_v53  ;;  %v7312_v11 = vmax.f32 %v7248_v21, 0.0  ;;  %v16072_v30 = vld [vmem:[#allocation122_spill] sm:$0xff]  ;;  %v16073_v53 = vld [vmem:[#allocation75_spill] sm:$0xff] }
 0x7c0   :  { %v7245_v39 = vadd.f32 %v7154_v27, %v16066_v50  ;;  %v7246_v5 = vadd.f32 %v7154_v27, %v16067_v38  ;;  %v14682_v41 = vpop.f32.mrb[248].mxu1  ;;  %9575 = vset.pattern.permute.xlu1 %v16069_v3  ;;  %v7501_v52 = vadd.f32 %v16073_v53, %v16072_v30  ;;  %v16074_v50 = vld [vmem:[#allocation124_spill] sm:$0xff]  ;;  %v16076_v3 = vld [vmem:[#allocation126_spill] sm:$0xff] }
 0x7c1   :  { %16068 = vst [vmem:[#allocation103_spill] sm:$0xff] %v14682_v41  ;;  %8398 = vmatprep.subr.bf16.mxu1 %v8180_v46  ;;  %v14685_v43 = vpop.f32.mrb[249].mxu1  ;;  %v7502_v57 = vadd.f32 %v16073_v53, %v16074_v50  ;;  %v16079_v30 = vld [vmem:[#allocation86_spill] sm:$0xff] }
 0x7c2   :  { %16070 = vst [vmem:[#allocation105_spill] sm:$0xff] %v14685_v43  ;;  %v7309_v31 = vmax.f32 %v7245_v39, 0.0  ;;  %v7310_v63 = vmax.f32 %v7246_v5, 0.0  ;;  %8399 = vmatpush1.bf16.msra.mxu1 %v8179_v19  ;;  %v14687_v32 = vpop.f32.mrb[250].mxu1  ;;  %v7565_v39 = vmax.f32 %v7501_v52, 0.0  ;;  %v7252_v53 = vadd.f32 %v16079_v30, %v16080_v17  ;;  %v16084_v52 = vld [vmem:[#allocation56_spill] sm:$0xff] }
 0x7c3   :  { %16071 = vst [vmem:[#allocation21_spill] sm:$0xff] %v14687_v32  ;;  %v14693_v28 = vpop.f32.mrb[251].mxu1  ;;  %v7566_v19 = vmax.f32 %v7502_v57, 0.0  ;;  %v16078_v32 = vld [vmem:[#allocation37_spill] sm:$0xff] }
 0x7c4   :  { %16075 = vst [vmem:[#allocation90_spill] sm:$0xff] %v14693_v28  ;;  %v8185_v27 = vpack.c.bf16 %v7311_v23, %v7309_v31  ;;  %v7423_v38 = vpop.permute.xlu1 %7422  ;;  %v8186_v46 = vpack.c.bf16 %v7312_v11, %v7310_v63  ;;  %v7251_v26 = vadd.f32 %v16079_v30, %v16078_v32  ;;  %v16089_v30 = vld [vmem:[#allocation130_spill] sm:$0xff] }
 0x7c5   :  { %v7503_v43 = vadd.f32 %v7423_v38, %v16076_v3  ;;  %v7504_v21 = vadd.f32 %v7423_v38, %v16077_v22  ;;  %v16083_v38 = vld [vmem:[#allocation49_spill] sm:$0xff]  ;;  %v7316_v3 = vmax.f32 %v7252_v53, 0.0 }
 0x7c6   :  { %8327 = vmatprep.subr.bf16.mxu0 %v8186_v46  ;;  %v7315_v32 = vmax.f32 %v7251_v26, 0.0 }
 0x7c7   :  { %v7567_v5 = vmax.f32 %v7503_v43, 0.0  ;;  %v7568_v41 = vmax.f32 %v7504_v21, 0.0  ;;  %8328 = vmatpush1.bf16.msra.mxu0 %v8185_v27  ;;  %v16087_v21 = vld [vmem:[#allocation91_spill] sm:$0xff] }
 0x7c8   :  { %v14701_v50 = vpop.f32.mrb[252].mxu1 }
 0x7c9   :  { %16081 = vst [vmem:[#allocation78_spill] sm:$0xff] %v14701_v50  ;;  %v8187_v23 = vpack.c.bf16 %v7567_v5, %v7565_v39  ;;  %v7164_v11 = vpop.permute.xlu1 %7163  ;;  %v14703_v31 = vpop.f32.mrb[253].mxu1  ;;  %v8188_v63 = vpack.c.bf16 %v7568_v41, %v7566_v19  ;;  %v16088_v39 = vld [vmem:[#allocation43_spill] sm:$0xff] }
 0x7ca   :  { %16082 = vst [vmem:[#allocation42_spill] sm:$0xff] %v14703_v31  ;;  %v7249_v46 = vadd.f32 %v7164_v11, %v16083_v38  ;;  %v7250_v57 = vadd.f32 %v7164_v11, %v16084_v52  ;;  %v14707_v43 = vpop.f32.mrb[254].mxu1  ;;  %v7505_v5 = vadd.f32 %v16088_v39, %v16087_v21  ;;  %v7506_v41 = vadd.f32 %v16088_v39, %v16089_v30  ;;  %v16090_v11 = vld [vmem:[#allocation131_spill] sm:$0xff]  ;;  %v16094_v21 = vld [vmem:[#allocation10_spill] sm:$0xff]  ;;  %v16096_v30 = vld [vmem:[#allocation9_spill] sm:$0xff] }
 0x7cb   :  { %16085 = vst [vmem:[#allocation25_spill] sm:$0xff] %v14707_v43  ;;  %8400 = vmatprep.subr.bf16.mxu1 %v8188_v63  ;;  %v14709_v27 = vpop.f32.mrb[255].mxu1  ;;  %v16091_v43 = vld [vmem:[#allocation133_spill] sm:$0xff] }
 0x7cc   :  { %16086 = vst [vmem:[#allocation27_spill] sm:$0xff] %v14709_v27  ;;  %v7313_v22 = vmax.f32 %v7249_v46, 0.0  ;;  %v7314_v17 = vmax.f32 %v7250_v57, 0.0  ;;  %8401 = vmatpush1.bf16.msra.mxu1 %v8187_v23  ;;  %v7569_v27 = vmax.f32 %v7505_v5, 0.0  ;;  %v7570_v26 = vmax.f32 %v7506_v41, 0.0  ;;  %v16092_v23 = vld [vmem:[#allocation39_spill] sm:$0xff] }
 0x7cd   :  { %v16093_v57 = vld [vmem:[#allocation85_spill] sm:$0xff] }
 0x7ce   :  { %v8193_v19 = vpack.c.bf16 %v7315_v32, %v7313_v22  ;;  %v7431_v38 = vpop.permute.xlu1 %7430  ;;  %v8194_v31 = vpack.c.bf16 %v7316_v3, %v7314_v17  ;;  %v7255_v50 = vadd.f32 %v16093_v57, %v16092_v23  ;;  %v7256_v28 = vadd.f32 %v16093_v57, %v16094_v21  ;;  %v16095_v3 = vld [vmem:[#allocation38_spill] sm:$0xff]  ;;  %v16099_v41 = vld [vmem:[#allocation73_spill] sm:$0xff]  ;;  %v16101_v21 = vld [vmem:[#allocation92_spill] sm:$0xff] }
 0x7cf   :  { %v7507_v52 = vadd.f32 %v7431_v38, %v16090_v11  ;;  %v7508_v63 = vadd.f32 %v7431_v38, %v16091_v43  ;;  %v16097_v43 = vld [vmem:[#allocation70_spill] sm:$0xff] }
 0x7d0   :  { %8329 = vmatprep.subr.bf16.mxu0 %v8194_v31  ;;  %v16098_v31 = vld [vmem:[#allocation79_spill] sm:$0xff] }
 0x7d1   :  { %v7571_v53 = vmax.f32 %v7507_v52, 0.0  ;;  %v7572_v46 = vmax.f32 %v7508_v63, 0.0  ;;  %8330 = vmatpush1.bf16.msra.mxu0 %v8193_v19  ;;  %v7509_v5 = vadd.f32 %v16098_v31, %v16097_v43  ;;  %v7510_v38 = vadd.f32 %v16098_v31, %v16099_v41  ;;  %v16102_v43 = vld [vmem:[#allocation44_spill] sm:$0xff]  ;;  %v16104_v31 = vld [vmem:[#allocation62_spill] sm:$0xff] }
 0x7d2   :  { %v7319_v19 = vmax.f32 %v7255_v50, 0.0  ;;  %v7320_v52 = vmax.f32 %v7256_v28, 0.0  ;;  %v7515_v10 = vadd.f32 %v16103_v0, %v16102_v43  ;;  %v7516_v50 = vadd.f32 %v16103_v0, %v16104_v31  ;;  %v366_v31 = vld [vmem:[%s15203_s11 + $0x18] sm:$0xff] }
 0x7d3   :  { %v8195_v39 = vpack.c.bf16 %v7571_v53, %v7569_v27  ;;  %v7174_v32 = vpop.permute.xlu1 %7173  ;;  %v8196_v22 = vpack.c.bf16 %v7572_v46, %v7570_v26  ;;  %v16100_v26 = vld [vmem:[#allocation68_spill] sm:$0xff] }
 0x7d4   :  { %v7253_v17 = vadd.f32 %v7174_v32, %v16095_v3  ;;  %v7254_v11 = vadd.f32 %v7174_v32, %v16096_v30  ;;  %v7573_v32 = vmax.f32 %v7509_v5, 0.0  ;;  %v7574_v30 = vmax.f32 %v7510_v38, 0.0  ;;  %v364_v5 = vld [vmem:[%s15203_s11 + $0x8] sm:$0xff]  ;;  %v363_v38 = vld [vmem:[%s15203_s11] sm:$0xff] }
 0x7d5   :  { %8402 = vmatprep.subr.bf16.mxu1 %v8196_v22  ;;  %v7580_v0 = vmax.f32 %v7516_v50, 0.0  ;;  %8232 = vperm.xlu1 %9575, %v364_v5   ;;  %v16110_v50 = vld [vmem:[#allocation57_spill] sm:$0xff] }
 0x7d6   :  { %v7317_v63 = vmax.f32 %v7253_v17, 0.0  ;;  %v7318_v23 = vmax.f32 %v7254_v11, 0.0  ;;  %8403 = vmatpush1.bf16.msra.mxu1 %v8195_v39  ;;  %v16105_v11 = vld [vmem:[#allocation22_spill] sm:$0xff]  ;;  %8227 = vperm.xlu0 %9574, %v363_v38  }
 0x7d7   :  { %v372_v5 = vld [vmem:[%s15204_s12 + $0x8] sm:$0xff] }
 0x7d8   :  { %v8201_v57 = vpack.c.bf16 %v7319_v19, %v7317_v63  ;;  %v7439_v27 = vpop.permute.xlu1 %7438  ;;  %v8202_v53 = vpack.c.bf16 %v7320_v52, %v7318_v23  ;;  %v16106_v19 = vld [vmem:[#allocation59_spill] sm:$0xff]  ;;  %v7579_v23 = vmax.f32 %v7515_v10, 0.0 }
 0x7d9   :  { %v7511_v46 = vadd.f32 %v7439_v27, %v16100_v26  ;;  %v7512_v3 = vadd.f32 %v7439_v27, %v16101_v21  ;;  %v16108_v26 = vld [vmem:[#allocation58_spill] sm:$0xff]  ;;  %v16109_v21 = vld [vmem:[#allocation12_spill] sm:$0xff] }
 0x7da   :  { %8331 = vmatprep.subr.bf16.mxu0 %v8202_v53  ;;  %8242 = vperm.xlu0 %9574, %v366_v31  }
 0x7db   :  { %v7575_v28 = vmax.f32 %v7511_v46, 0.0  ;;  %v7576_v22 = vmax.f32 %v7512_v3, 0.0  ;;  %8332 = vmatpush1.bf16.msra.mxu0 %v8201_v57  ;;  %v16107_v57 = vld [vmem:[#allocation45_spill] sm:$0xff]  ;;  %v7258_v3 = vadd.f32 %v16108_v26, %v16109_v21  ;;  %v373_v21 = vld [vmem:[%s15204_s12 + $0x10] sm:$0xff] }
 0x7dc   :  { %v7443_v39 = vpop.permute.xlu1 %7442  ;;  %v7257_v46 = vadd.f32 %v16108_v26, %v16107_v57  ;;  %v367_v26 = vld [vmem:[%s15203_s11 + $0x20] sm:$0xff] }
 0x7dd   :  { %v8203_v17 = vpack.c.bf16 %v7575_v28, %v7573_v32  ;;  %v7513_v41 = vadd.f32 %v7443_v39, %v16105_v11  ;;  %v7514_v52 = vadd.f32 %v7443_v39, %v16106_v19  ;;  %v8204_v63 = vpack.c.bf16 %v7576_v22, %v7574_v30  ;;  %v365_v32 = vld [vmem:[%s15203_s11 + $0x10] sm:$0xff] }
 0x7de   :  { %v16111_v22 = vld [vmem:[#allocation55_spill] sm:$0xff]  ;;  %8237 = vperm.xlu1 %9575, %v365_v32   ;;  %v7321_v11 = vmax.f32 %v7257_v46, 0.0  ;;  %8668 = vperm.xlu0 %9574, %v372_v5  }
 0x7df   :  { %v7577_v27 = vmax.f32 %v7513_v41, 0.0  ;;  %v7578_v53 = vmax.f32 %v7514_v52, 0.0  ;;  %8404 = vmatprep.subr.bf16.mxu1 %v8204_v63  ;;  %v371_v52 = vld [vmem:[%s15204_s12] sm:$0xff] }
 0x7e0   :  { %8405 = vmatpush1.bf16.msra.mxu1 %v8203_v17  ;;  %v7322_v17 = vmax.f32 %v7258_v3, 0.0  ;;  %v16114_v3 = vld [vmem:[#allocation60_spill] sm:$0xff] }
 0x7e1   :  { %v8211_v30 = vpack.c.bf16 %v7579_v23, %v7577_v27  ;;  %v7189_v43 = vpop.permute.xlu1 %7188  ;;  %v8212_v10 = vpack.c.bf16 %v7580_v0, %v7578_v53  ;;  %v16112_v0 = vld [vmem:[#allocation63_spill] sm:$0xff]  ;;  %v16113_v53 = vld [vmem:[#allocation48_spill] sm:$0xff] }
 0x7e2   :  { %v7259_v28 = vadd.f32 %v7189_v43, %v16110_v50  ;;  %v7260_v39 = vadd.f32 %v7189_v43, %v16111_v22  ;;  %8663 = vperm.xlu1 %9575, %v371_v52   ;;  %8673 = vperm.xlu0 %9574, %v373_v21   ;;  %v368_v22 = vld [vmem:[%s15203_s11 + $0x28] sm:$0xff]  ;;  %v374_v52 = vld [vmem:[%s15204_s12 + $0x18] sm:$0xff] }
 0x7e3   :  { %8406 = vmatprep.subr.bf16.mxu1 %v8212_v10 }
 0x7e4   :  { %v7323_v41 = vmax.f32 %v7259_v28, 0.0  ;;  %v7324_v19 = vmax.f32 %v7260_v39, 0.0  ;;  %8407 = vmatpush1.bf16.msra.mxu1 %v8211_v30  ;;  %v16115_v30 = vld [vmem:[#allocation50_spill] sm:$0xff]  ;;  %v16116_v39 = vld [vmem:[#allocation28_spill] sm:$0xff] }
 0x7e5   :  { %v7194_v63 = vpop.permute.xlu1 %7193 }
 0x7e6   :  { %v8209_v38 = vpack.c.bf16 %v7323_v41, %v7321_v11  ;;  %v8210_v23 = vpack.c.bf16 %v7324_v19, %v7322_v17  ;;  %v7261_v27 = vadd.f32 %v7194_v63, %v16112_v0  ;;  %v7262_v57 = vadd.f32 %v7194_v63, %v16113_v53  ;;  %8247 = vperm.xlu1 %9575, %v367_v26   ;;  %v16117_v11 = vld [vmem:[#allocation61_spill] sm:$0xff]  ;;  %v16118_v41 = vld [vmem:[#allocation31_spill] sm:$0xff]  ;;  %v16119_v0 = vld [vmem:[#allocation74_spill] sm:$0xff] }
 0x7e7   :  { %v7517_v17 = vadd.f32 %v16117_v11, %v16116_v39  ;;  %v7518_v19 = vadd.f32 %v16117_v11, %v16118_v41  ;;  %v16120_v53 = vld [vmem:[#allocation77_spill] sm:$0xff]  ;;  %8678 = vperm.xlu0 %9574, %v374_v52   ;;  %v14798_v11 = vld [vmem:[%s15202_s10 + $0x14] ss:$8 sps:$4 sm:$0xff]  }
 0x7e8   :  { %8333 = vmatprep.subr.bf16.mxu0 %v8210_v23  ;;  %v7325_v10 = vmax.f32 %v7261_v27, 0.0  ;;  %v7326_v31 = vmax.f32 %v7262_v57, 0.0  ;;  %v7915_v23 = vpop.permute.xlu0 %7914  ;;  %v14784_v26 = vld [vmem:[%s15202_s10] ss:$8 sps:$4 sm:$0xff]  }
 0x7e9   :  { %v7199_v46 = vpop.permute.xlu1 %7198  ;;  %8334 = vmatpush1.bf16.msra.mxu0 %v8209_v38  ;;  %v7581_v21 = vmax.f32 %v7517_v17, 0.0 }
 0x7ea   :  { %v7263_v32 = vadd.f32 %v7199_v46, %v16114_v3  ;;  %v7264_v43 = vadd.f32 %v7199_v46, %v16115_v30  ;;  %8252 = vperm.xlu1 %9575, %v368_v22   ;;  %v369_v46 = vld [vmem:[%s15203_s11 + $0x30] sm:$0xff]  ;;  %v7582_v3 = vmax.f32 %v7518_v19, 0.0  ;;  %v376_v19 = vld [vmem:[%s15204_s12 + $0x28] sm:$0xff] }
 0x7ec   :  { %v7327_v50 = vmax.f32 %v7263_v32, 0.0  ;;  %v7328_v28 = vmax.f32 %v7264_v43, 0.0  ;;  %v375_v43 = vld [vmem:[%s15204_s12 + $0x20] sm:$0xff] }
 0x7ed   :  { %8683 = vperm.xlu0 %9574, %v375_v43  }
 0x7ee   :  { %v8217_v63 = vpack.c.bf16 %v7327_v50, %v7325_v10  ;;  %v7455_v5 = vpop.permute.xlu1 %7454  ;;  %v8218_v38 = vpack.c.bf16 %v7328_v28, %v7326_v31  ;;  %v8005_v10 = vadd.f32 %v7915_v23, %v14497_v14  ;;  %v8006_v31 = vadd.f32 %v7915_v23, %v14504_v13  ;;  %v16121_v50 = vld [vmem:[#allocation26_spill] sm:$0xff]  ;;  %8257 = vperm.xlu1 %9575, %v369_v46   ;;  %v370_v13 = vld [vmem:[%s15203_s11 + $0x38] sm:$0xff] }
 0x7ef   :  { %v7519_v27 = vadd.f32 %v7455_v5, %v16119_v0  ;;  %v7520_v57 = vadd.f32 %v7455_v5, %v16120_v53  ;;  %v16122_v14 = vld [vmem:[#allocation54_spill] sm:$0xff]  ;;  %v16125_v23 = vld [vmem:[#allocation88_spill] sm:$0xff] }
 0x7f0   :  { %8335 = vmatprep.subr.bf16.mxu0 %v8218_v38  ;;  %v8069_v52 = vmax.f32 %v8005_v10, 0.0  ;;  %v16124_v38 = vld [vmem:[#allocation67_spill] sm:$0xff]  ;;  %v16128_v10 = vld [vmem:[#allocation118_spill] sm:$0xff] }
 0x7f1   :  { %v7583_v32 = vmax.f32 %v7519_v27, 0.0  ;;  %v7584_v30 = vmax.f32 %v7520_v57, 0.0  ;;  %8336 = vmatpush1.bf16.msra.mxu0 %v8217_v63  ;;  %v8070_v63 = vmax.f32 %v8006_v31, 0.0  ;;  %v7753_v0 = vadd.f32 %v16125_v23, %v16124_v38  ;;  %v16126_v27 = vld [vmem:[#allocation66_spill] sm:$0xff]  ;;  %8688 = vperm.xlu0 %9574, %v376_v19  }
 0x7f2   :  { %8451 = vmatprep.subr.bf16.mxu0 %v16121_v50  ;;  %v7754_v53 = vadd.f32 %v16125_v23, %v16126_v27  ;;  %8262 = vperm.xlu1 %9575, %v370_v13   ;;  %v14833_v50 = vld [vmem:[%s15202_s10 + $0x24] ss:$8 sps:$4 sm:$0xff]  }
 0x7f3   :  { %v8219_v28 = vpack.c.bf16 %v7583_v32, %v7581_v21  ;;  %v7919_v22 = vpop.permute.xlu1 %7918  ;;  %v8220_v39 = vpack.c.bf16 %v7584_v30, %v7582_v3  ;;  %v14824_v3 = vld [vmem:[%s15202_s10 + $0x10] ss:$8 sps:$4 sm:$0xff]   ;;  %v7927_v32 = vpop.permute.xlu0 %7926 }
 0x7f4   :  { %v8007_v17 = vadd.f32 %v7919_v22, %v14509_v7  ;;  %v8008_v41 = vadd.f32 %v7919_v22, %v14513_v12  ;;  %8338 = vmatmul.mubr.bf16.vlgmr.msra.gmra.mrb[0].mxu0 %v14784_v26  ;;  %v16123_v12 = vld [vmem:[#allocation96_spill] sm:$0xff]  ;;  %v16130_v22 = vld [vmem:[#allocation114_spill] sm:$0xff]  ;;  %v8011_v13 = vadd.f32 %v7927_v32, %v14557_v61  ;;  %v8012_v19 = vadd.f32 %v7927_v32, %v14564_v1 }
 0x7f5   :  { %8408 = vmatprep.subr.bf16.mxu1 %v8220_v39  ;;  %8452 = vmatpush1.bf16.msra.mxu0 %v16122_v14  ;;  %v16127_v30 = vld [vmem:[#allocation116_spill] sm:$0xff]  ;;  %v7817_v39 = vmax.f32 %v7753_v0, 0.0 }
 0x7f6   :  { %v8071_v5 = vmax.f32 %v8007_v17, 0.0  ;;  %v8072_v7 = vmax.f32 %v8008_v41, 0.0  ;;  %8409 = vmatpush1.bf16.msra.mxu1 %v8219_v28  ;;  %8453 = vmatprep.subr.bf16.mxu0 %v16123_v12  ;;  %v377_v28 = vld [vmem:[%s15204_s12 + $0x30] sm:$0xff]  ;;  %v7818_v17 = vmax.f32 %v7754_v53, 0.0  ;;  %v16132_v12 = vld [vmem:[#allocation129_spill] sm:$0xff]  ;;  %v8075_v38 = vmax.f32 %v8011_v13, 0.0 }
 0x7f7   :  { %8524 = vmatprep.subr.bf16.mxu1 %v14486_v40  ;;  %8347 = vmatprep.mubr.bf16.mxu0 %v14798_v11  ;;  %v16129_v40 = vld [vmem:[#allocation32_spill] sm:$0xff]  ;;  %v8076_v23 = vmax.f32 %v8012_v19, 0.0 }
 0x7f8   :  { %v14817_v57 = vpack.c.bf16 %v8071_v5, %v8069_v52  ;;  %v7671_v46 = vpop.permute.xlu1 %7670  ;;  %v14819_v21 = vpack.c.bf16 %v8072_v7, %v8070_v63  ;;  %8693 = vperm.xlu1 %9575, %v377_v28   ;;  %v378_v52 = vld [vmem:[%s15204_s12 + $0x38] sm:$0xff]  ;;  %v16131_v5 = vld [vmem:[#allocation113_spill] sm:$0xff] }
 0x7f9   :  { %v7755_v43 = vadd.f32 %v7671_v46, %v16127_v30  ;;  %v7756_v31 = vadd.f32 %v7671_v46, %v16128_v10  ;;  %8454 = vmatpush1.bf16.msra.mxu0 %v16129_v40  ;;  %8411 = vmatmul.mubr.bf16.vlgmr.msra.gmra.mrb[0].mxu1 %v14784_v26  ;;  %v14862_v53 = vld [vmem:[%s15202_s10 + $0x20] ss:$8 sps:$4 sm:$0xff]  }
 0x7fa   :  { %8455 = vmatprep.subr.bf16.mxu0 %v16130_v22  ;;  %8525 = vmatpush1.bf16.msra.mxu1 %v14478_v47  ;;  %v16134_v46 = vld [vmem:[#allocation40_spill] sm:$0xff]  ;;  %v16135_v30 = vld [vmem:[#allocation121_spill] sm:$0xff]  ;;  %v16138_v22 = vld [vmem:[#allocation14_spill] sm:$0xff] }
 0x7fb   :  { %v7819_v41 = vmax.f32 %v7755_v43, 0.0  ;;  %v7820_v14 = vmax.f32 %v7756_v31, 0.0  ;;  %8526 = vmatprep.subr.bf16.mxu1 %v14511_v62  ;;  %8420 = vmatprep.mubr.bf16.mxu1 %v14798_v11  ;;  %v379_v62 = vld [vmem:[#allocation2] sm:$0x1]  ;;  %v16137_v40 = vld [vmem:[#allocation33_spill] sm:$0xff] }
 0x7fc   :  { %8348 = vmatmul.mubr.bf16.gmra.mrb[4].mxu0 %v14824_v3  ;;  %8698 = vperm.xlu0 %9574, %v378_v52   ;;  %v16136_v10 = vld [vmem:[#allocation76_spill] sm:$0xff] }
 0x7fd   :  { %v14848_v47 = vpack.c.bf16 %v7819_v41, %v7817_v39  ;;  %v7923_v63 = vpop.permute.xlu1 %7922  ;;  %8456 = vmatpush1.bf16.msra.mxu0 %v16131_v5  ;;  %v14851_v7 = vpack.c.bf16 %v7820_v14, %v7818_v17  ;;  %8357 = vmatprep.mubr.bf16.mxu0 %v14833_v50  ;;  %v16139_v39 = vld [vmem:[#allocation123_spill] sm:$0xff]  ;;  %v16140_v17 = vld [vmem:[#allocation125_spill] sm:$0xff]  ;;  %v16141_v5 = vld [vmem:[#allocation20_spill] sm:$0xff] }
 0x7fe   :  { %v8009_v61 = vadd.f32 %v7923_v63, %v14541_v34  ;;  %v8010_v1 = vadd.f32 %v7923_v63, %v14549_v29  ;;  %8457 = vmatprep.subr.bf16.mxu0 %v16132_v12  ;;  %8527 = vmatpush1.bf16.msra.mxu1 %v14500_v44  ;;  %v16133_v34 = vld [vmem:[#allocation128_spill] sm:$0xff] }
 0x7ff   :  { %8528 = vmatprep.subr.bf16.mxu1 %v14523_v2  ;;  %8871 = vperm.xlu1 %9575, %v379_v62   ;;  %v14869_v44 = vld [vmem:[%s15202_s10 + $0x34] ss:$8 sps:$4 sm:$0xff]   ;;  %v14892_v14 = vld [vmem:[%s15202_s10 + $0x30] ss:$8 sps:$4 sm:$0xff]  }
 0x800   :  { %v8073_v0 = vmax.f32 %v8009_v61, 0.0  ;;  %v8074_v27 = vmax.f32 %v8010_v1, 0.0  ;;  %v16142_v61 = vld [vmem:[#allocation97_spill] sm:$0xff] }
 0x801   :  { %8458 = vmatpush1.bf16.msra.mxu0 %v16133_v34  ;;  %8421 = vmatmul.mubr.bf16.gmra.mrb[4].mxu1 %v14824_v3  ;;  %v16144_v34 = vld [vmem:[#allocation80_spill] sm:$0xff] }
 0x802   :  { %v14871_v2 = vpack.c.bf16 %v8075_v38, %v8073_v0  ;;  %v7675_v29 = vpop.permute.xlu1 %7674  ;;  %8459 = vmatprep.subr.bf16.mxu0 %v16134_v46  ;;  %8529 = vmatpush1.bf16.msra.mxu1 %v14518_v9  ;;  %v14875_v32 = vpack.c.bf16 %v8076_v23, %v8074_v27  ;;  %v7931_v9 = vpop.permute.xlu0 %7930  ;;  %v16147_v46 = vld [vmem:[#allocation132_spill] sm:$0xff] }
 0x803   :  { %8530 = vmatprep.subr.bf16.mxu1 %v14543_v6  ;;  %8430 = vmatprep.mubr.bf16.mxu1 %v14833_v50  ;;  %v7757_v43 = vadd.f32 %v7675_v29, %v16135_v30  ;;  %v7758_v31 = vadd.f32 %v7675_v29, %v16136_v10  ;;  %v8014_v62 = vadd.f32 %v7931_v9, %v14591_v45  ;;  %v16146_v29 = vld [vmem:[#allocation81_spill] sm:$0xff] }
 0x804   :  { %8358 = vmatmul.mubr.bf16.gmra.mrb[8].mxu0 %v14862_v53  ;;  %v7762_v30 = vadd.f32 %v16146_v29, %v16147_v46 }
 0x805   :  { %8460 = vmatpush1.bf16.msra.mxu0 %v16137_v40  ;;  %8367 = vmatprep.mubr.bf16.mxu0 %v14869_v44  ;;  %v7821_v13 = vmax.f32 %v7757_v43, 0.0  ;;  %v7822_v19 = vmax.f32 %v7758_v31, 0.0  ;;  %v8078_v0 = vmax.f32 %v8014_v62, 0.0 }
 0x806   :  { %v7679_v28 = vpop.permute.xlu1 %7678  ;;  %8461 = vmatprep.subr.bf16.mxu0 %v16138_v22  ;;  %8531 = vmatpush1.bf16.msra.mxu1 %v14536_v24  ;;  %v8013_v24 = vadd.f32 %v7931_v9, %v14584_v16  ;;  %v16143_v16 = vld [vmem:[#allocation65_spill] sm:$0xff]  ;;  %v7943_v40 = vpop.permute.xlu0 %7942  ;;  %v16149_v9 = vld [vmem:[#allocation135_spill] sm:$0xff] }
 0x807   :  { %v7759_v6 = vadd.f32 %v7679_v28, %v16139_v39  ;;  %v7760_v41 = vadd.f32 %v7679_v28, %v16140_v17  ;;  %8532 = vmatprep.subr.bf16.mxu1 %v14567_v49  ;;  %v16148_v28 = vld [vmem:[#allocation134_spill] sm:$0xff]  ;;  %v7826_v17 = vmax.f32 %v7762_v30, 0.0 }
 0x808   :  { %v8077_v45 = vmax.f32 %v8013_v24, 0.0 }
 0x809   :  { %v7823_v52 = vmax.f32 %v7759_v6, 0.0  ;;  %v7824_v63 = vmax.f32 %v7760_v41, 0.0  ;;  %8462 = vmatpush1.bf16.msra.mxu0 %v16141_v5  ;;  %8431 = vmatmul.mubr.bf16.gmra.mrb[8].mxu1 %v14862_v53  ;;  %v16150_v6 = vld [vmem:[#allocation87_spill] sm:$0xff] }
 0x80a   :  { %8463 = vmatprep.subr.bf16.mxu0 %v16142_v61  ;;  %8533 = vmatpush1.bf16.msra.mxu1 %v14559_v56  ;;  %v9785_v56 = vld [vmem:[%s15202_s10 + $0x4] ss:$8 sps:$4 sm:$0xff]   ;;  %s9815_s10 = smov [#allocation3]  }
 0x80b   :  { %v14900_v49 = vpack.c.bf16 %v7823_v52, %v7821_v13  ;;  %v7935_v1 = vpop.permute.xlu1 %7934  ;;  %8534 = vmatprep.subr.bf16.mxu1 %v14586_v36  ;;  %v8190_v12 = vpack.c.bf16 %v7824_v63, %v7822_v19  ;;  %8440 = vmatprep.mubr.bf16.mxu1 %v14869_v44  ;;  %v8019_v13 = vadd.f32 %v7943_v40, %v14631_v35  ;;  %s8982_s27 = sshll.u32 %s9815_s10, 4  ;;  %s8983_s27 = int_to_ptr.vmem [resolvable:$true] %s8982_s27 }
 0x80c   :  { %v8015_v38 = vadd.f32 %v7935_v1, %v14599_v48  ;;  %v8016_v23 = vadd.f32 %v7935_v1, %v14605_v20  ;;  %8368 = vmatmul.mubr.bf16.gmra.mrb[12].mxu0 %v14892_v14  ;;  %v16145_v48 = vld [vmem:[#allocation36_spill] sm:$0xff]  ;;  %v8020_v19 = vadd.f32 %v7943_v40, %v14637_v59  ;;  %v16153_v1 = vld [vmem:[#allocation137_spill] sm:$0xff]  ;;  %v16160_v40 = vld [vmem:[#allocation98_spill] sm:$0xff]  ;;  %s9786_s28 = scalar_lea.vmem %s8983_s27, 128  ;;  %p9791_p1 = scmp.lt.s32.totalorder %s8983_s27, %s8983_s27 }
 0x80d   :  { %8464 = vmatpush1.bf16.msra.mxu0 %v16143_v16  ;;  %8483 = vmatprep.mubr.bf16.mxu0 %v9785_v56  ;;  %v7761_v20 = vadd.f32 %v16146_v29, %v16145_v48  ;;  %p9787_p0 = scmp.ne.s32.totalorder %s8983_s27, %s9786_s28  ;;  %p9792_p2 = scmp.lt.s32.totalorder %s9786_s28, %s9786_s28 }
 0x80e   :  { %v8079_v27 = vmax.f32 %v8015_v38, 0.0  ;;  %v8080_v36 = vmax.f32 %v8016_v23, 0.0  ;;  %8465 = vmatprep.subr.bf16.mxu0 %v16144_v34  ;;  %8535 = vmatpush1.bf16.msra.mxu1 %v14573_v54  ;;  %v8084_v24 = vmax.f32 %v8020_v19, 0.0  ;;  %v16154_v23 = vld [vmem:[#allocation138_spill] sm:$0xff]  ;;  %v16157_v34 = vld [vmem:[#allocation83_spill] sm:$0xff] }
 0x80f   :  { %8536 = vmatprep.subr.bf16.mxu1 %v14609_v4  ;;  %v7825_v54 = vmax.f32 %v7761_v20, 0.0  ;;  %p9793_p3 = por %p9792_p2, %p9791_p1 }
 0x810   :  { %v14918_v43 = vpack.c.bf16 %v8079_v27, %v8077_v45  ;;  %v7687_v10 = vpop.permute.xlu1 %7686  ;;  %v8192_v31 = vpack.c.bf16 %v8080_v36, %v8078_v0  ;;  %v16155_v45 = vld [vmem:[#allocation102_spill] sm:$0xff] }
 0x811   :  { %v7763_v22 = vadd.f32 %v7687_v10, %v16148_v28  ;;  %v7764_v39 = vadd.f32 %v7687_v10, %v16149_v9  ;;  %8466 = vmatpush1.bf16.msra.mxu0 %v16150_v6  ;;  %8441 = vmatmul.mubr.bf16.gmra.mrb[12].mxu1 %v14892_v14  ;;  %v16159_v10 = vld [vmem:[#allocation30_spill] sm:$0xff]  ;;  %p9794_p4 = pnand %p9793_p3, %p9787_p0 }
 0x812   :  { %8467 = vmatprep.subr.bf16.mxu0 %v14551_v18  ;;  %8537 = vmatpush1.bf16.msra.mxu1 %v14601_v8  ;;  %v7769_v28 = vadd.f32 %v16160_v40, %v16159_v10 }
 0x813   :  { %v7827_v4 = vmax.f32 %v7763_v22, 0.0  ;;  %v7828_v41 = vmax.f32 %v7764_v39, 0.0  ;;  %8538 = vmatprep.subr.bf16.mxu1 %v14619_v33  ;;  %8556 = vmatprep.mubr.bf16.mxu1 %v9785_v56  ;;  %v8083_v33 = vmax.f32 %v8019_v13, 0.0 }
 0x814   :  { %v7833_v13 = vmax.f32 %v7769_v28, 0.0 }
 0x815   :  { %v8197_v52 = vpack.c.bf16 %v7827_v4, %v7825_v54  ;;  %v7939_v63 = vpop.permute.xlu1 %7938  ;;  %8468 = vmatpush1.bf16.msra.mxu0 %v14547_v55  ;;  %v8198_v5 = vpack.c.bf16 %v7828_v41, %v7826_v17  ;;  %v16162_v54 = vld [vmem:[#allocation100_spill] sm:$0xff]  ;;  %v16163_v4 = vld [vmem:[#allocation51_spill] sm:$0xff] }
 0x816   :  { %v8017_v18 = vadd.f32 %v7939_v63, %v14622_v37  ;;  %v8018_v8 = vadd.f32 %v7939_v63, %v14626_v60  ;;  %8469 = vmatprep.subr.bf16.mxu0 %v14651_v42  ;;  %8539 = vmatpush1.bf16.msra.mxu1 %v14615_v15  ;;  %v16151_v37 = vld [vmem:[#allocation71_spill] sm:$0xff]  ;;  %v16152_v15 = vld [vmem:[#allocation136_spill] sm:$0xff]  ;;  %v16164_v63 = vld [vmem:[#allocation21_spill] sm:$0xff] }
 0x817   :  { %8540 = vmatprep.subr.bf16.mxu1 %v14645_v25 }
 0x818   :  { %v8081_v35 = vmax.f32 %v8017_v18, 0.0  ;;  %v8082_v62 = vmax.f32 %v8018_v8, 0.0  ;;  %v16165_v18 = vld [vmem:[#allocation90_spill] sm:$0xff] }
 0x819   :  { %8470 = vmatpush1.bf16.msra.mxu0 %v14649_v51  ;;  %v7947_v51 = vpop.permute.xlu0 %7946 }
 0x81a   :  { %v8199_v59 = vpack.c.bf16 %v8083_v33, %v8081_v35  ;;  %v7691_v61 = vpop.permute.xlu1 %7690  ;;  %8471 = vmatprep.subr.bf16.mxu0 %v14851_v7  ;;  %8541 = vmatpush1.bf16.msra.mxu1 %v14634_v58  ;;  %v8200_v55 = vpack.c.bf16 %v8084_v24, %v8082_v62  ;;  %v8021_v0 = vadd.f32 %v7947_v51, %v16155_v45  ;;  %v16166_v62 = vld [vmem:[#allocation103_spill] sm:$0xff] }
 0x81b   :  { %8542 = vmatprep.subr.bf16.mxu1 %v14819_v21  ;;  %v7765_v60 = vadd.f32 %v7691_v61, %v16151_v37  ;;  %v7766_v42 = vadd.f32 %v7691_v61, %v16152_v15 }
 0x81c   :  { %v8085_v20 = vmax.f32 %v8021_v0, 0.0  ;;  %v16171_v0 = vld [vmem:[#allocation82_spill] sm:$0xff] }
 0x81d   :  { %8472 = vmatpush1.bf16.msra.mxu0 %v14848_v47  ;;  %v7829_v58 = vmax.f32 %v7765_v60, 0.0  ;;  %v7830_v16 = vmax.f32 %v7766_v42, 0.0  ;;  %v16156_v47 = vld [vmem:[#allocation104_spill] sm:$0xff]  ;;  %v7959_v6 = vpop.permute.xlu0 %7958 }
 0x81e   :  { %v7695_v25 = vpop.permute.xlu1 %7694  ;;  %8473 = vmatprep.subr.bf16.mxu0 %v8190_v12  ;;  %8543 = vmatpush1.bf16.msra.mxu1 %v14817_v57  ;;  %v8022_v27 = vadd.f32 %v7947_v51, %v16156_v47  ;;  %v8028_v8 = vadd.f32 %v7959_v6, %v16165_v18 }
 0x81f   :  { %v7767_v38 = vadd.f32 %v7695_v25, %v16153_v1  ;;  %v7768_v7 = vadd.f32 %v7695_v25, %v16154_v23  ;;  %8544 = vmatprep.subr.bf16.mxu1 %v14875_v32  ;;  %v16158_v32 = vld [vmem:[#allocation101_spill] sm:$0xff] }
 0x820   :  { %v8086_v46 = vmax.f32 %v8022_v27, 0.0 }
 0x821   :  { %v7831_v21 = vmax.f32 %v7767_v38, 0.0  ;;  %v7832_v56 = vmax.f32 %v7768_v7, 0.0  ;;  %8474 = vmatpush1.bf16.msra.mxu0 %v14900_v49  ;;  %v16168_v38 = vld [vmem:[#allocation53_spill] sm:$0xff]  ;;  %v16169_v7 = vld [vmem:[#allocation34_spill] sm:$0xff] }
 0x822   :  { %8475 = vmatprep.subr.bf16.mxu0 %v8198_v5  ;;  %8545 = vmatpush1.bf16.msra.mxu1 %v14871_v2  ;;  %v16161_v2 = vld [vmem:[#allocation16_spill] sm:$0xff]  ;;  %v8027_v5 = vadd.f32 %v7959_v6, %v16164_v63 }
 0x823   :  { %v8205_v57 = vpack.c.bf16 %v7831_v21, %v7829_v58  ;;  %v7951_v12 = vpop.permute.xlu1 %7950  ;;  %8546 = vmatprep.subr.bf16.mxu1 %v8192_v31  ;;  %v8206_v36 = vpack.c.bf16 %v7832_v56, %v7830_v16  ;;  %v7770_v22 = vadd.f32 %v16160_v40, %v16161_v2  ;;  %v7963_v21 = vpop.permute.xlu0 %7962  ;;  %v16170_v56 = vld [vmem:[#allocation89_spill] sm:$0xff]  ;;  %v16175_v40 = vld [vmem:[#allocation27_spill] sm:$0xff] }
 0x824   :  { %v8023_v48 = vadd.f32 %v7951_v12, %v16157_v34  ;;  %v8024_v29 = vadd.f32 %v7951_v12, %v16158_v32  ;;  %v8091_v60 = vmax.f32 %v8027_v5, 0.0  ;;  %v16172_v34 = vld [vmem:[#allocation78_spill] sm:$0xff] }
 0x825   :  { %8476 = vmatpush1.bf16.msra.mxu0 %v8197_v52  ;;  %v7834_v19 = vmax.f32 %v7770_v22, 0.0  ;;  %v16173_v32 = vld [vmem:[#allocation42_spill] sm:$0xff] }
 0x826   :  { %v8087_v30 = vmax.f32 %v8023_v48, 0.0  ;;  %v8088_v49 = vmax.f32 %v8024_v29, 0.0  ;;  %8477 = vmatprep.subr.bf16.mxu0 %v8206_v36  ;;  %8547 = vmatpush1.bf16.msra.mxu1 %v14918_v43  ;;  %v8029_v48 = vadd.f32 %v7963_v21, %v16172_v34  ;;  %v8030_v29 = vadd.f32 %v7963_v21, %v16173_v32 }
 0x827   :  { %8548 = vmatprep.subr.bf16.mxu1 %v8200_v55  ;;  %v16167_v55 = vld [vmem:[#allocation105_spill] sm:$0xff] }
 0x828   :  { %v8207_v31 = vpack.c.bf16 %v8087_v30, %v8085_v20  ;;  %v7703_v9 = vpop.permute.xlu1 %7702  ;;  %v8208_v39 = vpack.c.bf16 %v8088_v49, %v8086_v46  ;;  %v16174_v49 = vld [vmem:[#allocation25_spill] sm:$0xff]  ;;  %v8093_v2 = vmax.f32 %v8029_v48, 0.0  ;;  %v8094_v22 = vmax.f32 %v8030_v29, 0.0 }
 0x829   :  { %v7771_v17 = vadd.f32 %v7703_v9, %v16162_v54  ;;  %v7772_v41 = vadd.f32 %v7703_v9, %v16163_v4  ;;  %8478 = vmatpush1.bf16.msra.mxu0 %v8205_v57 }
 0x82a   :  { %8549 = vmatpush1.bf16.msra.mxu1 %v8199_v59  ;;  %v8092_v59 = vmax.f32 %v8028_v8, 0.0 }
 0x82b   :  { %v7835_v43 = vmax.f32 %v7771_v17, 0.0  ;;  %v7836_v52 = vmax.f32 %v7772_v41, 0.0  ;;  %8550 = vmatprep.subr.bf16.mxu1 %v8208_v39 }
 0x82d   :  { %v8213_v33 = vpack.c.bf16 %v7835_v43, %v7833_v13  ;;  %v7955_v24 = vpop.permute.xlu1 %7954  ;;  %v8214_v35 = vpack.c.bf16 %v7836_v52, %v7834_v19 }
 0x82e   :  { %v8025_v61 = vadd.f32 %v7955_v24, %v16166_v62  ;;  %v8026_v37 = vadd.f32 %v7955_v24, %v16167_v55  ;;  %8551 = vmatpush1.bf16.msra.mxu1 %v8207_v31 }
 0x82f   :  { %8479 = vmatprep.subr.bf16.mxu0 %v8214_v35 }
 0x830   :  { %v8089_v15 = vmax.f32 %v8025_v61, 0.0  ;;  %v8090_v42 = vmax.f32 %v8026_v37, 0.0  ;;  %8480 = vmatpush1.bf16.msra.mxu0 %v8213_v33 }
 0x832   :  { %v8215_v25 = vpack.c.bf16 %v8091_v60, %v8089_v15  ;;  %v7707_v51 = vpop.permute.xlu1 %7706  ;;  %v8216_v1 = vpack.c.bf16 %v8092_v59, %v8090_v42 }
 0x833   :  { %v7773_v23 = vadd.f32 %v7707_v51, %v16168_v38  ;;  %v7774_v58 = vadd.f32 %v7707_v51, %v16169_v7 }
 0x834   :  { %8552 = vmatprep.subr.bf16.mxu1 %v8216_v1 }
 0x835   :  { %8553 = vmatpush1.bf16.msra.mxu1 %v8215_v25  ;;  %v7837_v27 = vmax.f32 %v7773_v23, 0.0  ;;  %v7838_v57 = vmax.f32 %v7774_v58, 0.0 }
 0x836   :  { %v7711_v16 = vpop.permute.xlu1 %7710 }
 0x837   :  { %v7775_v45 = vadd.f32 %v7711_v16, %v16170_v56  ;;  %v7776_v47 = vadd.f32 %v7711_v16, %v16171_v0 }
 0x839   :  { %v7839_v12 = vmax.f32 %v7775_v45, 0.0  ;;  %v7840_v36 = vmax.f32 %v7776_v47, 0.0 }
 0x83b   :  { %v8221_v20 = vpack.c.bf16 %v7839_v12, %v7837_v27  ;;  %v7967_v46 = vpop.permute.xlu1 %7966  ;;  %v8222_v30 = vpack.c.bf16 %v7840_v36, %v7838_v57 }
 0x83c   :  { %v8031_v10 = vadd.f32 %v7967_v46, %v16174_v49  ;;  %v8032_v28 = vadd.f32 %v7967_v46, %v16175_v40 }
 0x83d   :  { %8481 = vmatprep.subr.bf16.mxu0 %v8222_v30 }
 0x83e   :  { %v8095_v31 = vmax.f32 %v8031_v10, 0.0  ;;  %v8096_v9 = vmax.f32 %v8032_v28, 0.0  ;;  %8482 = vmatpush1.bf16.msra.mxu0 %v8221_v20 }
 0x840   :  { %v8223_v39 = vpack.c.bf16 %v8095_v31, %v8093_v2  ;;  %v8224_v6 = vpack.c.bf16 %v8096_v9, %v8094_v22 }
 0x841   :  { %8484 = vmatmul.mubr.bf16.vlgmr.msra.gmra.mrb[16].mxu0 %v14784_v26 }
 0x842   :  { %8554 = vmatprep.subr.bf16.mxu1 %v8224_v6  ;;  %8493 = vmatprep.mubr.bf16.mxu0 %v14798_v11 }
 0x843   :  { %8555 = vmatpush1.bf16.msra.mxu1 %v8223_v39 }
 0x846   :  { %8557 = vmatmul.mubr.bf16.vlgmr.msra.gmra.mrb[16].mxu1 %v14784_v26 }
 0x847   :  { %8566 = vmatprep.mubr.bf16.mxu1 %v14798_v11 }
 0x849   :  { %8494 = vmatmul.mubr.bf16.gmra.mrb[20].mxu0 %v14824_v3 }
 0x84a   :  { %8503 = vmatprep.mubr.bf16.mxu0 %v14833_v50 }
 0x84e   :  { %8567 = vmatmul.mubr.bf16.gmra.mrb[20].mxu1 %v14824_v3 }
 0x84f   :  { %8576 = vmatprep.mubr.bf16.mxu1 %v14833_v50 }
 0x851   :  { %8504 = vmatmul.mubr.bf16.gmra.mrb[24].mxu0 %v14862_v53 }
 0x852   :  { %8513 = vmatprep.mubr.bf16.mxu0 %v14869_v44 }
 0x854   :  { %v14985_v26 = vpop.permute.xlu1 %8232 }
 0x855   :  { %v14987_v11 = vpop.permute.xlu0 %8227 }
 0x856   :  { %8577 = vmatmul.mubr.bf16.gmra.mrb[24].mxu1 %v14862_v53 }
 0x857   :  { %8586 = vmatprep.mubr.bf16.mxu1 %v14869_v44 }
 0x859   :  { %8514 = vmatmul.mubr.bf16.gmra.mrb[28].mxu0 %v14892_v14  ;;  %v14991_v3 = vpop.permute.xlu0 %8242 }
 0x85d   :  { %v14989_v54 = vpop.permute.xlu1 %8237  ;;  %v14995_v17 = vpop.permute.xlu0 %8668 }
 0x85e   :  { %8587 = vmatmul.mubr.bf16.gmra.mrb[28].mxu1 %v14892_v14 }
 0x861   :  { %v14993_v50 = vpop.permute.xlu1 %8663  ;;  %v15000_v13 = vpop.permute.xlu0 %8673 }
 0x865   :  { %v14997_v53 = vpop.permute.xlu1 %8247 }
 0x866   :  { %v15012_v42 = vpop.permute.xlu0 %8678 }
 0x869   :  { %v15008_v37 = vpop.permute.xlu1 %8252 }
 0x86c   :  { %v15030_v6 = vpop.permute.xlu0 %8683 }
 0x86d   :  { %v15026_v28 = vpop.permute.xlu1 %8257 }
 0x8c7   :  { %v8339_v4 = vpop.f32.mrb[0].mxu0 }
 0x8c8   :  { %v8340_v44 = vadd.f32 %v8339_v4, %v14987_v11  ;;  %v8341_v41 = vpop.f32.mrb[1].mxu0 }
 0x8c9   :  { %v8342_v14 = vadd.f32 %v8341_v41, %v14987_v11  ;;  %v8343_v19 = vpop.f32.mrb[2].mxu0 }
 0x8ca   :  { %v8597_v43 = vmax.f32 %v8340_v44, 0.0  ;;  %v8344_v52 = vadd.f32 %v8343_v19, %v14985_v26  ;;  %v8345_v63 = vpop.f32.mrb[3].mxu0 }
 0x8cb   :  { %v8598_v5 = vmax.f32 %v8342_v14, 0.0  ;;  %v8346_v18 = vadd.f32 %v8345_v63, %v14985_v26 }
 0x8cc   :  { %v8701_v8 = vmul.f32 %v14993_v50, %v8597_v43  ;;  %v8412_v33 = vpop.f32.mrb[0].mxu1  ;;  %v8605_v24 = vmax.f32 %v8344_v52, 0.0 }
 0x8cd   :  { %v8413_v35 = vadd.f32 %v8412_v33, %v14987_v11  ;;  %v8702_v62 = vmul.f32 %v14993_v50, %v8598_v5  ;;  %v8414_v61 = vpop.f32.mrb[1].mxu1  ;;  %v8606_v55 = vmax.f32 %v8346_v18, 0.0 }
 0x8ce   :  { %v8415_v60 = vadd.f32 %v8414_v61, %v14987_v11  ;;  %v8709_v59 = vmul.f32 %v14995_v17, %v8605_v24  ;;  %v8416_v15 = vpop.f32.mrb[2].mxu1 }
 0x8cf   :  { %v8599_v25 = vmax.f32 %v8413_v35, 0.0  ;;  %v8417_v51 = vadd.f32 %v8416_v15, %v14985_v26  ;;  %v8710_v1 = vmul.f32 %v14995_v17, %v8606_v55  ;;  %v8418_v38 = vpop.f32.mrb[3].mxu1  ;;  %v8349_v23 = vpop.f32.mrb[4].mxu0 }
 0x8d0   :  { %v8600_v7 = vmax.f32 %v8415_v60, 0.0  ;;  %v8765_v58 = vadd.f32 %v8709_v59, %v8701_v8  ;;  %v8419_v16 = vadd.f32 %v8418_v38, %v14985_v26  ;;  %v8350_v21 = vadd.f32 %v8349_v23, %v14989_v54  ;;  %v8351_v56 = vpop.f32.mrb[5].mxu0 }
 0x8d1   :  { %v8703_v45 = vmul.f32 %v14993_v50, %v8599_v25  ;;  %v8607_v0 = vmax.f32 %v8417_v51, 0.0  ;;  %v8778_v47 = vadd.f32 %v8710_v1, %v8702_v62  ;;  %v8352_v27 = vadd.f32 %v8351_v56, %v14989_v54  ;;  %v8353_v57 = vpop.f32.mrb[6].mxu0 }
 0x8d2   :  { %v8704_v12 = vmul.f32 %v14993_v50, %v8600_v7  ;;  %v8608_v36 = vmax.f32 %v8419_v16, 0.0  ;;  %v8613_v34 = vmax.f32 %v8350_v21, 0.0  ;;  %v8354_v48 = vadd.f32 %v8353_v57, %v14991_v3  ;;  %v8355_v32 = vpop.f32.mrb[7].mxu0 }
 0x8d3   :  { %v8711_v29 = vmul.f32 %v14995_v17, %v8607_v0  ;;  %v8614_v20 = vmax.f32 %v8352_v27, 0.0  ;;  %v8356_v46 = vadd.f32 %v8355_v32, %v14991_v3  ;;  %v15046_v0 = vpop.permute.xlu0 %8688 }
 0x8d4   :  { %v8712_v30 = vmul.f32 %v14995_v17, %v8608_v36  ;;  %v8717_v49 = vmul.f32 %v15000_v13, %v8613_v34  ;;  %v8422_v10 = vpop.f32.mrb[4].mxu1  ;;  %v8621_v40 = vmax.f32 %v8354_v48, 0.0 }
 0x8d5   :  { %v8791_v2 = vadd.f32 %v8711_v29, %v8703_v45  ;;  %v8423_v22 = vadd.f32 %v8422_v10, %v14989_v54  ;;  %v8718_v31 = vmul.f32 %v15000_v13, %v8614_v20  ;;  %v8424_v9 = vpop.f32.mrb[5].mxu1  ;;  %v8622_v39 = vmax.f32 %v8356_v46, 0.0  ;;  %v15044_v45 = vpop.permute.xlu1 %8262 }
 0x8d6   :  { %v8804_v4 = vadd.f32 %v8712_v30, %v8704_v12  ;;  %v8766_v44 = vadd.f32 %v8765_v58, %v8717_v49  ;;  %v8425_v41 = vadd.f32 %v8424_v9, %v14989_v54  ;;  %v8426_v14 = vpop.f32.mrb[6].mxu1  ;;  %v8725_v19 = vmul.f32 %v15012_v42, %v8621_v40 }
 0x8d7   :  { %v8615_v43 = vmax.f32 %v8423_v22, 0.0  ;;  %v8779_v52 = vadd.f32 %v8778_v47, %v8718_v31  ;;  %v8427_v63 = vadd.f32 %v8426_v14, %v14991_v3  ;;  %v8428_v5 = vpop.f32.mrb[7].mxu1  ;;  %v8726_v18 = vmul.f32 %v15012_v42, %v8622_v39  ;;  %v8359_v8 = vpop.f32.mrb[8].mxu0 }
 0x8d8   :  { %v8616_v33 = vmax.f32 %v8425_v41, 0.0  ;;  %v8429_v24 = vadd.f32 %v8428_v5, %v14991_v3  ;;  %v8767_v35 = vadd.f32 %v8766_v44, %v8725_v19  ;;  %v8360_v62 = vadd.f32 %v8359_v8, %v14997_v53  ;;  %v8361_v61 = vpop.f32.mrb[9].mxu0 }
 0x8d9   :  { %v8719_v55 = vmul.f32 %v15000_v13, %v8615_v43  ;;  %v8623_v60 = vmax.f32 %v8427_v63, 0.0  ;;  %v8780_v59 = vadd.f32 %v8779_v52, %v8726_v18  ;;  %v8362_v15 = vadd.f32 %v8361_v61, %v14997_v53  ;;  %v8363_v25 = vpop.f32.mrb[10].mxu0  ;;  %v15060_v8 = vpop.permute.xlu1 %8693 }
 0x8da   :  { %v8720_v51 = vmul.f32 %v15000_v13, %v8616_v33  ;;  %v8624_v1 = vmax.f32 %v8429_v24, 0.0  ;;  %v8629_v38 = vmax.f32 %v8360_v62, 0.0  ;;  %v8364_v23 = vadd.f32 %v8363_v25, %v15008_v37  ;;  %v8365_v7 = vpop.f32.mrb[11].mxu0 }
 0x8db   :  { %v8792_v58 = vadd.f32 %v8791_v2, %v8719_v55  ;;  %v8727_v16 = vmul.f32 %v15012_v42, %v8623_v60  ;;  %v8630_v21 = vmax.f32 %v8362_v15, 0.0  ;;  %v8366_v56 = vadd.f32 %v8365_v7, %v15008_v37 }
 0x8dc   :  { %v8805_v47 = vadd.f32 %v8804_v4, %v8720_v51  ;;  %v8728_v27 = vmul.f32 %v15012_v42, %v8624_v1  ;;  %v8432_v57 = vpop.f32.mrb[8].mxu1  ;;  %v8637_v12 = vmax.f32 %v8364_v23, 0.0  ;;  %v8733_v36 = vmul.f32 %v15030_v6, %v8629_v38  ;;  %v15066_v51 = vpop.permute.xlu0 %8698 }
 0x8dd   :  { %v8793_v34 = vadd.f32 %v8792_v58, %v8727_v16  ;;  %v8433_v48 = vadd.f32 %v8432_v57, %v14997_v53  ;;  %v8434_v32 = vpop.f32.mrb[9].mxu1  ;;  %v8638_v29 = vmax.f32 %v8366_v56, 0.0  ;;  %v8734_v20 = vmul.f32 %v15030_v6, %v8630_v21 }
 0x8de   :  { %v8806_v46 = vadd.f32 %v8805_v47, %v8728_v27  ;;  %v8435_v30 = vadd.f32 %v8434_v32, %v14997_v53  ;;  %v8436_v49 = vpop.f32.mrb[10].mxu1  ;;  %v8768_v10 = vadd.f32 %v8767_v35, %v8733_v36  ;;  %v8741_v40 = vmul.f32 %v15046_v0, %v8637_v12 }
 0x8df   :  { %v8631_v2 = vmax.f32 %v8433_v48, 0.0  ;;  %v8437_v22 = vadd.f32 %v8436_v49, %v15008_v37  ;;  %v8438_v31 = vpop.f32.mrb[11].mxu1  ;;  %v8781_v9 = vadd.f32 %v8780_v59, %v8734_v20  ;;  %v8369_v39 = vpop.f32.mrb[12].mxu0  ;;  %v8742_v4 = vmul.f32 %v15046_v0, %v8638_v29 }
 0x8e0   :  { %v8632_v44 = vmax.f32 %v8435_v30, 0.0  ;;  %v8439_v41 = vadd.f32 %v8438_v31, %v15008_v37  ;;  %v8370_v14 = vadd.f32 %v8369_v39, %v15026_v28  ;;  %v8371_v19 = vpop.f32.mrb[13].mxu0  ;;  %v8769_v43 = vadd.f32 %v8768_v10, %v8741_v40 }
 0x8e1   :  { %v8639_v52 = vmax.f32 %v8437_v22, 0.0  ;;  %v8735_v63 = vmul.f32 %v15030_v6, %v8631_v2  ;;  %v8372_v5 = vadd.f32 %v8371_v19, %v15026_v28  ;;  %v8373_v18 = vpop.f32.mrb[14].mxu0  ;;  %v8782_v33 = vadd.f32 %v8781_v9, %v8742_v4 }
 0x8e2   :  { %v8640_v24 = vmax.f32 %v8439_v41, 0.0  ;;  %v8736_v35 = vmul.f32 %v15030_v6, %v8632_v44  ;;  %v8645_v62 = vmax.f32 %v8370_v14, 0.0  ;;  %v8374_v61 = vadd.f32 %v8373_v18, %v15044_v45  ;;  %v8375_v55 = vpop.f32.mrb[15].mxu0 }
 0x8e3   :  { %v8794_v60 = vadd.f32 %v8793_v34, %v8735_v63  ;;  %v8646_v59 = vmax.f32 %v8372_v5, 0.0  ;;  %v8376_v15 = vadd.f32 %v8375_v55, %v15044_v45  ;;  %v8743_v25 = vmul.f32 %v15046_v0, %v8639_v52 }
 0x8e4   :  { %v8807_v1 = vadd.f32 %v8806_v46, %v8736_v35  ;;  %v8442_v38 = vpop.f32.mrb[12].mxu1  ;;  %v8653_v23 = vmax.f32 %v8374_v61, 0.0  ;;  %v8744_v7 = vmul.f32 %v15046_v0, %v8640_v24  ;;  %v8749_v58 = vmul.f32 %v15060_v8, %v8645_v62  ;;  %v8872_v62 = vpop.permute.xlu1 %8871 }
 0x8e5   :  { %v8443_v16 = vadd.f32 %v8442_v38, %v15026_v28  ;;  %v8444_v21 = vpop.f32.mrb[13].mxu1  ;;  %v8654_v56 = vmax.f32 %v8376_v15, 0.0  ;;  %v8750_v47 = vmul.f32 %v15060_v8, %v8646_v59  ;;  %v8795_v27 = vadd.f32 %v8794_v60, %v8743_v25 }
 0x8e6   :  { %v8445_v57 = vadd.f32 %v8444_v21, %v15026_v28  ;;  %v8446_v12 = vpop.f32.mrb[14].mxu1  ;;  %v8770_v36 = vadd.f32 %v8769_v43, %v8749_v58  ;;  %v8808_v34 = vadd.f32 %v8807_v1, %v8744_v7  ;;  %v8757_v48 = vmul.f32 %v15066_v51, %v8653_v23  ;;  %v16176_v23 = vld [vmem:[#allocation7_spill] sm:$0xff] }
 0x8e7   :  { %v8647_v32 = vmax.f32 %v8443_v16, 0.0  ;;  %v8447_v29 = vadd.f32 %v8446_v12, %v15044_v45  ;;  %v8448_v20 = vpop.f32.mrb[15].mxu1  ;;  %v8783_v46 = vadd.f32 %v8782_v33, %v8750_v47  ;;  %v8758_v30 = vmul.f32 %v15066_v51, %v8654_v56 }
 0x8e8   :  { %v8648_v49 = vmax.f32 %v8445_v57, 0.0  ;;  %v8449_v10 = vadd.f32 %v8448_v20, %v15044_v45  ;;  %v8771_v40 = vadd.f32 %v8770_v36, %v8757_v48  ;;  %v9814_v15 = vmov 1966171168  }
 0x8e9   :  { %v8655_v2 = vmax.f32 %v8447_v29, 0.0  ;;  %v8751_v22 = vmul.f32 %v15060_v8, %v8647_v32  ;;  %v8784_v31 = vadd.f32 %v8783_v46, %v8758_v30  ;;  %v8898_v25 = vunpack.c.l.s4 %v9814_v15  ;;  %v16177_v46 = vld [vmem:[#allocation6_spill] sm:$0xff] }
 0x8ea   :  { %v8656_v9 = vmax.f32 %v8449_v10, 0.0  ;;  %v8752_v39 = vmul.f32 %v15060_v8, %v8648_v49  ;;  %v8772_v4 = vrot.slane %v8771_v40, 4  ;;  %v15082_v7 = vrot.slane %v8872_v62, %v16176_v23 }
 0x8eb   :  { %v8796_v44 = vadd.f32 %v8795_v27, %v8751_v22  ;;  %v8759_v41 = vmul.f32 %v15066_v51, %v8655_v2  ;;  %v8785_v14 = vrot.slane %v8784_v31, 4  ;;  %v8899_v57 = vunpack.c.0.s8 %v8898_v25 }
 0x8ec   :  { %v8809_v19 = vadd.f32 %v8808_v34, %v8752_v39  ;;  %v8760_v43 = vmul.f32 %v15066_v51, %v8656_v9  ;;  %v8773_v52 = vadd.f32 %v8772_v4, %v8771_v40  ;;  %v16178_v4 = vlaneseq }
 0x8ed   :  { %v8786_v63 = vadd.f32 %v8785_v14, %v8784_v31  ;;  %v8797_v5 = vadd.f32 %v8796_v44, %v8759_v41  ;;  %v15087_v30 = vsub.s32 %v8899_v57, %v16177_v46 }
 0x8ee   :  { %v8774_v18 = vrot.slane %v8773_v52, 2  ;;  %v8810_v33 = vadd.f32 %v8809_v19, %v8760_v43  ;;  %vm15093_vm4 = vcmp.lt.s32.totalorder %v16178_v4, 256 }
 0x8ef   :  { %v8787_v24 = vrot.slane %v8786_v63, 2  ;;  %v8798_v35 = vrot.slane %v8797_v5, 4 }
 0x8f0   :  { %v8775_v61 = vadd.f32 %v8774_v18, %v8773_v52  ;;  %v8811_v55 = vrot.slane %v8810_v33, 4 }
 0x8f1   :  { %v8788_v60 = vadd.f32 %v8787_v24, %v8786_v63  ;;  %v8799_v59 = vadd.f32 %v8798_v35, %v8797_v5 }
 0x8f2   :  { %v8776_v1 = vrot.slane %v8775_v61, 1  ;;  %v8812_v38 = vadd.f32 %v8811_v55, %v8810_v33 }
 0x8f3   :  { %v8789_v58 = vrot.slane %v8788_v60, 1  ;;  %v8800_v16 = vrot.slane %v8799_v59, 2 }
 0x8f4   :  { %v8777_v21 = vadd.f32 %v8776_v1, %v8775_v61  ;;  %v8813_v56 = vrot.slane %v8812_v38, 2 }
 0x8f5   :  { %v8790_v47 = vadd.f32 %v8789_v58, %v8788_v60  ;;  %v8801_v27 = vadd.f32 %v8800_v16, %v8799_v59 }
 0x8f6   :  { %v8814_v12 = vadd.f32 %v8813_v56, %v8812_v38  ;;  %v8878_v36 = vadd.f32 %v15082_v7, %v8777_v21 }
 0x8f7   :  { %v8802_v34 = vrot.slane %v8801_v27, 1  ;;  %v8879_v48 = vadd.f32 %v15082_v7, %v8790_v47 }
 0x8f8   :  { %v8815_v32 = vrot.slane %v8814_v12, 1  ;;  %v8886_v29 = vmax.f32 %v8878_v36, 0.0 }
 0x8f9   :  { %v8803_v20 = vadd.f32 %v8802_v34, %v8801_v27  ;;  %v8887_v49 = vmax.f32 %v8879_v48, 0.0 }
 0x8fa   :  { %v8816_v10 = vadd.f32 %v8815_v32, %v8814_v12 }
 0x8fb   :  { %v8880_v40 = vadd.f32 %v15082_v7, %v8803_v20  ;;  %v8896_v2 = vcombine.low %v8886_v29, %v8887_v49 }
 0x8fc   :  { %v8881_v22 = vadd.f32 %v15082_v7, %v8816_v10 }
 0x8fd   :  { %v8888_v31 = vmax.f32 %v8880_v40, 0.0  ;;  %v8903_v9 = vrot.slane %v8896_v2, %v15087_v30 }
 0x8fe   :  { %v8889_v39 = vmax.f32 %v8881_v22, 0.0 }
 0x8ff   :  { %v8910_v41 = vrot.slane %v8903_v9, %v15087_v30 }
 0x900   :  { %v8919_v14 = vcombine.low %v8888_v31, %v8889_v39 }
 0x901   :  { %8916 = vst.msk [vmem:[#allocation3] sm:$0x3] %vm15093_vm4, %v8910_v41 }
 0x902   :  { %v8926_v19 = vrot.slane %v8919_v14, %v15087_v30 }
 0x904   :  { %v8933_v43 = vrot.slane %v8926_v19, %v15087_v30 }
 0x906   :  { %8936 = vst.msk [vmem:[#allocation3 + $0x2] sm:$0x3] %vm15093_vm4, %v8933_v43 }
 0x914   :  { %v8485_v52 = vpop.f32.mrb[16].mxu0 }
 0x915   :  { %v8486_v63 = vadd.f32 %v8485_v52, %v14987_v11  ;;  %v8487_v5 = vpop.f32.mrb[17].mxu0 }
 0x916   :  { %v8488_v18 = vadd.f32 %v8487_v5, %v14987_v11  ;;  %v8489_v33 = vpop.f32.mrb[18].mxu0 }
 0x917   :  { %v8601_v24 = vmax.f32 %v8486_v63, 0.0  ;;  %v8490_v35 = vadd.f32 %v8489_v33, %v14985_v26  ;;  %v8491_v62 = vpop.f32.mrb[19].mxu0 }
 0x918   :  { %v8602_v61 = vmax.f32 %v8488_v18, 0.0  ;;  %v8492_v55 = vadd.f32 %v8491_v62, %v14985_v26 }
 0x919   :  { %v8705_v60 = vmul.f32 %v14993_v50, %v8601_v24  ;;  %v8558_v59 = vpop.f32.mrb[16].mxu1  ;;  %v8609_v15 = vmax.f32 %v8490_v35, 0.0 }
 0x91a   :  { %v8559_v25 = vadd.f32 %v8558_v59, %v14987_v11  ;;  %v8706_v1 = vmul.f32 %v14993_v50, %v8602_v61  ;;  %v8560_v38 = vpop.f32.mrb[17].mxu1  ;;  %v8610_v23 = vmax.f32 %v8492_v55, 0.0 }
 0x91b   :  { %v8561_v58 = vadd.f32 %v8560_v38, %v14987_v11  ;;  %v8713_v16 = vmul.f32 %v14995_v17, %v8609_v15  ;;  %v8562_v21 = vpop.f32.mrb[18].mxu1 }
 0x91c   :  { %v8603_v56 = vmax.f32 %v8559_v25, 0.0  ;;  %v8563_v47 = vadd.f32 %v8562_v21, %v14985_v26  ;;  %v8714_v27 = vmul.f32 %v14995_v17, %v8610_v23  ;;  %v8564_v57 = vpop.f32.mrb[19].mxu1  ;;  %v8495_v12 = vpop.f32.mrb[20].mxu0 }
 0x91d   :  { %v8604_v36 = vmax.f32 %v8561_v58, 0.0  ;;  %v8817_v34 = vadd.f32 %v8713_v16, %v8705_v60  ;;  %v8565_v48 = vadd.f32 %v8564_v57, %v14985_v26  ;;  %v8496_v32 = vadd.f32 %v8495_v12, %v14989_v54  ;;  %v8497_v29 = vpop.f32.mrb[21].mxu0 }
 0x91e   :  { %v8611_v20 = vmax.f32 %v8563_v47, 0.0  ;;  %v8830_v46 = vadd.f32 %v8714_v27, %v8706_v1  ;;  %v8498_v11 = vadd.f32 %v8497_v29, %v14989_v54  ;;  %v8499_v49 = vpop.f32.mrb[22].mxu0  ;;  %v8707_v31 = vmul.f32 %v14993_v50, %v8603_v56 }
 0x91f   :  { %v8612_v10 = vmax.f32 %v8565_v48, 0.0  ;;  %v8617_v40 = vmax.f32 %v8496_v32, 0.0  ;;  %v8500_v2 = vadd.f32 %v8499_v49, %v14991_v3  ;;  %v8501_v22 = vpop.f32.mrb[23].mxu0  ;;  %v8708_v4 = vmul.f32 %v14993_v50, %v8604_v36 }
 0x920   :  { %v8715_v9 = vmul.f32 %v14995_v17, %v8611_v20  ;;  %v8618_v39 = vmax.f32 %v8498_v11, 0.0  ;;  %v8502_v26 = vadd.f32 %v8501_v22, %v14991_v3 }
 0x921   :  { %v8716_v41 = vmul.f32 %v14995_v17, %v8612_v10  ;;  %v8721_v14 = vmul.f32 %v15000_v13, %v8617_v40  ;;  %v8568_v19 = vpop.f32.mrb[20].mxu1  ;;  %v8625_v43 = vmax.f32 %v8500_v2, 0.0 }
 0x922   :  { %v8843_v52 = vadd.f32 %v8715_v9, %v8707_v31  ;;  %v8569_v63 = vadd.f32 %v8568_v19, %v14989_v54  ;;  %v8722_v5 = vmul.f32 %v15000_v13, %v8618_v39  ;;  %v8570_v18 = vpop.f32.mrb[21].mxu1  ;;  %v8626_v33 = vmax.f32 %v8502_v26, 0.0 }
 0x923   :  { %v8856_v24 = vadd.f32 %v8716_v41, %v8708_v4  ;;  %v8818_v35 = vadd.f32 %v8817_v34, %v8721_v14  ;;  %v8571_v62 = vadd.f32 %v8570_v18, %v14989_v54  ;;  %v8729_v61 = vmul.f32 %v15012_v42, %v8625_v43  ;;  %v8572_v50 = vpop.f32.mrb[22].mxu1 }
 0x924   :  { %v8619_v55 = vmax.f32 %v8569_v63, 0.0  ;;  %v8831_v17 = vadd.f32 %v8830_v46, %v8722_v5  ;;  %v8573_v60 = vadd.f32 %v8572_v50, %v14991_v3  ;;  %v8730_v59 = vmul.f32 %v15012_v42, %v8626_v33  ;;  %v8574_v15 = vpop.f32.mrb[23].mxu1  ;;  %v8505_v25 = vpop.f32.mrb[24].mxu0 }
 0x925   :  { %v8620_v1 = vmax.f32 %v8571_v62, 0.0  ;;  %v8819_v38 = vadd.f32 %v8818_v35, %v8729_v61  ;;  %v8575_v23 = vadd.f32 %v8574_v15, %v14991_v3  ;;  %v8506_v58 = vadd.f32 %v8505_v25, %v14997_v53  ;;  %v8507_v16 = vpop.f32.mrb[25].mxu0 }
 0x926   :  { %v8723_v54 = vmul.f32 %v15000_v13, %v8619_v55  ;;  %v8627_v21 = vmax.f32 %v8573_v60, 0.0  ;;  %v8832_v56 = vadd.f32 %v8831_v17, %v8730_v59  ;;  %v8508_v47 = vadd.f32 %v8507_v16, %v14997_v53  ;;  %v8509_v27 = vpop.f32.mrb[26].mxu0 }
 0x927   :  { %v8724_v57 = vmul.f32 %v15000_v13, %v8620_v1  ;;  %v8628_v12 = vmax.f32 %v8575_v23, 0.0  ;;  %v8633_v36 = vmax.f32 %v8506_v58, 0.0  ;;  %v8510_v34 = vadd.f32 %v8509_v27, %v15008_v37  ;;  %v8511_v48 = vpop.f32.mrb[27].mxu0 }
 0x928   :  { %v8844_v32 = vadd.f32 %v8843_v52, %v8723_v54  ;;  %v8731_v3 = vmul.f32 %v15012_v42, %v8627_v21  ;;  %v8634_v29 = vmax.f32 %v8508_v47, 0.0  ;;  %v8512_v20 = vadd.f32 %v8511_v48, %v15008_v37 }
 0x929   :  { %v8857_v46 = vadd.f32 %v8856_v24, %v8724_v57  ;;  %v8732_v11 = vmul.f32 %v15012_v42, %v8628_v12  ;;  %v8737_v49 = vmul.f32 %v15030_v6, %v8633_v36  ;;  %v8578_v10 = vpop.f32.mrb[24].mxu1  ;;  %v8641_v40 = vmax.f32 %v8510_v34, 0.0 }
 0x92a   :  { %v8845_v2 = vadd.f32 %v8844_v32, %v8731_v3  ;;  %v8579_v13 = vadd.f32 %v8578_v10, %v14997_v53  ;;  %v8738_v22 = vmul.f32 %v15030_v6, %v8634_v29  ;;  %v8580_v31 = vpop.f32.mrb[25].mxu1  ;;  %v8642_v9 = vmax.f32 %v8512_v20, 0.0 }
 0x92b   :  { %v8858_v39 = vadd.f32 %v8857_v46, %v8732_v11  ;;  %v8820_v26 = vadd.f32 %v8819_v38, %v8737_v49  ;;  %v8581_v4 = vadd.f32 %v8580_v31, %v14997_v53  ;;  %v8745_v41 = vmul.f32 %v15046_v0, %v8641_v40  ;;  %v8582_v14 = vpop.f32.mrb[26].mxu1 }
 0x92c   :  { %v8635_v19 = vmax.f32 %v8579_v13, 0.0  ;;  %v8833_v42 = vadd.f32 %v8832_v56, %v8738_v22  ;;  %v8583_v43 = vadd.f32 %v8582_v14, %v15008_v37  ;;  %v8746_v52 = vmul.f32 %v15046_v0, %v8642_v9  ;;  %v8584_v63 = vpop.f32.mrb[27].mxu1  ;;  %v8515_v5 = vpop.f32.mrb[28].mxu0 }
 0x92d   :  { %v8636_v18 = vmax.f32 %v8581_v4, 0.0  ;;  %v8821_v33 = vadd.f32 %v8820_v26, %v8745_v41  ;;  %v8585_v24 = vadd.f32 %v8584_v63, %v15008_v37  ;;  %v8516_v35 = vadd.f32 %v8515_v5, %v15026_v28  ;;  %v8517_v62 = vpop.f32.mrb[29].mxu0 }
 0x92e   :  { %v8739_v53 = vmul.f32 %v15030_v6, %v8635_v19  ;;  %v8643_v61 = vmax.f32 %v8583_v43, 0.0  ;;  %v8834_v50 = vadd.f32 %v8833_v42, %v8746_v52  ;;  %v8518_v55 = vadd.f32 %v8517_v62, %v15026_v28  ;;  %v8519_v17 = vpop.f32.mrb[30].mxu0 }
 0x92f   :  { %v8740_v60 = vmul.f32 %v15030_v6, %v8636_v18  ;;  %v8644_v59 = vmax.f32 %v8585_v24, 0.0  ;;  %v8649_v15 = vmax.f32 %v8516_v35, 0.0  ;;  %v8520_v25 = vadd.f32 %v8519_v17, %v15044_v45  ;;  %v8521_v1 = vpop.f32.mrb[31].mxu0 }
 0x930   :  { %v8846_v38 = vadd.f32 %v8845_v2, %v8739_v53  ;;  %v8747_v37 = vmul.f32 %v15046_v0, %v8643_v61  ;;  %v8650_v23 = vmax.f32 %v8518_v55, 0.0  ;;  %v8522_v58 = vadd.f32 %v8521_v1, %v15044_v45 }
 0x931   :  { %v8859_v16 = vadd.f32 %v8858_v39, %v8740_v60  ;;  %v8748_v54 = vmul.f32 %v15046_v0, %v8644_v59  ;;  %v8753_v21 = vmul.f32 %v15060_v8, %v8649_v15  ;;  %v8588_v56 = vpop.f32.mrb[28].mxu1  ;;  %v8657_v47 = vmax.f32 %v8520_v25, 0.0 }
 0x932   :  { %v8847_v27 = vadd.f32 %v8846_v38, %v8747_v37  ;;  %v8589_v6 = vadd.f32 %v8588_v56, %v15026_v28  ;;  %v8754_v57 = vmul.f32 %v15060_v8, %v8650_v23  ;;  %v8590_v12 = vpop.f32.mrb[29].mxu1  ;;  %v8658_v36 = vmax.f32 %v8522_v58, 0.0 }
 0x933   :  { %v8860_v34 = vadd.f32 %v8859_v16, %v8748_v54  ;;  %v8822_v48 = vadd.f32 %v8821_v33, %v8753_v21  ;;  %v8591_v32 = vadd.f32 %v8590_v12, %v15026_v28  ;;  %v8761_v3 = vmul.f32 %v15066_v51, %v8657_v47  ;;  %v8592_v29 = vpop.f32.mrb[30].mxu1 }
 0x934   :  { %v8651_v20 = vmax.f32 %v8589_v6, 0.0  ;;  %v8835_v0 = vadd.f32 %v8834_v50, %v8754_v57  ;;  %v8593_v46 = vadd.f32 %v8592_v29, %v15044_v45  ;;  %v8762_v11 = vmul.f32 %v15066_v51, %v8658_v36  ;;  %v8594_v49 = vpop.f32.mrb[31].mxu1 }
 0x935   :  { %v8652_v10 = vmax.f32 %v8591_v32, 0.0  ;;  %v8823_v40 = vadd.f32 %v8822_v48, %v8761_v3  ;;  %v8595_v2 = vadd.f32 %v8594_v49, %v15044_v45 }
 0x936   :  { %v8755_v13 = vmul.f32 %v15060_v8, %v8651_v20  ;;  %v8659_v22 = vmax.f32 %v8593_v46, 0.0  ;;  %v8836_v31 = vadd.f32 %v8835_v0, %v8762_v11 }
 0x937   :  { %v8756_v28 = vmul.f32 %v15060_v8, %v8652_v10  ;;  %v8824_v9 = vrot.slane %v8823_v40, 4  ;;  %v8660_v39 = vmax.f32 %v8595_v2, 0.0 }
 0x938   :  { %v8848_v26 = vadd.f32 %v8847_v27, %v8755_v13  ;;  %v8763_v4 = vmul.f32 %v15066_v51, %v8659_v22  ;;  %v8837_v41 = vrot.slane %v8836_v31, 4 }
 0x939   :  { %v8861_v14 = vadd.f32 %v8860_v34, %v8756_v28  ;;  %v8825_v19 = vadd.f32 %v8824_v9, %v8823_v40  ;;  %v8764_v42 = vmul.f32 %v15066_v51, %v8660_v39 }
 0x93a   :  { %v8849_v43 = vadd.f32 %v8848_v26, %v8763_v4  ;;  %v8838_v52 = vadd.f32 %v8837_v41, %v8836_v31 }
 0x93b   :  { %v8826_v63 = vrot.slane %v8825_v19, 2  ;;  %v8862_v45 = vadd.f32 %v8861_v14, %v8764_v42 }
 0x93c   :  { %v8850_v5 = vrot.slane %v8849_v43, 4  ;;  %v8839_v18 = vrot.slane %v8838_v52, 2 }
 0x93d   :  { %v8827_v33 = vadd.f32 %v8826_v63, %v8825_v19  ;;  %v8863_v24 = vrot.slane %v8862_v45, 4 }
 0x93e   :  { %v8851_v35 = vadd.f32 %v8850_v5, %v8849_v43  ;;  %v8840_v8 = vadd.f32 %v8839_v18, %v8838_v52 }
 0x93f   :  { %v8828_v62 = vrot.slane %v8827_v33, 1  ;;  %v8864_v53 = vadd.f32 %v8863_v24, %v8862_v45 }
 0x940   :  { %v8852_v61 = vrot.slane %v8851_v35, 2  ;;  %v8841_v50 = vrot.slane %v8840_v8, 1 }
 0x941   :  { %v8829_v55 = vadd.f32 %v8828_v62, %v8827_v33  ;;  %v8865_v17 = vrot.slane %v8864_v53, 2 }
 0x942   :  { %v8853_v60 = vadd.f32 %v8852_v61, %v8851_v35  ;;  %v8842_v59 = vadd.f32 %v8841_v50, %v8840_v8 }
 0x943   :  { %v8882_v51 = vadd.f32 %v15082_v7, %v8829_v55  ;;  %v8866_v15 = vadd.f32 %v8865_v17, %v8864_v53 }
 0x944   :  { %v8854_v25 = vrot.slane %v8853_v60, 1  ;;  %v8883_v1 = vadd.f32 %v15082_v7, %v8842_v59 }
 0x945   :  { %v8890_v38 = vmax.f32 %v8882_v51, 0.0  ;;  %v8867_v37 = vrot.slane %v8866_v15, 1 }
 0x946   :  { %v8855_v23 = vadd.f32 %v8854_v25, %v8853_v60  ;;  %v8891_v58 = vmax.f32 %v8883_v1, 0.0 }
 0x947   :  { %v8868_v16 = vadd.f32 %v8867_v37, %v8866_v15 }
 0x948   :  { %v8884_v54 = vadd.f32 %v15082_v7, %v8855_v23  ;;  %v8939_v21 = vcombine.low %v8890_v38, %v8891_v58 }
 0x949   :  { %v8885_v56 = vadd.f32 %v15082_v7, %v8868_v16 }
 0x94a   :  { %v8892_v47 = vmax.f32 %v8884_v54, 0.0  ;;  %v8946_v27 = vrot.slane %v8939_v21, %v15087_v30 }
 0x94b   :  { %v8893_v6 = vmax.f32 %v8885_v56, 0.0 }
 0x94c   :  { %v8953_v57 = vrot.slane %v8946_v27, %v15087_v30 }
 0x94d   :  { %v8959_v12 = vcombine.low %v8892_v47, %v8893_v6 }
 0x94e   :  { %8956 = vst.msk [vmem:[#allocation3 + $0x4] sm:$0x3] %vm15093_vm4, %v8953_v57 }
 0x94f   :  { %v8966_v36 = vrot.slane %v8959_v12, %v15087_v30 }
 0x951   :  { %v8973_v34 = vrot.slane %v8966_v36, %v15087_v30 }
 0x953   :  { %8976 = vst.msk [vmem:[#allocation3 + $0x6] sm:$0x3] %vm15093_vm4, %v8973_v34 }
 0x954   :  { %9797 = shalt.err (!%p9794_p4)
}
 0x955   :  { %s9798_s15 = scalar_lea.hbm %s15206_s14, 128 }
 0x956   :  { %p9799_p5 = scmp.ne.s32.totalorder %s15206_s14, %s9798_s15  ;;  %p9802_p6 = scmp.lt.u32.totalorder %s9798_s15, %s15206_s14 }
 0x958   :  { %p9804_p7 = pnand %p9802_p6, %p9799_p5 }
 0x95a   :  { %9807 = shalt.err (!%p9804_p7)
}
 0x95b   :  { %s9816_s19 = smov 32   ;;  %s9817_s20 = smov 2  }
 0x95c   :  { %8988 = dma.vmem_to_hbm [thread:$0]  %s8983_s27, 128, %s15206_s14, [#allocation4], %s9816_s19, %s9816_s19, %s9817_s20  }
 0x95d   :  { %9808 = dma.done.wait [#allocation4], 128  }
 0x95e   :  { %9809 = vsyncadd [#allocation4], 4294967168 }
 0x95f   :  { %8992 = vsyncpa [#allocation4], 1 }

</bundles_post_ra>
